<compile_context>
chip_gen: v6e
topology: v6e:2x2x1
jax: 0.10.0
libtpu: 0.0.40
codegen_flags: <defaults>
</compile_context>

<pallas_src>
import functools
import math

import jax
import jax.numpy as jnp
from jax.experimental import pallas as pl
from jax.experimental.pallas import tpu as pltpu


# ---------------------------------------------------------------------------
# Fused kernel
# ---------------------------------------------------------------------------
def fairmot_fused_kernel(cols_ref, ws_ref, ss_ref, bs_ref,
                         w1_ref, s1_ref, b1_ref,
                         w2_ref, s2_ref, b2_ref,
                         w3_ref, s3_ref, b3_ref,
                         o_ref,
                         buf0, buf1, col_ref,
                         *, hm_ch, emb_off, emb_size):
    H = o_ref.shape[1]
    W = o_ref.shape[2]
    C = o_ref.shape[3]           # fused lane width (128)
    HW = H * W
    COL0 = 8                     # interior column offset inside padded buffers

    # Zero the halo buffers; the "same"-conv zero padding comes from them.
    buf0[...] = jnp.zeros_like(buf0)
    buf1[...] = jnp.zeros_like(buf1)

    def bn_lrelu(acc, s_ref, b_ref):
        y = acc * s_ref[0] + b_ref[0]             # folded BatchNorm (f32)
        return jnp.where(y > 0.0, y, 0.01 * y)    # LeakyReLU(0.01)

    def store_act(buf, y):
        # Aligned interior store: row offset 1 (untiled dim), col offset 8.
        buf[1:H + 1, COL0:COL0 + W, :] = y.reshape(H, W, C).astype(buf.dtype)

    def conv_stage(buf, w_ref, s_ref, b_ref):
        # im2col: 9 shifted slabs -> one lane-aligned (HW, 9*C) matrix in VMEM,
        # then a single K = 9*C bf16 MXU matmul with f32 accumulation.
        for t in range(9):
            dy, dx = t // 3, t % 3
            slab = buf[dy:dy + H, COL0 - 1 + dx:COL0 - 1 + dx + W, :]
            col_ref[:, t * C:(t + 1) * C] = (
                slab.reshape(HW, C).astype(jnp.bfloat16))
        acc = jnp.dot(col_ref[...], w_ref[...],
                      preferred_element_type=jnp.float32)
        return bn_lrelu(acc, s_ref, b_ref)

    # --- backbone stem (im2col of the raw image precomputed in the wrapper) --
    y = jnp.dot(cols_ref[0], ws_ref[...], preferred_element_type=jnp.float32)
    y = bn_lrelu(y, ss_ref, bs_ref)
    store_act(buf0, y)

    # --- the 4 branches as one fused 128-wide chain (block-diagonal weights) -
    y = conv_stage(buf0, w1_ref, s1_ref, b1_ref)
    store_act(buf1, y)
    y = conv_stage(buf1, w2_ref, s2_ref, b2_ref)
    store_act(buf0, y)
    y = conv_stage(buf0, w3_ref, s3_ref, b3_ref)      # (HW, C) f32 head slab

    # --- per-head epilogue on the lane-dense slab ----------------------------
    ch = jax.lax.broadcasted_iota(jnp.int32, (HW, C), 1)
    is_hm = ch < hm_ch
    is_emb = (ch >= emb_off) & (ch < emb_off + emb_size)

    # softmax over the heatmap lanes (class_num + 1 channels)
    zhm = jnp.where(is_hm, y, -jnp.inf)
    m = jnp.max(zhm, axis=-1, keepdims=True)
    e = jnp.exp(zhm - m)
    s = jnp.sum(e, axis=-1, keepdims=True)
    hm = e / s

    # L2 normalization over the embedding lanes (eps = 1e-12)
    sq = jnp.where(is_emb, y * y, 0.0)
    nrm = jnp.maximum(jnp.sqrt(jnp.sum(sq, axis=-1, keepdims=True)), 1e-12)
    emb = y / nrm

    out = jnp.where(is_hm, hm, jnp.where(is_emb, emb, y))
    o_ref[...] = out.reshape(1, H, W, C).astype(o_ref.dtype)


# ---------------------------------------------------------------------------
# Wrapper
# ---------------------------------------------------------------------------
def _stem_im2col(x_nhwc):
    """(N,H,W,Cimg) -> (N, H*W, round_up(9*Cimg, 8)) bf16 im2col of 3x3 taps."""
    N, H, W, Cimg = x_nhwc.shape
    xp = jnp.pad(x_nhwc, ((0, 0), (1, 1), (1, 1), (0, 0)))
    taps = [xp[:, dy:dy + H, dx:dx + W, :]
            for dy in range(3) for dx in range(3)]
    cols = jnp.concatenate(taps, axis=-1).reshape(N, H * W, 9 * Cimg)
    kpad = (-(9 * Cimg)) % 8
    if kpad:
        cols = jnp.pad(cols, ((0, 0), (0, 0), (0, kpad)))
    return cols.astype(jnp.bfloat16)


def fairmot_forward(params, img_nchw, *, class_num, emb_size):
    N, _, H, W = img_nchw.shape
    x = jnp.transpose(img_nchw, (0, 2, 3, 1)).astype(jnp.float32)  # NCHW->NHWC
    cols = _stem_im2col(x)
    KS = cols.shape[-1]
    CP = params["w1"].shape[-1]          # fused lane width (128)

    hm_ch = class_num + 1
    emb_off = hm_ch + 4                  # [hm | offset(2) | wh(2) | emb | pad]
    WPAD = W + 16                        # padded column extent of scratch bufs

    kernel = functools.partial(fairmot_fused_kernel,
                               hm_ch=hm_ch, emb_off=emb_off, emb_size=emb_size)
    wspec = lambda shape: pl.BlockSpec(shape, lambda n: (0, 0))

    out = pl.pallas_call(
        kernel,
        out_shape=jax.ShapeDtypeStruct((N, H, W, CP), jnp.float32),
        grid=(N,),
        in_specs=[
            pl.BlockSpec((1, H * W, KS), lambda n: (n, 0, 0)),
            wspec((KS, CP)), wspec((1, CP)), wspec((1, CP)),
            wspec((9 * CP, CP)), wspec((1, CP)), wspec((1, CP)),
            wspec((9 * CP, CP)), wspec((1, CP)), wspec((1, CP)),
            wspec((9 * CP, CP)), wspec((1, CP)), wspec((1, CP)),
        ],
        out_specs=pl.BlockSpec((1, H, W, CP), lambda n: (n, 0, 0, 0)),
        scratch_shapes=[
            pltpu.VMEM((H + 2, WPAD, CP), jnp.float32),   # activation ping
            pltpu.VMEM((H + 2, WPAD, CP), jnp.float32),   # activation pong
            pltpu.VMEM((H * W, 9 * CP), jnp.bfloat16),    # im2col buffer
        ],
        compiler_params=pltpu.CompilerParams(
            dimension_semantics=("parallel",)),
    )(cols, params["ws"], params["ss"], params["bs"],
      params["w1"], params["s1"], params["b1"],
      params["w2"], params["s2"], params["b2"],
      params["w3"], params["s3"], params["b3"])

    heatmap = out[..., 0:hm_ch]
    offset = out[..., hm_ch:hm_ch + 2]
    wh = out[..., hm_ch + 2:hm_ch + 4]
    emb = out[..., emb_off:emb_off + emb_size]
    to_nchw = lambda t: jnp.transpose(t, (0, 3, 1, 2))
    return to_nchw(heatmap), to_nchw(offset), to_nchw(wh), to_nchw(emb)


# ---------------------------------------------------------------------------
# Parameter construction (deterministic, synthetic) + host-side fusion
# ---------------------------------------------------------------------------
def _init_conv_bn(key, cin, cout):
    """Conv 3x3 weight (HWIO, xavier-uniform) + identity-ish folded BN."""
    fan_in, fan_out = cin * 9, cout * 9
    limit = math.sqrt(6.0 / (fan_in + fan_out))
    w = jax.random.uniform(key, (3, 3, cin, cout), jnp.float32, -limit, limit)
    gamma = jnp.ones((cout,), jnp.float32)
    beta = jnp.zeros((cout,), jnp.float32)
    mean = jnp.zeros((cout,), jnp.float32)
    var = jnp.ones((cout,), jnp.float32)
    eps = 1e-5
    scale = gamma / jnp.sqrt(var + eps)
    bias = beta - mean * scale
    return w, scale, bias


def _init_branch(key, cin, cout, repeat=3):
    """Matches Branch.__init__: (cin->cin)*(repeat-1) then cin->cout."""
    keys = jax.random.split(key, repeat)
    convs = []
    for i in range(repeat):
        temp = cout if i == repeat - 1 else cin
        convs.append(_init_conv_bn(keys[i], cin, temp))
    return convs


def init_fairmot(key, img_ch, feature_map_ch, class_num, emb_size):
    F = feature_map_ch
    head_dims = [class_num + 1, 2, 2, emb_size]   # heatmap, offset, wh, emb
    NB = len(head_dims)
    CP = NB * F                                   # fused lane width
    assert CP % 128 == 0, "fused width must be lane-dense (multiple of 128)"
    assert sum(head_dims) <= CP

    k = jax.random.split(key, 1 + NB)
    stem = _init_conv_bn(k[0], img_ch, F)         # synthetic backbone stem
    branches = [_init_branch(k[1 + b], F, head_dims[b]) for b in range(NB)]

    # ---- fold everything into 4 lane-dense im2col weight matrices ----------
    ws = jnp.zeros((3, 3, img_ch, CP), jnp.float32).at[..., :F].set(stem[0])
    ss = jnp.ones((CP,), jnp.float32).at[:F].set(stem[1])
    bs = jnp.zeros((CP,), jnp.float32).at[:F].set(stem[2])

    w1 = jnp.zeros((3, 3, CP, CP), jnp.float32)   # concat along Cout
    s1 = jnp.ones((CP,), jnp.float32)
    b1 = jnp.zeros((CP,), jnp.float32)
    w2 = jnp.zeros((3, 3, CP, CP), jnp.float32)   # block-diagonal
    s2 = jnp.ones((CP,), jnp.float32)
    b2 = jnp.zeros((CP,), jnp.float32)
    w3 = jnp.zeros((3, 3, CP, CP), jnp.float32)   # block rows -> packed heads
    s3 = jnp.ones((CP,), jnp.float32)
    b3 = jnp.zeros((CP,), jnp.float32)

    off = 0
    for b, dim in enumerate(head_dims):
        (wa, sa, ba), (wm, sm, bm), (wc, sc, bc) = branches[b]
        lo, hi = b * F, (b + 1) * F
        w1 = w1.at[:, :, :F, lo:hi].set(wa)
        s1 = s1.at[lo:hi].set(sa)
        b1 = b1.at[lo:hi].set(ba)
        w2 = w2.at[:, :, lo:hi, lo:hi].set(wm)
        s2 = s2.at[lo:hi].set(sm)
        b2 = b2.at[lo:hi].set(bm)
        w3 = w3.at[:, :, lo:hi, off:off + dim].set(wc)
        s3 = s3.at[off:off + dim].set(sc)
        b3 = b3.at[off:off + dim].set(bc)
        off += dim

    ks = 9 * img_ch
    ws_mat = ws.reshape(ks, CP)
    kpad = (-ks) % 8
    if kpad:
        ws_mat = jnp.pad(ws_mat, ((0, kpad), (0, 0)))

    bf = jnp.bfloat16
    return {
        "ws": ws_mat.astype(bf),
        "ss": ss.reshape(1, CP), "bs": bs.reshape(1, CP),
        "w1": w1.reshape(9 * CP, CP).astype(bf),
        "s1": s1.reshape(1, CP), "b1": b1.reshape(1, CP),
        "w2": w2.reshape(9 * CP, CP).astype(bf),
        "s2": s2.reshape(1, CP), "b2": b2.reshape(1, CP),
        "w3": w3.reshape(9 * CP, CP).astype(bf),
        "s3": s3.reshape(1, CP), "b3": b3.reshape(1, CP),
    }


# ---------------------------------------------------------------------------
if __name__ == "__main__":
    N, IMG_CH, H, W = 2, 3, 16, 16
    FEATURE_MAP_CH = 32      # backbone.output_ch (synthetic)
    CLASS_NUM = 3            # heatmap channels = class_num + 1 = 4
    EMB_SIZE = 32

    key = jax.random.PRNGKey(0)
    k_img, k_params = jax.random.split(key)
    img = jax.random.normal(k_img, (N, IMG_CH, H, W), jnp.float32)  # NCHW
    params = init_fairmot(k_params, IMG_CH, FEATURE_MAP_CH, CLASS_NUM, EMB_SIZE)

    fwd = jax.jit(functools.partial(fairmot_forward,
                                    class_num=CLASS_NUM, emb_size=EMB_SIZE))
    heatmap, offset, wh, emb = fwd(params, img)
    jax.block_until_ready((heatmap, offset, wh, emb))

    assert heatmap.shape == (N, CLASS_NUM + 1, H, W)
    assert offset.shape == (N, 2, H, W)
    assert wh.shape == (N, 2, H, W)
    assert emb.shape == (N, EMB_SIZE, H, W)
    # heatmap is softmax over channels -> sums to 1
    assert jnp.allclose(jnp.sum(heatmap, axis=1), 1.0, atol=1e-5)
    # emb is L2-normalized over channels -> unit norm
    assert jnp.allclose(jnp.sum(emb * emb, axis=1), 1.0, atol=1e-5)

    print("KERNEL_OK")
</pallas_src>

<mosaic_0001>
module attributes {stable_mosaic.version = 11 : i64} {
  func.func @fairmot_fused_kernel(%arg0: i32, %arg1: memref<1x256x32xbf16, #tpu.memory_space<vmem>>, %arg2: memref<32x128xbf16, #tpu.memory_space<vmem>>, %arg3: memref<1x128xf32, #tpu.memory_space<vmem>>, %arg4: memref<1x128xf32, #tpu.memory_space<vmem>>, %arg5: memref<1152x128xbf16, #tpu.memory_space<vmem>>, %arg6: memref<1x128xf32, #tpu.memory_space<vmem>>, %arg7: memref<1x128xf32, #tpu.memory_space<vmem>>, %arg8: memref<1152x128xbf16, #tpu.memory_space<vmem>>, %arg9: memref<1x128xf32, #tpu.memory_space<vmem>>, %arg10: memref<1x128xf32, #tpu.memory_space<vmem>>, %arg11: memref<1152x128xbf16, #tpu.memory_space<vmem>>, %arg12: memref<1x128xf32, #tpu.memory_space<vmem>>, %arg13: memref<1x128xf32, #tpu.memory_space<vmem>>, %arg14: memref<1x16x16x128xf32, #tpu.memory_space<vmem>>, %arg15: memref<18x32x128xf32, #tpu.memory_space<vmem>>, %arg16: memref<18x32x128xf32, #tpu.memory_space<vmem>>, %arg17: memref<256x1152xbf16, #tpu.memory_space<vmem>>) attributes {dimension_semantics = [#tpu.dimension_semantics<parallel>], iteration_bounds = array<i64: 2>, scalar_prefetch = 0 : i64, scratch_operands = 3 : i64, tpu.core_type = #tpu.core_type<tc>, window_params = [{transform_indices = @transform_0, window_bounds = array<i64: 1, 256, 32>}, {pipeline_mode = #tpu.pipeline_mode<synchronous>, transform_indices = @transform_1, window_bounds = array<i64: 32, 128>}, {pipeline_mode = #tpu.pipeline_mode<synchronous>, transform_indices = @transform_2, window_bounds = array<i64: 1, 128>}, {pipeline_mode = #tpu.pipeline_mode<synchronous>, transform_indices = @transform_3, window_bounds = array<i64: 1, 128>}, {pipeline_mode = #tpu.pipeline_mode<synchronous>, transform_indices = @transform_4, window_bounds = array<i64: 1152, 128>}, {pipeline_mode = #tpu.pipeline_mode<synchronous>, transform_indices = @transform_5, window_bounds = array<i64: 1, 128>}, {pipeline_mode = #tpu.pipeline_mode<synchronous>, transform_indices = @transform_6, window_bounds = array<i64: 1, 128>}, {pipeline_mode = #tpu.pipeline_mode<synchronous>, transform_indices = @transform_7, window_bounds = array<i64: 1152, 128>}, {pipeline_mode = #tpu.pipeline_mode<synchronous>, transform_indices = @transform_8, window_bounds = array<i64: 1, 128>}, {pipeline_mode = #tpu.pipeline_mode<synchronous>, transform_indices = @transform_9, window_bounds = array<i64: 1, 128>}, {pipeline_mode = #tpu.pipeline_mode<synchronous>, transform_indices = @transform_10, window_bounds = array<i64: 1152, 128>}, {pipeline_mode = #tpu.pipeline_mode<synchronous>, transform_indices = @transform_11, window_bounds = array<i64: 1, 128>}, {pipeline_mode = #tpu.pipeline_mode<synchronous>, transform_indices = @transform_12, window_bounds = array<i64: 1, 128>}, {transform_indices = @transform_13, window_bounds = array<i64: 1, 16, 16, 128>}]} {
    %cst = arith.constant 0.000000e+00 : f32
    %0 = vector.broadcast %cst : f32 to vector<18x32x128xf32>
    %c0 = arith.constant 0 : index
    %c0_0 = arith.constant 0 : index
    %c0_1 = arith.constant 0 : index
    %1 = vector.load %arg15[%c0, %c0_0, %c0_1] : memref<18x32x128xf32, #tpu.memory_space<vmem>>, vector<18x32x128xf32>
    tpu.vector_store %arg15[%c0, %c0_0, %c0_1], %0 {strides = array<i32>} : memref<18x32x128xf32, #tpu.memory_space<vmem>>, vector<18x32x128xf32>,
    %cst_2 = arith.constant 0.000000e+00 : f32
    %2 = vector.broadcast %cst_2 : f32 to vector<18x32x128xf32>
    %c0_3 = arith.constant 0 : index
    %c0_4 = arith.constant 0 : index
    %c0_5 = arith.constant 0 : index
    %3 = vector.load %arg16[%c0_3, %c0_4, %c0_5] : memref<18x32x128xf32, #tpu.memory_space<vmem>>, vector<18x32x128xf32>
    tpu.vector_store %arg16[%c0_3, %c0_4, %c0_5], %2 {strides = array<i32>} : memref<18x32x128xf32, #tpu.memory_space<vmem>>, vector<18x32x128xf32>,
    %c0_6 = arith.constant 0 : index
    %c0_7 = arith.constant 0 : index
    %c0_8 = arith.constant 0 : index
    %4 = vector.load %arg1[%c0_6, %c0_7, %c0_8] : memref<1x256x32xbf16, #tpu.memory_space<vmem>>, vector<1x256x32xbf16>
    %5 = vector.shape_cast %4 : vector<1x256x32xbf16> to vector<256x32xbf16>
    %c0_9 = arith.constant 0 : index
    %c0_10 = arith.constant 0 : index
    %6 = vector.load %arg2[%c0_9, %c0_10] : memref<32x128xbf16, #tpu.memory_space<vmem>>, vector<32x128xbf16>
    %cst_11 = arith.constant dense<0.000000e+00> : vector<256x128xf32>
    %7 = tpu.matmul %5, %6, %cst_11 {dimension_numbers = #tpu.dot_dimension_numbers<[1], [0], [0], [1], [0, 0, 1, 1], [], []>} : vector<256x32xbf16>, vector<32x128xbf16>, vector<256x128xf32> -> vector<256x128xf32>
    %c0_12 = arith.constant 0 : index
    %c0_13 = arith.constant 0 : index
    %8 = vector.load %arg3[%c0_12, %c0_13] : memref<1x128xf32, #tpu.memory_space<vmem>>, vector<1x128xf32>
    %9 = vector.shape_cast %8 : vector<1x128xf32> to vector<128xf32>
    %10 = vector.shape_cast %9 : vector<128xf32> to vector<1x128xf32>
    %11 = vector.broadcast %10 : vector<1x128xf32> to vector<256x128xf32>
    %12 = arith.mulf %7, %11 : vector<256x128xf32>
    %c0_14 = arith.constant 0 : index
    %c0_15 = arith.constant 0 : index
    %13 = vector.load %arg4[%c0_14, %c0_15] : memref<1x128xf32, #tpu.memory_space<vmem>>, vector<1x128xf32>
    %14 = vector.shape_cast %13 : vector<1x128xf32> to vector<128xf32>
    %15 = vector.shape_cast %14 : vector<128xf32> to vector<1x128xf32>
    %16 = vector.broadcast %15 : vector<1x128xf32> to vector<256x128xf32>
    %17 = arith.addf %12, %16 : vector<256x128xf32>
    %cst_16 = arith.constant 0.000000e+00 : f32
    %18 = vector.broadcast %cst_16 : f32 to vector<256x128xf32>
    %19 = arith.cmpf ogt, %17, %18 : vector<256x128xf32>
    %cst_17 = arith.constant 0.00999999977 : f32
    %20 = vector.broadcast %cst_17 : f32 to vector<256x128xf32>
    %21 = arith.mulf %20, %17 : vector<256x128xf32>
    %22 = arith.select %19, %17, %21 : vector<256x128xi1>, vector<256x128xf32>
    %23 = vector.shape_cast %22 : vector<256x128xf32> to vector<16x16x128xf32>
    %c1 = arith.constant 1 : index
    %c8 = arith.constant 8 : index
    %c0_18 = arith.constant 0 : index
    %24 = vector.load %arg15[%c1, %c8, %c0_18] : memref<18x32x128xf32, #tpu.memory_space<vmem>>, vector<16x16x128xf32>
    tpu.vector_store %arg15[%c1, %c8, %c0_18], %23 {strides = array<i32>} : memref<18x32x128xf32, #tpu.memory_space<vmem>>, vector<16x16x128xf32>,
    %c0_19 = arith.constant 0 : index
    %c7 = arith.constant 7 : index
    %c0_20 = arith.constant 0 : index
    %25 = vector.load %arg15[%c0_19, %c7, %c0_20] : memref<18x32x128xf32, #tpu.memory_space<vmem>>, vector<16x16x128xf32>
    %26 = vector.shape_cast %25 : vector<16x16x128xf32> to vector<256x128xf32>
    %27 = arith.truncf %26 : vector<256x128xf32> to vector<256x128xbf16>
    %c0_21 = arith.constant 0 : index
    %c0_22 = arith.constant 0 : index
    %28 = vector.load %arg17[%c0_21, %c0_22] : memref<256x1152xbf16, #tpu.memory_space<vmem>>, vector<256x128xbf16>
    tpu.vector_store %arg17[%c0_21, %c0_22], %27 {strides = array<i32>} : memref<256x1152xbf16, #tpu.memory_space<vmem>>, vector<256x128xbf16>,
    %c0_23 = arith.constant 0 : index
    %c8_24 = arith.constant 8 : index
    %c0_25 = arith.constant 0 : index
    %29 = vector.load %arg15[%c0_23, %c8_24, %c0_25] : memref<18x32x128xf32, #tpu.memory_space<vmem>>, vector<16x16x128xf32>
    %30 = vector.shape_cast %29 : vector<16x16x128xf32> to vector<256x128xf32>
    %31 = arith.truncf %30 : vector<256x128xf32> to vector<256x128xbf16>
    %c0_26 = arith.constant 0 : index
    %c128 = arith.constant 128 : index
    %32 = vector.load %arg17[%c0_26, %c128] : memref<256x1152xbf16, #tpu.memory_space<vmem>>, vector<256x128xbf16>
    tpu.vector_store %arg17[%c0_26, %c128], %31 {strides = array<i32>} : memref<256x1152xbf16, #tpu.memory_space<vmem>>, vector<256x128xbf16>,
    %c0_27 = arith.constant 0 : index
    %c9 = arith.constant 9 : index
    %c0_28 = arith.constant 0 : index
    %33 = vector.load %arg15[%c0_27, %c9, %c0_28] : memref<18x32x128xf32, #tpu.memory_space<vmem>>, vector<16x16x128xf32>
    %34 = vector.shape_cast %33 : vector<16x16x128xf32> to vector<256x128xf32>
    %35 = arith.truncf %34 : vector<256x128xf32> to vector<256x128xbf16>
    %c0_29 = arith.constant 0 : index
    %c256 = arith.constant 256 : index
    %36 = vector.load %arg17[%c0_29, %c256] : memref<256x1152xbf16, #tpu.memory_space<vmem>>, vector<256x128xbf16>
    tpu.vector_store %arg17[%c0_29, %c256], %35 {strides = array<i32>} : memref<256x1152xbf16, #tpu.memory_space<vmem>>, vector<256x128xbf16>,
    %c1_30 = arith.constant 1 : index
    %c7_31 = arith.constant 7 : index
    %c0_32 = arith.constant 0 : index
    %37 = vector.load %arg15[%c1_30, %c7_31, %c0_32] : memref<18x32x128xf32, #tpu.memory_space<vmem>>, vector<16x16x128xf32>
    %38 = vector.shape_cast %37 : vector<16x16x128xf32> to vector<256x128xf32>
    %39 = arith.truncf %38 : vector<256x128xf32> to vector<256x128xbf16>
    %c0_33 = arith.constant 0 : index
    %c384 = arith.constant 384 : index
    %40 = vector.load %arg17[%c0_33, %c384] : memref<256x1152xbf16, #tpu.memory_space<vmem>>, vector<256x128xbf16>
    tpu.vector_store %arg17[%c0_33, %c384], %39 {strides = array<i32>} : memref<256x1152xbf16, #tpu.memory_space<vmem>>, vector<256x128xbf16>,
    %c1_34 = arith.constant 1 : index
    %c8_35 = arith.constant 8 : index
    %c0_36 = arith.constant 0 : index
    %41 = vector.load %arg15[%c1_34, %c8_35, %c0_36] : memref<18x32x128xf32, #tpu.memory_space<vmem>>, vector<16x16x128xf32>
    %42 = vector.shape_cast %41 : vector<16x16x128xf32> to vector<256x128xf32>
    %43 = arith.truncf %42 : vector<256x128xf32> to vector<256x128xbf16>
    %c0_37 = arith.constant 0 : index
    %c512 = arith.constant 512 : index
    %44 = vector.load %arg17[%c0_37, %c512] : memref<256x1152xbf16, #tpu.memory_space<vmem>>, vector<256x128xbf16>
    tpu.vector_store %arg17[%c0_37, %c512], %43 {strides = array<i32>} : memref<256x1152xbf16, #tpu.memory_space<vmem>>, vector<256x128xbf16>,
    %c1_38 = arith.constant 1 : index
    %c9_39 = arith.constant 9 : index
    %c0_40 = arith.constant 0 : index
    %45 = vector.load %arg15[%c1_38, %c9_39, %c0_40] : memref<18x32x128xf32, #tpu.memory_space<vmem>>, vector<16x16x128xf32>
    %46 = vector.shape_cast %45 : vector<16x16x128xf32> to vector<256x128xf32>
    %47 = arith.truncf %46 : vector<256x128xf32> to vector<256x128xbf16>
    %c0_41 = arith.constant 0 : index
    %c640 = arith.constant 640 : index
    %48 = vector.load %arg17[%c0_41, %c640] : memref<256x1152xbf16, #tpu.memory_space<vmem>>, vector<256x128xbf16>
    tpu.vector_store %arg17[%c0_41, %c640], %47 {strides = array<i32>} : memref<256x1152xbf16, #tpu.memory_space<vmem>>, vector<256x128xbf16>,
    %c2 = arith.constant 2 : index
    %c7_42 = arith.constant 7 : index
    %c0_43 = arith.constant 0 : index
    %49 = vector.load %arg15[%c2, %c7_42, %c0_43] : memref<18x32x128xf32, #tpu.memory_space<vmem>>, vector<16x16x128xf32>
    %50 = vector.shape_cast %49 : vector<16x16x128xf32> to vector<256x128xf32>
    %51 = arith.truncf %50 : vector<256x128xf32> to vector<256x128xbf16>
    %c0_44 = arith.constant 0 : index
    %c768 = arith.constant 768 : index
    %52 = vector.load %arg17[%c0_44, %c768] : memref<256x1152xbf16, #tpu.memory_space<vmem>>, vector<256x128xbf16>
    tpu.vector_store %arg17[%c0_44, %c768], %51 {strides = array<i32>} : memref<256x1152xbf16, #tpu.memory_space<vmem>>, vector<256x128xbf16>,
    %c2_45 = arith.constant 2 : index
    %c8_46 = arith.constant 8 : index
    %c0_47 = arith.constant 0 : index
    %53 = vector.load %arg15[%c2_45, %c8_46, %c0_47] : memref<18x32x128xf32, #tpu.memory_space<vmem>>, vector<16x16x128xf32>
    %54 = vector.shape_cast %53 : vector<16x16x128xf32> to vector<256x128xf32>
    %55 = arith.truncf %54 : vector<256x128xf32> to vector<256x128xbf16>
    %c0_48 = arith.constant 0 : index
    %c896 = arith.constant 896 : index
    %56 = vector.load %arg17[%c0_48, %c896] : memref<256x1152xbf16, #tpu.memory_space<vmem>>, vector<256x128xbf16>
    tpu.vector_store %arg17[%c0_48, %c896], %55 {strides = array<i32>} : memref<256x1152xbf16, #tpu.memory_space<vmem>>, vector<256x128xbf16>,
    %c2_49 = arith.constant 2 : index
    %c9_50 = arith.constant 9 : index
    %c0_51 = arith.constant 0 : index
    %57 = vector.load %arg15[%c2_49, %c9_50, %c0_51] : memref<18x32x128xf32, #tpu.memory_space<vmem>>, vector<16x16x128xf32>
    %58 = vector.shape_cast %57 : vector<16x16x128xf32> to vector<256x128xf32>
    %59 = arith.truncf %58 : vector<256x128xf32> to vector<256x128xbf16>
    %c0_52 = arith.constant 0 : index
    %c1024 = arith.constant 1024 : index
    %60 = vector.load %arg17[%c0_52, %c1024] : memref<256x1152xbf16, #tpu.memory_space<vmem>>, vector<256x128xbf16>
    tpu.vector_store %arg17[%c0_52, %c1024], %59 {strides = array<i32>} : memref<256x1152xbf16, #tpu.memory_space<vmem>>, vector<256x128xbf16>,
    %c0_53 = arith.constant 0 : index
    %c0_54 = arith.constant 0 : index
    %61 = vector.load %arg17[%c0_53, %c0_54] : memref<256x1152xbf16, #tpu.memory_space<vmem>>, vector<256x1152xbf16>
    %c0_55 = arith.constant 0 : index
    %c0_56 = arith.constant 0 : index
    %62 = vector.load %arg5[%c0_55, %c0_56] : memref<1152x128xbf16, #tpu.memory_space<vmem>>, vector<1152x128xbf16>
    %cst_57 = arith.constant dense<0.000000e+00> : vector<256x128xf32>
    %63 = tpu.matmul %61, %62, %cst_57 {dimension_numbers = #tpu.dot_dimension_numbers<[1], [0], [0], [1], [0, 0, 1, 1], [], []>} : vector<256x1152xbf16>, vector<1152x128xbf16>, vector<256x128xf32> -> vector<256x128xf32>
    %c0_58 = arith.constant 0 : index
    %c0_59 = arith.constant 0 : index
    %64 = vector.load %arg6[%c0_58, %c0_59] : memref<1x128xf32, #tpu.memory_space<vmem>>, vector<1x128xf32>
    %65 = vector.shape_cast %64 : vector<1x128xf32> to vector<128xf32>
    %66 = vector.shape_cast %65 : vector<128xf32> to vector<1x128xf32>
    %67 = vector.broadcast %66 : vector<1x128xf32> to vector<256x128xf32>
    %68 = arith.mulf %63, %67 : vector<256x128xf32>
    %c0_60 = arith.constant 0 : index
    %c0_61 = arith.constant 0 : index
    %69 = vector.load %arg7[%c0_60, %c0_61] : memref<1x128xf32, #tpu.memory_space<vmem>>, vector<1x128xf32>
    %70 = vector.shape_cast %69 : vector<1x128xf32> to vector<128xf32>
    %71 = vector.shape_cast %70 : vector<128xf32> to vector<1x128xf32>
    %72 = vector.broadcast %71 : vector<1x128xf32> to vector<256x128xf32>
    %73 = arith.addf %68, %72 : vector<256x128xf32>
    %cst_62 = arith.constant 0.000000e+00 : f32
    %74 = vector.broadcast %cst_62 : f32 to vector<256x128xf32>
    %75 = arith.cmpf ogt, %73, %74 : vector<256x128xf32>
    %cst_63 = arith.constant 0.00999999977 : f32
    %76 = vector.broadcast %cst_63 : f32 to vector<256x128xf32>
    %77 = arith.mulf %76, %73 : vector<256x128xf32>
    %78 = arith.select %75, %73, %77 : vector<256x128xi1>, vector<256x128xf32>
    %79 = vector.shape_cast %78 : vector<256x128xf32> to vector<16x16x128xf32>
    %c1_64 = arith.constant 1 : index
    %c8_65 = arith.constant 8 : index
    %c0_66 = arith.constant 0 : index
    %80 = vector.load %arg16[%c1_64, %c8_65, %c0_66] : memref<18x32x128xf32, #tpu.memory_space<vmem>>, vector<16x16x128xf32>
    tpu.vector_store %arg16[%c1_64, %c8_65, %c0_66], %79 {strides = array<i32>} : memref<18x32x128xf32, #tpu.memory_space<vmem>>, vector<16x16x128xf32>,
    %c0_67 = arith.constant 0 : index
    %c7_68 = arith.constant 7 : index
    %c0_69 = arith.constant 0 : index
    %81 = vector.load %arg16[%c0_67, %c7_68, %c0_69] : memref<18x32x128xf32, #tpu.memory_space<vmem>>, vector<16x16x128xf32>
    %82 = vector.shape_cast %81 : vector<16x16x128xf32> to vector<256x128xf32>
    %83 = arith.truncf %82 : vector<256x128xf32> to vector<256x128xbf16>
    %c0_70 = arith.constant 0 : index
    %c0_71 = arith.constant 0 : index
    %84 = vector.load %arg17[%c0_70, %c0_71] : memref<256x1152xbf16, #tpu.memory_space<vmem>>, vector<256x128xbf16>
    tpu.vector_store %arg17[%c0_70, %c0_71], %83 {strides = array<i32>} : memref<256x1152xbf16, #tpu.memory_space<vmem>>, vector<256x128xbf16>,
    %c0_72 = arith.constant 0 : index
    %c8_73 = arith.constant 8 : index
    %c0_74 = arith.constant 0 : index
    %85 = vector.load %arg16[%c0_72, %c8_73, %c0_74] : memref<18x32x128xf32, #tpu.memory_space<vmem>>, vector<16x16x128xf32>
    %86 = vector.shape_cast %85 : vector<16x16x128xf32> to vector<256x128xf32>
    %87 = arith.truncf %86 : vector<256x128xf32> to vector<256x128xbf16>
    %c0_75 = arith.constant 0 : index
    %c128_76 = arith.constant 128 : index
    %88 = vector.load %arg17[%c0_75, %c128_76] : memref<256x1152xbf16, #tpu.memory_space<vmem>>, vector<256x128xbf16>
    tpu.vector_store %arg17[%c0_75, %c128_76], %87 {strides = array<i32>} : memref<256x1152xbf16, #tpu.memory_space<vmem>>, vector<256x128xbf16>,
    %c0_77 = arith.constant 0 : index
    %c9_78 = arith.constant 9 : index
    %c0_79 = arith.constant 0 : index
    %89 = vector.load %arg16[%c0_77, %c9_78, %c0_79] : memref<18x32x128xf32, #tpu.memory_space<vmem>>, vector<16x16x128xf32>
    %90 = vector.shape_cast %89 : vector<16x16x128xf32> to vector<256x128xf32>
    %91 = arith.truncf %90 : vector<256x128xf32> to vector<256x128xbf16>
    %c0_80 = arith.constant 0 : index
    %c256_81 = arith.constant 256 : index
    %92 = vector.load %arg17[%c0_80, %c256_81] : memref<256x1152xbf16, #tpu.memory_space<vmem>>, vector<256x128xbf16>
    tpu.vector_store %arg17[%c0_80, %c256_81], %91 {strides = array<i32>} : memref<256x1152xbf16, #tpu.memory_space<vmem>>, vector<256x128xbf16>,
    %c1_82 = arith.constant 1 : index
    %c7_83 = arith.constant 7 : index
    %c0_84 = arith.constant 0 : index
    %93 = vector.load %arg16[%c1_82, %c7_83, %c0_84] : memref<18x32x128xf32, #tpu.memory_space<vmem>>, vector<16x16x128xf32>
    %94 = vector.shape_cast %93 : vector<16x16x128xf32> to vector<256x128xf32>
    %95 = arith.truncf %94 : vector<256x128xf32> to vector<256x128xbf16>
    %c0_85 = arith.constant 0 : index
    %c384_86 = arith.constant 384 : index
    %96 = vector.load %arg17[%c0_85, %c384_86] : memref<256x1152xbf16, #tpu.memory_space<vmem>>, vector<256x128xbf16>
    tpu.vector_store %arg17[%c0_85, %c384_86], %95 {strides = array<i32>} : memref<256x1152xbf16, #tpu.memory_space<vmem>>, vector<256x128xbf16>,
    %c1_87 = arith.constant 1 : index
    %c8_88 = arith.constant 8 : index
    %c0_89 = arith.constant 0 : index
    %97 = vector.load %arg16[%c1_87, %c8_88, %c0_89] : memref<18x32x128xf32, #tpu.memory_space<vmem>>, vector<16x16x128xf32>
    %98 = vector.shape_cast %97 : vector<16x16x128xf32> to vector<256x128xf32>
    %99 = arith.truncf %98 : vector<256x128xf32> to vector<256x128xbf16>
    %c0_90 = arith.constant 0 : index
    %c512_91 = arith.constant 512 : index
    %100 = vector.load %arg17[%c0_90, %c512_91] : memref<256x1152xbf16, #tpu.memory_space<vmem>>, vector<256x128xbf16>
    tpu.vector_store %arg17[%c0_90, %c512_91], %99 {strides = array<i32>} : memref<256x1152xbf16, #tpu.memory_space<vmem>>, vector<256x128xbf16>,
    %c1_92 = arith.constant 1 : index
    %c9_93 = arith.constant 9 : index
    %c0_94 = arith.constant 0 : index
    %101 = vector.load %arg16[%c1_92, %c9_93, %c0_94] : memref<18x32x128xf32, #tpu.memory_space<vmem>>, vector<16x16x128xf32>
    %102 = vector.shape_cast %101 : vector<16x16x128xf32> to vector<256x128xf32>
    %103 = arith.truncf %102 : vector<256x128xf32> to vector<256x128xbf16>
    %c0_95 = arith.constant 0 : index
    %c640_96 = arith.constant 640 : index
    %104 = vector.load %arg17[%c0_95, %c640_96] : memref<256x1152xbf16, #tpu.memory_space<vmem>>, vector<256x128xbf16>
    tpu.vector_store %arg17[%c0_95, %c640_96], %103 {strides = array<i32>} : memref<256x1152xbf16, #tpu.memory_space<vmem>>, vector<256x128xbf16>,
    %c2_97 = arith.constant 2 : index
    %c7_98 = arith.constant 7 : index
    %c0_99 = arith.constant 0 : index
    %105 = vector.load %arg16[%c2_97, %c7_98, %c0_99] : memref<18x32x128xf32, #tpu.memory_space<vmem>>, vector<16x16x128xf32>
    %106 = vector.shape_cast %105 : vector<16x16x128xf32> to vector<256x128xf32>
    %107 = arith.truncf %106 : vector<256x128xf32> to vector<256x128xbf16>
    %c0_100 = arith.constant 0 : index
    %c768_101 = arith.constant 768 : index
    %108 = vector.load %arg17[%c0_100, %c768_101] : memref<256x1152xbf16, #tpu.memory_space<vmem>>, vector<256x128xbf16>
    tpu.vector_store %arg17[%c0_100, %c768_101], %107 {strides = array<i32>} : memref<256x1152xbf16, #tpu.memory_space<vmem>>, vector<256x128xbf16>,
    %c2_102 = arith.constant 2 : index
    %c8_103 = arith.constant 8 : index
    %c0_104 = arith.constant 0 : index
    %109 = vector.load %arg16[%c2_102, %c8_103, %c0_104] : memref<18x32x128xf32, #tpu.memory_space<vmem>>, vector<16x16x128xf32>
    %110 = vector.shape_cast %109 : vector<16x16x128xf32> to vector<256x128xf32>
    %111 = arith.truncf %110 : vector<256x128xf32> to vector<256x128xbf16>
    %c0_105 = arith.constant 0 : index
    %c896_106 = arith.constant 896 : index
    %112 = vector.load %arg17[%c0_105, %c896_106] : memref<256x1152xbf16, #tpu.memory_space<vmem>>, vector<256x128xbf16>
    tpu.vector_store %arg17[%c0_105, %c896_106], %111 {strides = array<i32>} : memref<256x1152xbf16, #tpu.memory_space<vmem>>, vector<256x128xbf16>,
    %c2_107 = arith.constant 2 : index
    %c9_108 = arith.constant 9 : index
    %c0_109 = arith.constant 0 : index
    %113 = vector.load %arg16[%c2_107, %c9_108, %c0_109] : memref<18x32x128xf32, #tpu.memory_space<vmem>>, vector<16x16x128xf32>
    %114 = vector.shape_cast %113 : vector<16x16x128xf32> to vector<256x128xf32>
    %115 = arith.truncf %114 : vector<256x128xf32> to vector<256x128xbf16>
    %c0_110 = arith.constant 0 : index
    %c1024_111 = arith.constant 1024 : index
    %116 = vector.load %arg17[%c0_110, %c1024_111] : memref<256x1152xbf16, #tpu.memory_space<vmem>>, vector<256x128xbf16>
    tpu.vector_store %arg17[%c0_110, %c1024_111], %115 {strides = array<i32>} : memref<256x1152xbf16, #tpu.memory_space<vmem>>, vector<256x128xbf16>,
    %c0_112 = arith.constant 0 : index
    %c0_113 = arith.constant 0 : index
    %117 = vector.load %arg17[%c0_112, %c0_113] : memref<256x1152xbf16, #tpu.memory_space<vmem>>, vector<256x1152xbf16>
    %c0_114 = arith.constant 0 : index
    %c0_115 = arith.constant 0 : index
    %118 = vector.load %arg8[%c0_114, %c0_115] : memref<1152x128xbf16, #tpu.memory_space<vmem>>, vector<1152x128xbf16>
    %cst_116 = arith.constant dense<0.000000e+00> : vector<256x128xf32>
    %119 = tpu.matmul %117, %118, %cst_116 {dimension_numbers = #tpu.dot_dimension_numbers<[1], [0], [0], [1], [0, 0, 1, 1], [], []>} : vector<256x1152xbf16>, vector<1152x128xbf16>, vector<256x128xf32> -> vector<256x128xf32>
    %c0_117 = arith.constant 0 : index
    %c0_118 = arith.constant 0 : index
    %120 = vector.load %arg9[%c0_117, %c0_118] : memref<1x128xf32, #tpu.memory_space<vmem>>, vector<1x128xf32>
    %121 = vector.shape_cast %120 : vector<1x128xf32> to vector<128xf32>
    %122 = vector.shape_cast %121 : vector<128xf32> to vector<1x128xf32>
    %123 = vector.broadcast %122 : vector<1x128xf32> to vector<256x128xf32>
    %124 = arith.mulf %119, %123 : vector<256x128xf32>
    %c0_119 = arith.constant 0 : index
    %c0_120 = arith.constant 0 : index
    %125 = vector.load %arg10[%c0_119, %c0_120] : memref<1x128xf32, #tpu.memory_space<vmem>>, vector<1x128xf32>
    %126 = vector.shape_cast %125 : vector<1x128xf32> to vector<128xf32>
    %127 = vector.shape_cast %126 : vector<128xf32> to vector<1x128xf32>
    %128 = vector.broadcast %127 : vector<1x128xf32> to vector<256x128xf32>
    %129 = arith.addf %124, %128 : vector<256x128xf32>
    %cst_121 = arith.constant 0.000000e+00 : f32
    %130 = vector.broadcast %cst_121 : f32 to vector<256x128xf32>
    %131 = arith.cmpf ogt, %129, %130 : vector<256x128xf32>
    %cst_122 = arith.constant 0.00999999977 : f32
    %132 = vector.broadcast %cst_122 : f32 to vector<256x128xf32>
    %133 = arith.mulf %132, %129 : vector<256x128xf32>
    %134 = arith.select %131, %129, %133 : vector<256x128xi1>, vector<256x128xf32>
    %135 = vector.shape_cast %134 : vector<256x128xf32> to vector<16x16x128xf32>
    %c1_123 = arith.constant 1 : index
    %c8_124 = arith.constant 8 : index
    %c0_125 = arith.constant 0 : index
    %136 = vector.load %arg15[%c1_123, %c8_124, %c0_125] : memref<18x32x128xf32, #tpu.memory_space<vmem>>, vector<16x16x128xf32>
    tpu.vector_store %arg15[%c1_123, %c8_124, %c0_125], %135 {strides = array<i32>} : memref<18x32x128xf32, #tpu.memory_space<vmem>>, vector<16x16x128xf32>,
    %c0_126 = arith.constant 0 : index
    %c7_127 = arith.constant 7 : index
    %c0_128 = arith.constant 0 : index
    %137 = vector.load %arg15[%c0_126, %c7_127, %c0_128] : memref<18x32x128xf32, #tpu.memory_space<vmem>>, vector<16x16x128xf32>
    %138 = vector.shape_cast %137 : vector<16x16x128xf32> to vector<256x128xf32>
    %139 = arith.truncf %138 : vector<256x128xf32> to vector<256x128xbf16>
    %c0_129 = arith.constant 0 : index
    %c0_130 = arith.constant 0 : index
    %140 = vector.load %arg17[%c0_129, %c0_130] : memref<256x1152xbf16, #tpu.memory_space<vmem>>, vector<256x128xbf16>
    tpu.vector_store %arg17[%c0_129, %c0_130], %139 {strides = array<i32>} : memref<256x1152xbf16, #tpu.memory_space<vmem>>, vector<256x128xbf16>,
    %c0_131 = arith.constant 0 : index
    %c8_132 = arith.constant 8 : index
    %c0_133 = arith.constant 0 : index
    %141 = vector.load %arg15[%c0_131, %c8_132, %c0_133] : memref<18x32x128xf32, #tpu.memory_space<vmem>>, vector<16x16x128xf32>
    %142 = vector.shape_cast %141 : vector<16x16x128xf32> to vector<256x128xf32>
    %143 = arith.truncf %142 : vector<256x128xf32> to vector<256x128xbf16>
    %c0_134 = arith.constant 0 : index
    %c128_135 = arith.constant 128 : index
    %144 = vector.load %arg17[%c0_134, %c128_135] : memref<256x1152xbf16, #tpu.memory_space<vmem>>, vector<256x128xbf16>
    tpu.vector_store %arg17[%c0_134, %c128_135], %143 {strides = array<i32>} : memref<256x1152xbf16, #tpu.memory_space<vmem>>, vector<256x128xbf16>,
    %c0_136 = arith.constant 0 : index
    %c9_137 = arith.constant 9 : index
    %c0_138 = arith.constant 0 : index
    %145 = vector.load %arg15[%c0_136, %c9_137, %c0_138] : memref<18x32x128xf32, #tpu.memory_space<vmem>>, vector<16x16x128xf32>
    %146 = vector.shape_cast %145 : vector<16x16x128xf32> to vector<256x128xf32>
    %147 = arith.truncf %146 : vector<256x128xf32> to vector<256x128xbf16>
    %c0_139 = arith.constant 0 : index
    %c256_140 = arith.constant 256 : index
    %148 = vector.load %arg17[%c0_139, %c256_140] : memref<256x1152xbf16, #tpu.memory_space<vmem>>, vector<256x128xbf16>
    tpu.vector_store %arg17[%c0_139, %c256_140], %147 {strides = array<i32>} : memref<256x1152xbf16, #tpu.memory_space<vmem>>, vector<256x128xbf16>,
    %c1_141 = arith.constant 1 : index
    %c7_142 = arith.constant 7 : index
    %c0_143 = arith.constant 0 : index
    %149 = vector.load %arg15[%c1_141, %c7_142, %c0_143] : memref<18x32x128xf32, #tpu.memory_space<vmem>>, vector<16x16x128xf32>
    %150 = vector.shape_cast %149 : vector<16x16x128xf32> to vector<256x128xf32>
    %151 = arith.truncf %150 : vector<256x128xf32> to vector<256x128xbf16>
    %c0_144 = arith.constant 0 : index
    %c384_145 = arith.constant 384 : index
    %152 = vector.load %arg17[%c0_144, %c384_145] : memref<256x1152xbf16, #tpu.memory_space<vmem>>, vector<256x128xbf16>
    tpu.vector_store %arg17[%c0_144, %c384_145], %151 {strides = array<i32>} : memref<256x1152xbf16, #tpu.memory_space<vmem>>, vector<256x128xbf16>,
    %c1_146 = arith.constant 1 : index
    %c8_147 = arith.constant 8 : index
    %c0_148 = arith.constant 0 : index
    %153 = vector.load %arg15[%c1_146, %c8_147, %c0_148] : memref<18x32x128xf32, #tpu.memory_space<vmem>>, vector<16x16x128xf32>
    %154 = vector.shape_cast %153 : vector<16x16x128xf32> to vector<256x128xf32>
    %155 = arith.truncf %154 : vector<256x128xf32> to vector<256x128xbf16>
    %c0_149 = arith.constant 0 : index
    %c512_150 = arith.constant 512 : index
    %156 = vector.load %arg17[%c0_149, %c512_150] : memref<256x1152xbf16, #tpu.memory_space<vmem>>, vector<256x128xbf16>
    tpu.vector_store %arg17[%c0_149, %c512_150], %155 {strides = array<i32>} : memref<256x1152xbf16, #tpu.memory_space<vmem>>, vector<256x128xbf16>,
    %c1_151 = arith.constant 1 : index
    %c9_152 = arith.constant 9 : index
    %c0_153 = arith.constant 0 : index
    %157 = vector.load %arg15[%c1_151, %c9_152, %c0_153] : memref<18x32x128xf32, #tpu.memory_space<vmem>>, vector<16x16x128xf32>
    %158 = vector.shape_cast %157 : vector<16x16x128xf32> to vector<256x128xf32>
    %159 = arith.truncf %158 : vector<256x128xf32> to vector<256x128xbf16>
    %c0_154 = arith.constant 0 : index
    %c640_155 = arith.constant 640 : index
    %160 = vector.load %arg17[%c0_154, %c640_155] : memref<256x1152xbf16, #tpu.memory_space<vmem>>, vector<256x128xbf16>
    tpu.vector_store %arg17[%c0_154, %c640_155], %159 {strides = array<i32>} : memref<256x1152xbf16, #tpu.memory_space<vmem>>, vector<256x128xbf16>,
    %c2_156 = arith.constant 2 : index
    %c7_157 = arith.constant 7 : index
    %c0_158 = arith.constant 0 : index
    %161 = vector.load %arg15[%c2_156, %c7_157, %c0_158] : memref<18x32x128xf32, #tpu.memory_space<vmem>>, vector<16x16x128xf32>
    %162 = vector.shape_cast %161 : vector<16x16x128xf32> to vector<256x128xf32>
    %163 = arith.truncf %162 : vector<256x128xf32> to vector<256x128xbf16>
    %c0_159 = arith.constant 0 : index
    %c768_160 = arith.constant 768 : index
    %164 = vector.load %arg17[%c0_159, %c768_160] : memref<256x1152xbf16, #tpu.memory_space<vmem>>, vector<256x128xbf16>
    tpu.vector_store %arg17[%c0_159, %c768_160], %163 {strides = array<i32>} : memref<256x1152xbf16, #tpu.memory_space<vmem>>, vector<256x128xbf16>,
    %c2_161 = arith.constant 2 : index
    %c8_162 = arith.constant 8 : index
    %c0_163 = arith.constant 0 : index
    %165 = vector.load %arg15[%c2_161, %c8_162, %c0_163] : memref<18x32x128xf32, #tpu.memory_space<vmem>>, vector<16x16x128xf32>
    %166 = vector.shape_cast %165 : vector<16x16x128xf32> to vector<256x128xf32>
    %167 = arith.truncf %166 : vector<256x128xf32> to vector<256x128xbf16>
    %c0_164 = arith.constant 0 : index
    %c896_165 = arith.constant 896 : index
    %168 = vector.load %arg17[%c0_164, %c896_165] : memref<256x1152xbf16, #tpu.memory_space<vmem>>, vector<256x128xbf16>
    tpu.vector_store %arg17[%c0_164, %c896_165], %167 {strides = array<i32>} : memref<256x1152xbf16, #tpu.memory_space<vmem>>, vector<256x128xbf16>,
    %c2_166 = arith.constant 2 : index
    %c9_167 = arith.constant 9 : index
    %c0_168 = arith.constant 0 : index
    %169 = vector.load %arg15[%c2_166, %c9_167, %c0_168] : memref<18x32x128xf32, #tpu.memory_space<vmem>>, vector<16x16x128xf32>
    %170 = vector.shape_cast %169 : vector<16x16x128xf32> to vector<256x128xf32>
    %171 = arith.truncf %170 : vector<256x128xf32> to vector<256x128xbf16>
    %c0_169 = arith.constant 0 : index
    %c1024_170 = arith.constant 1024 : index
    %172 = vector.load %arg17[%c0_169, %c1024_170] : memref<256x1152xbf16, #tpu.memory_space<vmem>>, vector<256x128xbf16>
    tpu.vector_store %arg17[%c0_169, %c1024_170], %171 {strides = array<i32>} : memref<256x1152xbf16, #tpu.memory_space<vmem>>, vector<256x128xbf16>,
    %c0_171 = arith.constant 0 : index
    %c0_172 = arith.constant 0 : index
    %173 = vector.load %arg17[%c0_171, %c0_172] : memref<256x1152xbf16, #tpu.memory_space<vmem>>, vector<256x1152xbf16>
    %c0_173 = arith.constant 0 : index
    %c0_174 = arith.constant 0 : index
    %174 = vector.load %arg11[%c0_173, %c0_174] : memref<1152x128xbf16, #tpu.memory_space<vmem>>, vector<1152x128xbf16>
    %cst_175 = arith.constant dense<0.000000e+00> : vector<256x128xf32>
    %175 = tpu.matmul %173, %174, %cst_175 {dimension_numbers = #tpu.dot_dimension_numbers<[1], [0], [0], [1], [0, 0, 1, 1], [], []>} : vector<256x1152xbf16>, vector<1152x128xbf16>, vector<256x128xf32> -> vector<256x128xf32>
    %c0_176 = arith.constant 0 : index
    %c0_177 = arith.constant 0 : index
    %176 = vector.load %arg12[%c0_176, %c0_177] : memref<1x128xf32, #tpu.memory_space<vmem>>, vector<1x128xf32>
    %177 = vector.shape_cast %176 : vector<1x128xf32> to vector<128xf32>
    %178 = vector.shape_cast %177 : vector<128xf32> to vector<1x128xf32>
    %179 = vector.broadcast %178 : vector<1x128xf32> to vector<256x128xf32>
    %180 = arith.mulf %175, %179 : vector<256x128xf32>
    %c0_178 = arith.constant 0 : index
    %c0_179 = arith.constant 0 : index
    %181 = vector.load %arg13[%c0_178, %c0_179] : memref<1x128xf32, #tpu.memory_space<vmem>>, vector<1x128xf32>
    %182 = vector.shape_cast %181 : vector<1x128xf32> to vector<128xf32>
    %183 = vector.shape_cast %182 : vector<128xf32> to vector<1x128xf32>
    %184 = vector.broadcast %183 : vector<1x128xf32> to vector<256x128xf32>
    %185 = arith.addf %180, %184 : vector<256x128xf32>
    %cst_180 = arith.constant 0.000000e+00 : f32
    %186 = vector.broadcast %cst_180 : f32 to vector<256x128xf32>
    %187 = arith.cmpf ogt, %185, %186 : vector<256x128xf32>
    %cst_181 = arith.constant 0.00999999977 : f32
    %188 = vector.broadcast %cst_181 : f32 to vector<256x128xf32>
    %189 = arith.mulf %188, %185 : vector<256x128xf32>
    %190 = arith.select %187, %185, %189 : vector<256x128xi1>, vector<256x128xf32>
    %191 = tpu.iota {dimensions = array<i32: 1>} : vector<256x128xi32>
    %c4_i32 = arith.constant 4 : i32
    %192 = vector.broadcast %c4_i32 : i32 to vector<256x128xi32>
    %193 = arith.cmpi slt, %191, %192 : vector<256x128xi32>
    %c8_i32 = arith.constant 8 : i32
    %194 = vector.broadcast %c8_i32 : i32 to vector<256x128xi32>
    %195 = arith.cmpi sge, %191, %194 : vector<256x128xi32>
    %c40_i32 = arith.constant 40 : i32
    %196 = vector.broadcast %c40_i32 : i32 to vector<256x128xi32>
    %197 = arith.cmpi slt, %191, %196 : vector<256x128xi32>
    %198 = arith.andi %195, %197 : vector<256x128xi1>
    %cst_182 = arith.constant 0xFF800000 : f32
    %199 = vector.broadcast %cst_182 : f32 to vector<256x128xf32>
    %200 = arith.select %193, %190, %199 : vector<256x128xi1>, vector<256x128xf32>
    %cst_183 = arith.constant dense<0xFF800000> : vector<256xf32>
    %201 = vector.multi_reduction <maximumf>, %200, %cst_183 [1] : vector<256x128xf32> to vector<256xf32>
    %202 = vector.shape_cast %201 : vector<256xf32> to vector<256x1xf32>
    %203 = vector.broadcast %202 : vector<256x1xf32> to vector<256x128xf32>
    %204 = arith.subf %200, %203 : vector<256x128xf32>
    %205 = math.exp %204 : vector<256x128xf32>
    %cst_184 = arith.constant dense<0.000000e+00> : vector<256xf32>
    %206 = vector.multi_reduction <add>, %205, %cst_184 [1] : vector<256x128xf32> to vector<256xf32>
    %207 = vector.shape_cast %206 : vector<256xf32> to vector<256x1xf32>
    %208 = vector.broadcast %207 : vector<256x1xf32> to vector<256x128xf32>
    %209 = arith.divf %205, %208 : vector<256x128xf32>
    %210 = arith.mulf %190, %190 : vector<256x128xf32>
    %cst_185 = arith.constant 0.000000e+00 : f32
    %211 = vector.broadcast %cst_185 : f32 to vector<256x128xf32>
    %212 = arith.select %198, %210, %211 : vector<256x128xi1>, vector<256x128xf32>
    %cst_186 = arith.constant dense<0.000000e+00> : vector<256xf32>
    %213 = vector.multi_reduction <add>, %212, %cst_186 [1] : vector<256x128xf32> to vector<256xf32>
    %214 = vector.shape_cast %213 : vector<256xf32> to vector<256x1xf32>
    %215 = math.sqrt %214 : vector<256x1xf32>
    %cst_187 = arith.constant 9.99999996E-13 : f32
    %216 = vector.broadcast %cst_187 : f32 to vector<256x1xf32>
    %217 = arith.maximumf %215, %216 : vector<256x1xf32>
    %218 = vector.broadcast %217 : vector<256x1xf32> to vector<256x128xf32>
    %219 = arith.divf %190, %218 : vector<256x128xf32>
    %220 = arith.select %198, %219, %190 : vector<256x128xi1>, vector<256x128xf32>
    %221 = arith.select %193, %209, %220 : vector<256x128xi1>, vector<256x128xf32>
    %222 = vector.shape_cast %221 : vector<256x128xf32> to vector<1x16x16x128xf32>
    %c0_188 = arith.constant 0 : index
    %c0_189 = arith.constant 0 : index
    %c0_190 = arith.constant 0 : index
    %c0_191 = arith.constant 0 : index
    %223 = vector.load %arg14[%c0_188, %c0_189, %c0_190, %c0_191] : memref<1x16x16x128xf32, #tpu.memory_space<vmem>>, vector<1x16x16x128xf32>
    tpu.vector_store %arg14[%c0_188, %c0_189, %c0_190, %c0_191], %222 {strides = array<i32>} : memref<1x16x16x128xf32, #tpu.memory_space<vmem>>, vector<1x16x16x128xf32>,
    return
  }
  func.func @transform_0(%arg0: i32) -> (i32, i32, i32) {
    %c0_i32 = arith.constant 0 : i32
    %c0_i32_0 = arith.constant 0 : i32
    %c0_i32_1 = arith.constant 0 : i32
    return %arg0, %c0_i32, %c0_i32_0 : i32, i32, i32
  }
  func.func @transform_1(%arg0: i32) -> (i32, i32) {
    %c0_i32 = arith.constant 0 : i32
    %c0_i32_0 = arith.constant 0 : i32
    %c0_i32_1 = arith.constant 0 : i32
    return %c0_i32, %c0_i32_0 : i32, i32
  }
  func.func @transform_2(%arg0: i32) -> (i32, i32) {
    %c0_i32 = arith.constant 0 : i32
    %c0_i32_0 = arith.constant 0 : i32
    %c0_i32_1 = arith.constant 0 : i32
    return %c0_i32, %c0_i32_0 : i32, i32
  }
  func.func @transform_3(%arg0: i32) -> (i32, i32) {
    %c0_i32 = arith.constant 0 : i32
    %c0_i32_0 = arith.constant 0 : i32
    %c0_i32_1 = arith.constant 0 : i32
    return %c0_i32, %c0_i32_0 : i32, i32
  }
  func.func @transform_4(%arg0: i32) -> (i32, i32) {
    %c0_i32 = arith.constant 0 : i32
    %c0_i32_0 = arith.constant 0 : i32
    %c0_i32_1 = arith.constant 0 : i32
    return %c0_i32, %c0_i32_0 : i32, i32
  }
  func.func @transform_5(%arg0: i32) -> (i32, i32) {
    %c0_i32 = arith.constant 0 : i32
    %c0_i32_0 = arith.constant 0 : i32
    %c0_i32_1 = arith.constant 0 : i32
    return %c0_i32, %c0_i32_0 : i32, i32
  }
  func.func @transform_6(%arg0: i32) -> (i32, i32) {
    %c0_i32 = arith.constant 0 : i32
    %c0_i32_0 = arith.constant 0 : i32
    %c0_i32_1 = arith.constant 0 : i32
    return %c0_i32, %c0_i32_0 : i32, i32
  }
  func.func @transform_7(%arg0: i32) -> (i32, i32) {
    %c0_i32 = arith.constant 0 : i32
    %c0_i32_0 = arith.constant 0 : i32
    %c0_i32_1 = arith.constant 0 : i32
    return %c0_i32, %c0_i32_0 : i32, i32
  }
  func.func @transform_8(%arg0: i32) -> (i32, i32) {
    %c0_i32 = arith.constant 0 : i32
    %c0_i32_0 = arith.constant 0 : i32
    %c0_i32_1 = arith.constant 0 : i32
    return %c0_i32, %c0_i32_0 : i32, i32
  }
  func.func @transform_9(%arg0: i32) -> (i32, i32) {
    %c0_i32 = arith.constant 0 : i32
    %c0_i32_0 = arith.constant 0 : i32
    %c0_i32_1 = arith.constant 0 : i32
    return %c0_i32, %c0_i32_0 : i32, i32
  }
  func.func @transform_10(%arg0: i32) -> (i32, i32) {
    %c0_i32 = arith.constant 0 : i32
    %c0_i32_0 = arith.constant 0 : i32
    %c0_i32_1 = arith.constant 0 : i32
    return %c0_i32, %c0_i32_0 : i32, i32
  }
  func.func @transform_11(%arg0: i32) -> (i32, i32) {
    %c0_i32 = arith.constant 0 : i32
    %c0_i32_0 = arith.constant 0 : i32
    %c0_i32_1 = arith.constant 0 : i32
    return %c0_i32, %c0_i32_0 : i32, i32
  }
  func.func @transform_12(%arg0: i32) -> (i32, i32) {
    %c0_i32 = arith.constant 0 : i32
    %c0_i32_0 = arith.constant 0 : i32
    %c0_i32_1 = arith.constant 0 : i32
    return %c0_i32, %c0_i32_0 : i32, i32
  }
  func.func @transform_13(%arg0: i32) -> (i32, i32, i32, i32) {
    %c0_i32 = arith.constant 0 : i32
    %c0_i32_0 = arith.constant 0 : i32
    %c0_i32_1 = arith.constant 0 : i32
    %c0_i32_2 = arith.constant 0 : i32
    return %arg0, %c0_i32, %c0_i32_0, %c0_i32_1 : i32, i32, i32, i32
  }
}

</mosaic_0001>

<bundles_post_ra>
// kernel: fairmot_forward.1
= control target key start
LH: loop header
LB: loop body
LE: loop exit
PB: predicated region body
PF: predicated region fallthrough
CT: control target
= control target key end

     0   :  { %s19935_s25 = smov 0   ;;  %s23924_s0 = inlined_call_operand.vmem [shape: bf16[2,256,32], index: 0, kind: input, shape index: {}]   ;;  %s23925_s1 = inlined_call_operand.vmem [shape: bf16[32,128], index: 1, kind: input, shape index: {}]   ;;  %s23926_s2 = inlined_call_operand.vmem [shape: f32[1,128], index: 2, kind: input, shape index: {}]   ;;  %s23927_s3 = inlined_call_operand.vmem [shape: f32[1,128], index: 3, kind: input, shape index: {}]   ;;  %s23928_s4 = inlined_call_operand.vmem [shape: bf16[1152,128], index: 4, kind: input, shape index: {}]   ;;  %s23929_s5 = inlined_call_operand.vmem [shape: f32[1,128], index: 5, kind: input, shape index: {}]   ;;  %s23930_s6 = inlined_call_operand.vmem [shape: f32[1,128], index: 6, kind: input, shape index: {}]   ;;  %s23931_s7 = inlined_call_operand.vmem [shape: bf16[1152,128], index: 7, kind: input, shape index: {}]   ;;  %s23932_s8 = inlined_call_operand.vmem [shape: f32[1,128], index: 8, kind: input, shape index: {}]   ;;  %s23933_s9 = inlined_call_operand.vmem [shape: f32[1,128], index: 9, kind: input, shape index: {}]   ;;  %s23934_s10 = inlined_call_operand.vmem [shape: bf16[1152,128], index: 10, kind: input, shape index: {}]   ;;  %s23935_s11 = inlined_call_operand.vmem [shape: f32[1,128], index: 11, kind: input, shape index: {}]   ;;  %s23936_s12 = inlined_call_operand.vmem [shape: f32[1,128], index: 12, kind: input, shape index: {}]   ;;  %s23937_s13 = inlined_call_operand.vmem [shape: f32[2,16,16,128], index: 13, kind: output, shape index: {}]  }
   0x1 LB: > { %s14660_s26 = sadd.s32 4294967295, %s19861_s25   ;;  %p14664_p0 = scmp.ge.s32.totalorder %s19861_s25, 1  ;;  %s19861_s25 = sphi %s19935_s25, %s23_s25  }
   0x2   : > { %p387_p1 = scmp.lt.s32.totalorder %s19861_s25, 3 }
   0x4   : > { %p388_p2 = pnand %p14664_p0, %p387_p1 }
   0x6   : > { %391 = sbr.rel (%p388_p2) target bundleno = 2191 (0x88f), region = 72 }
   0xb   : > { %v18730_v0 = vld [vmem:[%s23925_s1 + $0x8] sm:$0xff]   ;;  %p431_p3 = scmp.lt.s32.totalorder %s14660_s26, 1  ;;  %v19949_v1 = vld [vmem:[%s23925_s1] sm:$0xff]   ;;  %v18748_v2 = vld [vmem:[%s23928_s4 + $0x78] sm:$0xff]   ;;  %v19863_v4 = vmov 0.0   ;;  %vm714_vm0 = vcmask 261120  }
   0xc   : > { %18525 = vmatprep.subr.bf16.mxu0 %v18730_v0  ;;  %v19959_v3 = vld [vmem:[%s23928_s4 + $0x38] sm:$0xff]   ;;  %17109 = vmatprep.subr.bf16.mxu1 %v18748_v2  ;;  %450 = vst [vmem:[#allocation2 + $0x40] sm:$0xff] %v19863_v4  ;;  %442 = vst [vmem:[#allocation2] sm:$0xff] %v19863_v4  ;;  %v18750_v5 = vld [vmem:[%s23928_s4 + $0x70] sm:$0xff]   ;;  %v19864_v42 = vmov 0.0|0.0  }
   0xd   : > { %s24227_s26 = smov (!%p431_p3, %s14660_s26), 1  ;;  %18526 = vmatpush3.bf16.msra.mxu0 %v18730_v0  ;;  %443 = vst [vmem:[#allocation2 + $0x8] sm:$0xff] %v19863_v4  ;;  %444 = vst [vmem:[#allocation2 + $0x10] sm:$0xff] %v19863_v4  ;;  %17110 = vmatpush3.bf16.msra.mxu1 %v19959_v3  ;;  %v18751_v13 = vld [vmem:[%s23928_s4 + $0x30] sm:$0xff]   ;;  %v18752_v14 = vld [vmem:[%s23928_s4 + $0x68] sm:$0xff]  }
   0xe   : > { %18527 = vmatprep.subr.bf16.mxu0 %v19949_v1  ;;  %s16225_s18 = sshll.u32 %s24227_s26, 7  ;;  %445 = vst [vmem:[#allocation2 + $0x18] sm:$0xff] %v19863_v4  ;;  %446 = vst [vmem:[#allocation2 + $0x20] sm:$0xff] %v19863_v4  ;;  %17111 = vmatprep.subr.bf16.mxu1 %v18750_v5  ;;  %v18753_v15 = vld [vmem:[%s23928_s4 + $0x28] sm:$0xff]   ;;  %v18754_v25 = vld [vmem:[%s23928_s4 + $0x60] sm:$0xff]   ;;  %s16226_s19 = sshll.u32 %s24227_s26, 8 }
   0xf   : > { %449 = vst [vmem:[#allocation2 + $0x38] sm:$0xff] %v19863_v4  ;;  %453 = vst [vmem:[#allocation2 + $0x58] sm:$0xff] %v19863_v4  ;;  %s20048_s21 = scalar_lea.vmem %s23924_s0, %s16225_s18  ;;  %v18755_v26 = vld [vmem:[%s23928_s4 + $0x20] sm:$0xff]   ;;  %v18756_v27 = vld [vmem:[%s23928_s4 + $0xf8] sm:$0xff]   ;;  %s23438_s22 = scalar_lea.vmem %s23937_s13, %s16226_s19 }
  0x10   : > { %454 = vst [vmem:[#allocation2 + $0x60] sm:$0xff] %v19863_v4  ;;  %457 = vst [vmem:[#allocation2 + $0x78] sm:$0xff] %v19863_v4  ;;  %v18732_v6 = vld [vmem:[%s20048_s21] sm:$0xff]   ;;  %v18733_v7 = vld [vmem:[%s20048_s21 + $0x8] sm:$0xff]  }
  0x11   : > { %458 = vst [vmem:[#allocation2 + $0x80] sm:$0xff] %v19863_v4  ;;  %461 = vst [vmem:[#allocation2 + $0x98] sm:$0xff] %v19863_v4  ;;  %18528 = vmatpush3.bf16.msra.mxu0 %v19949_v1  ;;  %18529 = vmatprep.mubr.msk.bf16.mxu0 %vm714_vm0, %v18732_v6  ;;  %v18734_v8 = vld [vmem:[%s20048_s21 + $0x10] sm:$0xff]   ;;  %v18735_v9 = vld [vmem:[%s20048_s21 + $0x18] sm:$0xff]  }
  0x12   : > { %462 = vst [vmem:[#allocation2 + $0xa0] sm:$0xff] %v19863_v4  ;;  %465 = vst [vmem:[#allocation2 + $0xb8] sm:$0xff] %v19863_v4  ;;  %v18736_v10 = vld [vmem:[%s20048_s21 + $0x20] sm:$0xff]   ;;  %v18737_v11 = vld [vmem:[%s20048_s21 + $0x28] sm:$0xff]   ;;  %17112 = vmatpush3.bf16.msra.mxu1 %v18751_v13  ;;  %17221 = vmatprep.subr.bf16.mxu0 %v18756_v27 }
  0x13   : > { %466 = vst [vmem:[#allocation2 + $0xc0] sm:$0xff] %v19863_v4  ;;  %469 = vst [vmem:[#allocation2 + $0xd8] sm:$0xff] %v19863_v4  ;;  %v18738_v12 = vld [vmem:[%s20048_s21 + $0x30] sm:$0xff]   ;;  %17113 = vmatprep.subr.bf16.mxu1 %v18752_v14  ;;  %v18739_v16 = vld [vmem:[%s20048_s21 + $0x38] sm:$0xff]  }
  0x14   : > { %470 = vst [vmem:[#allocation2 + $0xe0] sm:$0xff] %v19863_v4  ;;  %473 = vst [vmem:[#allocation2 + $0xf8] sm:$0xff] %v19863_v4  ;;  %18530 = vmatmul.mubr.msk.bf16.vlgmr.msra.gmra.mxu0 %vm714_vm0, %v18733_v7  ;;  %v18740_v17 = vld [vmem:[%s20048_s21 + $0x40] sm:$0xff]   ;;  %v18741_v18 = vld [vmem:[%s20048_s21 + $0x48] sm:$0xff]  }
  0x15   : > { %474 = vst [vmem:[#allocation2 + $0x100] sm:$0xff] %v19863_v4  ;;  %477 = vst [vmem:[#allocation2 + $0x118] sm:$0xff] %v19863_v4  ;;  %18533 = vmatprep.mubr.msk.bf16.mxu0 %vm714_vm0, %v18734_v8  ;;  %v18742_v19 = vld [vmem:[%s20048_s21 + $0x50] sm:$0xff]   ;;  %v18743_v20 = vld [vmem:[%s20048_s21 + $0x58] sm:$0xff]  }
  0x16   : > { %478 = vst [vmem:[#allocation2 + $0x120] sm:$0xff] %v19863_v4  ;;  %481 = vst [vmem:[#allocation2 + $0x138] sm:$0xff] %v19863_v4  ;;  %17114 = vmatpush3.bf16.msra.mxu1 %v18753_v15  ;;  %v18744_v21 = vld [vmem:[%s20048_s21 + $0x60] sm:$0xff]   ;;  %v18745_v22 = vld [vmem:[%s20048_s21 + $0x68] sm:$0xff]  }
  0x17   : > { %482 = vst [vmem:[#allocation2 + $0x140] sm:$0xff] %v19863_v4  ;;  %485 = vst [vmem:[#allocation2 + $0x158] sm:$0xff] %v19863_v4  ;;  %v18746_v23 = vld [vmem:[%s20048_s21 + $0x70] sm:$0xff]   ;;  %v18747_v24 = vld [vmem:[%s20048_s21 + $0x78] sm:$0xff]   ;;  %17115 = vmatprep.subr.bf16.mxu1 %v18754_v25 }
  0x18   : > { %486 = vst [vmem:[#allocation2 + $0x160] sm:$0xff] %v19863_v4  ;;  %489 = vst [vmem:[#allocation2 + $0x178] sm:$0xff] %v19863_v4  ;;  %v18757_v28 = vld [vmem:[%s23928_s4 + $0xb8] sm:$0xff]   ;;  %v18760_v31 = vld [vmem:[%s23928_s4 + $0xf0] sm:$0xff]  }
  0x19   : > { %490 = vst [vmem:[#allocation2 + $0x180] sm:$0xff] %v19863_v4  ;;  %493 = vst [vmem:[#allocation2 + $0x198] sm:$0xff] %v19863_v4  ;;  %v18758_v29 = vld [vmem:[%s23928_s4 + $0x58] sm:$0xff]   ;;  %17222 = vmatpush3.bf16.msra.mxu0 %v18757_v28  ;;  %v18761_v32 = vld [vmem:[%s23928_s4 + $0xb0] sm:$0xff]  }
  0x1a   : > { %494 = vst [vmem:[#allocation2 + $0x1a0] sm:$0xff] %v19863_v4  ;;  %497 = vst [vmem:[#allocation2 + $0x1b8] sm:$0xff] %v19863_v4  ;;  %17116 = vmatpush3.bf16.msra.mxu1 %v18755_v26  ;;  %v18759_v30 = vld [vmem:[%s23928_s4 + $0x18] sm:$0xff]   ;;  %17223 = vmatprep.subr.bf16.mxu0 %v18760_v31  ;;  %v18762_v33 = vld [vmem:[%s23928_s4 + $0x50] sm:$0xff]  }
  0x1b   : > { %498 = vst [vmem:[#allocation2 + $0x1c0] sm:$0xff] %v19863_v4  ;;  %501 = vst [vmem:[#allocation2 + $0x1d8] sm:$0xff] %v19863_v4  ;;  %17117 = vmatprep.subr.bf16.mxu1 %v18758_v29  ;;  %v18763_v34 = vld [vmem:[%s23928_s4 + $0x10] sm:$0xff]   ;;  %v18764_v35 = vld [vmem:[%s23928_s4 + $0xe8] sm:$0xff]  }
  0x1c   : > { %502 = vst [vmem:[#allocation2 + $0x1e0] sm:$0xff] %v19863_v4  ;;  %505 = vst [vmem:[#allocation2 + $0x1f8] sm:$0xff] %v19863_v4  ;;  %18534 = vmatmul.mubr.msk.bf16.gmra.mxu0 %vm714_vm0, %v18735_v9  ;;  %v1131_v36 = vld [vmem:[#allocation2 + $0x7] sm:$0xff]  ;;  %v1132_v37 = vld [vmem:[#allocation2 + $0xf] sm:$0xff] }
  0x1d   : > { %506 = vst [vmem:[#allocation2 + $0x200] sm:$0xff] %v19863_v4  ;;  %509 = vst [vmem:[#allocation2 + $0x218] sm:$0xff] %v19863_v4  ;;  %18537 = vmatprep.mubr.msk.bf16.mxu0 %vm714_vm0, %v18736_v10  ;;  %17224 = vmatpush3.bf16.msra.mxu0 %v18761_v32  ;;  %v18765_v38 = vld [vmem:[%s23928_s4 + $0xa8] sm:$0xff]   ;;  %v16227_v39 = vpack.c.bf16 %v1131_v36, %v1131_v36  ;;  %v16228_v40 = vpack.c.bf16 %v1132_v37, %v1132_v37  ;;  %v18768_v44 = vld [vmem:[%s23928_s4 + $0xe0] sm:$0xff]  }
  0x1e   : > { %510 = vst [vmem:[#allocation2 + $0x220] sm:$0xff] %v19863_v4  ;;  %511 = vst [vmem:[#allocation2 + $0x228] sm:$0xff] %v19863_v4  ;;  %17118 = vmatpush3.bf16.msra.mxu1 %v18759_v30  ;;  %17225 = vmatprep.subr.bf16.mxu0 %v18764_v35  ;;  %v18766_v41 = vld [vmem:[%s23928_s4 + $0x48] sm:$0xff]   ;;  %v18769_v45 = vld [vmem:[%s23928_s4 + $0xa0] sm:$0xff]  }
  0x1f   : > { %512 = vst [vmem:[#allocation2 + $0x230] sm:$0xff] %v19863_v4  ;;  %513 = vst [vmem:[#allocation2 + $0x238] sm:$0xff] %v19863_v4  ;;  %17119 = vmatprep.subr.bf16.mxu1 %v18762_v33  ;;  %v18767_v43 = vld [vmem:[%s23928_s4 + $0x8] sm:$0xff]   ;;  %v18770_v46 = vld [vmem:[%s23928_s4 + $0x40] sm:$0xff]  }
  0x20   : > { %514 = vst [vmem:[#allocation3] sm:$0xff] %v19863_v4  ;;  %515 = vst [vmem:[#allocation3 + $0x8] sm:$0xff] %v19863_v4  ;;  %v18771_v47 = vld [vmem:[%s23928_s4] sm:$0xff]   ;;  %v18772_v48 = vld [vmem:[%s23928_s4 + $0xd8] sm:$0xff]  }
  0x21   : > { %516 = vst [vmem:[#allocation3 + $0x10] sm:$0xff] %v19863_v4  ;;  %517 = vst [vmem:[#allocation3 + $0x18] sm:$0xff] %v19863_v4  ;;  %17226 = vmatpush3.bf16.msra.mxu0 %v18765_v38  ;;  %v18775_v50 = vld [vmem:[%s23928_s4 + $0x98] sm:$0xff]   ;;  %v1515_v52 = vld [vmem:[#allocation2 + $0x9] sm:$0xff] }
  0x22   : > { %518 = vst [vmem:[#allocation3 + $0x20] sm:$0xff] %v19863_v4  ;;  %521 = vst [vmem:[#allocation3 + $0x38] sm:$0xff] %v19863_v4  ;;  %17120 = vmatpush3.bf16.msra.mxu1 %v18763_v34  ;;  %17227 = vmatprep.subr.bf16.mxu0 %v18768_v44  ;;  %v16291_v53 = vpack.c.bf16 %v1515_v52, %v1515_v52  ;;  %v18777_v54 = vld [vmem:[%s23928_s4 + $0xd0] sm:$0xff]   ;;  %v18780_v58 = vld [vmem:[%s23928_s4 + $0xc8] sm:$0xff]  }
  0x23   : > { %522 = vst [vmem:[#allocation3 + $0x40] sm:$0xff] %v19863_v4  ;;  %525 = vst [vmem:[#allocation3 + $0x58] sm:$0xff] %v19863_v4  ;;  %17121 = vmatprep.subr.bf16.mxu1 %v18766_v41  ;;  %v18778_v55 = vld [vmem:[%s23928_s4 + $0x90] sm:$0xff]   ;;  %v18782_v59 = vld [vmem:[%s23928_s4 + $0x88] sm:$0xff]  }
  0x24   : > { %526 = vst [vmem:[#allocation3 + $0x60] sm:$0xff] %v19863_v4  ;;  %529 = vst [vmem:[#allocation3 + $0x78] sm:$0xff] %v19863_v4  ;;  %18538 = vmatmul.mubr.msk.bf16.gmra.mxu0 %vm714_vm0, %v18737_v11  ;;  %v1516_v56 = vld [vmem:[#allocation2 + $0x11] sm:$0xff]  ;;  %v18783_v60 = vld [vmem:[%s23928_s4 + $0xc0] sm:$0xff]  }
  0x25   : > { %530 = vst [vmem:[#allocation3 + $0x80] sm:$0xff] %v19863_v4  ;;  %533 = vst [vmem:[#allocation3 + $0x98] sm:$0xff] %v19863_v4  ;;  %18541 = vmatprep.mubr.msk.bf16.mxu0 %vm714_vm0, %v18738_v12  ;;  %17228 = vmatpush3.bf16.msra.mxu0 %v18769_v45  ;;  %v16292_v57 = vpack.c.bf16 %v1516_v56, %v1516_v56  ;;  %v18784_v61 = vld [vmem:[%s23928_s4 + $0x80] sm:$0xff]   ;;  %v18779_v62 = vld [vmem:[%s23928_s4 + $0x178] sm:$0xff]  }
  0x26   : > { %534 = vst [vmem:[#allocation3 + $0xa0] sm:$0xff] %v19863_v4  ;;  %537 = vst [vmem:[#allocation3 + $0xb8] sm:$0xff] %v19863_v4  ;;  %17122 = vmatpush3.bf16.msra.mxu1 %v18767_v43  ;;  %17229 = vmatprep.subr.bf16.mxu0 %v18772_v48  ;;  %v18781_v63 = vld [vmem:[%s23928_s4 + $0x138] sm:$0xff]   ;;  %v18795_v0 = vld [vmem:[%s23928_s4 + $0x170] sm:$0xff]  }
  0x27   : > { %538 = vst [vmem:[#allocation3 + $0xc0] sm:$0xff] %v19863_v4  ;;  %541 = vst [vmem:[#allocation3 + $0xd8] sm:$0xff] %v19863_v4  ;;  %17123 = vmatprep.subr.bf16.mxu1 %v18770_v46  ;;  %v18798_v1 = vld [vmem:[%s23928_s4 + $0x130] sm:$0xff]   ;;  %v18809_v2 = vld [vmem:[%s23928_s4 + $0x168] sm:$0xff]  }
  0x28   : > { %542 = vst [vmem:[#allocation3 + $0xe0] sm:$0xff] %v19863_v4  ;;  %545 = vst [vmem:[#allocation3 + $0xf8] sm:$0xff] %v19863_v4  ;;  %v18812_v3 = vld [vmem:[%s23928_s4 + $0x128] sm:$0xff]   ;;  %v18826_v5 = vld [vmem:[%s23928_s4 + $0x120] sm:$0xff]  }
  0x29   : > { %546 = vst [vmem:[#allocation3 + $0x100] sm:$0xff] %v19863_v4  ;;  %549 = vst [vmem:[#allocation3 + $0x118] sm:$0xff] %v19863_v4  ;;  %17230 = vmatpush3.bf16.msra.mxu0 %v18775_v50  ;;  %v18837_v6 = vld [vmem:[%s23928_s4 + $0x158] sm:$0xff]   ;;  %v18851_v8 = vld [vmem:[%s23928_s4 + $0x150] sm:$0xff]  }
  0x2a   : > { %550 = vst [vmem:[#allocation3 + $0x120] sm:$0xff] %v19863_v4  ;;  %553 = vst [vmem:[#allocation3 + $0x138] sm:$0xff] %v19863_v4  ;;  %17124 = vmatpush3.bf16.msra.mxu1 %v18771_v47  ;;  %17231 = vmatprep.subr.bf16.mxu0 %v18777_v54  ;;  %v18840_v7 = vld [vmem:[%s23928_s4 + $0x118] sm:$0xff]   ;;  %v18854_v9 = vld [vmem:[%s23928_s4 + $0x110] sm:$0xff]  }
  0x2b   : > { %554 = vst [vmem:[#allocation3 + $0x140] sm:$0xff] %v19863_v4  ;;  %557 = vst [vmem:[#allocation3 + $0x158] sm:$0xff] %v19863_v4  ;;  %17333 = vmatprep.subr.bf16.mxu1 %v18779_v62  ;;  %v18865_v10 = vld [vmem:[%s23928_s4 + $0x148] sm:$0xff]   ;;  %v20219_v12 = vld [vmem:[%s23926_s2] ss:$0 sm:$0xff] }
  0x2c   : > { %558 = vst [vmem:[#allocation3 + $0x160] sm:$0xff] %v19863_v4  ;;  %561 = vst [vmem:[#allocation3 + $0x178] sm:$0xff] %v19863_v4  ;;  %18542 = vmatmul.mubr.msk.bf16.gmra.mxu0 %vm714_vm0, %v18739_v16  ;;  %v18868_v11 = vld [vmem:[%s23928_s4 + $0x108] sm:$0xff]   ;;  %v20224_v14 = vld [vmem:[%s23927_s3] ss:$0 sm:$0xff] }
  0x2d   : > { %562 = vst [vmem:[#allocation3 + $0x180] sm:$0xff] %v19863_v4  ;;  %565 = vst [vmem:[#allocation3 + $0x198] sm:$0xff] %v19863_v4  ;;  %18545 = vmatprep.mubr.msk.bf16.mxu0 %vm714_vm0, %v18740_v17  ;;  %17232 = vmatpush3.bf16.msra.mxu0 %v18778_v55  ;;  %v18883_v25 = vld [vmem:[%s23928_s4 + $0x140] sm:$0xff]  }
  0x2e   : > { %566 = vst [vmem:[#allocation3 + $0x1a0] sm:$0xff] %v19863_v4  ;;  %569 = vst [vmem:[#allocation3 + $0x1b8] sm:$0xff] %v19863_v4  ;;  %17233 = vmatprep.subr.bf16.mxu0 %v18780_v58  ;;  %v18886_v44 = vld [vmem:[%s23928_s4 + $0x100] sm:$0xff]  }
  0x2f   : > { %570 = vst [vmem:[#allocation3 + $0x1c0] sm:$0xff] %v19863_v4  ;;  %573 = vst [vmem:[#allocation3 + $0x1d8] sm:$0xff] %v19863_v4 }
  0x30   : > { %574 = vst [vmem:[#allocation3 + $0x1e0] sm:$0xff] %v19863_v4  ;;  %577 = vst [vmem:[#allocation3 + $0x1f8] sm:$0xff] %v19863_v4 }
  0x31   : > { %578 = vst [vmem:[#allocation3 + $0x200] sm:$0xff] %v19863_v4  ;;  %581 = vst [vmem:[#allocation3 + $0x218] sm:$0xff] %v19863_v4  ;;  %17234 = vmatpush3.bf16.msra.mxu0 %v18782_v59 }
  0x32   : > { %582 = vst [vmem:[#allocation3 + $0x220] sm:$0xff] %v19863_v4  ;;  %583 = vst [vmem:[#allocation3 + $0x228] sm:$0xff] %v19863_v4  ;;  %17235 = vmatprep.subr.bf16.mxu0 %v18783_v60 }
  0x33   : > { %584 = vst [vmem:[#allocation3 + $0x230] sm:$0xff] %v19863_v4  ;;  %585 = vst [vmem:[#allocation3 + $0x238] sm:$0xff] %v19863_v4  ;;  %v18823_v4 = vld [vmem:[%s23928_s4 + $0x160] sm:$0xff]  }
  0x34   : > { %18546 = vmatmul.mubr.msk.bf16.gmra.mxu0 %vm714_vm0, %v18741_v18  ;;  %1291 = vst [vmem:[#allocation4] sm:$0xf] %v16227_v39  ;;  %1292 = vst [vmem:[#allocation4 + $0x24] sm:$0xf] %v16228_v40 }
  0x35   : > { %18549 = vmatprep.mubr.msk.bf16.mxu0 %vm714_vm0, %v18742_v19  ;;  %1483 = vst [vmem:[#allocation4 + $0x4] sm:$0xf] %v19864_v42  ;;  %1484 = vst [vmem:[#allocation4 + $0x28] sm:$0xf] %v19864_v42  ;;  %17236 = vmatpush3.bf16.msra.mxu0 %v18784_v61 }
  0x36   : > { %1675 = vst [vmem:[#allocation4 + $0x8] sm:$0xf] %v16291_v53  ;;  %1676 = vst [vmem:[#allocation4 + $0x2c] sm:$0xf] %v16292_v57 }
  0x3b   : > { %v18776_v51 = vld [vmem:[#allocation4] ss:$36 sps:$4 sm:$0xff]  }
  0x3c   : > { %18550 = vmatmul.mubr.msk.bf16.gmra.mxu0 %vm714_vm0, %v18743_v20  ;;  %v18773_v49 = vld [vmem:[#allocation4 + $0x4] ss:$36 sps:$4 sm:$0xff]   ;;  %v18875_v20 = vld [vmem:[%s23928_s4 + $0x1f8] sm:$0xff]  }
  0x3d   : > { %18553 = vmatprep.mubr.msk.bf16.mxu0 %vm714_vm0, %v18744_v21  ;;  %4364 = vmatprep.mubr.bf16.mxu1 %v18773_v49 }
  0x3e   : > { %4365 = vmatmul.mubr.bf16.vlgmr.msra.gmra.mxu1 %v18776_v51  ;;  %17445 = vmatprep.subr.bf16.mxu0 %v18875_v20 }
  0x3f   : > { %17334 = vmatpush3.bf16.msra.mxu1 %v18781_v63 }
  0x40   : > { %17335 = vmatprep.subr.bf16.mxu1 %v18795_v0 }
  0x43   : > { %17336 = vmatpush3.bf16.msra.mxu1 %v18798_v1 }
  0x44   : > { %18554 = vmatmul.mubr.msk.bf16.gmra.mxu0 %vm714_vm0, %v18745_v22  ;;  %17337 = vmatprep.subr.bf16.mxu1 %v18809_v2 }
  0x45   : > { %18557 = vmatprep.mubr.msk.bf16.mxu0 %vm714_vm0, %v18746_v23 }
  0x47   : > { %17338 = vmatpush3.bf16.msra.mxu1 %v18812_v3 }
  0x48   : > { %17339 = vmatprep.subr.bf16.mxu1 %v18823_v4 }
  0x4b   : > { %17340 = vmatpush3.bf16.msra.mxu1 %v18826_v5 }
  0x4c   : > { %18558 = vmatmul.mubr.msk.bf16.gmra.mxu0 %vm714_vm0, %v18747_v24  ;;  %17341 = vmatprep.subr.bf16.mxu1 %v18837_v6 }
  0x4f   : > { %17342 = vmatpush3.bf16.msra.mxu1 %v18840_v7 }
  0x50   : > { %17343 = vmatprep.subr.bf16.mxu1 %v18851_v8 }
  0x53   : > { %17344 = vmatpush3.bf16.msra.mxu1 %v18854_v9 }
  0x54   : > { %17345 = vmatprep.subr.bf16.mxu1 %v18865_v10 }
  0x57   : > { %17346 = vmatpush3.bf16.msra.mxu1 %v18868_v11 }
  0x58   : > { %17347 = vmatprep.subr.bf16.mxu1 %v18883_v25 }
  0x5b   : > { %17348 = vmatpush3.bf16.msra.mxu1 %v18886_v44 }
  0xd4   : > { %v18531_v13 = vpop.f32.mrf.mxu0 }
  0xd5   : > { %v933_v15 = vmul.f32 %v18531_v13, %v20219_v12 }
  0xd6   : > { %v797_v16 = vpop.f32.mrf.mxu0 }
  0xd7   : > { %v972_v17 = vadd.f32 %v20224_v14, %v933_v15  ;;  %v931_v18 = vmul.f32 %v20219_v12, %v797_v16 }
  0xd8   : > { %v18532_v19 = vpop.f32.mrf.mxu0 }
  0xd9   : > { %vm1004_vm1 = vcmp.gt.f32.partialorder %v972_v17, 0.0  ;;  %v1036_v21 = vmul.f32 0.01, %v972_v17  ;;  %v970_v22 = vadd.f32 %v20224_v14, %v931_v18  ;;  %v934_v23 = vmul.f32 %v18532_v19, %v20219_v12 }
  0xda   : > { %v800_v24 = vpop.f32.mrf.mxu0 }
  0xdb   : > { %v1068_v26 = vsel %vm1004_vm1, %v972_v17, %v1036_v21  ;;  %vm1002_vm2 = vcmp.gt.f32.partialorder %v970_v22, 0.0  ;;  %v1034_v27 = vmul.f32 0.01, %v970_v22  ;;  %v973_v28 = vadd.f32 %v20224_v14, %v934_v23 }
  0xdc   : > { %1101 = vst [vmem:[#allocation2 + $0x48] sm:$0xff] %v1068_v26  ;;  %v16263_v29 = vpack.c.bf16 %v1068_v26, %v1068_v26  ;;  %v932_v30 = vmul.f32 %v20219_v12, %v800_v24  ;;  %v18535_v31 = vpop.f32.mrf.mxu0 }
  0xdd   : > { %v1066_v32 = vsel %vm1002_vm2, %v970_v22, %v1034_v27  ;;  %vm1005_vm3 = vcmp.gt.f32.partialorder %v973_v28, 0.0  ;;  %v1037_v33 = vmul.f32 0.01, %v973_v28  ;;  %v937_v34 = vmul.f32 %v18535_v31, %v20219_v12 }
  0xde   : > { %1487 = vst [vmem:[#allocation4 + $0x94] sm:$0xf] %v16263_v29  ;;  %2061 = vst [vmem:[#allocation4 + $0x58] sm:$0xf] %v16263_v29  ;;  %v16261_v35 = vpack.c.bf16 %v1066_v32, %v1066_v32  ;;  %v971_v36 = vadd.f32 %v20224_v14, %v932_v30  ;;  %v813_v37 = vpop.f32.mrf.mxu0 }
  0xdf   : > { %2636 = vst [vmem:[#allocation4 + $0x1c] sm:$0xf] %v16263_v29  ;;  %1099 = vst [vmem:[#allocation2 + $0x28] sm:$0xff] %v1066_v32  ;;  %v1069_v38 = vsel %vm1005_vm3, %v973_v28, %v1037_v33  ;;  %v976_v39 = vadd.f32 %v20224_v14, %v937_v34  ;;  %v935_v40 = vmul.f32 %v20219_v12, %v813_v37  ;;  %v18905_v29 = vld [vmem:[%s23928_s4 + $0x238] sm:$0xff]  }
  0xe0   : > { %1485 = vst [vmem:[#allocation4 + $0x4c] sm:$0xf] %v16261_v35  ;;  %2059 = vst [vmem:[#allocation4 + $0x10] sm:$0xf] %v16261_v35  ;;  %v16264_v41 = vpack.c.bf16 %v1069_v38, %v1069_v38  ;;  %vm1003_vm4 = vcmp.gt.f32.partialorder %v971_v36, 0.0  ;;  %v18536_v43 = vpop.f32.mrf.mxu0  ;;  %18561 = vmatprep.subr.bf16.mxu1 %v18905_v29 }
  0xe1   : > { %1102 = vst [vmem:[#allocation2 + $0x50] sm:$0xff] %v1069_v38  ;;  %v1035_v42 = vmul.f32 0.01, %v971_v36  ;;  %vm1008_vm5 = vcmp.gt.f32.partialorder %v976_v39, 0.0  ;;  %v1040_v45 = vmul.f32 0.01, %v976_v39  ;;  %v974_v46 = vadd.f32 %v20224_v14, %v935_v40 }
  0xe2   : > { %v938_v47 = vmul.f32 %v18536_v43, %v20219_v12  ;;  %1488 = vst [vmem:[#allocation4 + $0xb8] sm:$0xf] %v16264_v41  ;;  %2062 = vst [vmem:[#allocation4 + $0x7c] sm:$0xf] %v16264_v41  ;;  %v816_v49 = vpop.f32.mrf.mxu0 }
  0xe3   : > { %2637 = vst [vmem:[#allocation4 + $0x40] sm:$0xf] %v16264_v41  ;;  %v1067_v48 = vsel %vm1003_vm4, %v971_v36, %v1035_v42  ;;  %v1135_v50 = vld [vmem:[#allocation2 + $0x47] sm:$0xff]  ;;  %v1072_v52 = vsel %vm1008_vm5, %v976_v39, %v1040_v45  ;;  %vm1006_vm6 = vcmp.gt.f32.partialorder %v974_v46, 0.0  ;;  %v1038_v53 = vmul.f32 0.01, %v974_v46 }
  0xe4   : > { %1100 = vst [vmem:[#allocation2 + $0x30] sm:$0xff] %v1067_v48  ;;  %v16262_v51 = vpack.c.bf16 %v1067_v48, %v1067_v48  ;;  %v16231_v54 = vpack.c.bf16 %v1135_v50, %v1135_v50  ;;  %1105 = vst [vmem:[#allocation2 + $0x88] sm:$0xff] %v1072_v52  ;;  %v16267_v55 = vpack.c.bf16 %v1072_v52, %v1072_v52  ;;  %v18539_v58 = vpop.f32.mrf.mxu0 }
  0xe5   : > { %v977_v56 = vadd.f32 %v20224_v14, %v938_v47  ;;  %v936_v57 = vmul.f32 %v20219_v12, %v816_v49  ;;  %v1070_v60 = vsel %vm1006_vm6, %v974_v46, %v1038_v53  ;;  %v941_v61 = vmul.f32 %v18539_v58, %v20219_v12 }
  0xe6   : > { %v1133_v59 = vld [vmem:[#allocation2 + $0x27] sm:$0xff]  ;;  %1486 = vst [vmem:[#allocation4 + $0x70] sm:$0xf] %v16262_v51  ;;  %2060 = vst [vmem:[#allocation4 + $0x34] sm:$0xf] %v16262_v51  ;;  %v16265_v63 = vpack.c.bf16 %v1070_v60, %v1070_v60  ;;  %v829_v1 = vpop.f32.mrf.mxu0 }
  0xe7   : > { %1295 = vst [vmem:[#allocation4 + $0x90] sm:$0xf] %v16231_v54  ;;  %1869 = vst [vmem:[#allocation4 + $0x54] sm:$0xf] %v16231_v54  ;;  %v16229_v62 = vpack.c.bf16 %v1133_v59, %v1133_v59  ;;  %vm1009_vm7 = vcmp.gt.f32.partialorder %v977_v56, 0.0  ;;  %v975_v5 = vadd.f32 %v20224_v14, %v936_v57  ;;  %v980_v6 = vadd.f32 %v20224_v14, %v941_v61 }
  0xe8   : > { %2444 = vst [vmem:[#allocation4 + $0x18] sm:$0xf] %v16231_v54  ;;  %1491 = vst [vmem:[#allocation4 + $0x124] sm:$0xf] %v16267_v55  ;;  %v1041_v0 = vmul.f32 0.01, %v977_v56  ;;  %v939_v7 = vmul.f32 %v20219_v12, %v829_v1  ;;  %v18540_v13 = vpop.f32.mrf.mxu0 }
  0xe9   : > { %2065 = vst [vmem:[#allocation4 + $0xe8] sm:$0xf] %v16267_v55  ;;  %2640 = vst [vmem:[#allocation4 + $0xac] sm:$0xf] %v16267_v55  ;;  %v1136_v2 = vld [vmem:[#allocation2 + $0x4f] sm:$0xff]  ;;  %vm1007_vm8 = vcmp.gt.f32.partialorder %v975_v5, 0.0  ;;  %v942_v22 = vmul.f32 %v18540_v13, %v20219_v12 }
  0xea   : > { %1103 = vst [vmem:[#allocation2 + $0x68] sm:$0xff] %v1070_v60  ;;  %v1519_v3 = vld [vmem:[#allocation2 + $0x49] sm:$0xff]  ;;  %v1520_v4 = vld [vmem:[#allocation2 + $0x51] sm:$0xff]  ;;  %1293 = vst [vmem:[#allocation4 + $0x48] sm:$0xf] %v16229_v62  ;;  %v16232_v8 = vpack.c.bf16 %v1136_v2, %v1136_v2  ;;  %v1073_v11 = vsel %vm1009_vm7, %v977_v56, %v1041_v0  ;;  %vm1012_vm9 = vcmp.gt.f32.partialorder %v980_v6, 0.0  ;;  %v978_v21 = vadd.f32 %v20224_v14, %v939_v7  ;;  %v832_v23 = vpop.f32.mrf.mxu0 }
  0xeb   : > { %1867 = vst [vmem:[#allocation4 + $0xc] sm:$0xf] %v16229_v62  ;;  %v16295_v9 = vpack.c.bf16 %v1519_v3, %v1519_v3  ;;  %v16296_v10 = vpack.c.bf16 %v1520_v4, %v1520_v4  ;;  %1489 = vst [vmem:[#allocation4 + $0xdc] sm:$0xf] %v16265_v63  ;;  %v16268_v15 = vpack.c.bf16 %v1073_v11, %v1073_v11  ;;  %v1039_v16 = vmul.f32 0.01, %v975_v5 }
  0xec   : > { %2063 = vst [vmem:[#allocation4 + $0xa0] sm:$0xf] %v16265_v63  ;;  %2638 = vst [vmem:[#allocation4 + $0x64] sm:$0xf] %v16265_v63  ;;  %v1134_v17 = vld [vmem:[#allocation2 + $0x2f] sm:$0xff]  ;;  %v1139_v27 = vld [vmem:[#allocation2 + $0x87] sm:$0xff]  ;;  %v18543_v34 = vpop.f32.mrf.mxu0  ;;  %v981_v38 = vadd.f32 %v20224_v14, %v942_v22  ;;  %v940_v39 = vmul.f32 %v20219_v12, %v832_v23 }
  0xed   : > { %1106 = vst [vmem:[#allocation2 + $0x90] sm:$0xff] %v1073_v11  ;;  %1296 = vst [vmem:[#allocation4 + $0xb4] sm:$0xf] %v16232_v8  ;;  %v1517_v18 = vld [vmem:[#allocation2 + $0x29] sm:$0xff]  ;;  %v1518_v19 = vld [vmem:[#allocation2 + $0x31] sm:$0xff]  ;;  %v16230_v24 = vpack.c.bf16 %v1134_v17, %v1134_v17  ;;  %v1071_v28 = vsel %vm1007_vm8, %v975_v5, %v1039_v16  ;;  %v16235_v31 = vpack.c.bf16 %v1139_v27, %v1139_v27  ;;  %vm1010_vm10 = vcmp.gt.f32.partialorder %v978_v21, 0.0 }
  0xee   : > { %1679 = vst [vmem:[#allocation4 + $0x98] sm:$0xf] %v16295_v9  ;;  %1680 = vst [vmem:[#allocation4 + $0xbc] sm:$0xf] %v16296_v10  ;;  %v1044_v20 = vmul.f32 0.01, %v980_v6  ;;  %v16293_v25 = vpack.c.bf16 %v1517_v18, %v1517_v18  ;;  %v16294_v26 = vpack.c.bf16 %v1518_v19, %v1518_v19  ;;  %v16266_v32 = vpack.c.bf16 %v1071_v28, %v1071_v28  ;;  %v845_v42 = vpop.f32.mrf.mxu0 }
  0xef   : > { %1870 = vst [vmem:[#allocation4 + $0x78] sm:$0xf] %v16232_v8  ;;  %2253 = vst [vmem:[#allocation4 + $0x5c] sm:$0xf] %v16295_v9  ;;  %v2669_v30 = vld [vmem:[#allocation2 + $0x51] sm:$0xff]  ;;  %v945_v41 = vmul.f32 %v18543_v34, %v20219_v12  ;;  %vm1013_vm11 = vcmp.gt.f32.partialorder %v981_v38, 0.0  ;;  %v979_v46 = vadd.f32 %v20224_v14, %v940_v39  ;;  %v943_v52 = vmul.f32 %v20219_v12, %v845_v42 }
  0xf0   : > { %2254 = vst [vmem:[#allocation4 + $0x80] sm:$0xf] %v16296_v10  ;;  %2445 = vst [vmem:[#allocation4 + $0x3c] sm:$0xf] %v16232_v8  ;;  %v1076_v33 = vsel %vm1012_vm9, %v980_v6, %v1044_v20  ;;  %v1042_v37 = vmul.f32 0.01, %v978_v21  ;;  %v16484_v43 = vpack.c.bf16 %v2669_v30, %v2669_v30  ;;  %v18544_v53 = vpop.f32.mrf.mxu0 }
  0xf1   : > { %1492 = vst [vmem:[#allocation4 + $0x148] sm:$0xf] %v16268_v15  ;;  %2066 = vst [vmem:[#allocation4 + $0x10c] sm:$0xf] %v16268_v15  ;;  %v1137_v35 = vld [vmem:[#allocation2 + $0x67] sm:$0xff]  ;;  %v16271_v36 = vpack.c.bf16 %v1076_v33, %v1076_v33  ;;  %v984_v51 = vadd.f32 %v20224_v14, %v945_v41  ;;  %vm1011_vm12 = vcmp.gt.f32.partialorder %v979_v46, 0.0  ;;  %v982_v1 = vadd.f32 %v20224_v14, %v943_v52 }
  0xf2   : > { %2641 = vst [vmem:[#allocation4 + $0xd0] sm:$0xf] %v16268_v15  ;;  %1104 = vst [vmem:[#allocation2 + $0x70] sm:$0xff] %v1071_v28  ;;  %v16233_v40 = vpack.c.bf16 %v1137_v35, %v1137_v35  ;;  %v1074_v44 = vsel %vm1010_vm10, %v978_v21, %v1042_v37  ;;  %v1045_v45 = vmul.f32 0.01, %v981_v38  ;;  %v848_v60 = vpop.f32.mrf.mxu0  ;;  %v946_v2 = vmul.f32 %v18544_v53, %v20219_v12  ;;  %v20280_v4 = vld [vmem:[%s23928_s4 + $0x1b8] sm:$0xff]  }
  0xf3   : > { %2828 = vst [vmem:[#allocation4 + $0x20] sm:$0xf] %v16295_v9  ;;  %1294 = vst [vmem:[#allocation4 + $0x6c] sm:$0xf] %v16230_v24  ;;  %v16269_v50 = vpack.c.bf16 %v1074_v44, %v1074_v44  ;;  %v1043_v59 = vmul.f32 0.01, %v979_v46  ;;  %v944_v3 = vmul.f32 %v20219_v12, %v848_v60 }
  0xf4   : > { %1677 = vst [vmem:[#allocation4 + $0x50] sm:$0xf] %v16293_v25  ;;  %1678 = vst [vmem:[#allocation4 + $0x74] sm:$0xf] %v16294_v26  ;;  %v1140_v47 = vld [vmem:[#allocation2 + $0x8f] sm:$0xff]  ;;  %v1077_v57 = vsel %vm1013_vm11, %v981_v38, %v1045_v45  ;;  %vm1016_vm13 = vcmp.gt.f32.partialorder %v984_v51, 0.0  ;;  %v18547_v13 = vpop.f32.mrf.mxu0  ;;  %v985_v23 = vadd.f32 %v20224_v14, %v946_v2 }
  0xf5   : > { %1868 = vst [vmem:[#allocation4 + $0x30] sm:$0xf] %v16230_v24  ;;  %2251 = vst [vmem:[#allocation4 + $0x14] sm:$0xf] %v16293_v25  ;;  %v1523_v48 = vld [vmem:[#allocation2 + $0x89] sm:$0xff]  ;;  %v1524_v49 = vld [vmem:[#allocation2 + $0x91] sm:$0xff]  ;;  %v16236_v54 = vpack.c.bf16 %v1140_v47, %v1140_v47  ;;  %v16272_v58 = vpack.c.bf16 %v1077_v57, %v1077_v57  ;;  %v1075_v9 = vsel %vm1011_vm12, %v979_v46, %v1043_v59 }
  0xf6   : > { %2252 = vst [vmem:[#allocation4 + $0x38] sm:$0xf] %v16294_v26  ;;  %1109 = vst [vmem:[#allocation2 + $0xc8] sm:$0xff] %v1076_v33  ;;  %v20269_v55 = vpack.c.bf16 %v1523_v48, %v1523_v48  ;;  %v16300_v56 = vpack.c.bf16 %v1524_v49, %v1524_v49  ;;  %v1048_v0 = vmul.f32 0.01, %v984_v51  ;;  %v20286_v15 = vld [vmem:[%s23928_s4 + $0x1f0] sm:$0xff]   ;;  %v16270_v17 = vpack.c.bf16 %v1075_v9, %v1075_v9  ;;  %v861_v26 = vpop.f32.mrf.mxu0 }
  0xf7   : > { %1299 = vst [vmem:[#allocation4 + $0x120] sm:$0xf] %v16235_v31  ;;  %1873 = vst [vmem:[#allocation4 + $0xe4] sm:$0xf] %v16235_v31  ;;  %v18785_v10 = vld [vmem:[#allocation4 + $0x4c] ss:$36 sps:$4 sm:$0xff]   ;;  %v983_v24 = vadd.f32 %v20224_v14, %v944_v3  ;;  %v949_v29 = vmul.f32 %v18547_v13, %v20219_v12  ;;  %v947_v30 = vmul.f32 %v20219_v12, %v861_v26 }
  0xf8   : > { %2448 = vst [vmem:[#allocation4 + $0xa8] sm:$0xf] %v16235_v31  ;;  %1490 = vst [vmem:[#allocation4 + $0x100] sm:$0xf] %v16266_v32  ;;  %v18791_v11 = vld [vmem:[#allocation4 + $0x94] ss:$36 sps:$4 sm:$0xff]   ;;  %v1080_v18 = vsel %vm1016_vm13, %v984_v51, %v1048_v0  ;;  %4372 = vmatprep.mubr.bf16.mxu1 %v18785_v10  ;;  %v18548_v35 = vpop.f32.mrf.mxu0 }
  0xf9   : > { %2064 = vst [vmem:[#allocation4 + $0xc4] sm:$0xf] %v16266_v32  ;;  %2639 = vst [vmem:[#allocation4 + $0x88] sm:$0xf] %v16266_v32  ;;  %v1138_v61 = vld [vmem:[#allocation2 + $0x6f] sm:$0xff]  ;;  %vm1014_vm14 = vcmp.gt.f32.partialorder %v982_v1, 0.0  ;;  %v16275_v21 = vpack.c.bf16 %v1080_v18, %v1080_v18  ;;  %v988_v41 = vadd.f32 %v20224_v14, %v949_v29 }
  0xfa   : > { %1495 = vst [vmem:[#allocation4 + $0x1b4] sm:$0xf] %v16271_v36  ;;  %2069 = vst [vmem:[#allocation4 + $0x178] sm:$0xf] %v16271_v36  ;;  %v1521_v62 = vld [vmem:[#allocation2 + $0x69] sm:$0xff]  ;;  %v1522_v63 = vld [vmem:[#allocation2 + $0x71] sm:$0xff]  ;;  %v16234_v5 = vpack.c.bf16 %v1138_v61, %v1138_v61  ;;  %v864_v46 = vpop.f32.mrf.mxu0 }
  0xfb   : > { %2644 = vst [vmem:[#allocation4 + $0x13c] sm:$0xf] %v16271_v36  ;;  %1297 = vst [vmem:[#allocation4 + $0xd8] sm:$0xf] %v16233_v40  ;;  %v16297_v6 = vpack.c.bf16 %v1521_v62, %v1521_v62  ;;  %v16298_v7 = vpack.c.bf16 %v1522_v63, %v1522_v63  ;;  %v18789_v20 = vld [vmem:[#allocation4 + $0x48] ss:$36 sps:$4 sm:$0xff]   ;;  %v948_v59 = vmul.f32 %v20219_v12, %v864_v46 }
  0xfc   : > { %1871 = vst [vmem:[#allocation4 + $0x9c] sm:$0xf] %v16233_v40  ;;  %2446 = vst [vmem:[#allocation4 + $0x60] sm:$0xf] %v16233_v40  ;;  %v18787_v19 = vld [vmem:[#allocation4 + $0xc] ss:$36 sps:$4 sm:$0xff]   ;;  %4373 = vmatmul.mubr.bf16.gmra.mxu1 %v18789_v20  ;;  %v18551_v60 = vpop.f32.mrf.mxu0 }
  0xfd   : > { %1107 = vst [vmem:[#allocation2 + $0xa8] sm:$0xff] %v1074_v44  ;;  %2829 = vst [vmem:[#allocation4 + $0x44] sm:$0xf] %v16484_v43  ;;  %v1143_v8 = vld [vmem:[#allocation2 + $0xc7] sm:$0xff]  ;;  %v1046_v22 = vmul.f32 0.01, %v982_v1  ;;  %4525 = vmatprep.mubr.bf16.mxu0 %v18787_v19  ;;  %4380 = vmatprep.mubr.bf16.mxu1 %v18791_v11  ;;  %v20327_v11 = vadd.f32 %v20224_v14, %v948_v59  ;;  %v953_v13 = vmul.f32 %v18551_v60, %v20219_v12 }
  0xfe   : > { %1493 = vst [vmem:[#allocation4 + $0x16c] sm:$0xf] %v16269_v50  ;;  %2067 = vst [vmem:[#allocation4 + $0x130] sm:$0xf] %v16269_v50  ;;  %v16239_v16 = vpack.c.bf16 %v1143_v8, %v1143_v8  ;;  %v18790_v25 = vld [vmem:[#allocation4 + $0x8] ss:$36 sps:$4 sm:$0xff]   ;;  %v877_v8 = vpop.f32.mrf.mxu0 }
  0xff   : > { %2642 = vst [vmem:[#allocation4 + $0xf4] sm:$0xf] %v16269_v50  ;;  %1110 = vst [vmem:[#allocation2 + $0xd0] sm:$0xff] %v1077_v57  ;;  %v18793_v28 = vld [vmem:[#allocation4 + $0x54] ss:$36 sps:$4 sm:$0xff]   ;;  %v1078_v33 = vsel %vm1014_vm14, %v982_v1, %v1046_v22  ;;  %vm1017_vm15 = vcmp.gt.f32.partialorder %v985_v23, 0.0  ;;  %4526 = vmatmul.mubr.bf16.vlgmr.msra.gmra.mxu0 %v18790_v25  ;;  %v986_v57 = vadd.f32 %v20224_v14, %v947_v30 }
 0x100   : > { %1300 = vst [vmem:[#allocation4 + $0x144] sm:$0xf] %v16236_v54  ;;  %1683 = vst [vmem:[#allocation4 + $0x128] sm:$0xf] %v20269_v55  ;;  %v20296_v31 = vld [vmem:[%s23928_s4 + $0x1b0] sm:$0xff]   ;;  %v16273_v39 = vpack.c.bf16 %v1078_v33, %v1078_v33  ;;  %vm1015_vm0 = vcmp.gt.f32.partialorder %v983_v24, 0.0  ;;  %4533 = vmatprep.mubr.bf16.mxu0 %v18793_v28  ;;  %17446 = vmatpush3.bf16.msra.mxu0 %v20280_v4  ;;  %v992_v28 = vadd.f32 %v20224_v14, %v953_v13 }
 0x101   : > { %1684 = vst [vmem:[#allocation4 + $0x14c] sm:$0xf] %v16300_v56  ;;  %1874 = vst [vmem:[#allocation4 + $0x108] sm:$0xf] %v16236_v54  ;;  %v1049_v34 = vmul.f32 0.01, %v985_v23  ;;  %17447 = vmatprep.subr.bf16.mxu0 %v20286_v15  ;;  %v951_v15 = vmul.f32 %v20219_v12, %v877_v8 }
 0x102   : > { %2257 = vst [vmem:[#allocation4 + $0xec] sm:$0xf] %v20269_v55  ;;  %2258 = vst [vmem:[#allocation4 + $0x110] sm:$0xf] %v16300_v56  ;;  %v1047_v40 = vmul.f32 0.01, %v983_v24 }
 0x103   : > { %2449 = vst [vmem:[#allocation4 + $0xcc] sm:$0xf] %v16236_v54  ;;  %1496 = vst [vmem:[#allocation4 + $0x1d8] sm:$0xf] %v16272_v58  ;;  %v1081_v45 = vsel %vm1017_vm15, %v985_v23, %v1049_v34  ;;  %v18887_v47 = vld [vmem:[%s23928_s4 + $0x1e8] sm:$0xff]   ;;  %vm1020_vm1 = vcmp.gt.f32.partialorder %v988_v41, 0.0  ;;  %v20347_v29 = vadd.f32 %v20224_v14, %v951_v15 }
 0x104   : > { %2070 = vst [vmem:[#allocation4 + $0x19c] sm:$0xf] %v16272_v58  ;;  %2645 = vst [vmem:[#allocation4 + $0x160] sm:$0xf] %v16272_v58  ;;  %v1141_v27 = vld [vmem:[#allocation2 + $0xa7] sm:$0xff]  ;;  %v16276_v48 = vpack.c.bf16 %v1081_v45, %v1081_v45  ;;  %v1079_v49 = vsel %vm1015_vm0, %v983_v24, %v1047_v40  ;;  %v950_v58 = vmul.f32 %v18548_v35, %v20219_v12  ;;  %17448 = vmatpush3.bf16.msra.mxu0 %v20296_v31  ;;  %v20341_v23 = vld [vmem:[%s23928_s4 + $0x1d8] sm:$0xff]  }
 0x105   : > { %1108 = vst [vmem:[#allocation2 + $0xb0] sm:$0xff] %v1075_v9  ;;  %1298 = vst [vmem:[#allocation4 + $0xfc] sm:$0xf] %v16234_v5  ;;  %v16237_v32 = vpack.c.bf16 %v1141_v27, %v1141_v27  ;;  %v1052_v50 = vmul.f32 0.01, %v988_v41  ;;  %v20313_v52 = vld [vmem:[%s23928_s4 + $0x1a8] sm:$0xff]   ;;  %v16274_v56 = vpack.c.bf16 %v1079_v49, %v1079_v49  ;;  %17449 = vmatprep.subr.bf16.mxu0 %v18887_v47 }
 0x106   : > { %1681 = vst [vmem:[#allocation4 + $0xe0] sm:$0xf] %v16297_v6  ;;  %1682 = vst [vmem:[#allocation4 + $0x104] sm:$0xf] %v16298_v7  ;;  %v1144_v36 = vld [vmem:[#allocation2 + $0xcf] sm:$0xff]  ;;  %v18893_v61 = vld [vmem:[%s23928_s4 + $0x1e0] sm:$0xff]   ;;  %v989_v9 = vadd.f32 %v20224_v14, %v950_v58 }
 0x107   : > { %1872 = vst [vmem:[#allocation4 + $0xc0] sm:$0xf] %v16234_v5  ;;  %2255 = vst [vmem:[#allocation4 + $0xa4] sm:$0xf] %v16297_v6  ;;  %v1527_v37 = vld [vmem:[#allocation2 + $0xc9] sm:$0xff]  ;;  %v1528_v38 = vld [vmem:[#allocation2 + $0xd1] sm:$0xff]  ;;  %v16240_v42 = vpack.c.bf16 %v1144_v36, %v1144_v36  ;;  %v1084_v2 = vsel %vm1020_vm1, %v988_v41, %v1052_v50 }
 0x108   : > { %2256 = vst [vmem:[#allocation4 + $0xc8] sm:$0xf] %v16298_v7  ;;  %2447 = vst [vmem:[#allocation4 + $0x84] sm:$0xf] %v16234_v5  ;;  %v20302_v43 = vpack.c.bf16 %v1527_v37, %v1527_v37  ;;  %v16304_v44 = vpack.c.bf16 %v1528_v38, %v1528_v38  ;;  %v18796_v51 = vld [vmem:[#allocation4 + $0x90] ss:$36 sps:$4 sm:$0xff]   ;;  %v16279_v5 = vpack.c.bf16 %v1084_v2, %v1084_v2  ;;  %17450 = vmatpush3.bf16.msra.mxu0 %v20313_v52 }
 0x109   : > { %2830 = vst [vmem:[#allocation4 + $0x68] sm:$0xf] %v16297_v6  ;;  %2831 = vst [vmem:[#allocation4 + $0x8c] sm:$0xf] %v16298_v7  ;;  %v18797_v3 = vld [vmem:[#allocation4 + $0x50] ss:$36 sps:$4 sm:$0xff]   ;;  %4381 = vmatmul.mubr.bf16.gmra.mxu1 %v18796_v51  ;;  %17451 = vmatprep.subr.bf16.mxu0 %v18893_v61 }
 0x10a   : > { %1113 = vst [vmem:[#allocation2 + $0x108] sm:$0xff] %v1080_v18  ;;  %1303 = vst [vmem:[#allocation4 + $0x1b0] sm:$0xf] %v16239_v16  ;;  %vm1018_vm2 = vcmp.gt.f32.partialorder %v986_v57, 0.0  ;;  %v1050_v6 = vmul.f32 0.01, %v986_v57  ;;  %4534 = vmatmul.mubr.bf16.gmra.mxu0 %v18797_v3  ;;  %v20332_v18 = vpop.f32.mrf.mxu0 }
 0x10b   : > { %1877 = vst [vmem:[#allocation4 + $0x174] sm:$0xf] %v16239_v16  ;;  %2452 = vst [vmem:[#allocation4 + $0x138] sm:$0xf] %v16239_v16  ;;  %v18799_v7 = vld [vmem:[#allocation4 + $0xdc] ss:$36 sps:$4 sm:$0xff]  }
 0x10c   : > { %1494 = vst [vmem:[#allocation4 + $0x190] sm:$0xf] %v16270_v17  ;;  %2068 = vst [vmem:[#allocation4 + $0x154] sm:$0xf] %v16270_v17  ;;  %v1142_v53 = vld [vmem:[#allocation2 + $0xaf] sm:$0xff]  ;;  %4388 = vmatprep.mubr.bf16.mxu1 %v18799_v7  ;;  %vm1021_vm3 = vcmp.gt.f32.partialorder %v989_v9, 0.0  ;;  %v880_v30 = vpop.f32.mrf.mxu0 }
 0x10d   : > { %2643 = vst [vmem:[#allocation4 + $0x118] sm:$0xf] %v16270_v17  ;;  %1499 = vst [vmem:[#allocation4 + $0x244] sm:$0xf] %v16275_v21  ;;  %v1525_v54 = vld [vmem:[#allocation2 + $0xa9] sm:$0xff]  ;;  %v16238_v62 = vpack.c.bf16 %v1142_v53, %v1142_v53  ;;  %v1082_v17 = vsel %vm1018_vm2, %v986_v57, %v1050_v6  ;;  %v18894_v22 = vld [vmem:[%s23928_s4 + $0x1a0] sm:$0xff]   ;;  %v952_v58 = vmul.f32 %v20219_v12, %v880_v30 }
 0x10e   : > { %2073 = vst [vmem:[#allocation4 + $0x208] sm:$0xf] %v16275_v21  ;;  %2648 = vst [vmem:[#allocation4 + $0x1cc] sm:$0xf] %v16275_v21  ;;  %v16301_v63 = vpack.c.bf16 %v1525_v54, %v1525_v54  ;;  %v18801_v10 = vld [vmem:[#allocation4 + $0x9c] ss:$36 sps:$4 sm:$0xff]   ;;  %v16277_v20 = vpack.c.bf16 %v1082_v17, %v1082_v17  ;;  %17452 = vmatpush3.bf16.msra.mxu0 %v18894_v22  ;;  %v954_v54 = vmul.f32 %v20332_v18, %v20219_v12 }
 0x10f   : > { %1111 = vst [vmem:[#allocation2 + $0xe8] sm:$0xff] %v1078_v33  ;;  %2832 = vst [vmem:[#allocation4 + $0xb0] sm:$0xf] %v20269_v55  ;;  %v1526_v55 = vld [vmem:[#allocation2 + $0xb1] sm:$0xff]  ;;  %v1053_v21 = vmul.f32 0.01, %v989_v9  ;;  %4541 = vmatprep.mubr.bf16.mxu0 %v18801_v10  ;;  %17453 = vmatprep.subr.bf16.mxu0 %v20341_v23 }
 0x110   : > { %1301 = vst [vmem:[#allocation4 + $0x168] sm:$0xf] %v16237_v32  ;;  %1875 = vst [vmem:[#allocation4 + $0x12c] sm:$0xf] %v16237_v32  ;;  %v16302_v0 = vpack.c.bf16 %v1526_v55, %v1526_v55  ;;  %vm1019_vm4 = vcmp.gt.f32.partialorder %v20327_v11, 0.0  ;;  %vm1024_vm5 = vcmp.gt.f32.partialorder %v992_v28, 0.0 }
 0x111   : > { %2450 = vst [vmem:[#allocation4 + $0xf0] sm:$0xf] %v16237_v32  ;;  %1497 = vst [vmem:[#allocation4 + $0x1fc] sm:$0xf] %v16273_v39  ;;  %v1147_v1 = vld [vmem:[#allocation2 + $0x107] sm:$0xff]  ;;  %v1085_v37 = vsel %vm1021_vm3, %v989_v9, %v1053_v21  ;;  %vm1022_vm6 = vcmp.gt.f32.partialorder %v20347_v29, 0.0 }
 0x112   : > { %2071 = vst [vmem:[#allocation4 + $0x1c0] sm:$0xf] %v16273_v39  ;;  %2646 = vst [vmem:[#allocation4 + $0x184] sm:$0xf] %v16273_v39  ;;  %v16243_v4 = vpack.c.bf16 %v1147_v1, %v1147_v1  ;;  %v1051_v27 = vmul.f32 0.01, %v20327_v11  ;;  %v993_v1 = vadd.f32 %v20224_v14, %v954_v54 }
 0x113   : > { %1114 = vst [vmem:[#allocation2 + $0x110] sm:$0xff] %v1081_v45  ;;  %1304 = vst [vmem:[#allocation4 + $0x1d4] sm:$0xf] %v16240_v42  ;;  %v18803_v38 = vld [vmem:[#allocation4 + $0xd8] ss:$36 sps:$4 sm:$0xff]   ;;  %v18555_v45 = vpop.f32.mrf.mxu0  ;;  %v18903_v61 = vld [vmem:[%s23928_s4 + $0x1d0] sm:$0xff]  }
 0x114   : > { %1687 = vst [vmem:[#allocation4 + $0x1b8] sm:$0xf] %v20302_v43  ;;  %1688 = vst [vmem:[#allocation4 + $0x1dc] sm:$0xf] %v16304_v44  ;;  %v1083_v47 = vsel %vm1019_vm4, %v20327_v11, %v1051_v27  ;;  %v18804_v52 = vld [vmem:[#allocation4 + $0x98] ss:$36 sps:$4 sm:$0xff]   ;;  %4389 = vmatmul.mubr.bf16.gmra.mxu1 %v18803_v38  ;;  %v957_v59 = vmul.f32 %v18555_v45, %v20219_v12 }
 0x115   : > { %1878 = vst [vmem:[#allocation4 + $0x198] sm:$0xf] %v16240_v42  ;;  %2261 = vst [vmem:[#allocation4 + $0x17c] sm:$0xf] %v20302_v43  ;;  %v16278_v51 = vpack.c.bf16 %v1083_v47, %v1083_v47  ;;  %v1054_v53 = vmul.f32 0.01, %v20347_v29  ;;  %v893_v55 = vpop.f32.mrf.mxu0  ;;  %4542 = vmatmul.mubr.bf16.gmra.mxu0 %v18804_v52 }
 0x116   : > { %2262 = vst [vmem:[#allocation4 + $0x1a0] sm:$0xf] %v16304_v44  ;;  %2453 = vst [vmem:[#allocation4 + $0x15c] sm:$0xf] %v16240_v42  ;;  %v1145_v16 = vld [vmem:[#allocation2 + $0xe7] sm:$0xff]  ;;  %v16280_v42 = vpack.c.bf16 %v1085_v37, %v1085_v37  ;;  %v955_v60 = vmul.f32 %v20219_v12, %v893_v55  ;;  %v20386_v6 = vadd.f32 %v20224_v14, %v957_v59  ;;  %vm1025_vm7 = vcmp.gt.f32.partialorder %v993_v1, 0.0 }
 0x117   : > { %1112 = vst [vmem:[#allocation2 + $0xf0] sm:$0xff] %v1079_v49  ;;  %1500 = vst [vmem:[#allocation4 + $0x268] sm:$0xf] %v16276_v48  ;;  %v16241_v19 = vpack.c.bf16 %v1145_v16, %v1145_v16  ;;  %v18805_v44 = vld [vmem:[#allocation4 + $0x124] ss:$36 sps:$4 sm:$0xff]   ;;  %v18902_v49 = vld [vmem:[%s23928_s4 + $0x198] sm:$0xff]  }
 0x118   : > { %2074 = vst [vmem:[#allocation4 + $0x22c] sm:$0xf] %v16276_v48  ;;  %2649 = vst [vmem:[#allocation4 + $0x1f0] sm:$0xf] %v16276_v48  ;;  %v1056_v48 = vmul.f32 0.01, %v992_v28  ;;  %4396 = vmatprep.mubr.bf16.mxu1 %v18805_v44  ;;  %v20389_v8 = vadd.f32 %v20224_v14, %v955_v60  ;;  %17454 = vmatpush3.bf16.msra.mxu0 %v18902_v49 }
 0x119   : > { %1498 = vst [vmem:[#allocation4 + $0x220] sm:$0xf] %v16274_v56  ;;  %2072 = vst [vmem:[#allocation4 + $0x1e4] sm:$0xf] %v16274_v56  ;;  %v1057_v7 = vmul.f32 0.01, %v993_v1  ;;  %17455 = vmatprep.subr.bf16.mxu0 %v18903_v61 }
 0x11a   : > { %2647 = vst [vmem:[#allocation4 + $0x1a8] sm:$0xf] %v16274_v56  ;;  %1117 = vst [vmem:[#allocation2 + $0x148] sm:$0xff] %v1084_v2  ;;  %v1148_v24 = vld [vmem:[#allocation2 + $0x10f] sm:$0xff]  ;;  %v18807_v56 = vld [vmem:[#allocation4 + $0xe4] ss:$36 sps:$4 sm:$0xff]   ;;  %v1088_v57 = vsel %vm1024_vm5, %v992_v28, %v1056_v48  ;;  %v18556_v2 = vpop.f32.mrf.mxu0 }
 0x11b   : > { %1302 = vst [vmem:[#allocation4 + $0x18c] sm:$0xf] %v16238_v62  ;;  %1685 = vst [vmem:[#allocation4 + $0x170] sm:$0xf] %v16301_v63  ;;  %v1531_v25 = vld [vmem:[#allocation2 + $0x109] sm:$0xff]  ;;  %v1532_v26 = vld [vmem:[#allocation2 + $0x111] sm:$0xff]  ;;  %v16244_v31 = vpack.c.bf16 %v1148_v24, %v1148_v24  ;;  %4549 = vmatprep.mubr.bf16.mxu0 %v18807_v56  ;;  %v958_v9 = vmul.f32 %v18556_v2, %v20219_v12  ;;  %v1089_v24 = vsel %vm1025_vm7, %v993_v1, %v1057_v7 }
 0x11c   : > { %1686 = vst [vmem:[#allocation4 + $0x194] sm:$0xf] %v16302_v0  ;;  %1876 = vst [vmem:[#allocation4 + $0x150] sm:$0xf] %v16238_v62  ;;  %v20349_v32 = vpack.c.bf16 %v1531_v25, %v1531_v25  ;;  %v16308_v33 = vpack.c.bf16 %v1532_v26, %v1532_v26  ;;  %v896_v10 = vpop.f32.mrf.mxu0  ;;  %v18904_v11 = vld [vmem:[%s23928_s4 + $0x190] sm:$0xff]   ;;  %v18908_v13 = vld [vmem:[%s23928_s4 + $0x1c8] sm:$0xff]   ;;  %v16284_v30 = vpack.c.bf16 %v1089_v24, %v1089_v24 }
 0x11d   : > { %2259 = vst [vmem:[#allocation4 + $0x134] sm:$0xf] %v16301_v63  ;;  %2260 = vst [vmem:[#allocation4 + $0x158] sm:$0xf] %v16302_v0  ;;  %v18810_v12 = vld [vmem:[#allocation4 + $0x120] ss:$36 sps:$4 sm:$0xff]   ;;  %17456 = vmatpush3.bf16.msra.mxu0 %v18904_v11 }
 0x11e   : > { %2451 = vst [vmem:[#allocation4 + $0x114] sm:$0xf] %v16238_v62  ;;  %1307 = vst [vmem:[#allocation4 + $0x240] sm:$0xf] %v16243_v4  ;;  %v1146_v34 = vld [vmem:[#allocation2 + $0xef] sm:$0xff]  ;;  %v20407_v25 = vpop.f32.mrf.mxu0  ;;  %vm1028_vm9 = vcmp.gt.f32.partialorder %v20386_v6, 0.0  ;;  %4397 = vmatmul.mubr.bf16.gmra.mxu1 %v18810_v12  ;;  %17457 = vmatprep.subr.bf16.mxu0 %v18908_v13 }
 0x11f   : > { %1881 = vst [vmem:[#allocation4 + $0x204] sm:$0xf] %v16243_v4  ;;  %2456 = vst [vmem:[#allocation4 + $0x1c8] sm:$0xf] %v16243_v4  ;;  %v1529_v35 = vld [vmem:[#allocation2 + $0xe9] sm:$0xff]  ;;  %v1530_v36 = vld [vmem:[#allocation2 + $0xf1] sm:$0xff]  ;;  %v16242_v39 = vpack.c.bf16 %v1146_v34, %v1146_v34 }
 0x120   : > { %1503 = vst [vmem:[#allocation4 + $0x2d4] sm:$0xf] %v16279_v5  ;;  %2077 = vst [vmem:[#allocation4 + $0x298] sm:$0xf] %v16279_v5  ;;  %v20352_v40 = vpack.c.bf16 %v1529_v35, %v1529_v35  ;;  %v20354_v41 = vpack.c.bf16 %v1530_v36, %v1530_v36  ;;  %v20401_v18 = vld [vmem:[%s23926_s2] ss:$0 sm:$0xff] }
 0x121   : > { %2652 = vst [vmem:[#allocation4 + $0x25c] sm:$0xf] %v16279_v5  ;;  %1115 = vst [vmem:[#allocation2 + $0x128] sm:$0xff] %v1082_v17  ;;  %v1151_v46 = vld [vmem:[#allocation2 + $0x147] sm:$0xff]  ;;  %v991_v5 = vadd.f32 %v20224_v14, %v952_v58  ;;  %vm1026_vm10 = vcmp.gt.f32.partialorder %v20389_v8, 0.0  ;;  %v961_v58 = vmul.f32 %v20401_v18, %v20407_v25 }
 0x122   : > { %2834 = vst [vmem:[#allocation4 + $0xf8] sm:$0xf] %v16301_v63  ;;  %2835 = vst [vmem:[#allocation4 + $0x11c] sm:$0xf] %v16302_v0  ;;  %v16247_v50 = vpack.c.bf16 %v1151_v46, %v1151_v46  ;;  %v16283_v63 = vpack.c.bf16 %v1088_v57, %v1088_v57  ;;  %v1086_v0 = vsel %vm1022_vm6, %v20347_v29, %v1054_v53  ;;  %v18811_v23 = vld [vmem:[#allocation4 + $0xe0] ss:$36 sps:$4 sm:$0xff]  }
 0x123   : > { %1305 = vst [vmem:[#allocation4 + $0x1f8] sm:$0xf] %v16241_v19  ;;  %1879 = vst [vmem:[#allocation4 + $0x1bc] sm:$0xf] %v16241_v19  ;;  %v16281_v4 = vpack.c.bf16 %v1086_v0, %v1086_v0  ;;  %vm1023_vm8 = vcmp.gt.f32.partialorder %v991_v5, 0.0  ;;  %v20412_v26 = vld [vmem:[%s23928_s4 + $0x188] sm:$0xff]   ;;  %4550 = vmatmul.mubr.bf16.gmra.mxu0 %v18811_v23 }
 0x124   : > { %2454 = vst [vmem:[#allocation4 + $0x180] sm:$0xf] %v16241_v19  ;;  %1501 = vst [vmem:[#allocation4 + $0x28c] sm:$0xf] %v16277_v20  ;;  %v1055_v14 = vmul.f32 0.01, %v991_v5  ;;  %v956_v19 = vmul.f32 %v20401_v18, %v896_v10  ;;  %17458 = vmatpush3.bf16.msra.mxu0 %v20412_v26 }
 0x125   : > { %2075 = vst [vmem:[#allocation4 + $0x250] sm:$0xf] %v16277_v20  ;;  %2650 = vst [vmem:[#allocation4 + $0x214] sm:$0xf] %v16277_v20  ;;  %v1058_v45 = vmul.f32 0.01, %v20389_v8 }
 0x126   : > { %1118 = vst [vmem:[#allocation2 + $0x150] sm:$0xff] %v1085_v37  ;;  %1308 = vst [vmem:[#allocation4 + $0x264] sm:$0xf] %v16244_v31  ;;  %v18813_v37 = vld [vmem:[#allocation4 + $0x16c] ss:$36 sps:$4 sm:$0xff]  }
 0x127   : > { %1691 = vst [vmem:[#allocation4 + $0x248] sm:$0xf] %v20349_v32  ;;  %1692 = vst [vmem:[#allocation4 + $0x26c] sm:$0xf] %v16308_v33  ;;  %v20432_v46 = vld [vmem:[%s23927_s3] ss:$0 sm:$0xff]  ;;  %4404 = vmatprep.mubr.bf16.mxu1 %v18813_v37  ;;  %v1090_v54 = vsel %vm1026_vm10, %v20389_v8, %v1058_v45 }
 0x128   : > { %1882 = vst [vmem:[#allocation4 + $0x228] sm:$0xf] %v16244_v31  ;;  %2265 = vst [vmem:[#allocation4 + $0x20c] sm:$0xf] %v20349_v32  ;;  %v1149_v62 = vld [vmem:[#allocation2 + $0x127] sm:$0xff]  ;;  %v16285_v56 = vpack.c.bf16 %v1090_v54, %v1090_v54  ;;  %v1000_v8 = vadd.f32 %v20432_v46, %v961_v58 }
 0x129   : > { %2266 = vst [vmem:[#allocation4 + $0x230] sm:$0xf] %v16308_v33  ;;  %2457 = vst [vmem:[#allocation4 + $0x1ec] sm:$0xf] %v16244_v31  ;;  %v16245_v3 = vpack.c.bf16 %v1149_v62, %v1149_v62  ;;  %v1087_v31 = vsel %vm1023_vm8, %v991_v5, %v1055_v14  ;;  %v1060_v33 = vmul.f32 0.01, %v20386_v6 }
 0x12a   : > { %1306 = vst [vmem:[#allocation4 + $0x21c] sm:$0xf] %v16242_v39  ;;  %1689 = vst [vmem:[#allocation4 + $0x200] sm:$0xf] %v20352_v40  ;;  %v16282_v38 = vpack.c.bf16 %v1087_v31, %v1087_v31  ;;  %v18817_v60 = vld [vmem:[#allocation4 + $0x168] ss:$36 sps:$4 sm:$0xff]  }
 0x12b   : > { %1690 = vst [vmem:[#allocation4 + $0x224] sm:$0xf] %v20354_v41  ;;  %1880 = vst [vmem:[#allocation4 + $0x1e0] sm:$0xf] %v16242_v39  ;;  %v1092_v44 = vsel %vm1028_vm9, %v20386_v6, %v1060_v33  ;;  %v18819_v5 = vld [vmem:[#allocation4 + $0x1b4] ss:$36 sps:$4 sm:$0xff]   ;;  %4405 = vmatmul.mubr.bf16.gmra.mxu1 %v18817_v60 }
 0x12c   : > { %2263 = vst [vmem:[#allocation4 + $0x1c4] sm:$0xf] %v20352_v40  ;;  %2264 = vst [vmem:[#allocation4 + $0x1e8] sm:$0xf] %v20354_v41  ;;  %vm1032_vm13 = vcmp.gt.f32.partialorder %v1000_v8, 0.0  ;;  %4412 = vmatprep.mubr.bf16.mxu1 %v18819_v5 }
 0x12d   : > { %2455 = vst [vmem:[#allocation4 + $0x1a4] sm:$0xf] %v16242_v39  ;;  %1504 = vst [vmem:[#allocation4 + $0x2f8] sm:$0xf] %v16280_v42  ;;  %v1152_v15 = vld [vmem:[#allocation2 + $0x14f] sm:$0xff]  ;;  %v909_v39 = vpop.f32.mrf.mxu0 }
 0x12e   : > { %2078 = vst [vmem:[#allocation4 + $0x2bc] sm:$0xf] %v16280_v42  ;;  %2653 = vst [vmem:[#allocation4 + $0x280] sm:$0xf] %v16280_v42  ;;  %v1535_v16 = vld [vmem:[#allocation2 + $0x149] sm:$0xff]  ;;  %v1536_v17 = vld [vmem:[#allocation2 + $0x151] sm:$0xff]  ;;  %v16248_v20 = vpack.c.bf16 %v1152_v15, %v1152_v15  ;;  %v959_v62 = vmul.f32 %v20401_v18, %v909_v39 }
 0x12f   : > { %1116 = vst [vmem:[#allocation2 + $0x130] sm:$0xff] %v1083_v47  ;;  %1311 = vst [vmem:[#allocation4 + $0x2d0] sm:$0xf] %v16247_v50  ;;  %v20404_v21 = vpack.c.bf16 %v1535_v16, %v1535_v16  ;;  %v16312_v22 = vpack.c.bf16 %v1536_v17, %v1536_v17  ;;  %v18815_v42 = vld [vmem:[#allocation4 + $0x12c] ss:$36 sps:$4 sm:$0xff]   ;;  %v997_v47 = vadd.f32 %v20432_v46, %v958_v9  ;;  %v18560_v52 = vpop.f32.mrf.mxu0 }
 0x130   : > { %1885 = vst [vmem:[#allocation4 + $0x294] sm:$0xf] %v16247_v50  ;;  %2460 = vst [vmem:[#allocation4 + $0x258] sm:$0xf] %v16247_v50  ;;  %v16287_v50 = vpack.c.bf16 %v1092_v44, %v1092_v44  ;;  %4557 = vmatprep.mubr.bf16.mxu0 %v18815_v42  ;;  %v998_v23 = vadd.f32 %v20432_v46, %v959_v62  ;;  %v18832_v60 = vld [vmem:[#allocation4 + $0x1b8] ss:$36 sps:$4 sm:$0xff]  }
 0x131   : > { %1502 = vst [vmem:[#allocation4 + $0x2b0] sm:$0xf] %v16278_v51  ;;  %2076 = vst [vmem:[#allocation4 + $0x274] sm:$0xf] %v16278_v51  ;;  %vm1029_vm11 = vcmp.gt.f32.partialorder %v997_v47, 0.0  ;;  %v912_v59 = vpop.f32.mrf.mxu0 }
 0x132   : > { %2651 = vst [vmem:[#allocation4 + $0x238] sm:$0xf] %v16278_v51  ;;  %1121 = vst [vmem:[#allocation2 + $0x188] sm:$0xff] %v1088_v57  ;;  %v995_v51 = vadd.f32 %v20432_v46, %v956_v19  ;;  %v1061_v55 = vmul.f32 0.01, %v997_v47  ;;  %vm1030_vm14 = vcmp.gt.f32.partialorder %v998_v23, 0.0 }
 0x133   : > { %1119 = vst [vmem:[#allocation2 + $0x168] sm:$0xff] %v1086_v0  ;;  %1507 = vst [vmem:[#allocation4 + $0x364] sm:$0xf] %v16283_v63  ;;  %v960_v0 = vmul.f32 %v20401_v18, %v912_v59  ;;  %v18821_v19 = vld [vmem:[#allocation4 + $0x174] ss:$36 sps:$4 sm:$0xff]  }
 0x134   : > { %2081 = vst [vmem:[#allocation4 + $0x328] sm:$0xf] %v16283_v63  ;;  %2656 = vst [vmem:[#allocation4 + $0x2ec] sm:$0xf] %v16283_v63  ;;  %vm1027_vm12 = vcmp.gt.f32.partialorder %v995_v51, 0.0  ;;  %v1093_v61 = vsel %vm1029_vm11, %v997_v47, %v1061_v55  ;;  %v962_v63 = vmul.f32 %v20401_v18, %v18560_v52 }
 0x135   : > { %1309 = vst [vmem:[#allocation4 + $0x288] sm:$0xf] %v16245_v3  ;;  %1883 = vst [vmem:[#allocation4 + $0x24c] sm:$0xf] %v16245_v3  ;;  %v1059_v57 = vmul.f32 0.01, %v995_v51  ;;  %v16288_v6 = vpack.c.bf16 %v1093_v61, %v1093_v61 }
 0x136   : > { %2458 = vst [vmem:[#allocation4 + $0x210] sm:$0xf] %v16245_v3  ;;  %1505 = vst [vmem:[#allocation4 + $0x31c] sm:$0xf] %v16281_v4  ;;  %v1150_v27 = vld [vmem:[#allocation2 + $0x12f] sm:$0xff] }
 0x137   : > { %2079 = vst [vmem:[#allocation4 + $0x2e0] sm:$0xf] %v16281_v4  ;;  %2654 = vst [vmem:[#allocation4 + $0x2a4] sm:$0xf] %v16281_v4  ;;  %v1533_v28 = vld [vmem:[#allocation2 + $0x129] sm:$0xff]  ;;  %v1534_v29 = vld [vmem:[#allocation2 + $0x131] sm:$0xff]  ;;  %v16246_v34 = vpack.c.bf16 %v1150_v27, %v1150_v27  ;;  %v1091_v7 = vsel %vm1027_vm12, %v995_v51, %v1059_v57 }
 0x138   : > { %1122 = vst [vmem:[#allocation2 + $0x190] sm:$0xff] %v1089_v24  ;;  %2836 = vst [vmem:[#allocation4 + $0x140] sm:$0xf] %v20302_v43  ;;  %v20420_v35 = vpack.c.bf16 %v1533_v28, %v1533_v28  ;;  %v20422_v36 = vpack.c.bf16 %v1534_v29, %v1534_v29  ;;  %v18818_v4 = vld [vmem:[#allocation4 + $0x128] ss:$36 sps:$4 sm:$0xff]   ;;  %v16286_v17 = vpack.c.bf16 %v1091_v7, %v1091_v7 }
 0x139   : > { %1312 = vst [vmem:[#allocation4 + $0x2f4] sm:$0xf] %v16248_v20  ;;  %1695 = vst [vmem:[#allocation4 + $0x2d8] sm:$0xf] %v20404_v21  ;;  %v1155_v43 = vld [vmem:[#allocation2 + $0x187] sm:$0xff]  ;;  %v20464_v24 = vadd.f32 %v20432_v46, %v960_v0  ;;  %4558 = vmatmul.mubr.bf16.gmra.mxu0 %v18818_v4 }
 0x13a   : > { %1696 = vst [vmem:[#allocation4 + $0x2fc] sm:$0xf] %v16312_v22  ;;  %1886 = vst [vmem:[#allocation4 + $0x2b8] sm:$0xf] %v16248_v20  ;;  %v16251_v48 = vpack.c.bf16 %v1155_v43, %v1155_v43  ;;  %v1153_v49 = vld [vmem:[#allocation2 + $0x167] sm:$0xff]  ;;  %4565 = vmatprep.mubr.bf16.mxu0 %v18821_v19 }
 0x13b   : > { %2269 = vst [vmem:[#allocation4 + $0x29c] sm:$0xf] %v20404_v21  ;;  %2270 = vst [vmem:[#allocation4 + $0x2c0] sm:$0xf] %v16312_v22  ;;  %v16249_v53 = vpack.c.bf16 %v1153_v49, %v1153_v49  ;;  %v1064_v22 = vmul.f32 0.01, %v1000_v8 }
 0x13c   : > { %2461 = vst [vmem:[#allocation4 + $0x27c] sm:$0xf] %v16248_v20  ;;  %1120 = vst [vmem:[#allocation2 + $0x170] sm:$0xff] %v1087_v31  ;;  %v1062_v28 = vmul.f32 0.01, %v998_v23  ;;  %vm1031_vm0 = vcmp.gt.f32.partialorder %v20464_v24, 0.0 }
 0x13d   : > { %1508 = vst [vmem:[#allocation4 + $0x388] sm:$0xf] %v16284_v30  ;;  %2082 = vst [vmem:[#allocation4 + $0x34c] sm:$0xf] %v16284_v30  ;;  %v1096_v27 = vsel %vm1032_vm13, %v1000_v8, %v1064_v22  ;;  %v1063_v39 = vmul.f32 0.01, %v20464_v24 }
 0x13e   : > { %2657 = vst [vmem:[#allocation4 + $0x310] sm:$0xf] %v16284_v30  ;;  %1310 = vst [vmem:[#allocation4 + $0x2ac] sm:$0xf] %v16246_v34  ;;  %v16385_v30 = vpack.c.bf16 %v1096_v27, %v1096_v27  ;;  %v18831_v58 = vld [vmem:[#allocation4 + $0x1f8] ss:$36 sps:$4 sm:$0xff]  }
 0x13f   : > { %1693 = vst [vmem:[#allocation4 + $0x290] sm:$0xf] %v20420_v35  ;;  %1694 = vst [vmem:[#allocation4 + $0x2b4] sm:$0xf] %v20422_v36  ;;  %v1156_v1 = vld [vmem:[#allocation2 + $0x18f] sm:$0xff] }
 0x140   : > { %1884 = vst [vmem:[#allocation4 + $0x270] sm:$0xf] %v16246_v34  ;;  %2267 = vst [vmem:[#allocation4 + $0x254] sm:$0xf] %v20420_v35  ;;  %v1539_v2 = vld [vmem:[#allocation2 + $0x189] sm:$0xff]  ;;  %v1540_v3 = vld [vmem:[#allocation2 + $0x191] sm:$0xff]  ;;  %v16252_v9 = vpack.c.bf16 %v1156_v1, %v1156_v1 }
 0x141   : > { %2268 = vst [vmem:[#allocation4 + $0x278] sm:$0xf] %v20422_v36  ;;  %2459 = vst [vmem:[#allocation4 + $0x234] sm:$0xf] %v16246_v34  ;;  %v20452_v10 = vpack.c.bf16 %v1539_v2, %v1539_v2  ;;  %v16316_v11 = vpack.c.bf16 %v1540_v3, %v1540_v3  ;;  %v18846_v22 = vld [vmem:[#allocation4 + $0x248] ss:$36 sps:$4 sm:$0xff]  }
 0x142   : > { %1506 = vst [vmem:[#allocation4 + $0x340] sm:$0xf] %v16282_v38  ;;  %2080 = vst [vmem:[#allocation4 + $0x304] sm:$0xf] %v16282_v38 }
 0x143   : > { %2655 = vst [vmem:[#allocation4 + $0x2c8] sm:$0xf] %v16282_v38  ;;  %1125 = vst [vmem:[#allocation2 + $0x1c8] sm:$0xff] %v1092_v44  ;;  %v1154_v13 = vld [vmem:[#allocation2 + $0x16f] sm:$0xff]  ;;  %v1094_v38 = vsel %vm1030_vm14, %v998_v23, %v1062_v28 }
 0x144   : > { %1315 = vst [vmem:[#allocation4 + $0x360] sm:$0xf] %v16251_v48  ;;  %1889 = vst [vmem:[#allocation4 + $0x324] sm:$0xf] %v16251_v48  ;;  %v1537_v15 = vld [vmem:[#allocation2 + $0x169] sm:$0xff]  ;;  %v1538_v16 = vld [vmem:[#allocation2 + $0x171] sm:$0xff]  ;;  %v16250_v12 = vpack.c.bf16 %v1154_v13, %v1154_v13 }
 0x145   : > { %2464 = vst [vmem:[#allocation4 + $0x2e8] sm:$0xf] %v16251_v48  ;;  %1511 = vst [vmem:[#allocation4 + $0x3f4] sm:$0xf] %v16287_v50  ;;  %v20454_v14 = vpack.c.bf16 %v1537_v15, %v1537_v15  ;;  %v20456_v18 = vpack.c.bf16 %v1538_v16, %v1538_v16  ;;  %v18825_v48 = vld [vmem:[#allocation4 + $0x170] ss:$36 sps:$4 sm:$0xff]  }
 0x146   : > { %2085 = vst [vmem:[#allocation4 + $0x3b8] sm:$0xf] %v16287_v50  ;;  %2660 = vst [vmem:[#allocation4 + $0x37c] sm:$0xf] %v16287_v50  ;;  %4566 = vmatmul.mubr.bf16.gmra.mxu0 %v18825_v48  ;;  %v18838_v13 = vld [vmem:[#allocation4 + $0x240] ss:$36 sps:$4 sm:$0xff]  }
 0x147   : > { %1123 = vst [vmem:[#allocation2 + $0x1a8] sm:$0xff] %v1090_v54  ;;  %1313 = vst [vmem:[#allocation4 + $0x318] sm:$0xf] %v16249_v53  ;;  %v18839_v16 = vld [vmem:[#allocation4 + $0x200] ss:$36 sps:$4 sm:$0xff]   ;;  %v2677_v48 = vld [vmem:[#allocation2 + $0xd1] sm:$0xff] }
 0x148   : > { %1887 = vst [vmem:[#allocation4 + $0x2dc] sm:$0xf] %v16249_v53  ;;  %2462 = vst [vmem:[#allocation4 + $0x2a0] sm:$0xf] %v16249_v53  ;;  %v18827_v53 = vld [vmem:[#allocation4 + $0x1fc] ss:$36 sps:$4 sm:$0xff]  }
 0x149   : > { %1509 = vst [vmem:[#allocation4 + $0x3ac] sm:$0xf] %v16285_v56  ;;  %2083 = vst [vmem:[#allocation4 + $0x370] sm:$0xf] %v16285_v56  ;;  %v18843_v19 = vld [vmem:[#allocation4 + $0x24c] ss:$36 sps:$4 sm:$0xff]  }
 0x14a   : > { %2658 = vst [vmem:[#allocation4 + $0x334] sm:$0xf] %v16285_v56  ;;  %1126 = vst [vmem:[#allocation2 + $0x1d0] sm:$0xff] %v1093_v61  ;;  %v1159_v20 = vld [vmem:[#allocation2 + $0x1c7] sm:$0xff]  ;;  %v18847_v23 = vld [vmem:[#allocation4 + $0x2d4] ss:$36 sps:$4 sm:$0xff]  }
 0x14b   : > { %1124 = vst [vmem:[#allocation2 + $0x1b0] sm:$0xff] %v1091_v7  ;;  %1512 = vst [vmem:[#allocation4 + $0x418] sm:$0xf] %v16288_v6  ;;  %v16255_v25 = vpack.c.bf16 %v1159_v20, %v1159_v20  ;;  %v18833_v61 = vld [vmem:[#allocation4 + $0x244] ss:$36 sps:$4 sm:$0xff]  }
 0x14c   : > { %2086 = vst [vmem:[#allocation4 + $0x3dc] sm:$0xf] %v16288_v6  ;;  %2661 = vst [vmem:[#allocation4 + $0x3a0] sm:$0xf] %v16288_v6  ;;  %v18835_v7 = vld [vmem:[#allocation4 + $0x204] ss:$36 sps:$4 sm:$0xff]  }
 0x14d   : > { %2838 = vst [vmem:[#allocation4 + $0x188] sm:$0xf] %v20352_v40  ;;  %1316 = vst [vmem:[#allocation4 + $0x384] sm:$0xf] %v16252_v9  ;;  %v1001_v40 = vadd.f32 %v20432_v46, %v962_v63  ;;  %v18845_v20 = vld [vmem:[#allocation4 + $0x288] ss:$36 sps:$4 sm:$0xff]  }
 0x14e   : > { %1699 = vst [vmem:[#allocation4 + $0x368] sm:$0xf] %v20452_v10  ;;  %1700 = vst [vmem:[#allocation4 + $0x38c] sm:$0xf] %v16316_v11  ;;  %v1157_v26 = vld [vmem:[#allocation2 + $0x1a7] sm:$0xff] }
 0x14f   : > { %1890 = vst [vmem:[#allocation4 + $0x348] sm:$0xf] %v16252_v9  ;;  %2273 = vst [vmem:[#allocation4 + $0x32c] sm:$0xf] %v20452_v10  ;;  %vm1033_vm15 = vcmp.gt.f32.partialorder %v1001_v40, 0.0  ;;  %v16253_v29 = vpack.c.bf16 %v1157_v26, %v1157_v26 }
 0x150   : > { %2274 = vst [vmem:[#allocation4 + $0x350] sm:$0xf] %v16316_v11  ;;  %2465 = vst [vmem:[#allocation4 + $0x30c] sm:$0xf] %v16252_v9  ;;  %v1065_v31 = vmul.f32 0.01, %v1001_v40  ;;  %v17125_v11 = vpop.f32.mrf.mxu1 }
 0x151   : > { %1510 = vst [vmem:[#allocation4 + $0x3d0] sm:$0xf] %v16286_v17  ;;  %2084 = vst [vmem:[#allocation4 + $0x394] sm:$0xf] %v16286_v17  ;;  %v1160_v33 = vld [vmem:[#allocation2 + $0x1cf] sm:$0xff] }
 0x152   : > { %2659 = vst [vmem:[#allocation4 + $0x358] sm:$0xf] %v16286_v17  ;;  %1314 = vst [vmem:[#allocation4 + $0x33c] sm:$0xf] %v16250_v12  ;;  %v1543_v34 = vld [vmem:[#allocation2 + $0x1c9] sm:$0xff]  ;;  %v1544_v37 = vld [vmem:[#allocation2 + $0x1d1] sm:$0xff]  ;;  %v16256_v43 = vpack.c.bf16 %v1160_v33, %v1160_v33  ;;  %v1097_v52 = vsel %vm1033_vm15, %v1001_v40, %v1065_v31  ;;  %v17126_v15 = vpop.f32.mrf.mxu1 }
 0x153   : > { %1697 = vst [vmem:[#allocation4 + $0x320] sm:$0xf] %v20454_v14  ;;  %1698 = vst [vmem:[#allocation4 + $0x344] sm:$0xf] %v20456_v18  ;;  %v20476_v42 = vpack.c.bf16 %v1543_v34, %v1543_v34  ;;  %v16320_v44 = vpack.c.bf16 %v1544_v37, %v1544_v37  ;;  %v1158_v45 = vld [vmem:[#allocation2 + $0x1af] sm:$0xff]  ;;  %v16386_v54 = vpack.c.bf16 %v1097_v52, %v1097_v52 }
 0x154   : > { %1888 = vst [vmem:[#allocation4 + $0x300] sm:$0xf] %v16250_v12  ;;  %2271 = vst [vmem:[#allocation4 + $0x2e4] sm:$0xf] %v20454_v14  ;;  %v1541_v46 = vld [vmem:[#allocation2 + $0x1a9] sm:$0xff]  ;;  %v1542_v47 = vld [vmem:[#allocation2 + $0x1b1] sm:$0xff]  ;;  %v16254_v49 = vpack.c.bf16 %v1158_v45, %v1158_v45  ;;  %v20498_v17 = vadd.f32 %v17126_v15, %v17125_v11 }
 0x155   : > { %2272 = vst [vmem:[#allocation4 + $0x308] sm:$0xf] %v20456_v18  ;;  %2463 = vst [vmem:[#allocation4 + $0x2c4] sm:$0xf] %v16250_v12  ;;  %v20478_v50 = vpack.c.bf16 %v1541_v46, %v1541_v46  ;;  %v20480_v51 = vpack.c.bf16 %v1542_v47, %v1542_v47  ;;  %v18841_v12 = vld [vmem:[#allocation4 + $0x28c] ss:$36 sps:$4 sm:$0xff]  }
 0x156   : > { %1319 = vst [vmem:[#allocation4 + $0x3f0] sm:$0xf] %v16255_v25  ;;  %1893 = vst [vmem:[#allocation4 + $0x3b4] sm:$0xf] %v16255_v25  ;;  %v18849_v40 = vld [vmem:[#allocation4 + $0x294] ss:$36 sps:$4 sm:$0xff]  }
 0x157   : > { %2468 = vst [vmem:[#allocation4 + $0x378] sm:$0xf] %v16255_v25  ;;  %1129 = vst [vmem:[#allocation2 + $0x208] sm:$0xff] %v1096_v27  ;;  %v18853_v25 = vld [vmem:[#allocation4 + $0x290] ss:$36 sps:$4 sm:$0xff]  }
 0x158   : > { %2839 = vst [vmem:[#allocation4 + $0x1ac] sm:$0xf] %v20354_v41  ;;  %2840 = vst [vmem:[#allocation4 + $0x1d0] sm:$0xf] %v20349_v32  ;;  %v16289_v32 = vpack.c.bf16 %v1094_v38, %v1094_v38  ;;  %v18824_v41 = vld [vmem:[#allocation4 + $0x1b0] ss:$36 sps:$4 sm:$0xff]  }
 0x159   : > { %1317 = vst [vmem:[#allocation4 + $0x3a8] sm:$0xf] %v16253_v29  ;;  %1891 = vst [vmem:[#allocation4 + $0x36c] sm:$0xf] %v16253_v29  ;;  %4413 = vmatmul.mubr.bf16.gmra.mxu1 %v18824_v41  ;;  %v18855_v26 = vld [vmem:[#allocation4 + $0x31c] ss:$36 sps:$4 sm:$0xff]  }
 0x15a   : > { %2466 = vst [vmem:[#allocation4 + $0x330] sm:$0xf] %v16253_v29  ;;  %2089 = vst [vmem:[#allocation4 + $0x448] sm:$0xf] %v16385_v30  ;;  %4420 = vmatprep.mubr.bf16.mxu1 %v18827_v53  ;;  %v18859_v28 = vld [vmem:[#allocation4 + $0x318] ss:$36 sps:$4 sm:$0xff]  }
 0x15b   : > { %2664 = vst [vmem:[#allocation4 + $0x40c] sm:$0xf] %v16385_v30  ;;  %1127 = vst [vmem:[#allocation2 + $0x1e8] sm:$0xff] %v1094_v38  ;;  %v18857_v27 = vld [vmem:[#allocation4 + $0x2dc] ss:$36 sps:$4 sm:$0xff]   ;;  %v2673_v47 = vld [vmem:[#allocation2 + $0x91] sm:$0xff] }
 0x15c   : > { %2842 = vst [vmem:[#allocation4 + $0x218] sm:$0xf] %v20420_v35  ;;  %2843 = vst [vmem:[#allocation4 + $0x23c] sm:$0xf] %v20422_v36  ;;  %v1095_v35 = vsel %vm1031_vm0, %v20464_v24, %v1063_v39  ;;  %v18829_v36 = vld [vmem:[#allocation4 + $0x1bc] ss:$36 sps:$4 sm:$0xff]   ;;  %v16488_v41 = vpack.c.bf16 %v2673_v47, %v2673_v47 }
 0x15d   : > { %1320 = vst [vmem:[#allocation4 + $0x414] sm:$0xf] %v16256_v43  ;;  %1703 = vst [vmem:[#allocation4 + $0x3f8] sm:$0xf] %v20476_v42  ;;  %v16290_v55 = vpack.c.bf16 %v1095_v35, %v1095_v35  ;;  %4573 = vmatprep.mubr.bf16.mxu0 %v18829_v36  ;;  %v18852_v24 = vld [vmem:[#allocation4 + $0x2d0] ss:$36 sps:$4 sm:$0xff]  }
 0x15e   : > { %1704 = vst [vmem:[#allocation4 + $0x41c] sm:$0xf] %v16320_v44  ;;  %1894 = vst [vmem:[#allocation4 + $0x3d8] sm:$0xf] %v16256_v43  ;;  %v1737_v56 = vld [vmem:[#allocation2 + $0x207] sm:$0xff]  ;;  %4574 = vmatmul.mubr.bf16.gmra.mxu0 %v18832_v60  ;;  %v2685_v53 = vld [vmem:[#allocation2 + $0x151] sm:$0xff] }
 0x15f   : > { %2277 = vst [vmem:[#allocation4 + $0x3bc] sm:$0xf] %v20476_v42  ;;  %2278 = vst [vmem:[#allocation4 + $0x3e0] sm:$0xf] %v16320_v44  ;;  %v16353_v57 = vpack.c.bf16 %v1737_v56, %v1737_v56  ;;  %4581 = vmatprep.mubr.bf16.mxu0 %v18835_v7  ;;  %v18860_v29 = vld [vmem:[#allocation4 + $0x2d8] ss:$36 sps:$4 sm:$0xff]  }
 0x160   : > { %2469 = vst [vmem:[#allocation4 + $0x39c] sm:$0xf] %v16256_v43  ;;  %1513 = vst [vmem:[#allocation4 + $0x43c] sm:$0xf] %v16289_v32  ;;  %v18861_v30 = vld [vmem:[#allocation4 + $0x364] ss:$36 sps:$4 sm:$0xff]  }
 0x161   : > { %2087 = vst [vmem:[#allocation4 + $0x400] sm:$0xf] %v16289_v32  ;;  %2662 = vst [vmem:[#allocation4 + $0x3c4] sm:$0xf] %v16289_v32  ;;  %4421 = vmatmul.mubr.bf16.gmra.mxu1 %v18831_v58  ;;  %v18863_v31 = vld [vmem:[#allocation4 + $0x324] ss:$36 sps:$4 sm:$0xff]  }
 0x162   : > { %1130 = vst [vmem:[#allocation2 + $0x210] sm:$0xff] %v1097_v52  ;;  %1318 = vst [vmem:[#allocation4 + $0x3cc] sm:$0xf] %v16254_v49  ;;  %v1161_v59 = vld [vmem:[#allocation2 + $0x1e7] sm:$0xff]  ;;  %4428 = vmatprep.mubr.bf16.mxu1 %v18833_v61  ;;  %v2693_v56 = vld [vmem:[#allocation2 + $0x1d1] sm:$0xff] }
 0x163   : > { %1701 = vst [vmem:[#allocation4 + $0x3b0] sm:$0xf] %v20478_v50  ;;  %1702 = vst [vmem:[#allocation4 + $0x3d4] sm:$0xf] %v20480_v51  ;;  %v16257_v62 = vpack.c.bf16 %v1161_v59, %v1161_v59  ;;  %v18866_v33 = vld [vmem:[#allocation4 + $0x360] ss:$36 sps:$4 sm:$0xff]  }
 0x164   : > { %1892 = vst [vmem:[#allocation4 + $0x390] sm:$0xf] %v16254_v49  ;;  %2275 = vst [vmem:[#allocation4 + $0x374] sm:$0xf] %v20478_v50  ;;  %v18867_v34 = vld [vmem:[#allocation4 + $0x320] ss:$36 sps:$4 sm:$0xff]  }
 0x165   : > { %2276 = vst [vmem:[#allocation4 + $0x398] sm:$0xf] %v20480_v51  ;;  %2467 = vst [vmem:[#allocation4 + $0x354] sm:$0xf] %v16254_v49  ;;  %v18869_v37 = vld [vmem:[#allocation4 + $0x3ac] ss:$36 sps:$4 sm:$0xff]   ;;  %v16492_v49 = vpack.c.bf16 %v2677_v48, %v2677_v48 }
 0x166   : > { %1128 = vst [vmem:[#allocation2 + $0x1f0] sm:$0xff] %v1095_v35  ;;  %2090 = vst [vmem:[#allocation4 + $0x46c] sm:$0xf] %v16386_v54  ;;  %4582 = vmatmul.mubr.bf16.gmra.mxu0 %v18839_v16  ;;  %v18874_v43 = vld [vmem:[#allocation4 + $0x368] ss:$36 sps:$4 sm:$0xff]   ;;  %v2689_v35 = vld [vmem:[#allocation2 + $0x191] sm:$0xff] }
 0x167   : > { %2665 = vst [vmem:[#allocation4 + $0x430] sm:$0xf] %v16386_v54  ;;  %2844 = vst [vmem:[#allocation4 + $0x260] sm:$0xf] %v20404_v21  ;;  %4589 = vmatprep.mubr.bf16.mxu0 %v18843_v19  ;;  %v18878_v44 = vld [vmem:[#allocation4 + $0x3b4] ss:$36 sps:$4 sm:$0xff]   ;;  %v16500_v54 = vpack.c.bf16 %v2685_v53, %v2685_v53 }
 0x168   : > { %2846 = vst [vmem:[#allocation4 + $0x2a8] sm:$0xf] %v20454_v14  ;;  %1514 = vst [vmem:[#allocation4 + $0x460] sm:$0xf] %v16290_v55  ;;  %v18914_v14 = vld [vmem:[%s23928_s4 + $0x1c0] sm:$0xff]   ;;  %v2698_v48 = vld [vmem:[#allocation2 + $0x229] sm:$0xff] }
 0x169   : > { %2088 = vst [vmem:[#allocation4 + $0x424] sm:$0xf] %v16290_v55  ;;  %2663 = vst [vmem:[#allocation4 + $0x3e8] sm:$0xf] %v16290_v55  ;;  %v1738_v21 = vld [vmem:[#allocation2 + $0x20f] sm:$0xff]  ;;  %4429 = vmatmul.mubr.bf16.gmra.mxu1 %v18838_v13  ;;  %17459 = vmatprep.subr.bf16.mxu0 %v18914_v14  ;;  %v16504_v55 = vpack.c.bf16 %v2689_v35, %v2689_v35  ;;  %v19846_v7 = vld [vmem:[#allocation2 + $0x40] sm:$0xff] }
 0x16a   : > { %2847 = vst [vmem:[#allocation4 + $0x2cc] sm:$0xf] %v20456_v18  ;;  %2848 = vst [vmem:[#allocation4 + $0x2f0] sm:$0xf] %v20452_v10  ;;  %v2121_v63 = vld [vmem:[#allocation2 + $0x209] sm:$0xff]  ;;  %v2122_v0 = vld [vmem:[#allocation2 + $0x211] sm:$0xff]  ;;  %v16354_v1 = vpack.c.bf16 %v1738_v21, %v1738_v21  ;;  %4436 = vmatprep.mubr.bf16.mxu1 %v18841_v12 }
 0x16b   : > { %1897 = vst [vmem:[#allocation4 + $0x444] sm:$0xf] %v16353_v57  ;;  %2472 = vst [vmem:[#allocation4 + $0x408] sm:$0xf] %v16353_v57  ;;  %v16417_v2 = vpack.c.bf16 %v2121_v63, %v2121_v63  ;;  %v16418_v3 = vpack.c.bf16 %v2122_v0, %v2122_v0  ;;  %v18915_v18 = vld [vmem:[%s23928_s4 + $0x180] sm:$0xff]   ;;  %v16508_v57 = vpack.c.bf16 %v2693_v56, %v2693_v56  ;;  %v2697_v61 = vld [vmem:[#allocation2 + $0x211] sm:$0xff] }
 0x16c   : > { %1321 = vst [vmem:[#allocation4 + $0x438] sm:$0xf] %v16257_v62  ;;  %1895 = vst [vmem:[#allocation4 + $0x3fc] sm:$0xf] %v16257_v62  ;;  %17460 = vmatpush3.bf16.msra.mxu0 %v18915_v18  ;;  %v18871_v38 = vld [vmem:[#allocation4 + $0x36c] ss:$36 sps:$4 sm:$0xff]  }
 0x16d   : > { %2470 = vst [vmem:[#allocation4 + $0x3c0] sm:$0xf] %v16257_v62  ;;  %v1162_v4 = vld [vmem:[#allocation2 + $0x1ef] sm:$0xff]  ;;  %1898 = vst [vmem:[#allocation4 + $0x468] sm:$0xf] %v16354_v1  ;;  %v16512_v62 = vpack.c.bf16 %v2697_v61, %v2697_v61  ;;  %v18948_v16 = vld [vmem:[%s23928_s4 + $0x220] sm:$0xff]  }
 0x16e   : > { %v1545_v5 = vld [vmem:[#allocation2 + $0x1e9] sm:$0xff]  ;;  %v1546_v6 = vld [vmem:[#allocation2 + $0x1f1] sm:$0xff]  ;;  %v16258_v8 = vpack.c.bf16 %v1162_v4, %v1162_v4  ;;  %2281 = vst [vmem:[#allocation4 + $0x44c] sm:$0xf] %v16417_v2  ;;  %2282 = vst [vmem:[#allocation4 + $0x470] sm:$0xf] %v16418_v3  ;;  %4590 = vmatmul.mubr.bf16.gmra.mxu0 %v18846_v22 }
 0x16f   : > { %v16321_v9 = vpack.c.bf16 %v1545_v5, %v1545_v5  ;;  %v16322_v10 = vpack.c.bf16 %v1546_v6, %v1546_v6  ;;  %2473 = vst [vmem:[#allocation4 + $0x42c] sm:$0xf] %v16354_v1  ;;  %2850 = vst [vmem:[#allocation4 + $0x338] sm:$0xf] %v20478_v50  ;;  %4597 = vmatprep.mubr.bf16.mxu0 %v18849_v40  ;;  %v18873_v39 = vld [vmem:[#allocation4 + $0x3a8] ss:$36 sps:$4 sm:$0xff]  }
 0x170   : > { %1322 = vst [vmem:[#allocation4 + $0x45c] sm:$0xf] %v16258_v8  ;;  %1896 = vst [vmem:[#allocation4 + $0x420] sm:$0xf] %v16258_v8  ;;  %v18884_v45 = vld [vmem:[#allocation4 + $0x3f0] ss:$36 sps:$4 sm:$0xff]  }
 0x171   : > { %1705 = vst [vmem:[#allocation4 + $0x440] sm:$0xf] %v16321_v9  ;;  %1706 = vst [vmem:[#allocation4 + $0x464] sm:$0xf] %v16322_v10  ;;  %4437 = vmatmul.mubr.bf16.gmra.mxu1 %v18845_v20  ;;  %v18885_v46 = vld [vmem:[#allocation4 + $0x3b0] ss:$36 sps:$4 sm:$0xff]  }
 0x172   : > { %2279 = vst [vmem:[#allocation4 + $0x404] sm:$0xf] %v16321_v9  ;;  %2280 = vst [vmem:[#allocation4 + $0x428] sm:$0xf] %v16322_v10  ;;  %4444 = vmatprep.mubr.bf16.mxu1 %v18847_v23  ;;  %v18888_v32 = vld [vmem:[#allocation4 + $0x43c] ss:$36 sps:$4 sm:$0xff]  }
 0x173   : > { %2471 = vst [vmem:[#allocation4 + $0x3e4] sm:$0xf] %v16258_v8  ;;  %2851 = vst [vmem:[#allocation4 + $0x35c] sm:$0xf] %v20480_v51  ;;  %v2681_v51 = vld [vmem:[#allocation2 + $0x111] sm:$0xff]  ;;  %v18935_v4 = vld [vmem:[%s23928_s4 + $0x228] sm:$0xff]   ;;  %v16481_v8 = vpack.c.bf16 %v19846_v7, %v19846_v7 }
 0x174   : > { %2852 = vst [vmem:[#allocation4 + $0x380] sm:$0xf] %v20476_v42  ;;  %2854 = vst [vmem:[#allocation4 + $0x3c8] sm:$0xf] %v16321_v9  ;;  %v18876_v42 = vld [vmem:[#allocation4 + $0x3f4] ss:$36 sps:$4 sm:$0xff]   ;;  %v16496_v52 = vpack.c.bf16 %v2681_v51, %v2681_v51 }
 0x175   : > { %2855 = vst [vmem:[#allocation4 + $0x3ec] sm:$0xf] %v16322_v10  ;;  %2856 = vst [vmem:[#allocation4 + $0x410] sm:$0xf] %v16417_v2  ;;  %v18896_v58 = vld [vmem:[#allocation4 + $0x3f8] ss:$36 sps:$4 sm:$0xff]  }
 0x176   : > { %4598 = vmatmul.mubr.bf16.gmra.mxu0 %v18853_v25  ;;  %2833 = vst [vmem:[#allocation4 + $0xd4] sm:$0xf] %v16488_v41  ;;  %2837 = vst [vmem:[#allocation4 + $0x164] sm:$0xf] %v16492_v49  ;;  %v18900_v59 = vld [vmem:[#allocation4 + $0x14] ss:$36 sps:$4 sm:$0xff]  }
 0x177   : > { %4605 = vmatprep.mubr.bf16.mxu0 %v18857_v27  ;;  %v18890_v50 = vld [vmem:[#allocation4 + $0x3fc] ss:$36 sps:$4 sm:$0xff]   ;;  %2841 = vst [vmem:[#allocation4 + $0x1f4] sm:$0xf] %v16496_v52  ;;  %2845 = vst [vmem:[#allocation4 + $0x284] sm:$0xf] %v16500_v54 }
 0x178   : > { %v18895_v36 = vld [vmem:[#allocation4 + $0x438] ss:$36 sps:$4 sm:$0xff]   ;;  %2849 = vst [vmem:[#allocation4 + $0x314] sm:$0xf] %v16504_v55  ;;  %v18898_v60 = vld [vmem:[#allocation4 + $0x444] ss:$36 sps:$4 sm:$0xff]  }
 0x179   : > { %4445 = vmatmul.mubr.bf16.gmra.mxu1 %v18852_v24  ;;  %2853 = vst [vmem:[#allocation4 + $0x3a4] sm:$0xf] %v16508_v57  ;;  %2857 = vst [vmem:[#allocation4 + $0x434] sm:$0xf] %v16512_v62  ;;  %v18907_v21 = vld [vmem:[#allocation4 + $0x10] ss:$36 sps:$4 sm:$0xff]  }
 0x17a   : > { %4452 = vmatprep.mubr.bf16.mxu1 %v18855_v26  ;;  %v18906_v63 = vld [vmem:[#allocation4 + $0x440] ss:$36 sps:$4 sm:$0xff]   ;;  %v18922_v0 = vld [vmem:[%s23928_s4 + $0x230] sm:$0xff]   ;;  %v19845_v3 = vld [vmem:[%s23928_s4 + $0x238] sm:$0xff]   ;;  %2666 = vst [vmem:[#allocation4 + $0x454] sm:$0xf] %v16481_v8 }
 0x17b   : > { %v18909_v1 = vld [vmem:[#allocation4 + $0x5c] ss:$36 sps:$4 sm:$0xff]   ;;  %v2314_v5 = vld [vmem:[#allocation2 + $0x227] sm:$0xff]  ;;  %v2315_v6 = vld [vmem:[#allocation2 + $0x22f] sm:$0xff]  ;;  %2667 = vst [vmem:[#allocation4 + $0x478] sm:$0xf] %v16481_v8 }
 0x17c   : > { %v18912_v2 = vld [vmem:[#allocation4 + $0x1c] ss:$36 sps:$4 sm:$0xff]   ;;  %v16449_v9 = vpack.c.bf16 %v2314_v5, %v2314_v5  ;;  %v16450_v10 = vpack.c.bf16 %v2315_v6, %v2315_v6  ;;  %v18918_v15 = vld [vmem:[#allocation4 + $0xa4] ss:$36 sps:$4 sm:$0xff]   ;;  %v18925_v20 = vld [vmem:[#allocation4 + $0xec] ss:$36 sps:$4 sm:$0xff]  }
 0x17d   : > { %v18916_v11 = vld [vmem:[#allocation4 + $0x58] ss:$36 sps:$4 sm:$0xff]   ;;  %v18920_v12 = vld [vmem:[#allocation4 + $0x64] ss:$36 sps:$4 sm:$0xff]   ;;  %v18974_v22 = vld [vmem:[%s23928_s4 + $0x210] sm:$0xff]  }
 0x17e   : > { %4606 = vmatmul.mubr.bf16.gmra.mxu0 %v18860_v29  ;;  %2474 = vst [vmem:[#allocation4 + $0x450] sm:$0xf] %v16449_v9  ;;  %2475 = vst [vmem:[#allocation4 + $0x474] sm:$0xf] %v16450_v10  ;;  %v18917_v13 = vld [vmem:[#allocation4 + $0x18] ss:$36 sps:$4 sm:$0xff]  }
 0x17f   : > { %4613 = vmatprep.mubr.bf16.mxu0 %v18863_v31  ;;  %v18961_v14 = vld [vmem:[%s23928_s4 + $0x218] sm:$0xff]   ;;  %v18923_v18 = vld [vmem:[#allocation4 + $0xa0] ss:$36 sps:$4 sm:$0xff]   ;;  %v18927_v23 = vld [vmem:[#allocation4 + $0xac] ss:$36 sps:$4 sm:$0xff]  }
 0x180   : > { %v18924_v19 = vld [vmem:[#allocation4 + $0x60] ss:$36 sps:$4 sm:$0xff]   ;;  %v18987_v40 = vld [vmem:[%s23928_s4 + $0x208] sm:$0xff]   ;;  %v18931_v26 = vld [vmem:[#allocation4 + $0x134] ss:$36 sps:$4 sm:$0xff]  }
 0x181   : > { %4453 = vmatmul.mubr.bf16.gmra.mxu1 %v18859_v28  ;;  %v18929_v24 = vld [vmem:[#allocation4 + $0xe8] ss:$36 sps:$4 sm:$0xff]   ;;  %v19000_v27 = vld [vmem:[%s23928_s4 + $0x200] sm:$0xff]   ;;  %v18933_v28 = vld [vmem:[#allocation4 + $0xf4] ss:$36 sps:$4 sm:$0xff]  }
 0x182   : > { %4460 = vmatprep.mubr.bf16.mxu1 %v18861_v30  ;;  %v18930_v25 = vld [vmem:[#allocation4 + $0xa8] ss:$36 sps:$4 sm:$0xff]   ;;  %v18936_v29 = vld [vmem:[#allocation4 + $0x130] ss:$36 sps:$4 sm:$0xff]   ;;  %v18938_v31 = vld [vmem:[#allocation4 + $0x17c] ss:$36 sps:$4 sm:$0xff]  }
 0x183   : > { %v18937_v30 = vld [vmem:[#allocation4 + $0xf0] ss:$36 sps:$4 sm:$0xff]   ;;  %v18956_v47 = vld [vmem:[#allocation4 + $0x1c8] ss:$36 sps:$4 sm:$0xff]   ;;  %v18966_v55 = vld [vmem:[#allocation4 + $0x25c] ss:$36 sps:$4 sm:$0xff]  }
 0x184   : > { %v18959_v41 = vld [vmem:[#allocation4 + $0x214] ss:$36 sps:$4 sm:$0xff]   ;;  %v6911_v53 = vld [vmem:[#allocation3 + $0x229] sm:$0xff]  ;;  %v18975_v10 = vld [vmem:[#allocation4 + $0x2e0] ss:$36 sps:$4 sm:$0xff]  }
 0x185   : > { %v2699_v49 = vld [vmem:[#allocation2 + $0x231] sm:$0xff]  ;;  %v16801_v56 = vpack.c.bf16 %v6911_v53, %v6911_v53 }
 0x186   : > { %4614 = vmatmul.mubr.bf16.gmra.mxu0 %v18867_v34  ;;  %v18942_v34 = vld [vmem:[#allocation4 + $0x178] ss:$36 sps:$4 sm:$0xff]   ;;  %v16514_v51 = vpack.c.bf16 %v2699_v49, %v2699_v49  ;;  %v18962_v52 = vld [vmem:[#allocation4 + $0x250] ss:$36 sps:$4 sm:$0xff]  }
 0x187   : > { %4621 = vmatprep.mubr.bf16.mxu0 %v18871_v38  ;;  %v18944_v38 = vld [vmem:[#allocation4 + $0x1c4] ss:$36 sps:$4 sm:$0xff]   ;;  %v6912_v54 = vld [vmem:[#allocation3 + $0x231] sm:$0xff] }
 0x188   : > { %2859 = vst [vmem:[#allocation4 + $0x47c] sm:$0xf] %v16514_v51  ;;  %v18963_v35 = vld [vmem:[#allocation4 + $0x210] ss:$36 sps:$4 sm:$0xff]   ;;  %v16802_v57 = vpack.c.bf16 %v6912_v54, %v6912_v54  ;;  %v18968_v61 = vld [vmem:[#allocation4 + $0x298] ss:$36 sps:$4 sm:$0xff]  }
 0x189   : > { %4461 = vmatmul.mubr.bf16.gmra.mxu1 %v18866_v33  ;;  %v18940_v33 = vld [vmem:[#allocation4 + $0x13c] ss:$36 sps:$4 sm:$0xff]  }
 0x18a   : > { %4468 = vmatprep.mubr.bf16.mxu1 %v18869_v37  ;;  %v18943_v37 = vld [vmem:[#allocation4 + $0x138] ss:$36 sps:$4 sm:$0xff]  }
 0x18b   : > { %v18969_v62 = vld [vmem:[#allocation4 + $0x258] ss:$36 sps:$4 sm:$0xff]  }
 0x18c   : > { %v19029_v49 = vld [vmem:[%s23931_s7 + $0x38] sm:$0xff]  }
 0x18e   : > { %4622 = vmatmul.mubr.bf16.gmra.mxu0 %v18874_v43  ;;  %v18949_v43 = vld [vmem:[#allocation4 + $0x1c0] ss:$36 sps:$4 sm:$0xff]  }
 0x18f   : > { %4629 = vmatprep.mubr.bf16.mxu0 %v18878_v44  ;;  %v18951_v44 = vld [vmem:[#allocation4 + $0x20c] ss:$36 sps:$4 sm:$0xff]  }
 0x191   : > { %4469 = vmatmul.mubr.bf16.gmra.mxu1 %v18873_v39  ;;  %v18946_v39 = vld [vmem:[#allocation4 + $0x184] ss:$36 sps:$4 sm:$0xff]  }
 0x192   : > { %4476 = vmatprep.mubr.bf16.mxu1 %v18876_v42  ;;  %v18950_v42 = vld [vmem:[#allocation4 + $0x180] ss:$36 sps:$4 sm:$0xff]  }
 0x196   : > { %4630 = vmatmul.mubr.bf16.gmra.mxu0 %v18885_v46  ;;  %v18955_v46 = vld [vmem:[#allocation4 + $0x208] ss:$36 sps:$4 sm:$0xff]  }
 0x197   : > { %4637 = vmatprep.mubr.bf16.mxu0 %v18890_v50  ;;  %v16513_v50 = vpack.c.bf16 %v2698_v48, %v2698_v48  ;;  %v19028_v48 = vld [vmem:[%s23931_s7 + $0x78] sm:$0xff]  }
 0x198   : > { %17581 = vmatprep.subr.bf16.mxu0 %v19028_v48 }
 0x199   : > { %4477 = vmatmul.mubr.bf16.gmra.mxu1 %v18884_v45  ;;  %v18953_v45 = vld [vmem:[#allocation4 + $0x1cc] ss:$36 sps:$4 sm:$0xff]   ;;  %2858 = vst [vmem:[#allocation4 + $0x458] sm:$0xf] %v16513_v50 }
 0x19a   : > { %4484 = vmatprep.mubr.bf16.mxu1 %v18888_v32  ;;  %v18957_v32 = vld [vmem:[#allocation4 + $0x254] ss:$36 sps:$4 sm:$0xff]  }
 0x19e   : > { %4638 = vmatmul.mubr.bf16.gmra.mxu0 %v18896_v58  ;;  %v17128_v58 = vpop.f32.mrf.mxu1 }
 0x19f   : > { %4645 = vmatprep.mubr.bf16.mxu0 %v18898_v60 }
 0x1a0   : > { %v17129_v60 = vpop.f32.mrf.mxu1 }
 0x1a1   : > { %4485 = vmatmul.mubr.bf16.gmra.mxu1 %v18895_v36  ;;  %v18964_v36 = vld [vmem:[#allocation4 + $0x29c] ss:$36 sps:$4 sm:$0xff]  }
 0x1a2   : > { %4686 = vmatprep.mubr.bf16.mxu1 %v18900_v59  ;;  %v20533_v59 = vld [vmem:[#allocation4 + $0x458] ss:$36 sps:$4 sm:$0xff]  }
 0x1a3   : > { %7071 = vst [vmem:[#allocation4 + $0x458] sm:$0xf] %v16801_v56  ;;  %7072 = vst [vmem:[#allocation4 + $0x47c] sm:$0xf] %v16802_v57  ;;  %v18992_v57 = vld [vmem:[#allocation4 + $0x37c] ss:$36 sps:$4 sm:$0xff]  }
 0x1a6   : > { %4646 = vmatmul.mubr.bf16.gmra.mxu0 %v18906_v63 }
 0x1a7   : > { %4847 = vmatprep.mubr.bf16.mxu0 %v18912_v2 }
 0x1a9   : > { %4687 = vmatmul.mubr.bf16.vlgmr.msra.gmra.mxu1 %v18907_v21  ;;  %v18970_v21 = vld [vmem:[#allocation4 + $0x2e4] ss:$36 sps:$4 sm:$0xff]  }
 0x1aa   : > { %18562 = vmatpush3.bf16.msra.mxu1 %v19845_v3  ;;  %4694 = vmatprep.mubr.bf16.mxu1 %v18909_v1 }
 0x1ab   : > { %18563 = vmatprep.subr.bf16.mxu1 %v18922_v0 }
 0x1ae   : > { %18564 = vmatpush3.bf16.msra.mxu1 %v18922_v0  ;;  %4848 = vmatmul.mubr.bf16.vlgmr.msra.gmra.mxu0 %v18917_v13  ;;  %v18972_v0 = vld [vmem:[#allocation4 + $0x2a4] ss:$36 sps:$4 sm:$0xff]  }
 0x1af   : > { %18565 = vmatprep.subr.bf16.mxu1 %v18935_v4  ;;  %4855 = vmatprep.mubr.bf16.mxu0 %v18920_v12  ;;  %v17130_v12 = vadd.f32 %v17129_v60, %v17128_v58 }
 0x1b0   : > { %17582 = vmatpush3.bf16.msra.mxu0 %v19029_v49  ;;  %v19007_v49 = vld [vmem:[#allocation4 + $0x448] ss:$36 sps:$4 sm:$0xff]  }
 0x1b1   : > { %4695 = vmatmul.mubr.bf16.gmra.mxu1 %v18916_v11 }
 0x1b2   : > { %4702 = vmatprep.mubr.bf16.mxu1 %v18918_v15  ;;  %18566 = vmatpush3.bf16.msra.mxu1 %v18935_v4  ;;  %v18976_v15 = vld [vmem:[#allocation4 + $0x2a0] ss:$36 sps:$4 sm:$0xff]  }
 0x1b3   : > { %18567 = vmatprep.subr.bf16.mxu1 %v18948_v16 }
 0x1b6   : > { %18568 = vmatpush3.bf16.msra.mxu1 %v18948_v16  ;;  %4856 = vmatmul.mubr.bf16.gmra.mxu0 %v18924_v19  ;;  %v18977_v16 = vld [vmem:[#allocation4 + $0x32c] ss:$36 sps:$4 sm:$0xff]  }
 0x1b7   : > { %18569 = vmatprep.subr.bf16.mxu1 %v18961_v14  ;;  %4863 = vmatprep.mubr.bf16.mxu0 %v18927_v23  ;;  %v18979_v19 = vld [vmem:[#allocation4 + $0x2ec] ss:$36 sps:$4 sm:$0xff]  }
 0x1b9   : > { %4703 = vmatmul.mubr.bf16.gmra.mxu1 %v18923_v18 }
 0x1ba   : > { %4710 = vmatprep.mubr.bf16.mxu1 %v18925_v20  ;;  %18570 = vmatpush3.bf16.msra.mxu1 %v18961_v14 }
 0x1bb   : > { %18571 = vmatprep.subr.bf16.mxu1 %v18974_v22 }
 0x1bc   : > { %v17131_v63 = vpop.f32.mrf.mxu1 }
 0x1be   : > { %18572 = vmatpush3.bf16.msra.mxu1 %v18974_v22  ;;  %4864 = vmatmul.mubr.bf16.gmra.mxu0 %v18930_v25  ;;  %v17132_v2 = vpop.f32.mrf.mxu1 }
 0x1bf   : > { %18573 = vmatprep.subr.bf16.mxu1 %v18987_v40  ;;  %4871 = vmatprep.mubr.bf16.mxu0 %v18933_v28  ;;  %v17237_v1 = vpop.f32.mrf.mxu0  ;;  %v17133_v3 = vadd.f32 %v17132_v2, %v17131_v63 }
 0x1c0   : > { %v17134_v6 = vpop.f32.mrf.mxu1 }
 0x1c1   : > { %4711 = vmatmul.mubr.bf16.gmra.mxu1 %v18929_v24  ;;  %v17238_v4 = vpop.f32.mrf.mxu0 }
 0x1c2   : > { %4718 = vmatprep.mubr.bf16.mxu1 %v18931_v26  ;;  %18574 = vmatpush3.bf16.msra.mxu1 %v18987_v40  ;;  %v17239_v5 = vadd.f32 %v17238_v4, %v17237_v1  ;;  %v17135_v9 = vpop.f32.mrf.mxu1  ;;  %v18994_v4 = vld [vmem:[#allocation4 + $0x3b8] ss:$36 sps:$4 sm:$0xff]  }
 0x1c3   : > { %18575 = vmatprep.subr.bf16.mxu1 %v19000_v27  ;;  %v17240_v7 = vpop.f32.mrf.mxu0  ;;  %v17136_v11 = vadd.f32 %v17135_v9, %v17134_v6  ;;  %v18996_v9 = vld [vmem:[#allocation4 + $0x404] ss:$36 sps:$4 sm:$0xff]  }
 0x1c4   : > { %v20536_v8 = vadd.f32 %v17239_v5, %v20498_v17 }
 0x1c5   : > { %v17241_v13 = vpop.f32.mrf.mxu0 }
 0x1c6   : > { %18576 = vmatpush3.bf16.msra.mxu1 %v19000_v27  ;;  %4872 = vmatmul.mubr.bf16.gmra.mxu0 %v18937_v30  ;;  %v17242_v14 = vadd.f32 %v17241_v13, %v17240_v7  ;;  %v18995_v7 = vld [vmem:[#allocation4 + $0x378] ss:$36 sps:$4 sm:$0xff]   ;;  %v18998_v13 = vld [vmem:[#allocation4 + $0x3c4] ss:$36 sps:$4 sm:$0xff]  }
 0x1c7   : > { %4879 = vmatprep.mubr.bf16.mxu0 %v18940_v33  ;;  %v18982_v33 = vld [vmem:[#allocation4 + $0x2e8] ss:$36 sps:$4 sm:$0xff]  }
 0x1c8   : > { %v20538_v22 = vadd.f32 %v17242_v14, %v17130_v12 }
 0x1c9   : > { %4719 = vmatmul.mubr.bf16.gmra.mxu1 %v18936_v29  ;;  %v17137_v18 = vpop.f32.mrf.mxu1  ;;  %v18981_v29 = vld [vmem:[#allocation4 + $0x328] ss:$36 sps:$4 sm:$0xff]  }
 0x1ca   : > { %4726 = vmatprep.mubr.bf16.mxu1 %v18938_v31  ;;  %v17243_v20 = vpop.f32.mrf.mxu0 }
 0x1cb   : > { %v17138_v23 = vpop.f32.mrf.mxu1 }
 0x1cc   : > { %v17139_v17 = vadd.f32 %v17138_v23, %v17137_v18  ;;  %v17244_v40 = vpop.f32.mrf.mxu0 }
 0x1cd   : > { %v17245_v24 = vadd.f32 %v17244_v40, %v17243_v20  ;;  %v17140_v25 = vpop.f32.mrf.mxu1  ;;  %v19031_v40 = vld [vmem:[%s23931_s7 + $0x30] sm:$0xff]  }
 0x1ce   : > { %4880 = vmatmul.mubr.bf16.gmra.mxu0 %v18943_v37  ;;  %v17246_v26 = vpop.f32.mrf.mxu0 }
 0x1cf   : > { %4887 = vmatprep.mubr.bf16.mxu0 %v18946_v39  ;;  %v20540_v27 = vadd.f32 %v17245_v24, %v17133_v3  ;;  %v17141_v28 = vpop.f32.mrf.mxu1  ;;  %v18985_v39 = vld [vmem:[#allocation4 + $0x334] ss:$36 sps:$4 sm:$0xff]  }
 0x1d0   : > { %v17142_v30 = vadd.f32 %v17141_v28, %v17140_v25  ;;  %v17247_v31 = vpop.f32.mrf.mxu0 }
 0x1d1   : > { %4727 = vmatmul.mubr.bf16.gmra.mxu1 %v18942_v34  ;;  %v18983_v34 = vld [vmem:[#allocation4 + $0x374] ss:$36 sps:$4 sm:$0xff]   ;;  %v17248_v37 = vadd.f32 %v17247_v31, %v17246_v26  ;;  %v19001_v26 = vld [vmem:[#allocation4 + $0x400] ss:$36 sps:$4 sm:$0xff]   ;;  %v19003_v31 = vld [vmem:[#allocation4 + $0x44c] ss:$36 sps:$4 sm:$0xff]  }
 0x1d2   : > { %4734 = vmatprep.mubr.bf16.mxu1 %v18944_v38 }
 0x1d4   : > { %v17143_v38 = vpop.f32.mrf.mxu1 }
 0x1d6   : > { %4888 = vmatmul.mubr.bf16.gmra.mxu0 %v18950_v42  ;;  %v20542_v42 = vadd.f32 %v17248_v37, %v17136_v11  ;;  %v19005_v37 = vld [vmem:[#allocation4 + $0x40c] ss:$36 sps:$4 sm:$0xff]  }
 0x1d7   : > { %4895 = vmatprep.mubr.bf16.mxu0 %v18953_v45 }
 0x1d9   : > { %4735 = vmatmul.mubr.bf16.gmra.mxu1 %v18949_v43  ;;  %v17249_v43 = vpop.f32.mrf.mxu0 }
 0x1da   : > { %4742 = vmatprep.mubr.bf16.mxu1 %v18951_v44  ;;  %v17144_v44 = vpop.f32.mrf.mxu1 }
 0x1db   : > { %v17145_v45 = vadd.f32 %v17144_v44, %v17143_v38 }
 0x1de   : > { %4896 = vmatmul.mubr.bf16.gmra.mxu0 %v18956_v47 }
 0x1df   : > { %4903 = vmatprep.mubr.bf16.mxu0 %v18959_v41 }
 0x1e1   : > { %4743 = vmatmul.mubr.bf16.gmra.mxu1 %v18955_v46  ;;  %v17250_v46 = vpop.f32.mrf.mxu0 }
 0x1e2   : > { %4750 = vmatprep.mubr.bf16.mxu1 %v18957_v32  ;;  %v17251_v47 = vadd.f32 %v17250_v46, %v17249_v43  ;;  %v17146_v32 = vpop.f32.mrf.mxu1 }
 0x1e3   : > { %v17252_v41 = vpop.f32.mrf.mxu0 }
 0x1e4   : > { %v20550_v50 = vadd.f32 %v17251_v47, %v17139_v17  ;;  %v17147_v51 = vpop.f32.mrf.mxu1  ;;  %v19030_v17 = vld [vmem:[%s23931_s7 + $0x70] sm:$0xff]  }
 0x1e5   : > { %v17148_v53 = vadd.f32 %v17147_v51, %v17146_v32  ;;  %v17253_v54 = vpop.f32.mrf.mxu0  ;;  %17583 = vmatprep.subr.bf16.mxu0 %v19030_v17  ;;  %v19010_v51 = vld [vmem:[#allocation4 + $0x454] ss:$36 sps:$4 sm:$0xff]  }
 0x1e6   : > { %4904 = vmatmul.mubr.bf16.gmra.mxu0 %v18963_v35  ;;  %v18989_v35 = vld [vmem:[#allocation4 + $0x330] ss:$36 sps:$4 sm:$0xff]   ;;  %v17149_v56 = vpop.f32.mrf.mxu1 }
 0x1e7   : > { %4911 = vmatprep.mubr.bf16.mxu0 %v18966_v55  ;;  %v17254_v55 = vadd.f32 %v17253_v54, %v17252_v41  ;;  %v17255_v58 = vpop.f32.mrf.mxu0  ;;  %17584 = vmatpush3.bf16.msra.mxu0 %v19031_v40  ;;  %v19008_v54 = vld [vmem:[#allocation4 + $0x408] ss:$36 sps:$4 sm:$0xff]  }
 0x1e9   : > { %4751 = vmatmul.mubr.bf16.gmra.mxu1 %v18962_v52  ;;  %v18988_v52 = vld [vmem:[#allocation4 + $0x370] ss:$36 sps:$4 sm:$0xff]   ;;  %v20552_v60 = vadd.f32 %v17254_v55, %v17142_v30  ;;  %v19002_v30 = vld [vmem:[#allocation4 + $0x3c0] ss:$36 sps:$4 sm:$0xff]  }
 0x1ea   : > { %4758 = vmatprep.mubr.bf16.mxu1 %v18964_v36  ;;  %v18990_v36 = vld [vmem:[#allocation4 + $0x3bc] ss:$36 sps:$4 sm:$0xff]  }
 0x1ee   : > { %4912 = vmatmul.mubr.bf16.gmra.mxu0 %v18969_v62 }
 0x1ef   : > { %4919 = vmatprep.mubr.bf16.mxu0 %v18972_v0 }
 0x1f1   : > { %4759 = vmatmul.mubr.bf16.gmra.mxu1 %v18968_v61  ;;  %v17150_v61 = vpop.f32.mrf.mxu1 }
 0x1f2   : > { %4766 = vmatprep.mubr.bf16.mxu1 %v18970_v21  ;;  %v17151_v62 = vadd.f32 %v17150_v61, %v17149_v56  ;;  %v17256_v21 = vpop.f32.mrf.mxu0 }
 0x1f3   : > { %v17257_v63 = vadd.f32 %v17256_v21, %v17255_v58  ;;  %v17152_v0 = vpop.f32.mrf.mxu1 }
 0x1f4   : > { %v17258_v1 = vpop.f32.mrf.mxu0 }
 0x1f5   : > { %v20554_v2 = vadd.f32 %v17257_v63, %v17145_v45  ;;  %v17153_v3 = vpop.f32.mrf.mxu1 }
 0x1f6   : > { %4920 = vmatmul.mubr.bf16.gmra.mxu0 %v18976_v15  ;;  %v17154_v5 = vadd.f32 %v17153_v3, %v17152_v0  ;;  %v17259_v6 = vpop.f32.mrf.mxu0  ;;  %v19032_v3 = vld [vmem:[%s23931_s7 + $0x68] sm:$0xff]  }
 0x1f7   : > { %4927 = vmatprep.mubr.bf16.mxu0 %v18979_v19  ;;  %v17155_v11 = vpop.f32.mrf.mxu1  ;;  %17585 = vmatprep.subr.bf16.mxu0 %v19032_v3 }
 0x1f9   : > { %4767 = vmatmul.mubr.bf16.gmra.mxu1 %v18975_v10  ;;  %v17260_v10 = vadd.f32 %v17259_v6, %v17258_v1  ;;  %v17261_v15 = vpop.f32.mrf.mxu0  ;;  %v17156_v12 = vpop.f32.mrf.mxu1  ;;  %v19012_v1 = vld [vmem:[#allocation4 + $0x450] ss:$36 sps:$4 sm:$0xff]  }
 0x1fa   : > { %4774 = vmatprep.mubr.bf16.mxu1 %v18977_v16  ;;  %v17157_v14 = vadd.f32 %v17156_v12, %v17155_v11  ;;  %v19014_v11 = vld [vmem:[#allocation4 + $0xb0] ss:$36 sps:$4 sm:$0xff]  }
 0x1fb   : > { %v20556_v16 = vadd.f32 %v17260_v10, %v17148_v53  ;;  %v17262_v18 = vpop.f32.mrf.mxu0  ;;  %v17158_v20 = vpop.f32.mrf.mxu1 }
 0x1fc   : > { %v17263_v19 = vadd.f32 %v17262_v18, %v17261_v15 }
 0x1fd   : > { %v17264_v23 = vpop.f32.mrf.mxu0  ;;  %v17159_v25 = vpop.f32.mrf.mxu1 }
 0x1fe   : > { %4928 = vmatmul.mubr.bf16.gmra.mxu0 %v18982_v33  ;;  %v20564_v24 = vadd.f32 %v17263_v19, %v17151_v62  ;;  %v17160_v28 = vadd.f32 %v17159_v25, %v17158_v20 }
 0x1ff   : > { %4935 = vmatprep.mubr.bf16.mxu0 %v18985_v39 }
 0x201   : > { %4775 = vmatmul.mubr.bf16.gmra.mxu1 %v18981_v29  ;;  %v17265_v29 = vpop.f32.mrf.mxu0 }
 0x202   : > { %4782 = vmatprep.mubr.bf16.mxu1 %v18983_v34  ;;  %v17266_v33 = vadd.f32 %v17265_v29, %v17264_v23 }
 0x204   : > { %v20566_v39 = vadd.f32 %v17266_v33, %v17154_v5 }
 0x206   : > { %4936 = vmatmul.mubr.bf16.gmra.mxu0 %v18989_v35  ;;  %v17267_v38 = vpop.f32.mrf.mxu0  ;;  %v19009_v35 = vld [vmem:[#allocation4 + $0x20] ss:$36 sps:$4 sm:$0xff]  }
 0x207   : > { %4943 = vmatprep.mubr.bf16.mxu0 %v18992_v57 }
 0x208   : > { %v17268_v45 = vpop.f32.mrf.mxu0 }
 0x209   : > { %4783 = vmatmul.mubr.bf16.gmra.mxu1 %v18988_v52  ;;  %v17269_v46 = vadd.f32 %v17268_v45, %v17267_v38 }
 0x20a   : > { %4790 = vmatprep.mubr.bf16.mxu1 %v18990_v36  ;;  %v17270_v32 = vpop.f32.mrf.mxu0 }
 0x20b   : > { %v20568_v41 = vadd.f32 %v17269_v46, %v17157_v14 }
 0x20c   : > { %v17271_v53 = vpop.f32.mrf.mxu0 }
 0x20d   : > { %v17272_v36 = vadd.f32 %v17271_v53, %v17270_v32  ;;  %v19017_v53 = vld [vmem:[#allocation4 + $0x188] ss:$36 sps:$4 sm:$0xff]  }
 0x20e   : > { %4944 = vmatmul.mubr.bf16.gmra.mxu0 %v18995_v7  ;;  %v19013_v7 = vld [vmem:[#allocation4 + $0x68] ss:$36 sps:$4 sm:$0xff]  }
 0x20f   : > { %4951 = vmatprep.mubr.bf16.mxu0 %v18998_v13  ;;  %v20570_v57 = vadd.f32 %v17272_v36, %v17160_v28  ;;  %v19015_v28 = vld [vmem:[#allocation4 + $0xf8] ss:$36 sps:$4 sm:$0xff]   ;;  %v19018_v36 = vld [vmem:[#allocation4 + $0x1d0] ss:$36 sps:$4 sm:$0xff]  }
 0x211   : > { %4791 = vmatmul.mubr.bf16.gmra.mxu1 %v18994_v4  ;;  %v19033_v4 = vld [vmem:[%s23931_s7 + $0x28] sm:$0xff]  }
 0x212   : > { %4798 = vmatprep.mubr.bf16.mxu1 %v18996_v9  ;;  %17586 = vmatpush3.bf16.msra.mxu0 %v19033_v4 }
 0x216   : > { %4952 = vmatmul.mubr.bf16.gmra.mxu0 %v19002_v30 }
 0x217   : > { %4959 = vmatprep.mubr.bf16.mxu0 %v19005_v37 }
 0x219   : > { %v17161_v34 = vpop.f32.mrf.mxu1  ;;  %4799 = vmatmul.mubr.bf16.gmra.mxu1 %v19001_v26 }
 0x21a   : > { %4806 = vmatprep.mubr.bf16.mxu1 %v19003_v31  ;;  %v19016_v31 = vld [vmem:[#allocation4 + $0x140] ss:$36 sps:$4 sm:$0xff]  }
 0x21b   : > { %v17162_v43 = vpop.f32.mrf.mxu1 }
 0x21c   : > { %v17163_v44 = vadd.f32 %v17162_v43, %v17161_v34 }
 0x21d   : > { %v17164_v47 = vpop.f32.mrf.mxu1 }
 0x21e   : > { %v17273_v56 = vpop.f32.mrf.mxu0  ;;  %4960 = vmatmul.mubr.bf16.gmra.mxu0 %v19008_v54 }
 0x21f   : > { %v17165_v48 = vpop.f32.mrf.mxu1  ;;  %4967 = vmatprep.mubr.bf16.mxu0 %v19010_v51 }
 0x220   : > { %v17166_v52 = vadd.f32 %v17165_v48, %v17164_v47  ;;  %v17274_v62 = vpop.f32.mrf.mxu0  ;;  %v19034_v48 = vld [vmem:[%s23931_s7 + $0x60] sm:$0xff]  }
 0x221   : > { %v17167_v55 = vpop.f32.mrf.mxu1  ;;  %4807 = vmatmul.mubr.bf16.gmra.mxu1 %v19007_v49  ;;  %v17275_v21 = vadd.f32 %v17274_v62, %v17273_v56  ;;  %v19035_v49 = vld [vmem:[%s23931_s7 + $0x20] sm:$0xff]   ;;  %17587 = vmatprep.subr.bf16.mxu0 %v19034_v48 }
 0x222   : > { %18577 = vmatprep.mubr.bf16.mxu1 %v19009_v35  ;;  %v17276_v0 = vpop.f32.mrf.mxu0  ;;  %17588 = vmatpush3.bf16.msra.mxu0 %v19035_v49 }
 0x223   : > { %v17168_v58 = vpop.f32.mrf.mxu1  ;;  %v20578_v5 = vadd.f32 %v17275_v21, %v17163_v44 }
 0x224   : > { %v17169_v61 = vadd.f32 %v17168_v58, %v17167_v55  ;;  %v17277_v10 = vpop.f32.mrf.mxu0 }
 0x225   : > { %v17170_v63 = vpop.f32.mrf.mxu1  ;;  %v17278_v13 = vadd.f32 %v17277_v10, %v17276_v0 }
 0x226   : > { %v17279_v12 = vpop.f32.mrf.mxu0  ;;  %4968 = vmatmul.mubr.bf16.gmra.mxu0 %v19012_v1 }
 0x227   : > { %v17171_v6 = vpop.f32.mrf.mxu1  ;;  %v20580_v14 = vadd.f32 %v17278_v13, %v17166_v52 }
 0x228   : > { %v17172_v9 = vadd.f32 %v17171_v6, %v17170_v63  ;;  %v17280_v20 = vpop.f32.mrf.mxu0 }
 0x229   : > { %v17173_v15 = vpop.f32.mrf.mxu1  ;;  %18578 = vmatmul.mubr.bf16.vlgmr.msra.gmra.mxu1 %v19013_v7  ;;  %v17281_v23 = vadd.f32 %v17280_v20, %v17279_v12  ;;  %v19019_v7 = vld [vmem:[#allocation4 + $0x218] ss:$36 sps:$4 sm:$0xff]  }
 0x22a   : > { %18581 = vmatprep.mubr.bf16.mxu1 %v19014_v11  ;;  %v17282_v40 = vpop.f32.mrf.mxu0  ;;  %v19020_v11 = vld [vmem:[#allocation4 + $0x260] ss:$36 sps:$4 sm:$0xff]  }
 0x22b   : > { %v17174_v18 = vpop.f32.mrf.mxu1  ;;  %v20582_v25 = vadd.f32 %v17281_v23, %v17169_v61 }
 0x22c   : > { %v17175_v19 = vadd.f32 %v17174_v18, %v17173_v15  ;;  %v17283_v30 = vpop.f32.mrf.mxu0 }
 0x22d   : > { %v17176_v17 = vpop.f32.mrf.mxu1  ;;  %v17284_v33 = vadd.f32 %v17283_v30, %v17282_v40 }
 0x22e   : > { %v17285_v37 = vpop.f32.mrf.mxu0 }
 0x22f   : > { %v17177_v26 = vpop.f32.mrf.mxu1  ;;  %v20584_v38 = vadd.f32 %v17284_v33, %v17172_v9  ;;  %v19021_v33 = vld [vmem:[#allocation4 + $0x2a8] ss:$36 sps:$4 sm:$0xff]  }
 0x230   : > { %v17178_v29 = vadd.f32 %v17177_v26, %v17176_v17  ;;  %v17286_v45 = vpop.f32.mrf.mxu0 }
 0x231   : > { %v17179_v34 = vpop.f32.mrf.mxu1  ;;  %18582 = vmatmul.mubr.bf16.gmra.mxu1 %v19015_v28  ;;  %v17287_v46 = vadd.f32 %v17286_v45, %v17285_v37  ;;  %v19036_v28 = vld [vmem:[%s23931_s7 + $0x58] sm:$0xff]  }
 0x232   : > { %18585 = vmatprep.mubr.bf16.mxu1 %v19016_v31  ;;  %v17288_v32 = vpop.f32.mrf.mxu0  ;;  %17589 = vmatprep.subr.bf16.mxu0 %v19036_v28 }
 0x233   : > { %v17180_v43 = vpop.f32.mrf.mxu1  ;;  %v20592_v51 = vadd.f32 %v17287_v46, %v17175_v19 }
 0x234   : > { %v17181_v44 = vadd.f32 %v17180_v43, %v17179_v34  ;;  %v17289_v35 = vpop.f32.mrf.mxu0  ;;  %v19022_v43 = vld [vmem:[#allocation4 + $0x2f0] ss:$36 sps:$4 sm:$0xff]  }
 0x235   : > { %v17182_v47 = vpop.f32.mrf.mxu1  ;;  %v17290_v55 = vadd.f32 %v17289_v35, %v17288_v32 }
 0x236   : > { %v17291_v58 = vpop.f32.mrf.mxu0 }
 0x237   : > { %v17183_v52 = vpop.f32.mrf.mxu1  ;;  %v20594_v61 = vadd.f32 %v17290_v55, %v17178_v29  ;;  %v19037_v29 = vld [vmem:[%s23931_s7 + $0x18] sm:$0xff]  }
 0x238   : > { %v17184_v54 = vadd.f32 %v17183_v52, %v17182_v47  ;;  %v17292_v63 = vpop.f32.mrf.mxu0  ;;  %17590 = vmatpush3.bf16.msra.mxu0 %v19037_v29  ;;  %v19023_v55 = vld [vmem:[#allocation4 + $0x338] ss:$36 sps:$4 sm:$0xff]  }
 0x239   : > { %v17185_v56 = vpop.f32.mrf.mxu1  ;;  %18586 = vmatmul.mubr.bf16.gmra.mxu1 %v19017_v53  ;;  %v17293_v0 = vadd.f32 %v17292_v63, %v17291_v58  ;;  %v19024_v58 = vld [vmem:[#allocation4 + $0x380] ss:$36 sps:$4 sm:$0xff]  }
 0x23a   : > { %18589 = vmatprep.mubr.bf16.mxu1 %v19018_v36  ;;  %v17294_v3 = vpop.f32.mrf.mxu0 }
 0x23b   : > { %v17186_v62 = vpop.f32.mrf.mxu1  ;;  %v20596_v4 = vadd.f32 %v17293_v0, %v17181_v44 }
 0x23c   : > { %v17187_v21 = vadd.f32 %v17186_v62, %v17185_v56  ;;  %v17295_v10 = vpop.f32.mrf.mxu0 }
 0x23d   : > { %v17188_v1 = vpop.f32.mrf.mxu1  ;;  %v17296_v13 = vadd.f32 %v17295_v10, %v17294_v3 }
 0x23e   : > { %v17297_v12 = vpop.f32.mrf.mxu0 }
 0x23f   : > { %v17189_v6 = vpop.f32.mrf.mxu1  ;;  %v20598_v18 = vadd.f32 %v17296_v13, %v17184_v54  ;;  %v19039_v13 = vld [vmem:[%s23931_s7 + $0x10] sm:$0xff]  }
 0x240   : > { %v17190_v9 = vadd.f32 %v17189_v6, %v17188_v1  ;;  %v17298_v23 = vpop.f32.mrf.mxu0 }
 0x241   : > { %v17191_v15 = vpop.f32.mrf.mxu1  ;;  %18590 = vmatmul.mubr.bf16.gmra.mxu1 %v19019_v7  ;;  %v17299_v17 = vadd.f32 %v17298_v23, %v17297_v12  ;;  %v19026_v23 = vld [vmem:[#allocation4 + $0x410] ss:$36 sps:$4 sm:$0xff]  }
 0x242   : > { %18593 = vmatprep.mubr.bf16.mxu1 %v19020_v11  ;;  %v17300_v26 = vpop.f32.mrf.mxu0  ;;  %v19038_v11 = vld [vmem:[%s23931_s7 + $0x50] sm:$0xff]  }
 0x243   : > { %v17192_v19 = vpop.f32.mrf.mxu1  ;;  %v20606_v30 = vadd.f32 %v17299_v17, %v17187_v21  ;;  %17591 = vmatprep.subr.bf16.mxu0 %v19038_v11 }
 0x244   : > { %v17193_v20 = vadd.f32 %v17192_v19, %v17191_v15  ;;  %v17301_v37 = vpop.f32.mrf.mxu0  ;;  %v19025_v19 = vld [vmem:[#allocation4 + $0x3c8] ss:$36 sps:$4 sm:$0xff]   ;;  %17592 = vmatpush3.bf16.msra.mxu0 %v19039_v13 }
 0x245   : > { %v17194_v40 = vpop.f32.mrf.mxu1  ;;  %v17302_v44 = vadd.f32 %v17301_v37, %v17300_v26 }
 0x246   : > { %v17303_v46 = vpop.f32.mrf.mxu0 }
 0x247   : > { %v17195_v31 = vpop.f32.mrf.mxu1  ;;  %v20608_v47 = vadd.f32 %v17302_v44, %v17190_v9 }
 0x248   : > { %v17196_v34 = vadd.f32 %v17195_v31, %v17194_v40  ;;  %v17304_v49 = vpop.f32.mrf.mxu0 }
 0x249   : > { %v17197_v45 = vpop.f32.mrf.mxu1  ;;  %18594 = vmatmul.mubr.bf16.gmra.mxu1 %v19021_v33  ;;  %v17305_v52 = vadd.f32 %v17304_v49, %v17303_v46 }
 0x24a   : > { %18597 = vmatprep.mubr.bf16.mxu1 %v19022_v43  ;;  %v17306_v54 = vpop.f32.mrf.mxu0 }
 0x24b   : > { %v17198_v32 = vpop.f32.mrf.mxu1  ;;  %v20610_v35 = vadd.f32 %v17305_v52, %v17193_v20 }
 0x24c   : > { %v17199_v48 = vadd.f32 %v17198_v32, %v17197_v45  ;;  %v17307_v56 = vpop.f32.mrf.mxu0 }
 0x24d   : > { %v17200_v53 = vpop.f32.mrf.mxu1  ;;  %v17308_v62 = vadd.f32 %v17307_v56, %v17306_v54 }
 0x24e   : > { %v17309_v63 = vpop.f32.mrf.mxu0 }
 0x24f   : > { %v17201_v36 = vpop.f32.mrf.mxu1  ;;  %v20612_v0 = vadd.f32 %v17308_v62, %v17196_v34 }
 0x250   : > { %v17310_v6 = vpop.f32.mrf.mxu0  ;;  %v17202_v17 = vadd.f32 %v17201_v36, %v17200_v53 }
 0x251   : > { %v17203_v21 = vpop.f32.mrf.mxu1  ;;  %18598 = vmatmul.mubr.bf16.gmra.mxu1 %v19023_v55  ;;  %v17311_v7 = vadd.f32 %v17310_v6, %v17309_v63  ;;  %v19040_v63 = vld [vmem:[%s23931_s7 + $0x48] sm:$0xff]  }
 0x252   : > { %18601 = vmatprep.mubr.bf16.mxu1 %v19024_v58  ;;  %v17312_v10 = vpop.f32.mrf.mxu0  ;;  %17593 = vmatprep.subr.bf16.mxu0 %v19040_v63 }
 0x253   : > { %v17204_v1 = vpop.f32.mrf.mxu1  ;;  %v20620_v15 = vadd.f32 %v17311_v7, %v17199_v48 }
 0x254   : > { %v17205_v3 = vadd.f32 %v17204_v1, %v17203_v21  ;;  %v17313_v20 = vpop.f32.mrf.mxu0  ;;  %v19041_v1 = vld [vmem:[%s23931_s7 + $0x8] sm:$0xff]  }
 0x255   : > { %v17206_v9 = vpop.f32.mrf.mxu1  ;;  %v17314_v40 = vadd.f32 %v17313_v20, %v17312_v10  ;;  %17594 = vmatpush3.bf16.msra.mxu0 %v19041_v1 }
 0x256   : > { %v17315_v28 = vpop.f32.mrf.mxu0 }
 0x257   : > { %v17207_v12 = vpop.f32.mrf.mxu1  ;;  %v20622_v29 = vadd.f32 %v17314_v40, %v17202_v17 }
 0x258   : > { %v17316_v34 = vpop.f32.mrf.mxu0  ;;  %v17208_v48 = vadd.f32 %v17207_v12, %v17206_v9 }
 0x259   : > { %v17209_v26 = vpop.f32.mrf.mxu1  ;;  %18602 = vmatmul.mubr.bf16.gmra.mxu1 %v19025_v19  ;;  %v17317_v37 = vadd.f32 %v17316_v34, %v17315_v28 }
 0x25a   : > { %18605 = vmatprep.mubr.bf16.mxu1 %v19026_v23  ;;  %v17318_v44 = vpop.f32.mrf.mxu0 }
 0x25b   : > { %v17210_v31 = vpop.f32.mrf.mxu1  ;;  %v20624_v45 = vadd.f32 %v17317_v37, %v17205_v3 }
 0x25c   : > { %v17211_v33 = vadd.f32 %v17210_v31, %v17209_v26  ;;  %v17319_v32 = vpop.f32.mrf.mxu0 }
 0x25d   : > { %v17212_v43 = vpop.f32.mrf.mxu1  ;;  %v17320_v49 = vadd.f32 %v17319_v32, %v17318_v44 }
 0x25e   : > { %v17321_v53 = vpop.f32.mrf.mxu0 }
 0x25f   : > { %v17213_v46 = vpop.f32.mrf.mxu1  ;;  %v20627_v54 = vadd.f32 %v17320_v49, %v17208_v48 }
 0x260   : > { %v17322_v56 = vpop.f32.mrf.mxu0  ;;  %v17214_v7 = vadd.f32 %v17213_v46, %v17212_v43 }
 0x261   : > { %v17215_v52 = vpop.f32.mrf.mxu1  ;;  %18606 = vmatmul.mubr.bf16.gmra.mxu1 %v20533_v59  ;;  %v17323_v58 = vadd.f32 %v17322_v56, %v17321_v53 }
 0x262   : > { %v17324_v21 = vpop.f32.mrf.mxu0 }
 0x263   : > { %v17216_v36 = vpop.f32.mrf.mxu1  ;;  %v20635_v3 = vadd.f32 %v17323_v58, %v17211_v33 }
 0x264   : > { %v17217_v55 = vadd.f32 %v17216_v36, %v17215_v52  ;;  %v17325_v6 = vpop.f32.mrf.mxu0 }
 0x265   : > { %v17218_v62 = vpop.f32.mrf.mxu1  ;;  %v17326_v9 = vadd.f32 %v17325_v6, %v17324_v21 }
 0x266   : > { %v17327_v11 = vpop.f32.mrf.mxu0 }
 0x267   : > { %v17219_v59 = vpop.f32.mrf.mxu1  ;;  %v20637_v13 = vadd.f32 %v17326_v9, %v17214_v7 }
 0x268   : > { %v17328_v19 = vpop.f32.mrf.mxu0  ;;  %v17220_v37 = vadd.f32 %v17219_v59, %v17218_v62 }
 0x269   : > { %v17349_v10 = vpop.f32.mrf.mxu1  ;;  %v17329_v23 = vadd.f32 %v17328_v19, %v17327_v11 }
 0x26a   : > { %v17330_v26 = vpop.f32.mrf.mxu0 }
 0x26b   : > { %v17350_v12 = vpop.f32.mrf.mxu1  ;;  %v20642_v28 = vadd.f32 %v17329_v23, %v17217_v55 }
 0x26c   : > { %v17351_v20 = vadd.f32 %v17350_v12, %v17349_v10  ;;  %v17331_v33 = vpop.f32.mrf.mxu0 }
 0x26d   : > { %v17352_v17 = vpop.f32.mrf.mxu1  ;;  %24008 = vst [vmem:[#allocation5_spill] sm:$0xff] %v20642_v28  ;;  %v17332_v43 = vadd.f32 %v17331_v33, %v17330_v26 }
 0x26e   : > { %v20640_v40 = vadd.f32 %v17351_v20, %v20536_v8  ;;  %v20647_v32 = vpop.f32.mrf.mxu0 }
 0x26f   : > { %v17353_v31 = vpop.f32.mrf.mxu1  ;;  %v20649_v48 = vadd.f32 %v17332_v43, %v17220_v37 }
 0x270   : > { %v17354_v34 = vadd.f32 %v17353_v31, %v17352_v17  ;;  %v20651_v8 = vpop.f32.mrf.mxu0  ;;  %v19043_v31 = vld [vmem:[%s23931_s7 + $0xb8] sm:$0xff]  }
 0x271   : > { %v17355_v44 = vpop.f32.mrf.mxu1  ;;  %24009 = vst [vmem:[#allocation6_spill] sm:$0xff] %v20649_v48 }
 0x272   : > { %v20645_v46 = vadd.f32 %v17354_v34, %v20538_v22  ;;  %v20656_v55 = vpop.f32.mrf.mxu0 }
 0x273   : > { %v17356_v49 = vpop.f32.mrf.mxu1 }
 0x274   : > { %v17357_v52 = vadd.f32 %v17356_v49, %v17355_v44  ;;  %v20658_v62 = vpop.f32.mrf.mxu0  ;;  %v19045_v44 = vld [vmem:[%s23931_s7 + $0xb0] sm:$0xff]  }
 0x275   : > { %v17358_v53 = vpop.f32.mrf.mxu1 }
 0x276   : > { %v20654_v36 = vadd.f32 %v17357_v52, %v20540_v27  ;;  %v20663_v63 = vpop.f32.mrf.mxu0 }
 0x277   : > { %v17359_v56 = vpop.f32.mrf.mxu1 }
 0x278   : > { %v17360_v58 = vadd.f32 %v17359_v56, %v17358_v53  ;;  %v20665_v6 = vpop.f32.mrf.mxu0  ;;  %v19047_v56 = vld [vmem:[%s23931_s7] sm:$0xff]  }
 0x279   : > { %v17361_v22 = vpop.f32.mrf.mxu1 }
 0x27a   : > { %v20661_v21 = vadd.f32 %v17360_v58, %v20542_v42  ;;  %v20670_v9 = vpop.f32.mrf.mxu0  ;;  %v19042_v42 = vld [vmem:[%s23931_s7 + $0xf8] sm:$0xff]   ;;  %v19048_v58 = vld [vmem:[%s23931_s7 + $0xe8] sm:$0xff]  }
 0x27b   : > { %v17362_v1 = vpop.f32.mrf.mxu1  ;;  %17693 = vmatprep.subr.bf16.mxu1 %v19042_v42 }
 0x27c   : > { %v17363_v59 = vadd.f32 %v17362_v1, %v17361_v22  ;;  %v20672_v12 = vpop.f32.mrf.mxu0  ;;  %17694 = vmatpush3.bf16.msra.mxu1 %v19043_v31 }
 0x27d   : > { %v17364_v7 = vpop.f32.mrf.mxu1 }
 0x27e   : > { %v20668_v27 = vadd.f32 %v17363_v59, %v20550_v50  ;;  %v20680_v23 = vpop.f32.mrf.mxu0 }
 0x27f   : > { %v17365_v10 = vpop.f32.mrf.mxu1 }
 0x280   : > { %v17366_v11 = vadd.f32 %v17365_v10, %v17364_v7  ;;  %v20682_v26 = vpop.f32.mrf.mxu0 }
 0x281   : > { %v17367_v19 = vpop.f32.mrf.mxu1 }
 0x282   : > { %v20678_v20 = vadd.f32 %v17366_v11, %v20552_v60  ;;  %v20690_v37 = vpop.f32.mrf.mxu0  ;;  %v19044_v60 = vld [vmem:[%s23931_s7 + $0xf0] sm:$0xff]  }
 0x283   : > { %v17368_v17 = vpop.f32.mrf.mxu1  ;;  %17695 = vmatprep.subr.bf16.mxu1 %v19044_v60 }
 0x284   : > { %24010 = vst [vmem:[#allocation7_spill] sm:$0xff] %v20678_v20  ;;  %v17369_v50 = vadd.f32 %v17368_v17, %v17367_v19  ;;  %v20698_v52 = vpop.f32.mrf.mxu0  ;;  %17696 = vmatpush3.bf16.msra.mxu1 %v19045_v44  ;;  %v19049_v19 = vld [vmem:[%s23931_s7 + $0xa8] sm:$0xff]  }
 0x285   : > { %v17370_v33 = vpop.f32.mrf.mxu1  ;;  %17697 = vmatprep.subr.bf16.mxu1 %v19048_v58 }
 0x286   : > { %v20688_v34 = vadd.f32 %v17369_v50, %v20554_v2  ;;  %v19046_v2 = vld [vmem:[%s23931_s7 + $0x40] sm:$0xff]   ;;  %v20712_v1 = vpop.f32.mrf.mxu0 }
 0x287   : > { %v17371_v43 = vpop.f32.mrf.mxu1  ;;  %17595 = vmatprep.subr.bf16.mxu0 %v19046_v2 }
 0x288   : > { %v17372_v49 = vadd.f32 %v17371_v43, %v17370_v33  ;;  %v20714_v10 = vpop.f32.mrf.mxu0  ;;  %17596 = vmatpush3.bf16.msra.mxu0 %v19047_v56  ;;  %17698 = vmatpush3.bf16.msra.mxu1 %v19049_v19  ;;  %v19050_v33 = vld [vmem:[%s23931_s7 + $0xe0] sm:$0xff]  }
 0x289   : > { %v17373_v53 = vpop.f32.mrf.mxu1  ;;  %17699 = vmatprep.subr.bf16.mxu1 %v19050_v33 }
 0x28a   : > { %v20710_v22 = vadd.f32 %v17372_v49, %v20556_v16  ;;  %v20722_v16 = vpop.f32.mrf.mxu0 }
 0x28b   : > { %v17374_v59 = vpop.f32.mrf.mxu1 }
 0x28c   : > { %24011 = vst [vmem:[#allocation8_spill] sm:$0xff] %v20710_v22  ;;  %v17375_v7 = vadd.f32 %v17374_v59, %v17373_v53  ;;  %v20724_v31 = vpop.f32.mrf.mxu0  ;;  %v19052_v53 = vld [vmem:[%s23931_s7 + $0xd8] sm:$0xff]   ;;  %v5345_v59 = vld [vmem:[#allocation3 + $0xf] sm:$0xff] }
 0x28d   : > { %v17376_v11 = vpop.f32.mrf.mxu1  ;;  %v16516_v33 = vpack.c.bf16 %v5345_v59, %v5345_v59 }
 0x28e   : > { %v20720_v42 = vadd.f32 %v17375_v7, %v20564_v24  ;;  %v20732_v44 = vpop.f32.mrf.mxu0  ;;  %v19051_v24 = vld [vmem:[%s23931_s7 + $0xa0] sm:$0xff]  }
 0x28f   : > { %v17377_v17 = vpop.f32.mrf.mxu1  ;;  %17700 = vmatpush3.bf16.msra.mxu1 %v19051_v24  ;;  %v19847_v7 = vld [vmem:[#allocation2 + $0x40] sm:$0xff]  ;;  %5505 = vst [vmem:[#allocation4 + $0x24] sm:$0xf] %v16516_v33 }
 0x290   : > { %24012 = vst [vmem:[#allocation9_spill] sm:$0xff] %v20720_v42  ;;  %v17378_v50 = vadd.f32 %v17377_v17, %v17376_v11  ;;  %v20740_v56 = vpop.f32.mrf.mxu0  ;;  %17701 = vmatprep.subr.bf16.mxu1 %v19052_v53  ;;  %v16547_v11 = vpack.c.bf16 %v19847_v7, %v19847_v7 }
 0x291   : > { %v17379_v60 = vpop.f32.mrf.mxu1 }
 0x292   : > { %v20730_v43 = vadd.f32 %v17378_v50, %v20566_v39  ;;  %v5344_v39 = vld [vmem:[#allocation3 + $0x7] sm:$0xff]  ;;  %v20745_v17 = vpop.f32.mrf.mxu0  ;;  %5696 = vst [vmem:[#allocation4 + $0x4] sm:$0xf] %v16547_v11  ;;  %5697 = vst [vmem:[#allocation4 + $0x28] sm:$0xf] %v16547_v11 }
 0x293   : > { %v17380_v49 = vpop.f32.mrf.mxu1  ;;  %v16515_v50 = vpack.c.bf16 %v5344_v39, %v5344_v39 }
 0x294   : > { %24013 = vst [vmem:[#allocation10_spill] sm:$0xff] %v20730_v43  ;;  %v17381_v2 = vadd.f32 %v17380_v49, %v17379_v60  ;;  %v19056_v60 = vld [vmem:[%s23931_s7 + $0x98] sm:$0xff]   ;;  %v20750_v53 = vpop.f32.mrf.mxu0  ;;  %v19057_v43 = vld [vmem:[%s23931_s7 + $0xd0] sm:$0xff]  }
 0x295   : > { %v17382_v58 = vpop.f32.mrf.mxu1  ;;  %5504 = vst [vmem:[#allocation4] sm:$0xf] %v16515_v50  ;;  %17702 = vmatpush3.bf16.msra.mxu1 %v19056_v60  ;;  %v19058_v60 = vld [vmem:[%s23931_s7 + $0x90] sm:$0xff]  }
 0x296   : > { %v20743_v19 = vadd.f32 %v17381_v2, %v20568_v41  ;;  %v9556_v41 = vld [vmem:[#allocation2 + $0x7] sm:$0xff]  ;;  %v9557_v2 = vld [vmem:[#allocation2 + $0xf] sm:$0xff]  ;;  %v20755_v39 = vpop.f32.mrf.mxu0  ;;  %17703 = vmatprep.subr.bf16.mxu1 %v19057_v43  ;;  %v19059_v43 = vld [vmem:[%s23931_s7 + $0x178] sm:$0xff]  }
 0x297   : > { %v17383_v49 = vpop.f32.mrf.mxu1  ;;  %v16804_v50 = vpack.c.bf16 %v9557_v2, %v9557_v2  ;;  %17805 = vmatprep.subr.bf16.mxu0 %v19059_v43 }
 0x298   : > { %24014 = vst [vmem:[#allocation11_spill] sm:$0xff] %v20743_v19  ;;  %v17384_v24 = vadd.f32 %v17383_v49, %v17382_v58  ;;  %v20760_v58 = vpop.f32.mrf.mxu0  ;;  %v16803_v49 = vpack.c.bf16 %v9556_v41, %v9556_v41  ;;  %v19062_v41 = vld [vmem:[%s23931_s7 + $0x88] sm:$0xff]  }
 0x299   : > { %v17385_v7 = vpop.f32.mrf.mxu1  ;;  %17704 = vmatpush3.bf16.msra.mxu1 %v19058_v60 }
 0x29a   : > { %v20753_v48 = vadd.f32 %v17384_v24, %v20570_v57  ;;  %v20768_v24 = vpop.f32.mrf.mxu0 }
 0x29b   : > { %v17386_v59 = vpop.f32.mrf.mxu1 }
 0x29c   : > { %24015 = vst [vmem:[#allocation12_spill] sm:$0xff] %v20753_v48  ;;  %v17387_v19 = vadd.f32 %v17386_v59, %v17385_v7  ;;  %v19053_v28 = vld [vmem:[#allocation4] ss:$36 sps:$4 sm:$0xff]   ;;  %v20770_v7 = vpop.f32.mrf.mxu0 }
 0x29d   : > { %v17388_v33 = vpop.f32.mrf.mxu1  ;;  %v19055_v59 = vld [vmem:[#allocation4 + $0x4] ss:$36 sps:$4 sm:$0xff]   ;;  %9716 = vst [vmem:[#allocation4] sm:$0xf] %v16803_v49  ;;  %9717 = vst [vmem:[#allocation4 + $0x24] sm:$0xf] %v16804_v50 }
 0x29e   : > { %v20766_v57 = vadd.f32 %v17387_v19, %v20578_v5  ;;  %9908 = vst [vmem:[#allocation4 + $0x4] sm:$0xf] %v16547_v11  ;;  %9909 = vst [vmem:[#allocation4 + $0x28] sm:$0xf] %v16547_v11  ;;  %v19060_v5 = vld [vmem:[%s23931_s7 + $0xc8] sm:$0xff]   ;;  %v20787_v11 = vpop.f32.mrf.mxu0  ;;  %8577 = vmatprep.mubr.bf16.mxu0 %v19055_v59  ;;  %v19063_v49 = vld [vmem:[%s23931_s7 + $0xc0] sm:$0xff]  }
 0x29f   : > { %v17389_v48 = vpop.f32.mrf.mxu1  ;;  %8578 = vmatmul.mubr.bf16.vlgmr.msra.gmra.mxu0 %v19053_v28  ;;  %17705 = vmatprep.subr.bf16.mxu1 %v19060_v5 }
 0x2a0   : > { %24016 = vst [vmem:[#allocation13_spill] sm:$0xff] %v20766_v57  ;;  %v17390_v42 = vadd.f32 %v17389_v48, %v17388_v33  ;;  %v19061_v48 = vld [vmem:[%s23931_s7 + $0x138] sm:$0xff]   ;;  %v20792_v60 = vpop.f32.mrf.mxu0  ;;  %17706 = vmatpush3.bf16.msra.mxu1 %v19062_v41 }
 0x2a1   : > { %v17391_v19 = vpop.f32.mrf.mxu1  ;;  %17806 = vmatpush3.bf16.msra.mxu0 %v19061_v48  ;;  %17707 = vmatprep.subr.bf16.mxu1 %v19063_v49  ;;  %v5729_v48 = vld [vmem:[#allocation3 + $0x11] sm:$0xff] }
 0x2a2   : > { %v20785_v2 = vadd.f32 %v17390_v42, %v20580_v14  ;;  %v19064_v14 = vld [vmem:[%s23931_s7 + $0x80] sm:$0xff]   ;;  %v20800_v43 = vpop.f32.mrf.mxu0  ;;  %v16580_v49 = vpack.c.bf16 %v5729_v48, %v5729_v48 }
 0x2a3   : > { %v17392_v50 = vpop.f32.mrf.mxu1 }
 0x2a4   : > { %24017 = vst [vmem:[#allocation14_spill] sm:$0xff] %v20785_v2  ;;  %v17393_v33 = vadd.f32 %v17392_v50, %v17391_v19  ;;  %v20802_v28 = vpop.f32.mrf.mxu0  ;;  %17708 = vmatpush3.bf16.msra.mxu1 %v19064_v14  ;;  %v5728_v19 = vld [vmem:[#allocation3 + $0x9] sm:$0xff]  ;;  %5889 = vst [vmem:[#allocation4 + $0x2c] sm:$0xf] %v16580_v49 }
 0x2a5   : > { %v17394_v42 = vpop.f32.mrf.mxu1  ;;  %v16579_v20 = vpack.c.bf16 %v5728_v19, %v5728_v19 }
 0x2a6   : > { %v20798_v59 = vadd.f32 %v17393_v33, %v20582_v25  ;;  %v20807_v50 = vpop.f32.mrf.mxu0 }
 0x2a7   : > { %v17395_v2 = vpop.f32.mrf.mxu1  ;;  %5888 = vst [vmem:[#allocation4 + $0x8] sm:$0xf] %v16579_v20 }
 0x2a8   : > { %24018 = vst [vmem:[#allocation15_spill] sm:$0xff] %v20798_v59  ;;  %v17396_v57 = vadd.f32 %v17395_v2, %v17394_v42  ;;  %v20809_v33 = vpop.f32.mrf.mxu0 }
 0x2a9   : > { %v17397_v5 = vpop.f32.mrf.mxu1 }
 0x2aa   : > { %v20805_v41 = vadd.f32 %v17396_v57, %v20584_v38  ;;  %v20814_v14 = vpop.f32.mrf.mxu0  ;;  %v19075_v38 = vld [vmem:[%s23931_s7 + $0x170] sm:$0xff]  }
 0x2ab   : > { %v17398_v22 = vpop.f32.mrf.mxu1  ;;  %24021 = vst [vmem:[#allocation18_spill] sm:$0xff] %v20814_v14  ;;  %v19078_v57 = vld [vmem:[%s23931_s7 + $0x130] sm:$0xff]   ;;  %17807 = vmatprep.subr.bf16.mxu0 %v19075_v38 }
 0x2ac   : > { %24019 = vst [vmem:[#allocation16_spill] sm:$0xff] %v20805_v41  ;;  %v17399_v25 = vadd.f32 %v17398_v22, %v17397_v5  ;;  %v20822_v5 = vpop.f32.mrf.mxu0  ;;  %17808 = vmatpush3.bf16.msra.mxu0 %v19078_v57 }
 0x2ad   : > { %v17400_v2 = vpop.f32.mrf.mxu1  ;;  %24022 = vst [vmem:[#allocation19_spill] sm:$0xff] %v20822_v5 }
 0x2ae   : > { %v20812_v42 = vadd.f32 %v17399_v25, %v20592_v51  ;;  %v20827_v51 = vpop.f32.mrf.mxu0 }
 0x2af   : > { %v17401_v59 = vpop.f32.mrf.mxu1 }
 0x2b0   : > { %24020 = vst [vmem:[#allocation17_spill] sm:$0xff] %v20812_v42  ;;  %v17402_v22 = vadd.f32 %v17401_v59, %v17400_v2  ;;  %v20829_v25 = vpop.f32.mrf.mxu0 }
 0x2b1   : > { %v17403_v20 = vpop.f32.mrf.mxu1 }
 0x2b2   : > { %v20825_v19 = vadd.f32 %v17402_v22, %v20594_v61  ;;  %v20834_v14 = vpop.f32.mrf.mxu0 }
 0x2b3   : > { %v17404_v48 = vpop.f32.mrf.mxu1 }
 0x2b4   : > { %24023 = vst [vmem:[#allocation20_spill] sm:$0xff] %v20825_v19  ;;  %v17405_v49 = vadd.f32 %v17404_v48, %v17403_v20  ;;  %v20836_v5 = vpop.f32.mrf.mxu0 }
 0x2b5   : > { %v17406_v42 = vpop.f32.mrf.mxu1  ;;  %24025 = vst [vmem:[#allocation22_spill] sm:$0xff] %v20836_v5 }
 0x2b6   : > { %v20832_v41 = vadd.f32 %v17405_v49, %v20596_v4  ;;  %v20841_v22 = vpop.f32.mrf.mxu0 }
 0x2b7   : > { %v17407_v59 = vpop.f32.mrf.mxu1 }
 0x2b8   : > { %24024 = vst [vmem:[#allocation21_spill] sm:$0xff] %v20832_v41  ;;  %v17408_v2 = vadd.f32 %v17407_v59, %v17406_v42  ;;  %v20843_v48 = vpop.f32.mrf.mxu0 }
 0x2b9   : > { %v17409_v38 = vpop.f32.mrf.mxu1  ;;  %24027 = vst [vmem:[#allocation24_spill] sm:$0xff] %v20843_v48 }
 0x2ba   : > { %v20839_v61 = vadd.f32 %v17408_v2, %v20598_v18  ;;  %v20848_v49 = vpop.f32.mrf.mxu0 }
 0x2bb   : > { %v17410_v57 = vpop.f32.mrf.mxu1 }
 0x2bc   : > { %24026 = vst [vmem:[#allocation23_spill] sm:$0xff] %v20839_v61  ;;  %v17411_v20 = vadd.f32 %v17410_v57, %v17409_v38  ;;  %v20850_v59 = vpop.f32.mrf.mxu0 }
 0x2bd   : > { %v17412_v19 = vpop.f32.mrf.mxu1 }
 0x2be   : > { %v20846_v4 = vadd.f32 %v17411_v20, %v20606_v30  ;;  %v20855_v2 = vpop.f32.mrf.mxu0  ;;  %v19089_v30 = vld [vmem:[%s23931_s7 + $0x168] sm:$0xff]  }
 0x2bf   : > { %v17413_v41 = vpop.f32.mrf.mxu1  ;;  %17809 = vmatprep.subr.bf16.mxu0 %v19089_v30 }
 0x2c0   : > { %24028 = vst [vmem:[#allocation25_spill] sm:$0xff] %v20846_v4  ;;  %v17414_v42 = vadd.f32 %v17413_v41, %v17412_v19  ;;  %v20857_v57 = vpop.f32.mrf.mxu0  ;;  %v19092_v41 = vld [vmem:[%s23931_s7 + $0x128] sm:$0xff]  }
 0x2c1   : > { %v17415_v5 = vpop.f32.mrf.mxu1  ;;  %17810 = vmatpush3.bf16.msra.mxu0 %v19092_v41  ;;  %v19120_v41 = vld [vmem:[%s23931_s7 + $0x118] sm:$0xff]  }
 0x2c2   : > { %v20853_v18 = vadd.f32 %v17414_v42, %v20608_v47  ;;  %v20868_v47 = vpop.f32.mrf.mxu0 }
 0x2c3   : > { %v17416_v61 = vpop.f32.mrf.mxu1  ;;  %24031 = vst [vmem:[#allocation28_spill] sm:$0xff] %v20868_v47 }
 0x2c4   : > { %24029 = vst [vmem:[#allocation26_spill] sm:$0xff] %v20853_v18  ;;  %v17417_v38 = vadd.f32 %v17416_v61, %v17415_v5  ;;  %v19103_v5 = vld [vmem:[%s23931_s7 + $0x160] sm:$0xff]   ;;  %v20873_v42 = vpop.f32.mrf.mxu0 }
 0x2c5   : > { %v17418_v48 = vpop.f32.mrf.mxu1  ;;  %24032 = vst [vmem:[#allocation29_spill] sm:$0xff] %v20873_v42  ;;  %v19106_v18 = vld [vmem:[%s23931_s7 + $0x120] sm:$0xff]   ;;  %17811 = vmatprep.subr.bf16.mxu0 %v19103_v5 }
 0x2c6   : > { %v20866_v19 = vadd.f32 %v17417_v38, %v20610_v35  ;;  %v19117_v35 = vld [vmem:[%s23931_s7 + $0x158] sm:$0xff]   ;;  %17812 = vmatpush3.bf16.msra.mxu0 %v19106_v18 }
 0x2c7   : > { %v17419_v61 = vpop.f32.mrf.mxu1  ;;  %17813 = vmatprep.subr.bf16.mxu0 %v19117_v35 }
 0x2c8   : > { %24030 = vst [vmem:[#allocation27_spill] sm:$0xff] %v20866_v19  ;;  %v17420_v20 = vadd.f32 %v17419_v61, %v17418_v48  ;;  %v20884_v19 = vpop.f32.mrf.mxu0 }
 0x2c9   : > { %v17421_v4 = vpop.f32.mrf.mxu1 }
 0x2ca   : > { %v20882_v38 = vadd.f32 %v17420_v20, %v20612_v0  ;;  %v20886_v61 = vpop.f32.mrf.mxu0  ;;  %17814 = vmatpush3.bf16.msra.mxu0 %v19120_v41 }
 0x2cb   : > { %v17422_v30 = vpop.f32.mrf.mxu1  ;;  %24034 = vst [vmem:[#allocation31_spill] sm:$0xff] %v20886_v61 }
 0x2cc   : > { %24033 = vst [vmem:[#allocation30_spill] sm:$0xff] %v20882_v38  ;;  %v17423_v48 = vadd.f32 %v17422_v30, %v17421_v4  ;;  %v20894_v47 = vpop.f32.mrf.mxu0  ;;  %v19131_v4 = vld [vmem:[%s23931_s7 + $0x150] sm:$0xff]  }
 0x2cd   : > { %v17424_v42 = vpop.f32.mrf.mxu1  ;;  %17815 = vmatprep.subr.bf16.mxu0 %v19131_v4 }
 0x2ce   : > { %v20892_v5 = vadd.f32 %v17423_v48, %v20620_v15  ;;  %v20896_v38 = vpop.f32.mrf.mxu0 }
 0x2cf   : > { %v17425_v0 = vpop.f32.mrf.mxu1  ;;  %24036 = vst [vmem:[#allocation33_spill] sm:$0xff] %v20896_v38  ;;  %v19134_v38 = vld [vmem:[%s23931_s7 + $0x110] sm:$0xff]  }
 0x2d0   : > { %24035 = vst [vmem:[#allocation32_spill] sm:$0xff] %v20892_v5  ;;  %v17426_v20 = vadd.f32 %v17425_v0, %v17424_v42  ;;  %v20904_v61 = vpop.f32.mrf.mxu0  ;;  %17816 = vmatpush3.bf16.msra.mxu0 %v19134_v38  ;;  %v17466_v38 = vadd.f32 %v20658_v62, %v20656_v55  ;;  %v17481_v55 = vadd.f32 %v20714_v10, %v20712_v1 }
 0x2d1   : > { %v17427_v18 = vpop.f32.mrf.mxu1  ;;  %v17484_v62 = vadd.f32 %v20724_v31, %v20722_v16  ;;  %v17499_v1 = vadd.f32 %v20792_v60, %v20787_v11  ;;  %v24043_v11 = vld [vmem:[#allocation9_spill] sm:$0xff] }
 0x2d2   : > { %v20902_v30 = vadd.f32 %v17426_v20, %v20622_v29  ;;  %v20906_v48 = vpop.f32.mrf.mxu0  ;;  %v20969_v31 = vadd.f32 %v17466_v38, %v20645_v46  ;;  %v24047_v38 = vld [vmem:[#allocation18_spill] sm:$0xff] }
 0x2d3   : > { %v17428_v15 = vpop.f32.mrf.mxu1  ;;  %24038 = vst [vmem:[#allocation35_spill] sm:$0xff] %v20906_v48 }
 0x2d4   : > { %24037 = vst [vmem:[#allocation34_spill] sm:$0xff] %v20902_v30  ;;  %v17429_v35 = vadd.f32 %v17428_v15, %v17427_v18  ;;  %v20911_v41 = vpop.f32.mrf.mxu0 }
 0x2d5   : > { %v17430_v5 = vpop.f32.mrf.mxu1  ;;  %24040 = vst [vmem:[#allocation37_spill] sm:$0xff] %v20911_v41  ;;  %v17463_v41 = vadd.f32 %v20651_v8, %v20647_v32  ;;  %v17478_v8 = vadd.f32 %v20698_v52, %v20690_v37  ;;  %v17496_v52 = vadd.f32 %v20770_v7, %v20768_v24  ;;  %v24042_v24 = vld [vmem:[#allocation7_spill] sm:$0xff] }
 0x2d6   : > { %v20909_v42 = vadd.f32 %v17429_v35, %v20624_v45  ;;  %v20916_v20 = vpop.f32.mrf.mxu0 }
 0x2d7   : > { %v17431_v0 = vpop.f32.mrf.mxu1  ;;  %v4850_v37 = vadd.f32 %v17463_v41, %v20640_v40  ;;  %v20988_v7 = vadd.f32 %v17478_v8, %v24042_v24 }
 0x2d8   : > { %24039 = vst [vmem:[#allocation36_spill] sm:$0xff] %v20909_v42  ;;  %v17432_v29 = vadd.f32 %v17431_v0, %v17430_v5  ;;  %v20921_v18 = vpop.f32.mrf.mxu0 }
 0x2d9   : > { %v17433_v30 = vpop.f32.mrf.mxu1 }
 0x2da   : > { %v20919_v4 = vadd.f32 %v17432_v29, %v20627_v54  ;;  %v20923_v35 = vpop.f32.mrf.mxu0  ;;  %v17469_v54 = vadd.f32 %v20665_v6, %v20663_v63  ;;  %v17475_v29 = vadd.f32 %v20682_v26, %v20680_v23  ;;  %v17487_v63 = vadd.f32 %v20740_v56, %v20732_v44 }
 0x2db   : > { %v17434_v15 = vpop.f32.mrf.mxu1 }
 0x2dc   : > { %v17435_v45 = vadd.f32 %v17434_v15, %v17433_v30  ;;  %v20930_v5 = vpop.f32.mrf.mxu0  ;;  %v17472_v30 = vadd.f32 %v20672_v12, %v20670_v9  ;;  %v17490_v9 = vadd.f32 %v20750_v53, %v20745_v17  ;;  %v17493_v12 = vadd.f32 %v20760_v58, %v20755_v39  ;;  %v20979_v53 = vld [vmem:[#allocation2 + $0x9] sm:$0xff] }
 0x2dd   : > { %v17436_v42 = vpop.f32.mrf.mxu1  ;;  %v4858_v16 = vadd.f32 %v17469_v54, %v20654_v36  ;;  %v20977_v17 = vadd.f32 %v17475_v29, %v20668_v27  ;;  %v20982_v58 = vadd.f32 %v17481_v55, %v20688_v34  ;;  %v24041_v36 = vld [vmem:[#allocation8_spill] sm:$0xff]  ;;  %v20991_v60 = vadd.f32 %v17487_v63, %v24043_v11  ;;  %v24044_v27 = vld [vmem:[#allocation5_spill] sm:$0xff]  ;;  %v24046_v34 = vld [vmem:[#allocation10_spill] sm:$0xff] }
 0x2de   : > { %v20928_v48 = vadd.f32 %v17435_v45, %v20635_v3  ;;  %v20940_v32 = vpop.f32.mrf.mxu0  ;;  %v19145_v3 = vld [vmem:[%s23931_s7 + $0x148] sm:$0xff]   ;;  %v4861_v40 = vadd.f32 %v17472_v30, %v20661_v21  ;;  %v20985_v46 = vadd.f32 %v17484_v62, %v24041_v36  ;;  %v17505_v21 = vadd.f32 %v20809_v33, %v20807_v50  ;;  %v21004_v45 = vld [vmem:[#allocation2 + $0x11] sm:$0xff]  ;;  %v24050_v50 = vld [vmem:[#allocation13_spill] sm:$0xff] }
 0x2df   : > { %v17437_v0 = vpop.f32.mrf.mxu1  ;;  %17817 = vmatprep.subr.bf16.mxu0 %v19145_v3  ;;  %v21002_v41 = vadd.f32 %v17490_v9, %v24046_v34  ;;  %v24048_v54 = vld [vmem:[#allocation19_spill] sm:$0xff]  ;;  %v21014_v33 = vadd.f32 %v17499_v1, %v24050_v50  ;;  %v16867_v8 = vpack.c.bf16 %v20979_v53, %v20979_v53  ;;  %v19148_v55 = vld [vmem:[%s23931_s7 + $0x108] sm:$0xff]   ;;  %v17511_v62 = vadd.f32 %v20829_v25, %v20827_v51  ;;  %v24053_v1 = vld [vmem:[#allocation24_spill] sm:$0xff] }
 0x2e0   : > { %v17438_v15 = vadd.f32 %v17437_v0, %v17436_v42  ;;  %v20960_v26 = vpop.f32.mrf.mxu0  ;;  %v17508_v0 = vadd.f32 %v24048_v54, %v24047_v38  ;;  %v24051_v63 = vld [vmem:[#allocation22_spill] sm:$0xff]  ;;  %v17523_v36 = vadd.f32 %v20857_v57, %v20855_v2  ;;  %v21037_v51 = vld [vmem:[%s23929_s5] ss:$0 sm:$0xff]  ;;  %17818 = vmatpush3.bf16.msra.mxu0 %v19148_v55  ;;  %v24054_v25 = vld [vmem:[#allocation28_spill] sm:$0xff] }
 0x2e1   : > { %v17439_v6 = vpop.f32.mrf.mxu1  ;;  %v24058_v2 = vld [vmem:[#allocation31_spill] sm:$0xff]  ;;  %v24061_v50 = vld [vmem:[#allocation16_spill] sm:$0xff] }
 0x2e2   : > { %v20958_v23 = vadd.f32 %v17438_v15, %v20637_v13  ;;  %v17502_v13 = vadd.f32 %v20802_v28, %v20800_v43  ;;  %v20973_v56 = vpop.f32.mrf.mxu0  ;;  %v24045_v28 = vld [vmem:[#allocation11_spill] sm:$0xff]  ;;  %v24049_v15 = vld [vmem:[#allocation12_spill] sm:$0xff]  ;;  %v17529_v57 = vadd.f32 %v24058_v2, %v20884_v19 }
 0x2e3   : > { %v17440_v10 = vpop.f32.mrf.mxu1  ;;  %v20999_v42 = vadd.f32 %v17493_v12, %v24045_v28  ;;  %v21011_v3 = vadd.f32 %v17496_v52, %v24049_v15  ;;  %v24052_v12 = vld [vmem:[#allocation14_spill] sm:$0xff]  ;;  %v24059_v28 = vld [vmem:[#allocation33_spill] sm:$0xff]  ;;  %v24060_v38 = vld [vmem:[#allocation35_spill] sm:$0xff] }
 0x2e4   : > { %v17441_v44 = vadd.f32 %v17440_v10, %v17439_v6  ;;  %v21008_v30 = vpop.f32.mrf.mxu0  ;;  %v17514_v6 = vadd.f32 %v24051_v63, %v20834_v14  ;;  %v21026_v52 = vadd.f32 %v17502_v13, %v24052_v12  ;;  %v17517_v10 = vadd.f32 %v24053_v1, %v20841_v22  ;;  %v24055_v13 = vld [vmem:[#allocation29_spill] sm:$0xff]  ;;  %v24056_v22 = vld [vmem:[#allocation6_spill] sm:$0xff] }
 0x2e5   : > { %v17442_v39 = vpop.f32.mrf.mxu1  ;;  %v16868_v14 = vpack.c.bf16 %v21004_v45, %v21004_v45  ;;  %v17532_v34 = vadd.f32 %v24059_v28, %v20894_v47  ;;  %v17535_v54 = vadd.f32 %v24060_v38, %v20904_v61  ;;  %v21060_v15 = vld [vmem:[%s23930_s6] ss:$0 sm:$0xff]  ;;  %v24063_v47 = vld [vmem:[#allocation20_spill] sm:$0xff] }
 0x2e6   : > { %v20996_v43 = vadd.f32 %v17441_v44, %v24044_v27  ;;  %v17520_v44 = vadd.f32 %v20850_v59, %v20848_v49  ;;  %v24057_v59 = vld [vmem:[#allocation15_spill] sm:$0xff]  ;;  %v24062_v63 = vld [vmem:[#allocation17_spill] sm:$0xff]  ;;  %v21070_v12 = vadd.f32 %v17514_v6, %v24063_v47  ;;  %v24068_v6 = vld [vmem:[#allocation26_spill] sm:$0xff] }
 0x2e7   : > { %v17443_v29 = vpop.f32.mrf.mxu1  ;;  %v21047_v27 = vadd.f32 %v17505_v21, %v24057_v59  ;;  %v21063_v21 = vadd.f32 %v17508_v0, %v24061_v50  ;;  %v24064_v61 = vld [vmem:[#allocation37_spill] sm:$0xff] }
 0x2e8   : > { %v17444_v9 = vadd.f32 %v17443_v29, %v17442_v39  ;;  %v17526_v39 = vadd.f32 %v24055_v13, %v24054_v25  ;;  %v21055_v29 = vpop.f32.mrf.mxu0  ;;  %v17538_v1 = vadd.f32 %v20916_v20, %v24064_v61  ;;  %v24065_v25 = vld [vmem:[#allocation21_spill] sm:$0xff]  ;;  %v17541_v20 = vadd.f32 %v20923_v35, %v20921_v18 }
 0x2e9   : > { %v18579_v24 = vpop.f32.mrf.mxu1  ;;  %v21075_v13 = vadd.f32 %v17517_v10, %v24065_v25  ;;  %v24067_v0 = vld [vmem:[#allocation25_spill] sm:$0xff]  ;;  %v17544_v35 = vadd.f32 %v20940_v32, %v20930_v5 }
 0x2ea   : > { %v21044_v11 = vadd.f32 %v17444_v9, %v24056_v22  ;;  %v5019_v49 = vadd.f32 %v18579_v24, %v4858_v16  ;;  %v21067_v9 = vadd.f32 %v17511_v62, %v24062_v63  ;;  %v24066_v22 = vld [vmem:[#allocation23_spill] sm:$0xff]  ;;  %v21081_v2 = vadd.f32 %v17523_v36, %v24067_v0  ;;  %v17551_v38 = vpop.f32.mrf.mxu0  ;;  %v24071_v36 = vld [vmem:[#allocation32_spill] sm:$0xff] }
 0x2eb   : > { %v5010_v16 = vpop.f32.mrf.mxu1  ;;  %v21078_v59 = vadd.f32 %v17520_v44, %v24066_v22  ;;  %v21086_v28 = vadd.f32 %v17526_v39, %v24068_v6  ;;  %v24070_v44 = vld [vmem:[#allocation30_spill] sm:$0xff]  ;;  %v21097_v47 = vadd.f32 %v17535_v54, %v24071_v36  ;;  %v21125_v36 = vadd.f32 %v17544_v35, %v20919_v4  ;;  %v19166_v4 = vld [vmem:[%s23931_s7 + $0x100] sm:$0xff]  }
 0x2ec   : > { %v5146_v55 = vmul.f32 %v21037_v51, %v5019_v49  ;;  %v5011_v19 = vadd.f32 %v5010_v16, %v4850_v37  ;;  %v24069_v16 = vld [vmem:[#allocation27_spill] sm:$0xff]  ;;  %v21094_v63 = vadd.f32 %v17532_v34, %v24070_v44  ;;  %v17552_v32 = vpop.f32.mrf.mxu0 }
 0x2ed   : > { %v18580_v24 = vpop.f32.mrf.mxu1  ;;  %v21091_v50 = vadd.f32 %v17529_v57, %v24069_v16  ;;  %v17547_v57 = vadd.f32 %v20973_v56, %v20960_v26 }
 0x2ee   : > { %v5185_v37 = vadd.f32 %v21060_v15, %v5146_v55  ;;  %v5144_v62 = vmul.f32 %v21037_v51, %v5011_v19  ;;  %v5022_v49 = vadd.f32 %v18580_v24, %v4861_v40  ;;  %v19155_v40 = vld [vmem:[%s23931_s7 + $0x1f8] sm:$0xff]   ;;  %v24072_v19 = vld [vmem:[#allocation34_spill] sm:$0xff]  ;;  %v19163_v24 = vld [vmem:[%s23931_s7 + $0x140] sm:$0xff]  }
 0x2ef   : > { %v5013_v10 = vpop.f32.mrf.mxu1  ;;  %v21110_v61 = vadd.f32 %v17538_v1, %v24072_v19  ;;  %17917 = vmatprep.subr.bf16.mxu1 %v19155_v40  ;;  %v24073_v1 = vld [vmem:[#allocation36_spill] sm:$0xff]  ;;  %17819 = vmatprep.subr.bf16.mxu0 %v19163_v24  ;;  %v21143_v24 = vadd.f32 %v17552_v32, %v17551_v38 }
 0x2f0   : > { %vm5217_vm1 = vcmp.gt.f32.partialorder %v5185_v37, 0.0  ;;  %v5249_v39 = vmul.f32 0.01, %v5185_v37  ;;  %v5183_v55 = vadd.f32 %v21060_v15, %v5144_v62  ;;  %v5147_v18 = vmul.f32 %v21037_v51, %v5022_v49  ;;  %17820 = vmatpush3.bf16.msra.mxu0 %v19166_v4 }
 0x2f1   : > { %v5014_v34 = vadd.f32 %v5013_v10, %v20969_v31  ;;  %v18583_v54 = vpop.f32.mrf.mxu1  ;;  %v21119_v62 = vadd.f32 %v17541_v20, %v24073_v1 }
 0x2f2   : > { %v5281_v25 = vsel %vm5217_vm1, %v5185_v37, %v5249_v39  ;;  %vm5215_vm2 = vcmp.gt.f32.partialorder %v5183_v55, 0.0  ;;  %v5247_v22 = vmul.f32 0.01, %v5183_v55  ;;  %v5186_v0 = vadd.f32 %v21060_v15, %v5147_v18 }
 0x2f3   : > { %5314 = vst [vmem:[#allocation3 + $0x48] sm:$0xff] %v5281_v25  ;;  %v16551_v5 = vpack.c.bf16 %v5281_v25, %v5281_v25  ;;  %v5145_v26 = vmul.f32 %v21037_v51, %v5014_v34  ;;  %v5035_v31 = vadd.f32 %v18583_v54, %v20982_v58  ;;  %v5026_v56 = vpop.f32.mrf.mxu1 }
 0x2f4   : > { %v5279_v49 = vsel %vm5215_vm2, %v5183_v55, %v5247_v22  ;;  %vm5218_vm3 = vcmp.gt.f32.partialorder %v5186_v0, 0.0  ;;  %v5250_v6 = vmul.f32 0.01, %v5186_v0  ;;  %v5027_v37 = vadd.f32 %v5026_v56, %v20977_v17  ;;  %v17554_v55 = vpop.f32.mrf.mxu0 }
 0x2f5   : > { %5700 = vst [vmem:[#allocation4 + $0x94] sm:$0xf] %v16551_v5  ;;  %6274 = vst [vmem:[#allocation4 + $0x58] sm:$0xf] %v16551_v5  ;;  %v16549_v10 = vpack.c.bf16 %v5279_v49, %v5279_v49  ;;  %v5184_v16 = vadd.f32 %v21060_v15, %v5145_v26  ;;  %v5150_v44 = vmul.f32 %v21037_v51, %v5035_v31  ;;  %v18584_v58 = vpop.f32.mrf.mxu1 }
 0x2f6   : > { %6849 = vst [vmem:[#allocation4 + $0x1c] sm:$0xf] %v16551_v5  ;;  %5312 = vst [vmem:[#allocation3 + $0x28] sm:$0xff] %v5279_v49  ;;  %v5282_v20 = vsel %vm5218_vm3, %v5186_v0, %v5250_v6  ;;  %v5148_v40 = vmul.f32 %v21037_v51, %v5027_v37  ;;  %v5038_v39 = vadd.f32 %v18584_v58, %v20985_v46  ;;  %v17555_v56 = vpop.f32.mrf.mxu0 }
 0x2f7   : > { %v21130_v17 = vadd.f32 %v17547_v57, %v20928_v48  ;;  %5698 = vst [vmem:[#allocation4 + $0x4c] sm:$0xf] %v16549_v10  ;;  %6272 = vst [vmem:[#allocation4 + $0x10] sm:$0xf] %v16549_v10  ;;  %v16552_v18 = vpack.c.bf16 %v5282_v20, %v5282_v20  ;;  %vm5216_vm4 = vcmp.gt.f32.partialorder %v5184_v16, 0.0  ;;  %v5189_v54 = vadd.f32 %v21060_v15, %v5150_v44  ;;  %v5029_v19 = vpop.f32.mrf.mxu1 }
 0x2f8   : > { %5315 = vst [vmem:[#allocation3 + $0x50] sm:$0xff] %v5282_v20  ;;  %v5248_v34 = vmul.f32 0.01, %v5184_v16  ;;  %v21138_v46 = vadd.f32 %v21055_v29, %v21008_v30  ;;  %v5187_v48 = vadd.f32 %v21060_v15, %v5148_v40  ;;  %v5151_v35 = vmul.f32 %v21037_v51, %v5038_v39 }
 0x2f9   : > { %v5030_v57 = vadd.f32 %v5029_v19, %v20988_v7  ;;  %5701 = vst [vmem:[#allocation4 + $0xb8] sm:$0xf] %v16552_v18  ;;  %6275 = vst [vmem:[#allocation4 + $0x7c] sm:$0xf] %v16552_v18  ;;  %vm5221_vm5 = vcmp.gt.f32.partialorder %v5189_v54, 0.0  ;;  %v18587_v0 = vpop.f32.mrf.mxu1 }
 0x2fa   : > { %6850 = vst [vmem:[#allocation4 + $0x40] sm:$0xf] %v16552_v18  ;;  %v5280_v25 = vsel %vm5216_vm4, %v5184_v16, %v5248_v34  ;;  %v5253_v22 = vmul.f32 0.01, %v5189_v54  ;;  %v5348_v5 = vld [vmem:[#allocation3 + $0x47] sm:$0xff]  ;;  %vm5219_vm6 = vcmp.gt.f32.partialorder %v5187_v48, 0.0  ;;  %v5190_v26 = vadd.f32 %v21060_v15, %v5151_v35 }
 0x2fb   : > { %5313 = vst [vmem:[#allocation3 + $0x30] sm:$0xff] %v5280_v25  ;;  %v16550_v30 = vpack.c.bf16 %v5280_v25, %v5280_v25  ;;  %v5251_v29 = vmul.f32 0.01, %v5187_v48  ;;  %v16519_v31 = vpack.c.bf16 %v5348_v5, %v5348_v5  ;;  %v5149_v38 = vmul.f32 %v21037_v51, %v5030_v57  ;;  %v5042_v1 = vpop.f32.mrf.mxu1 }
 0x2fc   : > { %v5285_v7 = vsel %vm5221_vm5, %v5189_v54, %v5253_v22  ;;  %v5051_v32 = vadd.f32 %v18587_v0, %v20999_v42  ;;  %vm5222_vm7 = vcmp.gt.f32.partialorder %v5190_v26, 0.0  ;;  %v5254_v10 = vmul.f32 0.01, %v5190_v26 }
 0x2fd   : > { %v5346_v49 = vld [vmem:[#allocation3 + $0x27] sm:$0xff]  ;;  %5699 = vst [vmem:[#allocation4 + $0x70] sm:$0xf] %v16550_v30  ;;  %6273 = vst [vmem:[#allocation4 + $0x34] sm:$0xf] %v16550_v30  ;;  %v16555_v6 = vpack.c.bf16 %v5285_v7, %v5285_v7  ;;  %v5283_v37 = vsel %vm5219_vm6, %v5187_v48, %v5251_v29  ;;  %v5188_v58 = vadd.f32 %v21060_v15, %v5149_v38  ;;  %v18588_v42 = vpop.f32.mrf.mxu1 }
 0x2fe   : > { %5318 = vst [vmem:[#allocation3 + $0x88] sm:$0xff] %v5285_v7  ;;  %5508 = vst [vmem:[#allocation4 + $0x90] sm:$0xf] %v16519_v31  ;;  %v16517_v16 = vpack.c.bf16 %v5346_v49, %v5346_v49  ;;  %v16553_v44 = vpack.c.bf16 %v5283_v37, %v5283_v37  ;;  %v5154_v20 = vmul.f32 %v21037_v51, %v5051_v32 }
 0x2ff   : > { %6082 = vst [vmem:[#allocation4 + $0x54] sm:$0xf] %v16519_v31  ;;  %6657 = vst [vmem:[#allocation4 + $0x18] sm:$0xf] %v16519_v31  ;;  %v5349_v40 = vld [vmem:[#allocation3 + $0x4f] sm:$0xff]  ;;  %v21150_v34 = vadd.f32 %v17555_v56, %v17554_v55  ;;  %v5286_v54 = vsel %vm5222_vm7, %v5190_v26, %v5254_v10  ;;  %v5043_v19 = vadd.f32 %v5042_v1, %v20991_v60  ;;  %v5045_v25 = vpop.f32.mrf.mxu1  ;;  %vm5220_vm8 = vcmp.gt.f32.partialorder %v5188_v58, 0.0 }
 0x300   : > { %5316 = vst [vmem:[#allocation3 + $0x68] sm:$0xff] %v5283_v37  ;;  %v5732_v39 = vld [vmem:[#allocation3 + $0x49] sm:$0xff]  ;;  %v5733_v18 = vld [vmem:[#allocation3 + $0x51] sm:$0xff]  ;;  %5704 = vst [vmem:[#allocation4 + $0x124] sm:$0xf] %v16555_v6  ;;  %v5054_v4 = vadd.f32 %v18588_v42, %v21011_v3  ;;  %v16520_v48 = vpack.c.bf16 %v5349_v40, %v5349_v40  ;;  %v16556_v55 = vpack.c.bf16 %v5286_v54, %v5286_v54 }
 0x301   : > { %6278 = vst [vmem:[#allocation4 + $0xe8] sm:$0xf] %v16555_v6  ;;  %6853 = vst [vmem:[#allocation4 + $0xac] sm:$0xf] %v16555_v6  ;;  %v16583_v35 = vpack.c.bf16 %v5732_v39, %v5732_v39  ;;  %v16584_v57 = vpack.c.bf16 %v5733_v18, %v5733_v18  ;;  %v6881_v22 = vld [vmem:[#allocation3 + $0x49] sm:$0xff]  ;;  %v6882_v0 = vld [vmem:[#allocation3 + $0x51] sm:$0xff]  ;;  %v5193_v30 = vadd.f32 %v21060_v15, %v5154_v20  ;;  %v18591_v7 = vpop.f32.mrf.mxu1 }
 0x302   : > { %5506 = vst [vmem:[#allocation4 + $0x48] sm:$0xf] %v16517_v16  ;;  %6080 = vst [vmem:[#allocation4 + $0xc] sm:$0xf] %v16517_v16  ;;  %v5252_v5 = vmul.f32 0.01, %v5188_v58  ;;  %v5152_v60 = vmul.f32 %v21037_v51, %v5043_v19  ;;  %v5155_v31 = vmul.f32 %v21037_v51, %v5054_v4  ;;  %v5046_v56 = vadd.f32 %v5045_v25, %v21002_v41 }
 0x303   : > { %5702 = vst [vmem:[#allocation4 + $0xdc] sm:$0xf] %v16553_v44  ;;  %6276 = vst [vmem:[#allocation4 + $0xa0] sm:$0xf] %v16553_v44  ;;  %v5347_v3 = vld [vmem:[#allocation3 + $0x2f] sm:$0xff]  ;;  %v16771_v38 = vpack.c.bf16 %v6881_v22, %v6881_v22  ;;  %v16772_v32 = vpack.c.bf16 %v6882_v0, %v6882_v0  ;;  %v19186_v10 = vld [vmem:[%s23931_s7 + $0x238] sm:$0xff]   ;;  %v5058_v41 = vpop.f32.mrf.mxu1 }
 0x304   : > { %6851 = vst [vmem:[#allocation4 + $0x64] sm:$0xf] %v16553_v44  ;;  %5319 = vst [vmem:[#allocation3 + $0x90] sm:$0xff] %v5286_v54  ;;  %v5730_v29 = vld [vmem:[#allocation3 + $0x29] sm:$0xff]  ;;  %v5731_v26 = vld [vmem:[#allocation3 + $0x31] sm:$0xff]  ;;  %v16518_v1 = vpack.c.bf16 %v5347_v3, %v5347_v3  ;;  %v5284_v37 = vsel %vm5220_vm8, %v5188_v58, %v5252_v5  ;;  %vm5225_vm9 = vcmp.gt.f32.partialorder %v5193_v30, 0.0  ;;  %v5191_v42 = vadd.f32 %v21060_v15, %v5152_v60 }
 0x305   : > { %5509 = vst [vmem:[#allocation4 + $0xb4] sm:$0xf] %v16520_v48  ;;  %5892 = vst [vmem:[#allocation4 + $0x98] sm:$0xf] %v16583_v35  ;;  %v16581_v49 = vpack.c.bf16 %v5730_v29, %v5730_v29  ;;  %v16582_v6 = vpack.c.bf16 %v5731_v26, %v5731_v26  ;;  %v5352_v16 = vld [vmem:[#allocation3 + $0x87] sm:$0xff]  ;;  %v16554_v44 = vpack.c.bf16 %v5284_v37, %v5284_v37  ;;  %18609 = vmatprep.subr.bf16.mxu0 %v19186_v10 }
 0x306   : > { %5893 = vst [vmem:[#allocation4 + $0xbc] sm:$0xf] %v16584_v57  ;;  %6083 = vst [vmem:[#allocation4 + $0x78] sm:$0xf] %v16520_v48  ;;  %v5257_v20 = vmul.f32 0.01, %v5193_v30  ;;  %v16523_v58 = vpack.c.bf16 %v5352_v16, %v5352_v16  ;;  %v5194_v39 = vadd.f32 %v21060_v15, %v5155_v31  ;;  %v5153_v18 = vmul.f32 %v21037_v51, %v5046_v56 }
 0x307   : > { %6466 = vst [vmem:[#allocation4 + $0x5c] sm:$0xf] %v16583_v35  ;;  %6467 = vst [vmem:[#allocation4 + $0x80] sm:$0xf] %v16584_v57  ;;  %v5350_v40 = vld [vmem:[#allocation3 + $0x67] sm:$0xff]  ;;  %v5067_v54 = vadd.f32 %v18591_v7, %v21047_v27  ;;  %vm5223_vm10 = vcmp.gt.f32.partialorder %v5191_v42, 0.0  ;;  %v18592_v35 = vpop.f32.mrf.mxu1 }
 0x308   : > { %6658 = vst [vmem:[#allocation4 + $0x3c] sm:$0xf] %v16520_v48  ;;  %5705 = vst [vmem:[#allocation4 + $0x148] sm:$0xf] %v16556_v55  ;;  %v16521_v19 = vpack.c.bf16 %v5350_v40, %v5350_v40  ;;  %v5289_v4 = vsel %vm5225_vm9, %v5193_v30, %v5257_v20  ;;  %v5255_v48 = vmul.f32 0.01, %v5191_v42  ;;  %v5192_v0 = vadd.f32 %v21060_v15, %v5153_v18 }
 0x309   : > { %6279 = vst [vmem:[#allocation4 + $0x10c] sm:$0xf] %v16556_v55  ;;  %6854 = vst [vmem:[#allocation4 + $0xd0] sm:$0xf] %v16556_v55  ;;  %v16559_v22 = vpack.c.bf16 %v5289_v4, %v5289_v4  ;;  %vm5226_vm11 = vcmp.gt.f32.partialorder %v5194_v39, 0.0  ;;  %v5061_v29 = vpop.f32.mrf.mxu1 }
 0x30a   : > { %5317 = vst [vmem:[#allocation3 + $0x70] sm:$0xff] %v5284_v37  ;;  %7041 = vst [vmem:[#allocation4 + $0x20] sm:$0xf] %v16771_v38  ;;  %v5258_v27 = vmul.f32 0.01, %v5194_v39  ;;  %v5287_v3 = vsel %vm5223_vm10, %v5191_v42, %v5255_v48  ;;  %vm5224_vm12 = vcmp.gt.f32.partialorder %v5192_v0, 0.0  ;;  %v5158_v38 = vmul.f32 %v21037_v51, %v5067_v54 }
 0x30b   : > { %7042 = vst [vmem:[#allocation4 + $0x44] sm:$0xf] %v16772_v32  ;;  %5507 = vst [vmem:[#allocation4 + $0x6c] sm:$0xf] %v16518_v1  ;;  %v5353_v57 = vld [vmem:[#allocation3 + $0x8f] sm:$0xff]  ;;  %v16557_v26 = vpack.c.bf16 %v5287_v3, %v5287_v3  ;;  %v5059_v32 = vadd.f32 %v5058_v41, %v21014_v33  ;;  %v21179_v42 = vadd.f32 %v21138_v46, %v20958_v23 }
 0x30c   : > { %5890 = vst [vmem:[#allocation4 + $0x50] sm:$0xf] %v16581_v49  ;;  %5891 = vst [vmem:[#allocation4 + $0x74] sm:$0xf] %v16582_v6  ;;  %v5736_v55 = vld [vmem:[#allocation3 + $0x89] sm:$0xff]  ;;  %v5737_v25 = vld [vmem:[#allocation3 + $0x91] sm:$0xff]  ;;  %v16524_v5 = vpack.c.bf16 %v5353_v57, %v5353_v57  ;;  %v5290_v31 = vsel %vm5226_vm11, %v5194_v39, %v5258_v27  ;;  %v21205_v27 = vadd.f32 %v21143_v24, %v20996_v43 }
 0x30d   : > { %6081 = vst [vmem:[#allocation4 + $0x30] sm:$0xf] %v16518_v1  ;;  %6464 = vst [vmem:[#allocation4 + $0x14] sm:$0xf] %v16581_v49  ;;  %v16587_v30 = vpack.c.bf16 %v5736_v55, %v5736_v55  ;;  %v16588_v60 = vpack.c.bf16 %v5737_v25, %v5737_v25  ;;  %v5256_v56 = vmul.f32 0.01, %v5192_v0  ;;  %v16560_v7 = vpack.c.bf16 %v5290_v31, %v5290_v31  ;;  %v18595_v49 = vpop.f32.mrf.mxu1 }
 0x30e   : > { %6465 = vst [vmem:[#allocation4 + $0x38] sm:$0xf] %v16582_v6  ;;  %5703 = vst [vmem:[#allocation4 + $0x100] sm:$0xf] %v16554_v44  ;;  %v5070_v1 = vadd.f32 %v18592_v35, %v21063_v21  ;;  %v5083_v20 = vadd.f32 %v18595_v49, %v21075_v13  ;;  %v19065_v39 = vld [vmem:[#allocation4 + $0x4c] ss:$36 sps:$4 sm:$0xff]   ;;  %v5197_v13 = vadd.f32 %v21060_v15, %v5158_v38 }
 0x30f   : > { %6277 = vst [vmem:[#allocation4 + $0xc4] sm:$0xf] %v16554_v44  ;;  %6852 = vst [vmem:[#allocation4 + $0x88] sm:$0xf] %v16554_v44  ;;  %v5288_v16 = vsel %vm5224_vm12, %v5192_v0, %v5256_v56  ;;  %v5062_v44 = vadd.f32 %v5061_v29, %v21026_v52  ;;  %v5074_v40 = vpop.f32.mrf.mxu1  ;;  %v19160_v52 = vld [vmem:[%s23931_s7 + $0x1b8] sm:$0xff]   ;;  %v5156_v18 = vmul.f32 %v21037_v51, %v5059_v32  ;;  %v21191_v35 = vld [vmem:[%s23931_s7 + $0x1f0] sm:$0xff]   ;;  %8585 = vmatprep.mubr.bf16.mxu0 %v19065_v39 }
 0x310   : > { %5512 = vst [vmem:[#allocation4 + $0x120] sm:$0xf] %v16523_v58  ;;  %6086 = vst [vmem:[#allocation4 + $0xe4] sm:$0xf] %v16523_v58  ;;  %v5159_v23 = vmul.f32 %v21037_v51, %v5070_v1  ;;  %v19067_v54 = vld [vmem:[#allocation4 + $0x8] ss:$36 sps:$4 sm:$0xff]   ;;  %v5162_v55 = vmul.f32 %v21037_v51, %v5083_v20  ;;  %v5075_v25 = vadd.f32 %v5074_v40, %v21067_v9 }
 0x311   : > { %6661 = vst [vmem:[#allocation4 + $0xa8] sm:$0xf] %v16523_v58  ;;  %5322 = vst [vmem:[#allocation3 + $0xc8] sm:$0xff] %v5289_v4  ;;  %v5351_v6 = vld [vmem:[#allocation3 + $0x6f] sm:$0xff]  ;;  %v16558_v58 = vpack.c.bf16 %v5288_v16, %v5288_v16  ;;  %v5157_v46 = vmul.f32 %v21037_v51, %v5062_v44  ;;  %v21209_v0 = vadd.f32 %v21150_v34, %v21044_v11  ;;  %vm5229_vm13 = vcmp.gt.f32.partialorder %v5197_v13, 0.0 }
 0x312   : > { %5510 = vst [vmem:[#allocation4 + $0xd8] sm:$0xf] %v16521_v19  ;;  %6084 = vst [vmem:[#allocation4 + $0x9c] sm:$0xf] %v16521_v19  ;;  %v5734_v37 = vld [vmem:[#allocation3 + $0x69] sm:$0xff]  ;;  %v5735_v10 = vld [vmem:[#allocation3 + $0x71] sm:$0xff]  ;;  %v16522_v33 = vpack.c.bf16 %v5351_v6, %v5351_v6  ;;  %v5198_v45 = vadd.f32 %v21060_v15, %v5159_v23  ;;  %v21217_v43 = vadd.f32 %v21060_v15, %v5162_v55 }
 0x313   : > { %6659 = vst [vmem:[#allocation4 + $0x60] sm:$0xf] %v16521_v19  ;;  %5708 = vst [vmem:[#allocation4 + $0x1b4] sm:$0xf] %v16559_v22  ;;  %v16585_v41 = vpack.c.bf16 %v5734_v37, %v5734_v37  ;;  %v16586_v21 = vpack.c.bf16 %v5735_v10, %v5735_v10  ;;  %v19070_v4 = vld [vmem:[#allocation4 + $0x48] ss:$36 sps:$4 sm:$0xff]   ;;  %v5160_v11 = vmul.f32 %v21037_v51, %v5075_v25 }
 0x314   : > { %6282 = vst [vmem:[#allocation4 + $0x178] sm:$0xf] %v16559_v22  ;;  %6857 = vst [vmem:[#allocation4 + $0x13c] sm:$0xf] %v16559_v22  ;;  %v19069_v19 = vld [vmem:[#allocation4 + $0xc] ss:$36 sps:$4 sm:$0xff]   ;;  %v21195_v22 = vpop.f32.mrf.mxu1  ;;  %8586 = vmatmul.mubr.bf16.gmra.mxu0 %v19070_v4 }
 0x315   : > { %5320 = vst [vmem:[#allocation3 + $0xa8] sm:$0xff] %v5287_v3  ;;  %5513 = vst [vmem:[#allocation4 + $0x144] sm:$0xf] %v16524_v5  ;;  %v19071_v48 = vld [vmem:[#allocation4 + $0x94] ss:$36 sps:$4 sm:$0xff]   ;;  %8738 = vmatprep.mubr.bf16.mxu1 %v19069_v19  ;;  %vm5230_vm15 = vcmp.gt.f32.partialorder %v5198_v45, 0.0  ;;  %v5199_v20 = vadd.f32 %v21060_v15, %v5160_v11 }
 0x316   : > { %5896 = vst [vmem:[#allocation4 + $0x128] sm:$0xf] %v16587_v30  ;;  %5897 = vst [vmem:[#allocation4 + $0x14c] sm:$0xf] %v16588_v60  ;;  %v19073_v53 = vld [vmem:[#allocation4 + $0x54] ss:$36 sps:$4 sm:$0xff]   ;;  %8739 = vmatmul.mubr.bf16.vlgmr.msra.gmra.mxu1 %v19067_v54  ;;  %v21220_v24 = vpop.f32.mrf.mxu1  ;;  %8593 = vmatprep.mubr.bf16.mxu0 %v19071_v48  ;;  %v5086_v48 = vadd.f32 %v21195_v22, %v21078_v59 }
 0x317   : > { %6087 = vst [vmem:[#allocation4 + $0x108] sm:$0xf] %v16524_v5  ;;  %6470 = vst [vmem:[#allocation4 + $0xec] sm:$0xf] %v16587_v30  ;;  %v5195_v30 = vadd.f32 %v21060_v15, %v5156_v18  ;;  %8746 = vmatprep.mubr.bf16.mxu1 %v19073_v53  ;;  %17918 = vmatpush3.bf16.msra.mxu1 %v19160_v52  ;;  %v19162_v49 = vld [vmem:[%s23931_s7 + $0x1b0] sm:$0xff]   ;;  %vm5233_vm1 = vcmp.gt.f32.partialorder %v21217_v43, 0.0 }
 0x318   : > { %6471 = vst [vmem:[#allocation4 + $0x110] sm:$0xf] %v16588_v60  ;;  %6662 = vst [vmem:[#allocation4 + $0xcc] sm:$0xf] %v16524_v5  ;;  %v5356_v57 = vld [vmem:[#allocation3 + $0xc7] sm:$0xff]  ;;  %v18599_v1 = vpop.f32.mrf.mxu1  ;;  %17919 = vmatprep.subr.bf16.mxu1 %v21191_v35  ;;  %vm5231_vm2 = vcmp.gt.f32.partialorder %v5199_v20, 0.0  ;;  %v5078_v35 = vadd.f32 %v21220_v24, %v21070_v12 }
 0x319   : > { %5323 = vst [vmem:[#allocation3 + $0xd0] sm:$0xff] %v5290_v31  ;;  %5706 = vst [vmem:[#allocation4 + $0x16c] sm:$0xf] %v16557_v26  ;;  %v16527_v9 = vpack.c.bf16 %v5356_v57, %v5356_v57  ;;  %v5261_v5 = vmul.f32 0.01, %v5197_v13  ;;  %vm5227_vm14 = vcmp.gt.f32.partialorder %v5195_v30, 0.0  ;;  %v5099_v57 = vadd.f32 %v18599_v1, %v21091_v50 }
 0x31a   : > { %6280 = vst [vmem:[#allocation4 + $0x130] sm:$0xf] %v16557_v26  ;;  %6855 = vst [vmem:[#allocation4 + $0xf4] sm:$0xf] %v16557_v26  ;;  %v5259_v31 = vmul.f32 0.01, %v5195_v30  ;;  %v5090_v39 = vpop.f32.mrf.mxu1 }
 0x31b   : > { %5709 = vst [vmem:[#allocation4 + $0x1d8] sm:$0xf] %v16560_v7  ;;  %6283 = vst [vmem:[#allocation4 + $0x19c] sm:$0xf] %v16560_v7  ;;  %v5293_v26 = vsel %vm5229_vm13, %v5197_v13, %v5261_v5  ;;  %v5262_v44 = vmul.f32 0.01, %v5198_v45  ;;  %17920 = vmatpush3.bf16.msra.mxu1 %v19162_v49  ;;  %v5091_v12 = vadd.f32 %v5090_v39, %v21081_v2 }
 0x31c   : > { %6858 = vst [vmem:[#allocation4 + $0x160] sm:$0xf] %v16560_v7  ;;  %5321 = vst [vmem:[#allocation3 + $0xb0] sm:$0xff] %v5288_v16  ;;  %v16563_v32 = vpack.c.bf16 %v5293_v26, %v5293_v26  ;;  %v5291_v16 = vsel %vm5227_vm14, %v5195_v30, %v5259_v31  ;;  %v19077_v52 = vld [vmem:[#allocation4 + $0x50] ss:$36 sps:$4 sm:$0xff]   ;;  %v18600_v19 = vpop.f32.mrf.mxu1  ;;  %v19167_v25 = vld [vmem:[%s23931_s7 + $0x1e8] sm:$0xff]   ;;  %v5166_v24 = vmul.f32 %v21037_v51, %v5099_v57 }
 0x31d   : > { %7043 = vst [vmem:[#allocation4 + $0x68] sm:$0xf] %v16585_v41  ;;  %7044 = vst [vmem:[#allocation4 + $0x8c] sm:$0xf] %v16586_v21  ;;  %v16561_v40 = vpack.c.bf16 %v5291_v16, %v5291_v16  ;;  %v5294_v13 = vsel %vm5230_vm15, %v5198_v45, %v5262_v44  ;;  %v5263_v54 = vmul.f32 0.01, %v5199_v20  ;;  %17921 = vmatprep.subr.bf16.mxu1 %v19167_v25 }
 0x31e   : > { %5511 = vst [vmem:[#allocation4 + $0xfc] sm:$0xf] %v16522_v33  ;;  %5894 = vst [vmem:[#allocation4 + $0xe0] sm:$0xf] %v16585_v41  ;;  %v16564_v23 = vpack.c.bf16 %v5294_v13, %v5294_v13  ;;  %v19079_v55 = vld [vmem:[#allocation4 + $0xdc] ss:$36 sps:$4 sm:$0xff]   ;;  %8747 = vmatmul.mubr.bf16.gmra.mxu1 %v19077_v52  ;;  %v5093_v50 = vpop.f32.mrf.mxu1 }
 0x31f   : > { %5895 = vst [vmem:[#allocation4 + $0x104] sm:$0xf] %v16586_v21  ;;  %6085 = vst [vmem:[#allocation4 + $0xc0] sm:$0xf] %v16522_v33  ;;  %v5295_v22 = vsel %vm5231_vm2, %v5199_v20, %v5263_v54  ;;  %v19172_v30 = vld [vmem:[%s23931_s7 + $0x1a8] sm:$0xff]   ;;  %v19173_v2 = vld [vmem:[%s23931_s7 + $0x1e0] sm:$0xff]  }
 0x320   : > { %6468 = vst [vmem:[#allocation4 + $0xa4] sm:$0xf] %v16585_v41  ;;  %6469 = vst [vmem:[#allocation4 + $0xc8] sm:$0xf] %v16586_v21  ;;  %v5357_v60 = vld [vmem:[#allocation3 + $0xcf] sm:$0xff]  ;;  %v16565_v45 = vpack.c.bf16 %v5295_v22, %v5295_v22  ;;  %17922 = vmatpush3.bf16.msra.mxu1 %v19172_v30 }
 0x321   : > { %6660 = vst [vmem:[#allocation4 + $0x84] sm:$0xf] %v16522_v33  ;;  %5707 = vst [vmem:[#allocation4 + $0x190] sm:$0xf] %v16558_v58  ;;  %v5740_v3 = vld [vmem:[#allocation3 + $0xc9] sm:$0xff]  ;;  %v5741_v29 = vld [vmem:[#allocation3 + $0xd1] sm:$0xff]  ;;  %v16528_v56 = vpack.c.bf16 %v5357_v60, %v5357_v60  ;;  %v5102_v60 = vadd.f32 %v18600_v19, %v21094_v63  ;;  %17923 = vmatprep.subr.bf16.mxu1 %v19173_v2 }
 0x322   : > { %6281 = vst [vmem:[#allocation4 + $0x154] sm:$0xf] %v16558_v58  ;;  %6856 = vst [vmem:[#allocation4 + $0x118] sm:$0xf] %v16558_v58  ;;  %v16591_v7 = vpack.c.bf16 %v5740_v3, %v5740_v3  ;;  %v16592_v38 = vpack.c.bf16 %v5741_v29, %v5741_v29  ;;  %v19076_v33 = vld [vmem:[#allocation4 + $0x90] ss:$36 sps:$4 sm:$0xff]   ;;  %v18603_v3 = vpop.f32.mrf.mxu1 }
 0x323   : > { %10100 = vst [vmem:[#allocation4 + $0x8] sm:$0xf] %v16867_v8  ;;  %10101 = vst [vmem:[#allocation4 + $0x2c] sm:$0xf] %v16868_v14  ;;  %v5354_v8 = vld [vmem:[#allocation3 + $0xa7] sm:$0xff]  ;;  %v21214_v14 = vadd.f32 %v21060_v15, %v5157_v46  ;;  %v5355_v6 = vld [vmem:[#allocation3 + $0xaf] sm:$0xff]  ;;  %8594 = vmatmul.mubr.bf16.gmra.mxu0 %v19076_v33  ;;  %v5167_v1 = vmul.f32 %v21037_v51, %v5102_v60 }
 0x324   : > { %5516 = vst [vmem:[#allocation4 + $0x1b0] sm:$0xf] %v16527_v9  ;;  %6090 = vst [vmem:[#allocation4 + $0x174] sm:$0xf] %v16527_v9  ;;  %v16525_v34 = vpack.c.bf16 %v5354_v8, %v5354_v8  ;;  %v5738_v37 = vld [vmem:[#allocation3 + $0xa9] sm:$0xff]  ;;  %v5739_v10 = vld [vmem:[#allocation3 + $0xb1] sm:$0xff]  ;;  %v16526_v41 = vpack.c.bf16 %v5355_v6, %v5355_v6  ;;  %8601 = vmatprep.mubr.bf16.mxu0 %v19079_v55  ;;  %v21272_v49 = vpop.f32.mrf.mxu1 }
 0x325   : > { %6665 = vst [vmem:[#allocation4 + $0x138] sm:$0xf] %v16527_v9  ;;  %5326 = vst [vmem:[#allocation3 + $0x108] sm:$0xff] %v5293_v26  ;;  %v16589_v21 = vpack.c.bf16 %v5738_v37, %v5738_v37  ;;  %v16590_v58 = vpack.c.bf16 %v5739_v10, %v5739_v10  ;;  %vm5228_vm0 = vcmp.gt.f32.partialorder %v21214_v14, 0.0  ;;  %v5260_v18 = vmul.f32 0.01, %v21214_v14 }
 0x326   : > { %5514 = vst [vmem:[#allocation4 + $0x168] sm:$0xf] %v16525_v34  ;;  %6088 = vst [vmem:[#allocation4 + $0x12c] sm:$0xf] %v16525_v34  ;;  %v5265_v46 = vmul.f32 0.01, %v21217_v43  ;;  %v21290_v52 = vpop.f32.mrf.mxu1  ;;  %v21295_v19 = vadd.f32 %v21060_v15, %v5167_v1  ;;  %v5107_v60 = vadd.f32 %v21272_v49, %v21097_v47 }
 0x327   : > { %6663 = vst [vmem:[#allocation4 + $0xf0] sm:$0xf] %v16525_v34  ;;  %5517 = vst [vmem:[#allocation4 + $0x1d4] sm:$0xf] %v16528_v56  ;;  %v5292_v4 = vsel %vm5228_vm0, %v21214_v14, %v5260_v18  ;;  %v19081_v5 = vld [vmem:[#allocation4 + $0x9c] ss:$36 sps:$4 sm:$0xff]   ;;  %v5163_v14 = vmul.f32 %v21037_v51, %v5086_v48  ;;  %v5164_v34 = vmul.f32 %v21037_v51, %v5091_v12 }
 0x328   : > { %5900 = vst [vmem:[#allocation4 + $0x1b8] sm:$0xf] %v16591_v7  ;;  %5901 = vst [vmem:[#allocation4 + $0x1dc] sm:$0xf] %v16592_v38  ;;  %v16562_v9 = vpack.c.bf16 %v5292_v4, %v5292_v4  ;;  %v5297_v59 = vsel %vm5233_vm1, %v21217_v43, %v5265_v46  ;;  %v5161_v43 = vmul.f32 %v21037_v51, %v5078_v35  ;;  %8754 = vmatprep.mubr.bf16.mxu1 %v19081_v5  ;;  %v19083_v6 = vld [vmem:[#allocation4 + $0xd8] ss:$36 sps:$4 sm:$0xff]  }
 0x329   : > { %6091 = vst [vmem:[#allocation4 + $0x198] sm:$0xf] %v16528_v56  ;;  %6474 = vst [vmem:[#allocation4 + $0x17c] sm:$0xf] %v16591_v7  ;;  %v16567_v8 = vpack.c.bf16 %v5297_v59, %v5297_v59  ;;  %v5202_v26 = vadd.f32 %v21060_v15, %v5163_v14  ;;  %v5115_v7 = vadd.f32 %v18603_v3, %v21119_v62  ;;  %v19084_v37 = vld [vmem:[#allocation4 + $0x98] ss:$36 sps:$4 sm:$0xff]  }
 0x32a   : > { %6475 = vst [vmem:[#allocation4 + $0x1a0] sm:$0xf] %v16592_v38  ;;  %6666 = vst [vmem:[#allocation4 + $0x15c] sm:$0xf] %v16528_v56  ;;  %v5200_v31 = vadd.f32 %v21060_v15, %v5161_v43  ;;  %v5094_v56 = vadd.f32 %v5093_v50, %v21086_v28  ;;  %v21266_v38 = vadd.f32 %v21060_v15, %v5166_v24  ;;  %v21277_v28 = vld [vmem:[%s23931_s7 + $0x1a0] sm:$0xff]   ;;  %8755 = vmatmul.mubr.bf16.gmra.mxu1 %v19084_v37  ;;  %v19183_v50 = vld [vmem:[%s23931_s7 + $0x198] sm:$0xff]  }
 0x32b   : > { %5712 = vst [vmem:[#allocation4 + $0x244] sm:$0xf] %v16563_v32  ;;  %6286 = vst [vmem:[#allocation4 + $0x208] sm:$0xf] %v16563_v32  ;;  %vm5234_vm3 = vcmp.gt.f32.partialorder %v5202_v26, 0.0  ;;  %v21283_v33 = vmul.f32 %v21037_v51, %v5115_v7  ;;  %8602 = vmatmul.mubr.bf16.gmra.mxu0 %v19083_v6  ;;  %vm5238_vm7 = vcmp.gt.f32.partialorder %v21295_v19, 0.0  ;;  %17924 = vmatpush3.bf16.msra.mxu1 %v21277_v28 }
 0x32c   : > { %6861 = vst [vmem:[#allocation4 + $0x1cc] sm:$0xf] %v16563_v32  ;;  %5324 = vst [vmem:[#allocation3 + $0xe8] sm:$0xff] %v5291_v16  ;;  %v5360_v53 = vld [vmem:[#allocation3 + $0x107] sm:$0xff]  ;;  %v21269_v32 = vadd.f32 %v21060_v15, %v5164_v34  ;;  %v5266_v44 = vmul.f32 0.01, %v5202_v26  ;;  %v21280_v20 = vmul.f32 %v21037_v51, %v5094_v56  ;;  %v5118_v3 = vadd.f32 %v21290_v52, %v21125_v36 }
 0x32d   : > { %5515 = vst [vmem:[#allocation4 + $0x18c] sm:$0xf] %v16526_v41  ;;  %5898 = vst [vmem:[#allocation4 + $0x170] sm:$0xf] %v16589_v21  ;;  %v16531_v11 = vpack.c.bf16 %v5360_v53, %v5360_v53  ;;  %vm5232_vm4 = vcmp.gt.f32.partialorder %v5200_v31, 0.0  ;;  %vm5237_vm5 = vcmp.gt.f32.partialorder %v21266_v38, 0.0 }
 0x32e   : > { %5899 = vst [vmem:[#allocation4 + $0x194] sm:$0xf] %v16590_v58  ;;  %6089 = vst [vmem:[#allocation4 + $0x150] sm:$0xf] %v16526_v41  ;;  %v5298_v46 = vsel %vm5234_vm3, %v5202_v26, %v5266_v44  ;;  %v5264_v54 = vmul.f32 0.01, %v5200_v31 }
 0x32f   : > { %6472 = vst [vmem:[#allocation4 + $0x134] sm:$0xf] %v16589_v21  ;;  %6473 = vst [vmem:[#allocation4 + $0x158] sm:$0xf] %v16590_v58  ;;  %v16568_v25 = vpack.c.bf16 %v5298_v46, %v5298_v46  ;;  %v5269_v12 = vmul.f32 0.01, %v21266_v38 }
 0x330   : > { %6664 = vst [vmem:[#allocation4 + $0x114] sm:$0xf] %v16526_v41  ;;  %7047 = vst [vmem:[#allocation4 + $0xf8] sm:$0xf] %v16589_v21  ;;  %v19085_v41 = vld [vmem:[#allocation4 + $0x124] ss:$36 sps:$4 sm:$0xff]  }
 0x331   : > { %7048 = vst [vmem:[#allocation4 + $0x11c] sm:$0xf] %v16590_v58  ;;  %5710 = vst [vmem:[#allocation4 + $0x1fc] sm:$0xf] %v16561_v40  ;;  %v21288_v21 = vld [vmem:[%s23931_s7 + $0x1d8] sm:$0xff]   ;;  %8609 = vmatprep.mubr.bf16.mxu0 %v19085_v41  ;;  %vm5235_vm6 = vcmp.gt.f32.partialorder %v21269_v32, 0.0  ;;  %v5301_v53 = vsel %vm5237_vm5, %v21266_v38, %v5269_v12 }
 0x332   : > { %6284 = vst [vmem:[#allocation4 + $0x1c0] sm:$0xf] %v16561_v40  ;;  %6859 = vst [vmem:[#allocation4 + $0x184] sm:$0xf] %v16561_v40  ;;  %v5267_v30 = vmul.f32 0.01, %v21269_v32  ;;  %17925 = vmatprep.subr.bf16.mxu1 %v21288_v21  ;;  %v16571_v24 = vpack.c.bf16 %v5301_v53, %v5301_v53 }
 0x333   : > { %5327 = vst [vmem:[#allocation3 + $0x110] sm:$0xff] %v5294_v13  ;;  %5713 = vst [vmem:[#allocation4 + $0x268] sm:$0xf] %v16564_v23  ;;  %v5358_v29 = vld [vmem:[#allocation3 + $0xe7] sm:$0xff]  ;;  %v21335_v7 = vld [vmem:[%s23931_s7 + $0x1d0] sm:$0xff]   ;;  %17926 = vmatpush3.bf16.msra.mxu1 %v19183_v50 }
 0x334   : > { %6287 = vst [vmem:[#allocation4 + $0x22c] sm:$0xf] %v16564_v23  ;;  %6862 = vst [vmem:[#allocation4 + $0x1f0] sm:$0xf] %v16564_v23  ;;  %v16529_v63 = vpack.c.bf16 %v5358_v29, %v5358_v29  ;;  %v19087_v13 = vld [vmem:[#allocation4 + $0xe4] ss:$36 sps:$4 sm:$0xff]   ;;  %v5299_v34 = vsel %vm5235_vm6, %v21269_v32, %v5267_v30  ;;  %17927 = vmatprep.subr.bf16.mxu1 %v21335_v7 }
 0x335   : > { %5325 = vst [vmem:[#allocation3 + $0xf0] sm:$0xff] %v5292_v4  ;;  %5330 = vst [vmem:[#allocation3 + $0x148] sm:$0xff] %v5297_v59  ;;  %8762 = vmatprep.mubr.bf16.mxu1 %v19087_v13  ;;  %v19091_v29 = vld [vmem:[#allocation4 + $0xe0] ss:$36 sps:$4 sm:$0xff]   ;;  %v16569_v26 = vpack.c.bf16 %v5299_v34, %v5299_v34  ;;  %v19093_v32 = vld [vmem:[#allocation4 + $0x16c] ss:$36 sps:$4 sm:$0xff]  }
 0x336   : > { %5328 = vst [vmem:[#allocation3 + $0x128] sm:$0xff] %v5295_v22  ;;  %5711 = vst [vmem:[#allocation4 + $0x220] sm:$0xf] %v16562_v9  ;;  %v5296_v22 = vsel %vm5232_vm4, %v5200_v31, %v5264_v54  ;;  %v21346_v1 = vld [vmem:[%s23931_s7 + $0x190] sm:$0xff]   ;;  %8763 = vmatmul.mubr.bf16.gmra.mxu1 %v19091_v29  ;;  %v19098_v12 = vld [vmem:[#allocation4 + $0x128] ss:$36 sps:$4 sm:$0xff]  }
 0x337   : > { %6285 = vst [vmem:[#allocation4 + $0x1e4] sm:$0xf] %v16562_v9  ;;  %6860 = vst [vmem:[#allocation4 + $0x1a8] sm:$0xf] %v16562_v9  ;;  %v21297_v9 = vpop.f32.mrf.mxu1  ;;  %v16566_v5 = vpack.c.bf16 %v5296_v22, %v5296_v22  ;;  %17928 = vmatpush3.bf16.msra.mxu1 %v21346_v1 }
 0x338   : > { %5716 = vst [vmem:[#allocation4 + $0x2d4] sm:$0xf] %v16567_v8  ;;  %6290 = vst [vmem:[#allocation4 + $0x298] sm:$0xf] %v16567_v8 }
 0x339   : > { %6865 = vst [vmem:[#allocation4 + $0x25c] sm:$0xf] %v16567_v8  ;;  %5714 = vst [vmem:[#allocation4 + $0x28c] sm:$0xf] %v16565_v45  ;;  %v5270_v8 = vmul.f32 0.01, %v21295_v19  ;;  %v18607_v2 = vpop.f32.mrf.mxu1 }
 0x33a   : > { %6288 = vst [vmem:[#allocation4 + $0x250] sm:$0xf] %v16565_v45  ;;  %6863 = vst [vmem:[#allocation4 + $0x214] sm:$0xf] %v16565_v45  ;;  %v5361_v62 = vld [vmem:[#allocation3 + $0x10f] sm:$0xff] }
 0x33b   : > { %5520 = vst [vmem:[#allocation4 + $0x240] sm:$0xf] %v16531_v11  ;;  %6094 = vst [vmem:[#allocation4 + $0x204] sm:$0xf] %v16531_v11  ;;  %v5744_v10 = vld [vmem:[#allocation3 + $0x109] sm:$0xff]  ;;  %v5745_v16 = vld [vmem:[#allocation3 + $0x111] sm:$0xff]  ;;  %v16532_v58 = vpack.c.bf16 %v5361_v62, %v5361_v62  ;;  %v5302_v31 = vsel %vm5238_vm7, %v21295_v19, %v5270_v8  ;;  %v5122_v44 = vpop.f32.mrf.mxu1 }
 0x33c   : > { %6669 = vst [vmem:[#allocation4 + $0x1c8] sm:$0xf] %v16531_v11  ;;  %5518 = vst [vmem:[#allocation4 + $0x1f8] sm:$0xf] %v16529_v63  ;;  %v16595_v40 = vpack.c.bf16 %v5744_v10, %v5744_v10  ;;  %v16596_v39 = vpack.c.bf16 %v5745_v16, %v5745_v16  ;;  %v5359_v18 = vld [vmem:[#allocation3 + $0xef] sm:$0xff]  ;;  %v5364_v57 = vld [vmem:[#allocation3 + $0x147] sm:$0xff]  ;;  %v16572_v47 = vpack.c.bf16 %v5302_v31, %v5302_v31 }
 0x33d   : > { %6092 = vst [vmem:[#allocation4 + $0x1bc] sm:$0xf] %v16529_v63  ;;  %6667 = vst [vmem:[#allocation4 + $0x180] sm:$0xf] %v16529_v63  ;;  %v5742_v51 = vld [vmem:[#allocation3 + $0xe9] sm:$0xff]  ;;  %v5743_v23 = vld [vmem:[#allocation3 + $0xf1] sm:$0xff]  ;;  %v16530_v4 = vpack.c.bf16 %v5359_v18, %v5359_v18  ;;  %v16535_v15 = vpack.c.bf16 %v5364_v57, %v5364_v57  ;;  %v5110_v10 = vadd.f32 %v21297_v9, %v21110_v61  ;;  %v21364_v57 = vpop.f32.mrf.mxu1 }
 0x33e   : > { %5521 = vst [vmem:[#allocation4 + $0x264] sm:$0xf] %v16532_v58  ;;  %5904 = vst [vmem:[#allocation4 + $0x248] sm:$0xf] %v16595_v40  ;;  %v16593_v48 = vpack.c.bf16 %v5742_v51, %v5742_v51  ;;  %v16594_v35 = vpack.c.bf16 %v5743_v23, %v5743_v23  ;;  %v5362_v55 = vld [vmem:[#allocation3 + $0x127] sm:$0xff]  ;;  %v5131_v16 = vadd.f32 %v18607_v2, %v21205_v27 }
 0x33f   : > { %5905 = vst [vmem:[#allocation4 + $0x26c] sm:$0xf] %v16596_v39  ;;  %6095 = vst [vmem:[#allocation4 + $0x228] sm:$0xf] %v16532_v58  ;;  %v16533_v59 = vpack.c.bf16 %v5362_v55, %v5362_v55  ;;  %v21315_v45 = vld [vmem:[%s23930_s6] ss:$0 sm:$0xff] }
 0x340   : > { %6478 = vst [vmem:[#allocation4 + $0x20c] sm:$0xf] %v16595_v40  ;;  %6479 = vst [vmem:[#allocation4 + $0x230] sm:$0xf] %v16596_v39  ;;  %v5204_v14 = vadd.f32 %v21315_v45, %v21280_v20  ;;  %v5209_v43 = vadd.f32 %v21315_v45, %v21283_v33  ;;  %v19090_v11 = vld [vmem:[#allocation4 + $0x120] ss:$36 sps:$4 sm:$0xff]  }
 0x341   : > { %6670 = vst [vmem:[#allocation4 + $0x1ec] sm:$0xf] %v16532_v58  ;;  %5331 = vst [vmem:[#allocation3 + $0x150] sm:$0xff] %v5298_v46  ;;  %v21340_v63 = vld [vmem:[%s23929_s5] ss:$0 sm:$0xff]  ;;  %8610 = vmatmul.mubr.bf16.gmra.mxu0 %v19090_v11  ;;  %v19188_v40 = vld [vmem:[%s23931_s7 + $0x1c8] sm:$0xff]  }
 0x342   : > { %5519 = vst [vmem:[#allocation4 + $0x21c] sm:$0xf] %v16530_v4  ;;  %5902 = vst [vmem:[#allocation4 + $0x200] sm:$0xf] %v16593_v48  ;;  %vm5236_vm8 = vcmp.gt.f32.partialorder %v5204_v14, 0.0  ;;  %vm5241_vm9 = vcmp.gt.f32.partialorder %v5209_v43, 0.0  ;;  %v5168_v38 = vmul.f32 %v21340_v63, %v5107_v60  ;;  %v5171_v62 = vmul.f32 %v21340_v63, %v5118_v3  ;;  %8617 = vmatprep.mubr.bf16.mxu0 %v19093_v32 }
 0x343   : > { %5903 = vst [vmem:[#allocation4 + $0x224] sm:$0xf] %v16594_v35  ;;  %6093 = vst [vmem:[#allocation4 + $0x1e0] sm:$0xf] %v16530_v4  ;;  %v5268_v56 = vmul.f32 0.01, %v5204_v14  ;;  %v5169_v51 = vmul.f32 %v21340_v63, %v5110_v10  ;;  %17929 = vmatprep.subr.bf16.mxu1 %v19188_v40 }
 0x344   : > { %6476 = vst [vmem:[#allocation4 + $0x1c4] sm:$0xf] %v16593_v48  ;;  %6477 = vst [vmem:[#allocation4 + $0x1e8] sm:$0xf] %v16594_v35  ;;  %v5273_v36 = vmul.f32 0.01, %v5209_v43  ;;  %v5207_v13 = vadd.f32 %v21315_v45, %v5168_v38  ;;  %v21359_v18 = vadd.f32 %v21315_v45, %v5171_v62  ;;  %v5125_v38 = vpop.f32.mrf.mxu1 }
 0x345   : > { %6668 = vst [vmem:[#allocation4 + $0x1a4] sm:$0xf] %v16530_v4  ;;  %7051 = vst [vmem:[#allocation4 + $0x188] sm:$0xf] %v16593_v48  ;;  %v5300_v28 = vsel %vm5236_vm8, %v5204_v14, %v5268_v56  ;;  %v19095_v58 = vld [vmem:[#allocation4 + $0x12c] ss:$36 sps:$4 sm:$0xff]  }
 0x346   : > { %7052 = vst [vmem:[#allocation4 + $0x1ac] sm:$0xf] %v16594_v35  ;;  %5717 = vst [vmem:[#allocation4 + $0x2f8] sm:$0xf] %v16568_v25  ;;  %v16570_v21 = vpack.c.bf16 %v5300_v28, %v5300_v28  ;;  %v5305_v27 = vsel %vm5241_vm9, %v5209_v43, %v5273_v36  ;;  %8770 = vmatprep.mubr.bf16.mxu1 %v19095_v58  ;;  %vm5239_vm10 = vcmp.gt.f32.partialorder %v5207_v13, 0.0  ;;  %vm5242_vm11 = vcmp.gt.f32.partialorder %v21359_v18, 0.0 }
 0x347   : > { %6291 = vst [vmem:[#allocation4 + $0x2bc] sm:$0xf] %v16568_v25  ;;  %6866 = vst [vmem:[#allocation4 + $0x280] sm:$0xf] %v16568_v25  ;;  %v16575_v19 = vpack.c.bf16 %v5305_v27, %v5305_v27  ;;  %v5271_v48 = vmul.f32 0.01, %v5207_v13  ;;  %v5208_v35 = vadd.f32 %v21315_v45, %v5169_v51  ;;  %8771 = vmatmul.mubr.bf16.gmra.mxu1 %v19098_v12 }
 0x348   : > { %5329 = vst [vmem:[#allocation3 + $0x130] sm:$0xff] %v5296_v22  ;;  %5524 = vst [vmem:[#allocation4 + $0x2d0] sm:$0xf] %v16535_v15  ;;  %v5365_v49 = vld [vmem:[#allocation3 + $0x14f] sm:$0xff]  ;;  %v5123_v22 = vadd.f32 %v5122_v44, %v21130_v17  ;;  %v19195_v3 = vld [vmem:[%s23931_s7 + $0x1c0] sm:$0xff]   ;;  %v5134_v44 = vadd.f32 %v21364_v57, %v21209_v0 }
 0x349   : > { %6098 = vst [vmem:[#allocation4 + $0x294] sm:$0xf] %v16535_v15  ;;  %6673 = vst [vmem:[#allocation4 + $0x258] sm:$0xf] %v16535_v15  ;;  %v5748_v6 = vld [vmem:[#allocation3 + $0x149] sm:$0xff]  ;;  %v5749_v37 = vld [vmem:[#allocation3 + $0x151] sm:$0xff]  ;;  %v16536_v20 = vpack.c.bf16 %v5365_v49, %v5365_v49  ;;  %v5303_v8 = vsel %vm5239_vm10, %v5207_v13, %v5271_v48 }
 0x34a   : > { %5522 = vst [vmem:[#allocation4 + $0x288] sm:$0xf] %v16533_v59  ;;  %6096 = vst [vmem:[#allocation4 + $0x24c] sm:$0xf] %v16533_v59  ;;  %v16599_v33 = vpack.c.bf16 %v5748_v6, %v5748_v6  ;;  %v16600_v41 = vpack.c.bf16 %v5749_v37, %v5749_v37  ;;  %v19097_v55 = vld [vmem:[#allocation4 + $0x168] ss:$36 sps:$4 sm:$0xff]   ;;  %v16573_v17 = vpack.c.bf16 %v5303_v8, %v5303_v8 }
 0x34b   : > { %6671 = vst [vmem:[#allocation4 + $0x210] sm:$0xf] %v16533_v59  ;;  %5715 = vst [vmem:[#allocation4 + $0x2b0] sm:$0xf] %v16566_v5  ;;  %v5274_v15 = vmul.f32 0.01, %v21359_v18  ;;  %v5174_v59 = vmul.f32 %v21340_v63, %v5131_v16  ;;  %v5172_v36 = vmul.f32 %v21340_v63, %v5123_v22  ;;  %8618 = vmatmul.mubr.bf16.gmra.mxu0 %v19097_v55 }
 0x34c   : > { %6289 = vst [vmem:[#allocation4 + $0x274] sm:$0xf] %v16566_v5  ;;  %6864 = vst [vmem:[#allocation4 + $0x238] sm:$0xf] %v16566_v5  ;;  %vm5240_vm12 = vcmp.gt.f32.partialorder %v5208_v35, 0.0  ;;  %v19191_v60 = vld [vmem:[%s23931_s7 + $0x188] sm:$0xff]  }
 0x34d   : > { %5334 = vst [vmem:[#allocation3 + $0x188] sm:$0xff] %v5301_v53  ;;  %5332 = vst [vmem:[#allocation3 + $0x168] sm:$0xff] %v5299_v34  ;;  %v5272_v14 = vmul.f32 0.01, %v5208_v35  ;;  %v19099_v43 = vld [vmem:[#allocation4 + $0x1b4] ss:$36 sps:$4 sm:$0xff]   ;;  %v5306_v56 = vsel %vm5242_vm11, %v21359_v18, %v5274_v15  ;;  %v5211_v10 = vadd.f32 %v21315_v45, %v5172_v36  ;;  %17930 = vmatpush3.bf16.msra.mxu1 %v19191_v60 }
 0x34e   : > { %5720 = vst [vmem:[#allocation4 + $0x364] sm:$0xf] %v16571_v24  ;;  %6294 = vst [vmem:[#allocation4 + $0x328] sm:$0xf] %v16571_v24  ;;  %v19101_v34 = vld [vmem:[#allocation4 + $0x174] ss:$36 sps:$4 sm:$0xff]   ;;  %v16576_v6 = vpack.c.bf16 %v5306_v56, %v5306_v56  ;;  %8625 = vmatprep.mubr.bf16.mxu0 %v19099_v43  ;;  %17931 = vmatprep.subr.bf16.mxu1 %v19195_v3 }
 0x34f   : > { %6869 = vst [vmem:[#allocation4 + $0x2ec] sm:$0xf] %v16571_v24  ;;  %5335 = vst [vmem:[#allocation3 + $0x190] sm:$0xff] %v5302_v31  ;;  %v5363_v39 = vld [vmem:[#allocation3 + $0x12f] sm:$0xff]  ;;  %v5304_v7 = vsel %vm5240_vm12, %v5208_v35, %v5272_v14  ;;  %8778 = vmatprep.mubr.bf16.mxu1 %v19101_v34  ;;  %vm5243_vm14 = vcmp.gt.f32.partialorder %v5211_v10, 0.0 }
 0x350   : > { %5718 = vst [vmem:[#allocation4 + $0x31c] sm:$0xf] %v16569_v26  ;;  %6292 = vst [vmem:[#allocation4 + $0x2e0] sm:$0xf] %v16569_v26  ;;  %v5746_v61 = vld [vmem:[#allocation3 + $0x129] sm:$0xff]  ;;  %v5747_v52 = vld [vmem:[#allocation3 + $0x131] sm:$0xff]  ;;  %v16534_v23 = vpack.c.bf16 %v5363_v39, %v5363_v39 }
 0x351   : > { %6867 = vst [vmem:[#allocation4 + $0x2a4] sm:$0xf] %v16569_v26  ;;  %5721 = vst [vmem:[#allocation4 + $0x388] sm:$0xf] %v16572_v47  ;;  %v16597_v46 = vpack.c.bf16 %v5746_v61, %v5746_v61  ;;  %v16598_v54 = vpack.c.bf16 %v5747_v52, %v5747_v52  ;;  %v19104_v40 = vld [vmem:[#allocation4 + $0x1b0] ss:$36 sps:$4 sm:$0xff]  }
 0x352   : > { %6295 = vst [vmem:[#allocation4 + $0x34c] sm:$0xf] %v16572_v47  ;;  %6870 = vst [vmem:[#allocation4 + $0x310] sm:$0xf] %v16572_v47  ;;  %v5213_v47 = vadd.f32 %v21315_v45, %v5174_v59  ;;  %v19105_v52 = vld [vmem:[#allocation4 + $0x170] ss:$36 sps:$4 sm:$0xff]  }
 0x353   : > { %5333 = vst [vmem:[#allocation3 + $0x170] sm:$0xff] %v5300_v28  ;;  %5525 = vst [vmem:[#allocation4 + $0x2f4] sm:$0xf] %v16536_v20  ;;  %v16574_v28 = vpack.c.bf16 %v5304_v7, %v5304_v7  ;;  %8626 = vmatmul.mubr.bf16.gmra.mxu0 %v19104_v40  ;;  %8779 = vmatmul.mubr.bf16.gmra.mxu1 %v19105_v52 }
 0x354   : > { %5908 = vst [vmem:[#allocation4 + $0x2d8] sm:$0xf] %v16599_v33  ;;  %5909 = vst [vmem:[#allocation4 + $0x2fc] sm:$0xf] %v16600_v41  ;;  %v5368_v4 = vld [vmem:[#allocation3 + $0x187] sm:$0xff]  ;;  %vm5245_vm13 = vcmp.gt.f32.partialorder %v5213_v47, 0.0 }
 0x355   : > { %6099 = vst [vmem:[#allocation4 + $0x2b8] sm:$0xf] %v16536_v20  ;;  %6482 = vst [vmem:[#allocation4 + $0x29c] sm:$0xf] %v16599_v33  ;;  %v16539_v25 = vpack.c.bf16 %v5368_v4, %v5368_v4  ;;  %v5366_v9 = vld [vmem:[#allocation3 + $0x167] sm:$0xff] }
 0x356   : > { %6483 = vst [vmem:[#allocation4 + $0x2c0] sm:$0xf] %v16600_v41  ;;  %6674 = vst [vmem:[#allocation4 + $0x27c] sm:$0xf] %v16536_v20  ;;  %v16537_v50 = vpack.c.bf16 %v5366_v9, %v5366_v9  ;;  %v5369_v5 = vld [vmem:[#allocation3 + $0x18f] sm:$0xff]  ;;  %v5126_v20 = vadd.f32 %v5125_v38, %v21179_v42  ;;  %v19196_v33 = vld [vmem:[%s23931_s7 + $0x180] sm:$0xff]   ;;  %v5175_v42 = vmul.f32 %v21340_v63, %v5134_v44 }
 0x357   : > { %5719 = vst [vmem:[#allocation4 + $0x340] sm:$0xf] %v16570_v21  ;;  %6293 = vst [vmem:[#allocation4 + $0x304] sm:$0xf] %v16570_v21  ;;  %v5752_v30 = vld [vmem:[#allocation3 + $0x189] sm:$0xff]  ;;  %v5753_v53 = vld [vmem:[#allocation3 + $0x191] sm:$0xff]  ;;  %v16540_v2 = vpack.c.bf16 %v5369_v5, %v5369_v5  ;;  %17932 = vmatpush3.bf16.msra.mxu1 %v19196_v33 }
 0x358   : > { %6868 = vst [vmem:[#allocation4 + $0x2c8] sm:$0xf] %v16570_v21  ;;  %5338 = vst [vmem:[#allocation3 + $0x1c8] sm:$0xff] %v5305_v27  ;;  %v16603_v11 = vpack.c.bf16 %v5752_v30, %v5752_v30  ;;  %v16604_v24 = vpack.c.bf16 %v5753_v53, %v5753_v53  ;;  %v5277_v62 = vmul.f32 0.01, %v5213_v47  ;;  %v5173_v58 = vmul.f32 %v21340_v63, %v5126_v20 }
 0x359   : > { %5523 = vst [vmem:[#allocation4 + $0x2ac] sm:$0xf] %v16534_v23  ;;  %5906 = vst [vmem:[#allocation4 + $0x290] sm:$0xf] %v16597_v46  ;;  %v5275_v21 = vmul.f32 0.01, %v5211_v10  ;;  %v5214_v18 = vadd.f32 %v21315_v45, %v5175_v42 }
 0x35a   : > { %5907 = vst [vmem:[#allocation4 + $0x2b4] sm:$0xf] %v16598_v54  ;;  %6097 = vst [vmem:[#allocation4 + $0x270] sm:$0xf] %v16534_v23  ;;  %v5367_v29 = vld [vmem:[#allocation3 + $0x16f] sm:$0xff]  ;;  %v5309_v41 = vsel %vm5245_vm13, %v5213_v47, %v5277_v62  ;;  %v5212_v51 = vadd.f32 %v21315_v45, %v5173_v58 }
 0x35b   : > { %6480 = vst [vmem:[#allocation4 + $0x254] sm:$0xf] %v16597_v46  ;;  %6481 = vst [vmem:[#allocation4 + $0x278] sm:$0xf] %v16598_v54  ;;  %v5750_v26 = vld [vmem:[#allocation3 + $0x169] sm:$0xff]  ;;  %v5751_v31 = vld [vmem:[#allocation3 + $0x171] sm:$0xff]  ;;  %v16538_v32 = vpack.c.bf16 %v5367_v29, %v5367_v29  ;;  %v16673_v0 = vpack.c.bf16 %v5309_v41, %v5309_v41  ;;  %v5307_v61 = vsel %vm5243_vm14, %v5211_v10, %v5275_v21 }
 0x35c   : > { %6672 = vst [vmem:[#allocation4 + $0x234] sm:$0xf] %v16534_v23  ;;  %7055 = vst [vmem:[#allocation4 + $0x218] sm:$0xf] %v16597_v46  ;;  %v16601_v1 = vpack.c.bf16 %v5750_v26, %v5750_v26  ;;  %v16602_v49 = vpack.c.bf16 %v5751_v31, %v5751_v31  ;;  %v16577_v13 = vpack.c.bf16 %v5307_v61, %v5307_v61  ;;  %v19107_v23 = vld [vmem:[#allocation4 + $0x1fc] ss:$36 sps:$4 sm:$0xff]  }
 0x35d   : > { %7056 = vst [vmem:[#allocation4 + $0x23c] sm:$0xf] %v16598_v54  ;;  %5724 = vst [vmem:[#allocation4 + $0x3f4] sm:$0xf] %v16575_v19  ;;  %v19109_v46 = vld [vmem:[#allocation4 + $0x1bc] ss:$36 sps:$4 sm:$0xff]   ;;  %8633 = vmatprep.mubr.bf16.mxu0 %v19107_v23 }
 0x35e   : > { %6298 = vst [vmem:[#allocation4 + $0x3b8] sm:$0xf] %v16575_v19  ;;  %6873 = vst [vmem:[#allocation4 + $0x37c] sm:$0xf] %v16575_v19  ;;  %vm5246_vm15 = vcmp.gt.f32.partialorder %v5214_v18, 0.0  ;;  %8786 = vmatprep.mubr.bf16.mxu1 %v19109_v46  ;;  %vm5244_vm0 = vcmp.gt.f32.partialorder %v5212_v51, 0.0 }
 0x35f   : > { %5528 = vst [vmem:[#allocation4 + $0x360] sm:$0xf] %v16539_v25  ;;  %6102 = vst [vmem:[#allocation4 + $0x324] sm:$0xf] %v16539_v25  ;;  %v5372_v37 = vld [vmem:[#allocation3 + $0x1c7] sm:$0xff]  ;;  %v17597_v40 = vpop.f32.mrf.mxu0 }
 0x360   : > { %6677 = vst [vmem:[#allocation4 + $0x2e8] sm:$0xf] %v16539_v25  ;;  %5336 = vst [vmem:[#allocation3 + $0x1a8] sm:$0xff] %v5303_v8  ;;  %v16543_v16 = vpack.c.bf16 %v5372_v37, %v5372_v37  ;;  %v5278_v59 = vmul.f32 0.01, %v5214_v18 }
 0x361   : > { %5526 = vst [vmem:[#allocation4 + $0x318] sm:$0xf] %v16537_v50  ;;  %6100 = vst [vmem:[#allocation4 + $0x2dc] sm:$0xf] %v16537_v50  ;;  %v5276_v22 = vmul.f32 0.01, %v5212_v51 }
 0x362   : > { %6675 = vst [vmem:[#allocation4 + $0x2a0] sm:$0xf] %v16537_v50  ;;  %5529 = vst [vmem:[#allocation4 + $0x384] sm:$0xf] %v16540_v2  ;;  %v5310_v50 = vsel %vm5246_vm15, %v5214_v18, %v5278_v59  ;;  %v19111_v8 = vld [vmem:[#allocation4 + $0x1f8] ss:$36 sps:$4 sm:$0xff]  }
 0x363   : > { %5912 = vst [vmem:[#allocation4 + $0x368] sm:$0xf] %v16603_v11  ;;  %5913 = vst [vmem:[#allocation4 + $0x38c] sm:$0xf] %v16604_v24  ;;  %v16674_v30 = vpack.c.bf16 %v5310_v50, %v5310_v50  ;;  %v5308_v53 = vsel %vm5244_vm0, %v5212_v51, %v5276_v22  ;;  %8634 = vmatmul.mubr.bf16.gmra.mxu0 %v19111_v8  ;;  %v19123_v37 = vld [vmem:[#allocation4 + $0x24c] ss:$36 sps:$4 sm:$0xff]  }
 0x364   : > { %6103 = vst [vmem:[#allocation4 + $0x348] sm:$0xf] %v16540_v2  ;;  %6486 = vst [vmem:[#allocation4 + $0x32c] sm:$0xf] %v16603_v11  ;;  %v16578_v43 = vpack.c.bf16 %v5308_v53, %v5308_v53  ;;  %v19112_v11 = vld [vmem:[#allocation4 + $0x1b8] ss:$36 sps:$4 sm:$0xff]  }
 0x365   : > { %6487 = vst [vmem:[#allocation4 + $0x350] sm:$0xf] %v16604_v24  ;;  %6678 = vst [vmem:[#allocation4 + $0x30c] sm:$0xf] %v16540_v2  ;;  %v19113_v24 = vld [vmem:[#allocation4 + $0x244] ss:$36 sps:$4 sm:$0xff]   ;;  %8787 = vmatmul.mubr.bf16.gmra.mxu1 %v19112_v11 }
 0x366   : > { %5722 = vst [vmem:[#allocation4 + $0x3ac] sm:$0xf] %v16573_v17  ;;  %6296 = vst [vmem:[#allocation4 + $0x370] sm:$0xf] %v16573_v17  ;;  %8641 = vmatprep.mubr.bf16.mxu0 %v19113_v24  ;;  %v19125_v62 = vld [vmem:[#allocation4 + $0x288] ss:$36 sps:$4 sm:$0xff]  }
 0x367   : > { %6871 = vst [vmem:[#allocation4 + $0x334] sm:$0xf] %v16573_v17  ;;  %5339 = vst [vmem:[#allocation3 + $0x1d0] sm:$0xff] %v5306_v56  ;;  %v5370_v39 = vld [vmem:[#allocation3 + $0x1a7] sm:$0xff]  ;;  %v19132_v44 = vld [vmem:[#allocation4 + $0x2d0] ss:$36 sps:$4 sm:$0xff]  }
 0x368   : > { %5337 = vst [vmem:[#allocation3 + $0x1b0] sm:$0xff] %v5304_v7  ;;  %5527 = vst [vmem:[#allocation4 + $0x33c] sm:$0xf] %v16538_v32  ;;  %v16541_v27 = vpack.c.bf16 %v5370_v39, %v5370_v39  ;;  %v19115_v17 = vld [vmem:[#allocation4 + $0x204] ss:$36 sps:$4 sm:$0xff]  }
 0x369   : > { %5910 = vst [vmem:[#allocation4 + $0x320] sm:$0xf] %v16601_v1  ;;  %5911 = vst [vmem:[#allocation4 + $0x344] sm:$0xf] %v16602_v49  ;;  %8794 = vmatprep.mubr.bf16.mxu1 %v19115_v17  ;;  %v19126_v10 = vld [vmem:[#allocation4 + $0x248] ss:$36 sps:$4 sm:$0xff]  }
 0x36a   : > { %6101 = vst [vmem:[#allocation4 + $0x300] sm:$0xf] %v16538_v32  ;;  %6484 = vst [vmem:[#allocation4 + $0x2e4] sm:$0xf] %v16601_v1  ;;  %v19133_v20 = vld [vmem:[#allocation4 + $0x290] ss:$36 sps:$4 sm:$0xff]  }
 0x36b   : > { %6485 = vst [vmem:[#allocation4 + $0x308] sm:$0xf] %v16602_v49  ;;  %6676 = vst [vmem:[#allocation4 + $0x2c4] sm:$0xf] %v16538_v32  ;;  %v19135_v33 = vld [vmem:[#allocation4 + $0x31c] ss:$36 sps:$4 sm:$0xff]  }
 0x36c   : > { %7059 = vst [vmem:[#allocation4 + $0x2a8] sm:$0xf] %v16601_v1  ;;  %7060 = vst [vmem:[#allocation4 + $0x2cc] sm:$0xf] %v16602_v49  ;;  %v19118_v1 = vld [vmem:[#allocation4 + $0x240] ss:$36 sps:$4 sm:$0xff]  }
 0x36d   : > { %5725 = vst [vmem:[#allocation4 + $0x418] sm:$0xf] %v16576_v6  ;;  %6299 = vst [vmem:[#allocation4 + $0x3dc] sm:$0xf] %v16576_v6  ;;  %v19119_v49 = vld [vmem:[#allocation4 + $0x200] ss:$36 sps:$4 sm:$0xff]   ;;  %8642 = vmatmul.mubr.bf16.gmra.mxu0 %v19118_v1 }
 0x36e   : > { %6874 = vst [vmem:[#allocation4 + $0x3a0] sm:$0xf] %v16576_v6  ;;  %5723 = vst [vmem:[#allocation4 + $0x3d0] sm:$0xf] %v16574_v28  ;;  %v5373_v54 = vld [vmem:[#allocation3 + $0x1cf] sm:$0xff]  ;;  %8795 = vmatmul.mubr.bf16.gmra.mxu1 %v19119_v49 }
 0x36f   : > { %6297 = vst [vmem:[#allocation4 + $0x394] sm:$0xf] %v16574_v28  ;;  %6872 = vst [vmem:[#allocation4 + $0x358] sm:$0xf] %v16574_v28  ;;  %v5756_v19 = vld [vmem:[#allocation3 + $0x1c9] sm:$0xff]  ;;  %v5757_v4 = vld [vmem:[#allocation3 + $0x1d1] sm:$0xff]  ;;  %v16544_v63 = vpack.c.bf16 %v5373_v54, %v5373_v54  ;;  %8802 = vmatprep.mubr.bf16.mxu1 %v19123_v37 }
 0x370   : > { %5532 = vst [vmem:[#allocation4 + $0x3f0] sm:$0xf] %v16543_v16  ;;  %6106 = vst [vmem:[#allocation4 + $0x3b4] sm:$0xf] %v16543_v16  ;;  %v16607_v48 = vpack.c.bf16 %v5756_v19, %v5756_v19  ;;  %v16608_v35 = vpack.c.bf16 %v5757_v4, %v5757_v4  ;;  %v5371_v57 = vld [vmem:[#allocation3 + $0x1af] sm:$0xff] }
 0x371   : > { %6681 = vst [vmem:[#allocation4 + $0x378] sm:$0xf] %v16543_v16  ;;  %5342 = vst [vmem:[#allocation3 + $0x208] sm:$0xff] %v5309_v41  ;;  %v5754_v55 = vld [vmem:[#allocation3 + $0x1a9] sm:$0xff]  ;;  %v5755_v25 = vld [vmem:[#allocation3 + $0x1b1] sm:$0xff]  ;;  %v16542_v45 = vpack.c.bf16 %v5371_v57, %v5371_v57 }
 0x372   : > { %6302 = vst [vmem:[#allocation4 + $0x448] sm:$0xf] %v16673_v0  ;;  %6877 = vst [vmem:[#allocation4 + $0x40c] sm:$0xf] %v16673_v0  ;;  %v16605_v9 = vpack.c.bf16 %v5754_v55, %v5754_v55  ;;  %v16606_v15 = vpack.c.bf16 %v5755_v25, %v5755_v25  ;;  %v19121_v6 = vld [vmem:[#allocation4 + $0x28c] ss:$36 sps:$4 sm:$0xff]  }
 0x373   : > { %5340 = vst [vmem:[#allocation3 + $0x1e8] sm:$0xff] %v5307_v61  ;;  %5530 = vst [vmem:[#allocation4 + $0x3a8] sm:$0xf] %v16541_v27  ;;  %8649 = vmatprep.mubr.bf16.mxu0 %v19121_v6  ;;  %v19127_v28 = vld [vmem:[#allocation4 + $0x2d4] ss:$36 sps:$4 sm:$0xff]   ;;  %v6889_v25 = vld [vmem:[#allocation3 + $0xc9] sm:$0xff] }
 0x374   : > { %6104 = vst [vmem:[#allocation4 + $0x36c] sm:$0xf] %v16541_v27  ;;  %6679 = vst [vmem:[#allocation4 + $0x330] sm:$0xf] %v16541_v27  ;;  %v19129_v16 = vld [vmem:[#allocation4 + $0x294] ss:$36 sps:$4 sm:$0xff]   ;;  %v17598_v27 = vpop.f32.mrf.mxu0 }
 0x375   : > { %5726 = vst [vmem:[#allocation4 + $0x43c] sm:$0xf] %v16577_v13  ;;  %6300 = vst [vmem:[#allocation4 + $0x400] sm:$0xf] %v16577_v13  ;;  %8650 = vmatmul.mubr.bf16.gmra.mxu0 %v19125_v62  ;;  %v19137_v41 = vld [vmem:[#allocation4 + $0x2dc] ss:$36 sps:$4 sm:$0xff]   ;;  %v21398_v18 = vadd.f32 %v17598_v27, %v17597_v40 }
 0x376   : > { %6875 = vst [vmem:[#allocation4 + $0x3c4] sm:$0xf] %v16577_v13  ;;  %5533 = vst [vmem:[#allocation4 + $0x414] sm:$0xf] %v16544_v63  ;;  %8803 = vmatmul.mubr.bf16.gmra.mxu1 %v19126_v10  ;;  %8657 = vmatprep.mubr.bf16.mxu0 %v19127_v28  ;;  %v19139_v21 = vld [vmem:[#allocation4 + $0x318] ss:$36 sps:$4 sm:$0xff]  }
 0x377   : > { %5916 = vst [vmem:[#allocation4 + $0x3f8] sm:$0xf] %v16607_v48  ;;  %5917 = vst [vmem:[#allocation4 + $0x41c] sm:$0xf] %v16608_v35  ;;  %8810 = vmatprep.mubr.bf16.mxu1 %v19129_v16  ;;  %v19140_v0 = vld [vmem:[#allocation4 + $0x2d8] ss:$36 sps:$4 sm:$0xff]  }
 0x378   : > { %6107 = vst [vmem:[#allocation4 + $0x3d8] sm:$0xf] %v16544_v63  ;;  %6490 = vst [vmem:[#allocation4 + $0x3bc] sm:$0xf] %v16607_v48  ;;  %v5950_v12 = vld [vmem:[#allocation3 + $0x207] sm:$0xff]  ;;  %v6886_v48 = vld [vmem:[#allocation3 + $0x91] sm:$0xff] }
 0x379   : > { %6491 = vst [vmem:[#allocation4 + $0x3e0] sm:$0xf] %v16608_v35  ;;  %6682 = vst [vmem:[#allocation4 + $0x39c] sm:$0xf] %v16544_v63  ;;  %v16641_v5 = vpack.c.bf16 %v5950_v12, %v5950_v12  ;;  %v19141_v42 = vld [vmem:[#allocation4 + $0x364] ss:$36 sps:$4 sm:$0xff]   ;;  %v16776_v55 = vpack.c.bf16 %v6886_v48, %v6886_v48 }
 0x37a   : > { %5531 = vst [vmem:[#allocation4 + $0x3cc] sm:$0xf] %v16542_v45  ;;  %5914 = vst [vmem:[#allocation4 + $0x3b0] sm:$0xf] %v16605_v9  ;;  %v5374_v14 = vld [vmem:[#allocation3 + $0x1e7] sm:$0xff]  ;;  %v6894_v12 = vld [vmem:[#allocation3 + $0x111] sm:$0xff] }
 0x37b   : > { %5915 = vst [vmem:[#allocation4 + $0x3d4] sm:$0xf] %v16606_v15  ;;  %6105 = vst [vmem:[#allocation4 + $0x390] sm:$0xf] %v16542_v45  ;;  %v16545_v2 = vpack.c.bf16 %v5374_v14, %v5374_v14  ;;  %v19143_v58 = vld [vmem:[#allocation4 + $0x324] ss:$36 sps:$4 sm:$0xff]  }
 0x37c   : > { %6488 = vst [vmem:[#allocation4 + $0x374] sm:$0xf] %v16605_v9  ;;  %6489 = vst [vmem:[#allocation4 + $0x398] sm:$0xf] %v16606_v15  ;;  %v19146_v39 = vld [vmem:[#allocation4 + $0x360] ss:$36 sps:$4 sm:$0xff]  }
 0x37d   : > { %6680 = vst [vmem:[#allocation4 + $0x354] sm:$0xf] %v16542_v45  ;;  %7063 = vst [vmem:[#allocation4 + $0x338] sm:$0xf] %v16605_v9  ;;  %8658 = vmatmul.mubr.bf16.gmra.mxu0 %v19132_v44  ;;  %v19147_v61 = vld [vmem:[#allocation4 + $0x320] ss:$36 sps:$4 sm:$0xff]   ;;  %v16779_v9 = vpack.c.bf16 %v6889_v25, %v6889_v25 }
 0x37e   : > { %7064 = vst [vmem:[#allocation4 + $0x35c] sm:$0xf] %v16606_v15  ;;  %5343 = vst [vmem:[#allocation3 + $0x210] sm:$0xff] %v5310_v50  ;;  %8811 = vmatmul.mubr.bf16.gmra.mxu1 %v19133_v20  ;;  %8665 = vmatprep.mubr.bf16.mxu0 %v19135_v33  ;;  %v19149_v52 = vld [vmem:[#allocation4 + $0x3ac] ss:$36 sps:$4 sm:$0xff]   ;;  %v19850_v28 = vld [vmem:[%s23931_s7 + $0x238] sm:$0xff]  }
 0x37f   : > { %5341 = vst [vmem:[#allocation3 + $0x1f0] sm:$0xff] %v5308_v53  ;;  %6110 = vst [vmem:[#allocation4 + $0x444] sm:$0xf] %v16641_v5  ;;  %8818 = vmatprep.mubr.bf16.mxu1 %v19137_v41  ;;  %v19154_v23 = vld [vmem:[#allocation4 + $0x368] ss:$36 sps:$4 sm:$0xff]   ;;  %v6890_v45 = vld [vmem:[#allocation3 + $0xd1] sm:$0xff] }
 0x380   : > { %6685 = vst [vmem:[#allocation4 + $0x408] sm:$0xf] %v16641_v5  ;;  %6303 = vst [vmem:[#allocation4 + $0x46c] sm:$0xf] %v16674_v30  ;;  %v19156_v46 = vld [vmem:[#allocation4 + $0x3f4] ss:$36 sps:$4 sm:$0xff]   ;;  %v16780_v59 = vpack.c.bf16 %v6890_v45, %v6890_v45  ;;  %v16784_v5 = vpack.c.bf16 %v6894_v12, %v6894_v12 }
 0x381   : > { %6878 = vst [vmem:[#allocation4 + $0x430] sm:$0xf] %v16674_v30  ;;  %5727 = vst [vmem:[#allocation4 + $0x460] sm:$0xf] %v16578_v43  ;;  %v19153_v51 = vld [vmem:[#allocation4 + $0x3a8] ss:$36 sps:$4 sm:$0xff]  }
 0x382   : > { %6301 = vst [vmem:[#allocation4 + $0x424] sm:$0xf] %v16578_v43  ;;  %6876 = vst [vmem:[#allocation4 + $0x3e8] sm:$0xf] %v16578_v43  ;;  %v19151_v13 = vld [vmem:[#allocation4 + $0x36c] ss:$36 sps:$4 sm:$0xff]  }
 0x383   : > { %5534 = vst [vmem:[#allocation4 + $0x438] sm:$0xf] %v16545_v2  ;;  %6108 = vst [vmem:[#allocation4 + $0x3fc] sm:$0xf] %v16545_v2  ;;  %v19158_v54 = vld [vmem:[#allocation4 + $0x3b4] ss:$36 sps:$4 sm:$0xff]  }
 0x384   : > { %6683 = vst [vmem:[#allocation4 + $0x3c0] sm:$0xf] %v16545_v2  ;;  %v19164_v19 = vld [vmem:[#allocation4 + $0x3f0] ss:$36 sps:$4 sm:$0xff]   ;;  %7046 = vst [vmem:[#allocation4 + $0xd4] sm:$0xf] %v16776_v55 }
 0x385   : > { %v5951_v34 = vld [vmem:[#allocation3 + $0x20f] sm:$0xff]  ;;  %8666 = vmatmul.mubr.bf16.gmra.mxu0 %v19139_v21  ;;  %7049 = vst [vmem:[#allocation4 + $0x140] sm:$0xf] %v16779_v9  ;;  %7050 = vst [vmem:[#allocation4 + $0x164] sm:$0xf] %v16780_v59  ;;  %v6527_v10 = vld [vmem:[#allocation3 + $0x227] sm:$0xff] }
 0x386   : > { %v6334_v60 = vld [vmem:[#allocation3 + $0x209] sm:$0xff]  ;;  %v6335_v3 = vld [vmem:[#allocation3 + $0x211] sm:$0xff]  ;;  %v16642_v29 = vpack.c.bf16 %v5951_v34, %v5951_v34  ;;  %8819 = vmatmul.mubr.bf16.gmra.mxu1 %v19140_v0  ;;  %8673 = vmatprep.mubr.bf16.mxu0 %v19141_v42  ;;  %7054 = vst [vmem:[#allocation4 + $0x1f4] sm:$0xf] %v16784_v5  ;;  %v19189_v6 = vld [vmem:[#allocation4 + $0x5c] ss:$36 sps:$4 sm:$0xff]   ;;  %v16737_v33 = vpack.c.bf16 %v6527_v10, %v6527_v10 }
 0x387   : > { %v16705_v26 = vpack.c.bf16 %v6334_v60, %v6334_v60  ;;  %v16706_v31 = vpack.c.bf16 %v6335_v3, %v6335_v3  ;;  %v5375_v56 = vld [vmem:[#allocation3 + $0x1ef] sm:$0xff]  ;;  %8826 = vmatprep.mubr.bf16.mxu1 %v19143_v58  ;;  %v19194_v37 = vld [vmem:[#allocation4 + $0x1c] ss:$36 sps:$4 sm:$0xff]   ;;  %v10738_v0 = vld [vmem:[#allocation2 + $0x227] sm:$0xff] }
 0x388   : > { %v5758_v7 = vld [vmem:[#allocation3 + $0x1e9] sm:$0xff]  ;;  %v5759_v47 = vld [vmem:[#allocation3 + $0x1f1] sm:$0xff]  ;;  %v16546_v36 = vpack.c.bf16 %v5375_v56, %v5375_v56  ;;  %6111 = vst [vmem:[#allocation4 + $0x468] sm:$0xf] %v16642_v29  ;;  %6686 = vst [vmem:[#allocation4 + $0x42c] sm:$0xf] %v16642_v29 }
 0x389   : > { %v16609_v38 = vpack.c.bf16 %v5758_v7, %v5758_v7  ;;  %v16610_v32 = vpack.c.bf16 %v5759_v47, %v5759_v47  ;;  %6494 = vst [vmem:[#allocation4 + $0x44c] sm:$0xf] %v16705_v26  ;;  %6495 = vst [vmem:[#allocation4 + $0x470] sm:$0xf] %v16706_v31  ;;  %v19165_v4 = vld [vmem:[#allocation4 + $0x3b0] ss:$36 sps:$4 sm:$0xff]  }
 0x38a   : > { %5535 = vst [vmem:[#allocation4 + $0x45c] sm:$0xf] %v16546_v36  ;;  %6109 = vst [vmem:[#allocation4 + $0x420] sm:$0xf] %v16546_v36  ;;  %v6885_v63 = vld [vmem:[#allocation3 + $0x89] sm:$0xff]  ;;  %v6898_v53 = vld [vmem:[#allocation3 + $0x151] sm:$0xff] }
 0x38b   : > { %5918 = vst [vmem:[#allocation4 + $0x440] sm:$0xf] %v16609_v38  ;;  %5919 = vst [vmem:[#allocation4 + $0x464] sm:$0xf] %v16610_v32  ;;  %v19168_v35 = vld [vmem:[#allocation4 + $0x43c] ss:$36 sps:$4 sm:$0xff]   ;;  %v16775_v57 = vpack.c.bf16 %v6885_v63, %v6885_v63  ;;  %v16788_v14 = vpack.c.bf16 %v6898_v53, %v6898_v53 }
 0x38c   : > { %6492 = vst [vmem:[#allocation4 + $0x404] sm:$0xf] %v16609_v38  ;;  %6493 = vst [vmem:[#allocation4 + $0x428] sm:$0xf] %v16610_v32  ;;  %v6893_v22 = vld [vmem:[#allocation3 + $0x109] sm:$0xff]  ;;  %v6902_v2 = vld [vmem:[#allocation3 + $0x191] sm:$0xff] }
 0x38d   : > { %6684 = vst [vmem:[#allocation4 + $0x3e4] sm:$0xf] %v16546_v36  ;;  %7067 = vst [vmem:[#allocation4 + $0x3c8] sm:$0xf] %v16609_v38  ;;  %8674 = vmatmul.mubr.bf16.gmra.mxu0 %v19146_v39  ;;  %v16783_v50 = vpack.c.bf16 %v6893_v22, %v6893_v22  ;;  %v6897_v30 = vld [vmem:[#allocation3 + $0x149] sm:$0xff]  ;;  %v16792_v34 = vpack.c.bf16 %v6902_v2, %v6902_v2  ;;  %v6906_v3 = vld [vmem:[#allocation3 + $0x1d1] sm:$0xff] }
 0x38e   : > { %7068 = vst [vmem:[#allocation4 + $0x3ec] sm:$0xf] %v16610_v32  ;;  %8827 = vmatmul.mubr.bf16.gmra.mxu1 %v19147_v61  ;;  %8681 = vmatprep.mubr.bf16.mxu0 %v19149_v52  ;;  %7045 = vst [vmem:[#allocation4 + $0xb0] sm:$0xf] %v16775_v57  ;;  %v16787_v8 = vpack.c.bf16 %v6897_v30, %v6897_v30  ;;  %v6901_v43 = vld [vmem:[#allocation3 + $0x189] sm:$0xff]  ;;  %v16796_v31 = vpack.c.bf16 %v6906_v3, %v6906_v3  ;;  %v6910_v47 = vld [vmem:[#allocation3 + $0x211] sm:$0xff] }
 0x38f   : > { %8834 = vmatprep.mubr.bf16.mxu1 %v19151_v13  ;;  %7053 = vst [vmem:[#allocation4 + $0x1d0] sm:$0xf] %v16783_v50  ;;  %v19182_v24 = vld [vmem:[#allocation4 + $0x14] ss:$36 sps:$4 sm:$0xff]   ;;  %7058 = vst [vmem:[#allocation4 + $0x284] sm:$0xf] %v16788_v14  ;;  %v16791_v17 = vpack.c.bf16 %v6901_v43, %v6901_v43  ;;  %v16800_v38 = vpack.c.bf16 %v6910_v47, %v6910_v47  ;;  %v17025_v52 = vpack.c.bf16 %v10738_v0, %v10738_v0  ;;  %v17600_v47 = vpop.f32.mrf.mxu0 }
 0x390   : > { %7057 = vst [vmem:[#allocation4 + $0x260] sm:$0xf] %v16787_v8  ;;  %v6905_v60 = vld [vmem:[#allocation3 + $0x1c9] sm:$0xff]  ;;  %v19176_v26 = vld [vmem:[#allocation4 + $0x3f8] ss:$36 sps:$4 sm:$0xff]   ;;  %v19851_v44 = vld [vmem:[#allocation2 + $0x40] sm:$0xff] }
 0x391   : > { %v19170_v15 = vld [vmem:[#allocation4 + $0x3fc] ss:$36 sps:$4 sm:$0xff]   ;;  %v16795_v29 = vpack.c.bf16 %v6905_v60, %v6905_v60  ;;  %7061 = vst [vmem:[#allocation4 + $0x2f0] sm:$0xf] %v16791_v17  ;;  %7062 = vst [vmem:[#allocation4 + $0x314] sm:$0xf] %v16792_v34  ;;  %v16769_v20 = vpack.c.bf16 %v19851_v44, %v19851_v44 }
 0x392   : > { %v19175_v11 = vld [vmem:[#allocation4 + $0x438] ss:$36 sps:$4 sm:$0xff]   ;;  %v19178_v56 = vld [vmem:[#allocation4 + $0x444] ss:$36 sps:$4 sm:$0xff]   ;;  %7066 = vst [vmem:[#allocation4 + $0x3a4] sm:$0xf] %v16796_v31 }
 0x393   : > { %7065 = vst [vmem:[#allocation4 + $0x380] sm:$0xf] %v16795_v29  ;;  %v6909_v7 = vld [vmem:[#allocation3 + $0x209] sm:$0xff]  ;;  %7070 = vst [vmem:[#allocation4 + $0x434] sm:$0xf] %v16800_v38  ;;  %v19228_v39 = vld [vmem:[%s23931_s7 + $0x220] sm:$0xff]  }
 0x394   : > { %v16799_v36 = vpack.c.bf16 %v6909_v7, %v6909_v7  ;;  %v19180_v32 = vld [vmem:[#allocation4 + $0x10] ss:$36 sps:$4 sm:$0xff]   ;;  %v19187_v1 = vld [vmem:[#allocation4 + $0x440] ss:$36 sps:$4 sm:$0xff]   ;;  %v19215_v62 = vld [vmem:[%s23931_s7 + $0x228] sm:$0xff]  }
 0x395   : > { %8682 = vmatmul.mubr.bf16.gmra.mxu0 %v19153_v51  ;;  %v19202_v49 = vld [vmem:[%s23931_s7 + $0x230] sm:$0xff]   ;;  %6879 = vst [vmem:[#allocation4 + $0x454] sm:$0xf] %v16769_v20  ;;  %6880 = vst [vmem:[#allocation4 + $0x478] sm:$0xf] %v16769_v20  ;;  %v19241_v13 = vld [vmem:[%s23931_s7 + $0x218] sm:$0xff]  }
 0x396   : > { %8835 = vmatmul.mubr.bf16.gmra.mxu1 %v19154_v23  ;;  %8689 = vmatprep.mubr.bf16.mxu0 %v19156_v46  ;;  %7069 = vst [vmem:[#allocation4 + $0x410] sm:$0xf] %v16799_v36  ;;  %v6528_v16 = vld [vmem:[#allocation3 + $0x22f] sm:$0xff]  ;;  %6687 = vst [vmem:[#allocation4 + $0x450] sm:$0xf] %v16737_v33  ;;  %v19280_v55 = vld [vmem:[%s23931_s7 + $0x200] sm:$0xff]   ;;  %v17601_v36 = vpop.f32.mrf.mxu0 }
 0x397   : > { %8842 = vmatprep.mubr.bf16.mxu1 %v19158_v54  ;;  %v16738_v41 = vpack.c.bf16 %v6528_v16, %v6528_v16  ;;  %v19197_v21 = vld [vmem:[#allocation4 + $0x58] ss:$36 sps:$4 sm:$0xff]   ;;  %v10739_v42 = vld [vmem:[#allocation2 + $0x22f] sm:$0xff]  ;;  %v19198_v40 = vld [vmem:[#allocation4 + $0xa4] ss:$36 sps:$4 sm:$0xff]  }
 0x398   : > { %v19192_v58 = vld [vmem:[#allocation4 + $0x18] ss:$36 sps:$4 sm:$0xff]   ;;  %v19200_v61 = vld [vmem:[#allocation4 + $0x64] ss:$36 sps:$4 sm:$0xff]   ;;  %v17026_v27 = vpack.c.bf16 %v10739_v42, %v10739_v42  ;;  %10898 = vst [vmem:[#allocation4 + $0x450] sm:$0xf] %v17025_v52 }
 0x399   : > { %6688 = vst [vmem:[#allocation4 + $0x474] sm:$0xf] %v16738_v41  ;;  %v19203_v23 = vld [vmem:[#allocation4 + $0xa0] ss:$36 sps:$4 sm:$0xff]   ;;  %v19205_v54 = vld [vmem:[#allocation4 + $0xec] ss:$36 sps:$4 sm:$0xff]  }
 0x39a   : > { %10899 = vst [vmem:[#allocation4 + $0x474] sm:$0xf] %v17026_v27  ;;  %v19204_v46 = vld [vmem:[#allocation4 + $0x60] ss:$36 sps:$4 sm:$0xff]   ;;  %v19267_v63 = vld [vmem:[%s23931_s7 + $0x208] sm:$0xff]   ;;  %v11123_v34 = vld [vmem:[#allocation2 + $0x231] sm:$0xff] }
 0x39b   : > { %v19209_v48 = vld [vmem:[#allocation4 + $0xe8] ss:$36 sps:$4 sm:$0xff]   ;;  %v19211_v57 = vld [vmem:[#allocation4 + $0x134] ss:$36 sps:$4 sm:$0xff]   ;;  %v19220_v59 = vld [vmem:[#allocation4 + $0x13c] ss:$36 sps:$4 sm:$0xff]   ;;  %v17090_v3 = vpack.c.bf16 %v11123_v34, %v11123_v34 }
 0x39c   : > { %v21415_v51 = vld [vmem:[#allocation4 + $0x454] ss:$36 sps:$4 sm:$0xff]   ;;  %v19224_v50 = vld [vmem:[#allocation4 + $0x1c4] ss:$36 sps:$4 sm:$0xff]   ;;  %v19231_v8 = vld [vmem:[#allocation4 + $0x20c] ss:$36 sps:$4 sm:$0xff]  }
 0x39d   : > { %8690 = vmatmul.mubr.bf16.gmra.mxu0 %v19164_v19  ;;  %11090 = vst [vmem:[#allocation4 + $0x454] sm:$0xf] %v16769_v20  ;;  %11091 = vst [vmem:[#allocation4 + $0x478] sm:$0xf] %v16769_v20  ;;  %v19254_v19 = vld [vmem:[%s23931_s7 + $0x210] sm:$0xff]  }
 0x39e   : > { %8843 = vmatmul.mubr.bf16.gmra.mxu1 %v19165_v4  ;;  %8697 = vmatprep.mubr.bf16.mxu0 %v19168_v35  ;;  %v19207_v4 = vld [vmem:[#allocation4 + $0xac] ss:$36 sps:$4 sm:$0xff]   ;;  %v19213_v25 = vld [vmem:[#allocation4 + $0xf4] ss:$36 sps:$4 sm:$0xff]   ;;  %v19226_v5 = vld [vmem:[#allocation4 + $0x184] ss:$36 sps:$4 sm:$0xff]  }
 0x39f   : > { %8850 = vmatprep.mubr.bf16.mxu1 %v19170_v15  ;;  %v19210_v35 = vld [vmem:[#allocation4 + $0xa8] ss:$36 sps:$4 sm:$0xff]   ;;  %v19216_v45 = vld [vmem:[#allocation4 + $0x130] ss:$36 sps:$4 sm:$0xff]   ;;  %v19218_v15 = vld [vmem:[#allocation4 + $0x17c] ss:$36 sps:$4 sm:$0xff]  }
 0x3a0   : > { %v19217_v9 = vld [vmem:[#allocation4 + $0xf0] ss:$36 sps:$4 sm:$0xff]   ;;  %v19222_v22 = vld [vmem:[#allocation4 + $0x178] ss:$36 sps:$4 sm:$0xff]   ;;  %v19229_v30 = vld [vmem:[#allocation4 + $0x1c0] ss:$36 sps:$4 sm:$0xff]  }
 0x3a1   : > { %v19223_v12 = vld [vmem:[#allocation4 + $0x138] ss:$36 sps:$4 sm:$0xff]   ;;  %v19230_v53 = vld [vmem:[#allocation4 + $0x180] ss:$36 sps:$4 sm:$0xff]   ;;  %v19233_v14 = vld [vmem:[#allocation4 + $0x1cc] ss:$36 sps:$4 sm:$0xff]  }
 0x3a2   : > { %v19235_v43 = vld [vmem:[#allocation4 + $0x208] ss:$36 sps:$4 sm:$0xff]   ;;  %v21426_v29 = vld [vmem:[#allocation4 + $0x458] ss:$36 sps:$4 sm:$0xff]   ;;  %v19243_v31 = vld [vmem:[#allocation4 + $0x210] ss:$36 sps:$4 sm:$0xff]  }
 0x3a3   : > { %v19236_v2 = vld [vmem:[#allocation4 + $0x1c8] ss:$36 sps:$4 sm:$0xff]   ;;  %11283 = vst [vmem:[#allocation4 + $0x47c] sm:$0xf] %v17090_v3  ;;  %v19246_v7 = vld [vmem:[#allocation4 + $0x25c] ss:$36 sps:$4 sm:$0xff]  }
 0x3a4   : > { %v11122_v17 = vld [vmem:[#allocation2 + $0x229] sm:$0xff]  ;;  %v19248_v38 = vld [vmem:[#allocation4 + $0x298] ss:$36 sps:$4 sm:$0xff]  }
 0x3a5   : > { %8698 = vmatmul.mubr.bf16.gmra.mxu0 %v19175_v11  ;;  %v19237_v11 = vld [vmem:[#allocation4 + $0x254] ss:$36 sps:$4 sm:$0xff]   ;;  %v17089_v60 = vpack.c.bf16 %v11122_v17, %v11122_v17  ;;  %v19259_v27 = vld [vmem:[#allocation4 + $0x2ec] ss:$36 sps:$4 sm:$0xff]  }
 0x3a6   : > { %8851 = vmatmul.mubr.bf16.gmra.mxu1 %v19176_v26  ;;  %8899 = vmatprep.mubr.bf16.mxu0 %v19182_v24  ;;  %v19239_v24 = vld [vmem:[#allocation4 + $0x214] ss:$36 sps:$4 sm:$0xff]  }
 0x3a7   : > { %8858 = vmatprep.mubr.bf16.mxu1 %v19178_v56  ;;  %11282 = vst [vmem:[#allocation4 + $0x458] sm:$0xf] %v17089_v60  ;;  %v19242_v26 = vld [vmem:[#allocation4 + $0x250] ss:$36 sps:$4 sm:$0xff]   ;;  %v19244_v56 = vld [vmem:[#allocation4 + $0x29c] ss:$36 sps:$4 sm:$0xff]  }
 0x3a8   : > { %v19268_v34 = vld [vmem:[#allocation4 + $0x370] ss:$36 sps:$4 sm:$0xff]  }
 0x3ad   : > { %8900 = vmatmul.mubr.bf16.vlgmr.msra.gmra.mxu0 %v19180_v32  ;;  %v19249_v32 = vld [vmem:[#allocation4 + $0x258] ss:$36 sps:$4 sm:$0xff]  }
 0x3ae   : > { %8859 = vmatmul.mubr.bf16.gmra.mxu1 %v19187_v1  ;;  %18610 = vmatpush3.bf16.msra.mxu0 %v19850_v28  ;;  %v19250_v1 = vld [vmem:[#allocation4 + $0x2e4] ss:$36 sps:$4 sm:$0xff]  }
 0x3af   : > { %8907 = vmatprep.mubr.bf16.mxu0 %v19189_v6  ;;  %9060 = vmatprep.mubr.bf16.mxu1 %v19194_v37  ;;  %v19252_v6 = vld [vmem:[#allocation4 + $0x2a4] ss:$36 sps:$4 sm:$0xff]  }
 0x3b0   : > { %18611 = vmatprep.subr.bf16.mxu0 %v19202_v49 }
 0x3b2   : > { %18612 = vmatpush3.bf16.msra.mxu0 %v19202_v49 }
 0x3b3   : > { %18613 = vmatprep.subr.bf16.mxu0 %v19215_v62 }
 0x3b5   : > { %8908 = vmatmul.mubr.bf16.gmra.mxu0 %v19197_v21  ;;  %v19255_v21 = vld [vmem:[#allocation4 + $0x2e0] ss:$36 sps:$4 sm:$0xff]  }
 0x3b6   : > { %9061 = vmatmul.mubr.bf16.vlgmr.msra.gmra.mxu1 %v19192_v58  ;;  %8915 = vmatprep.mubr.bf16.mxu0 %v19198_v40  ;;  %v19256_v58 = vld [vmem:[#allocation4 + $0x2a0] ss:$36 sps:$4 sm:$0xff]   ;;  %v19257_v40 = vld [vmem:[#allocation4 + $0x32c] ss:$36 sps:$4 sm:$0xff]  }
 0x3b7   : > { %9068 = vmatprep.mubr.bf16.mxu1 %v19200_v61  ;;  %18614 = vmatpush3.bf16.msra.mxu0 %v19215_v62 }
 0x3b8   : > { %18615 = vmatprep.subr.bf16.mxu0 %v19228_v39 }
 0x3bb   : > { %18616 = vmatpush3.bf16.msra.mxu0 %v19228_v39  ;;  %v17602_v39 = vadd.f32 %v17601_v36, %v17600_v47  ;;  %v19272_v47 = vld [vmem:[#allocation4 + $0x37c] ss:$36 sps:$4 sm:$0xff]  }
 0x3bc   : > { %18617 = vmatprep.subr.bf16.mxu0 %v19241_v13 }
 0x3bd   : > { %8916 = vmatmul.mubr.bf16.gmra.mxu0 %v19203_v23 }
 0x3be   : > { %9069 = vmatmul.mubr.bf16.gmra.mxu1 %v19204_v46  ;;  %8923 = vmatprep.mubr.bf16.mxu0 %v19205_v54 }
 0x3bf   : > { %9076 = vmatprep.mubr.bf16.mxu1 %v19207_v4  ;;  %18618 = vmatpush3.bf16.msra.mxu0 %v19241_v13 }
 0x3c0   : > { %18619 = vmatprep.subr.bf16.mxu0 %v19254_v19 }
 0x3c3   : > { %18620 = vmatpush3.bf16.msra.mxu0 %v19254_v19 }
 0x3c4   : > { %18621 = vmatprep.subr.bf16.mxu0 %v19267_v63 }
 0x3c5   : > { %8924 = vmatmul.mubr.bf16.gmra.mxu0 %v19209_v48 }
 0x3c6   : > { %9077 = vmatmul.mubr.bf16.gmra.mxu1 %v19210_v35  ;;  %8931 = vmatprep.mubr.bf16.mxu0 %v19211_v57  ;;  %v19261_v57 = vld [vmem:[#allocation4 + $0x328] ss:$36 sps:$4 sm:$0xff]  }
 0x3c7   : > { %9084 = vmatprep.mubr.bf16.mxu1 %v19213_v25  ;;  %18622 = vmatpush3.bf16.msra.mxu0 %v19267_v63 }
 0x3c8   : > { %18623 = vmatprep.subr.bf16.mxu0 %v19280_v55 }
 0x3cb   : > { %18624 = vmatpush3.bf16.msra.mxu0 %v19280_v55 }
 0x3cd   : > { %8932 = vmatmul.mubr.bf16.gmra.mxu0 %v19216_v45  ;;  %v19262_v45 = vld [vmem:[#allocation4 + $0x2e8] ss:$36 sps:$4 sm:$0xff]  }
 0x3ce   : > { %9085 = vmatmul.mubr.bf16.gmra.mxu1 %v19217_v9  ;;  %8939 = vmatprep.mubr.bf16.mxu0 %v19218_v15  ;;  %v19263_v9 = vld [vmem:[#allocation4 + $0x374] ss:$36 sps:$4 sm:$0xff]  }
 0x3cf   : > { %9092 = vmatprep.mubr.bf16.mxu1 %v19220_v59 }
 0x3d4   : > { %v17603_v49 = vpop.f32.mrf.mxu0 }
 0x3d5   : > { %8940 = vmatmul.mubr.bf16.gmra.mxu0 %v19222_v22  ;;  %v19265_v22 = vld [vmem:[#allocation4 + $0x334] ss:$36 sps:$4 sm:$0xff]  }
 0x3d6   : > { %9093 = vmatmul.mubr.bf16.gmra.mxu1 %v19223_v12  ;;  %8947 = vmatprep.mubr.bf16.mxu0 %v19224_v50  ;;  %v17709_v37 = vpop.f32.mrf.mxu1  ;;  %v17604_v28 = vpop.f32.mrf.mxu0 }
 0x3d7   : > { %9100 = vmatprep.mubr.bf16.mxu1 %v19226_v5  ;;  %v17605_v62 = vadd.f32 %v17604_v28, %v17603_v49 }
 0x3d8   : > { %v17710_v10 = vpop.f32.mrf.mxu1  ;;  %v17606_v44 = vpop.f32.mrf.mxu0 }
 0x3d9   : > { %v17711_v16 = vadd.f32 %v17710_v10, %v17709_v37 }
 0x3da   : > { %v17712_v20 = vpop.f32.mrf.mxu1  ;;  %v17607_v41 = vpop.f32.mrf.mxu0 }
 0x3db   : > { %v21429_v33 = vadd.f32 %v17711_v16, %v21398_v18  ;;  %v17608_v0 = vadd.f32 %v17607_v41, %v17606_v44  ;;  %v19274_v16 = vld [vmem:[#allocation4 + $0x3b8] ss:$36 sps:$4 sm:$0xff]  }
 0x3dc   : > { %v17713_v42 = vpop.f32.mrf.mxu1  ;;  %v19275_v41 = vld [vmem:[#allocation4 + $0x378] ss:$36 sps:$4 sm:$0xff]  }
 0x3dd   : > { %8948 = vmatmul.mubr.bf16.gmra.mxu0 %v19229_v30  ;;  %v17714_v61 = vadd.f32 %v17713_v42, %v17712_v20 }
 0x3de   : > { %9101 = vmatmul.mubr.bf16.gmra.mxu1 %v19230_v53  ;;  %8955 = vmatprep.mubr.bf16.mxu0 %v19231_v8  ;;  %v17715_v13 = vpop.f32.mrf.mxu1 }
 0x3df   : > { %9108 = vmatprep.mubr.bf16.mxu1 %v19233_v14  ;;  %v21431_v23 = vadd.f32 %v17714_v61, %v17602_v39 }
 0x3e0   : > { %v17716_v54 = vpop.f32.mrf.mxu1 }
 0x3e1   : > { %v17717_v19 = vadd.f32 %v17716_v54, %v17715_v13  ;;  %v19309_v54 = vld [vmem:[%s23934_s10 + $0x70] sm:$0xff]  }
 0x3e2   : > { %v17718_v63 = vpop.f32.mrf.mxu1 }
 0x3e3   : > { %v17609_v52 = vpop.f32.mrf.mxu0  ;;  %v21433_v48 = vadd.f32 %v17717_v19, %v17605_v62  ;;  %v19310_v19 = vld [vmem:[%s23934_s10 + $0x30] sm:$0xff]  }
 0x3e4   : > { %v17719_v25 = vpop.f32.mrf.mxu1 }
 0x3e5   : > { %8956 = vmatmul.mubr.bf16.gmra.mxu0 %v19235_v43  ;;  %v17610_v46 = vpop.f32.mrf.mxu0  ;;  %v17720_v15 = vadd.f32 %v17719_v25, %v17718_v63  ;;  %v19282_v25 = vld [vmem:[#allocation4 + $0x3c0] ss:$36 sps:$4 sm:$0xff]  }
 0x3e6   : > { %9109 = vmatmul.mubr.bf16.gmra.mxu1 %v19236_v2  ;;  %8963 = vmatprep.mubr.bf16.mxu0 %v19237_v11  ;;  %v17611_v18 = vadd.f32 %v17610_v46, %v17609_v52  ;;  %v19307_v2 = vld [vmem:[%s23934_s10 + $0x78] sm:$0xff]  }
 0x3e7   : > { %9116 = vmatprep.mubr.bf16.mxu1 %v19239_v24  ;;  %v17612_v4 = vpop.f32.mrf.mxu0  ;;  %v21435_v50 = vadd.f32 %v17720_v15, %v17608_v0  ;;  %v19308_v11 = vld [vmem:[%s23934_s10 + $0x38] sm:$0xff]   ;;  %18053 = vmatprep.subr.bf16.mxu1 %v19307_v2 }
 0x3e8   : > { %18054 = vmatpush3.bf16.msra.mxu1 %v19308_v11 }
 0x3e9   : > { %v17613_v35 = vpop.f32.mrf.mxu0  ;;  %18055 = vmatprep.subr.bf16.mxu1 %v19309_v54 }
 0x3ea   : > { %v17614_v55 = vadd.f32 %v17613_v35, %v17612_v4  ;;  %v17721_v12 = vpop.f32.mrf.mxu1  ;;  %v19281_v35 = vld [vmem:[#allocation4 + $0x400] ss:$36 sps:$4 sm:$0xff]  }
 0x3eb   : > { %v17615_v59 = vpop.f32.mrf.mxu0 }
 0x3ec   : > { %v17722_v53 = vpop.f32.mrf.mxu1  ;;  %18056 = vmatpush3.bf16.msra.mxu1 %v19310_v19 }
 0x3ed   : > { %8964 = vmatmul.mubr.bf16.gmra.mxu0 %v19242_v26  ;;  %v17616_v5 = vpop.f32.mrf.mxu0  ;;  %v17723_v8 = vadd.f32 %v17722_v53, %v17721_v12  ;;  %v19269_v26 = vld [vmem:[#allocation4 + $0x330] ss:$36 sps:$4 sm:$0xff]  }
 0x3ee   : > { %9117 = vmatmul.mubr.bf16.gmra.mxu1 %v19243_v31  ;;  %8971 = vmatprep.mubr.bf16.mxu0 %v19244_v56  ;;  %v17617_v30 = vadd.f32 %v17616_v5, %v17615_v59  ;;  %v17724_v43 = vpop.f32.mrf.mxu1  ;;  %v19270_v31 = vld [vmem:[#allocation4 + $0x3bc] ss:$36 sps:$4 sm:$0xff]   ;;  %v19285_v59 = vld [vmem:[#allocation4 + $0x40c] ss:$36 sps:$4 sm:$0xff]  }
 0x3ef   : > { %9124 = vmatprep.mubr.bf16.mxu1 %v19246_v7  ;;  %v17618_v14 = vpop.f32.mrf.mxu0  ;;  %v21443_v24 = vadd.f32 %v17723_v8, %v17611_v18 }
 0x3f0   : > { %v17725_v3 = vpop.f32.mrf.mxu1 }
 0x3f1   : > { %v17619_v17 = vpop.f32.mrf.mxu0  ;;  %v17726_v56 = vadd.f32 %v17725_v3, %v17724_v43  ;;  %v19288_v3 = vld [vmem:[#allocation4 + $0x408] ss:$36 sps:$4 sm:$0xff]  }
 0x3f2   : > { %v17620_v60 = vadd.f32 %v17619_v17, %v17618_v14  ;;  %v19287_v17 = vld [vmem:[#allocation4 + $0x448] ss:$36 sps:$4 sm:$0xff]  }
 0x3f5   : > { %8972 = vmatmul.mubr.bf16.gmra.mxu0 %v19248_v38  ;;  %v21445_v38 = vadd.f32 %v17726_v56, %v17614_v55 }
 0x3f6   : > { %9125 = vmatmul.mubr.bf16.gmra.mxu1 %v19249_v32  ;;  %8979 = vmatprep.mubr.bf16.mxu0 %v19250_v1  ;;  %v17727_v36 = vpop.f32.mrf.mxu1 }
 0x3f7   : > { %9132 = vmatprep.mubr.bf16.mxu1 %v19252_v6 }
 0x3f8   : > { %v17728_v49 = vpop.f32.mrf.mxu1 }
 0x3f9   : > { %v17729_v6 = vadd.f32 %v17728_v49, %v17727_v36 }
 0x3fa   : > { %v17730_v28 = vpop.f32.mrf.mxu1 }
 0x3fb   : > { %v21447_v62 = vadd.f32 %v17729_v6, %v17617_v30 }
 0x3fc   : > { %v17731_v20 = vpop.f32.mrf.mxu1 }
 0x3fd   : > { %8980 = vmatmul.mubr.bf16.gmra.mxu0 %v19255_v21  ;;  %v19276_v21 = vld [vmem:[#allocation4 + $0x404] ss:$36 sps:$4 sm:$0xff]   ;;  %v17732_v0 = vadd.f32 %v17731_v20, %v17730_v28 }
 0x3fe   : > { %9133 = vmatmul.mubr.bf16.gmra.mxu1 %v19256_v58  ;;  %8987 = vmatprep.mubr.bf16.mxu0 %v19257_v40  ;;  %v19278_v58 = vld [vmem:[#allocation4 + $0x3c4] ss:$36 sps:$4 sm:$0xff]  }
 0x3ff   : > { %9140 = vmatprep.mubr.bf16.mxu1 %v19259_v27  ;;  %v21449_v39 = vadd.f32 %v17732_v0, %v17620_v60  ;;  %v19312_v20 = vld [vmem:[%s23934_s10 + $0x28] sm:$0xff]  }
 0x400   : > { %v19292_v0 = vld [vmem:[#allocation4 + $0x68] ss:$36 sps:$4 sm:$0xff]  }
 0x401   : > { %v17621_v7 = vpop.f32.mrf.mxu0 }
 0x403   : > { %v17622_v32 = vpop.f32.mrf.mxu0 }
 0x404   : > { %v17623_v1 = vadd.f32 %v17622_v32, %v17621_v7  ;;  %v7226_v32 = vld [vmem:[#allocation4 + $0x450] sm:$0xff] }
 0x405   : > { %8988 = vmatmul.mubr.bf16.gmra.mxu0 %v19261_v57  ;;  %v17624_v37 = vpop.f32.mrf.mxu0 }
 0x406   : > { %9141 = vmatmul.mubr.bf16.gmra.mxu1 %v19262_v45  ;;  %8995 = vmatprep.mubr.bf16.mxu0 %v19263_v9  ;;  %v19283_v45 = vld [vmem:[#allocation4 + $0x44c] ss:$36 sps:$4 sm:$0xff]  }
 0x407   : > { %9148 = vmatprep.mubr.bf16.mxu1 %v19265_v22  ;;  %v17625_v10 = vpop.f32.mrf.mxu0  ;;  %v17733_v40 = vpop.f32.mrf.mxu1 }
 0x408   : > { %v17626_v44 = vadd.f32 %v17625_v10, %v17624_v37 }
 0x409   : > { %v17734_v27 = vpop.f32.mrf.mxu1 }
 0x40a   : > { %v17735_v13 = vadd.f32 %v17734_v27, %v17733_v40 }
 0x40b   : > { %v17627_v42 = vpop.f32.mrf.mxu0  ;;  %v17736_v18 = vpop.f32.mrf.mxu1 }
 0x40c   : > { %v21457_v4 = vadd.f32 %v17735_v13, %v17623_v1  ;;  %v7231_v1 = vld [vmem:[#allocation4 + $0x474] sm:$0xff] }
 0x40d   : > { %8996 = vmatmul.mubr.bf16.gmra.mxu0 %v19268_v34  ;;  %v17628_v61 = vpop.f32.mrf.mxu0  ;;  %v17737_v55 = vpop.f32.mrf.mxu1 }
 0x40e   : > { %9149 = vmatmul.mubr.bf16.gmra.mxu1 %v19269_v26  ;;  %9003 = vmatprep.mubr.bf16.mxu0 %v19270_v31  ;;  %v17629_v52 = vadd.f32 %v17628_v61, %v17627_v42  ;;  %v17738_v9 = vadd.f32 %v17737_v55, %v17736_v18  ;;  %v19289_v26 = vld [vmem:[#allocation4 + $0x20] ss:$36 sps:$4 sm:$0xff]   ;;  %v19294_v55 = vld [vmem:[#allocation4 + $0xf8] ss:$36 sps:$4 sm:$0xff]  }
 0x40f   : > { %9156 = vmatprep.mubr.bf16.mxu1 %v19272_v47  ;;  %v17630_v46 = vpop.f32.mrf.mxu0 }
 0x410   : > { %v21459_v12 = vadd.f32 %v17738_v9, %v17626_v44  ;;  %v19311_v44 = vld [vmem:[%s23934_s10 + $0x68] sm:$0xff]   ;;  %v19295_v9 = vld [vmem:[#allocation4 + $0x140] ss:$36 sps:$4 sm:$0xff]  }
 0x411   : > { %v17631_v63 = vpop.f32.mrf.mxu0  ;;  %18057 = vmatprep.subr.bf16.mxu1 %v19311_v44 }
 0x412   : > { %v17632_v57 = vadd.f32 %v17631_v63, %v17630_v46  ;;  %18058 = vmatpush3.bf16.msra.mxu1 %v19312_v20 }
 0x413   : > { %v17633_v15 = vpop.f32.mrf.mxu0  ;;  %v17739_v22 = vpop.f32.mrf.mxu1 }
 0x415   : > { %9004 = vmatmul.mubr.bf16.gmra.mxu0 %v19274_v16  ;;  %v17634_v5 = vpop.f32.mrf.mxu0  ;;  %v17740_v53 = vpop.f32.mrf.mxu1  ;;  %v15640_v16 = vcombine.low %v7226_v32, %v7231_v1 }
 0x416   : > { %9157 = vmatmul.mubr.bf16.gmra.mxu1 %v19275_v41  ;;  %9011 = vmatprep.mubr.bf16.mxu0 %v19276_v21  ;;  %v17635_v30 = vadd.f32 %v17634_v5, %v17633_v15  ;;  %v17741_v8 = vadd.f32 %v17740_v53, %v17739_v22 }
 0x417   : > { %9164 = vmatprep.mubr.bf16.mxu1 %v19278_v58  ;;  %v17636_v14 = vpop.f32.mrf.mxu0  ;;  %v17742_v43 = vpop.f32.mrf.mxu1  ;;  %v19293_v58 = vld [vmem:[#allocation4 + $0xb0] ss:$36 sps:$4 sm:$0xff]  }
 0x418   : > { %v21461_v2 = vadd.f32 %v17741_v8, %v17629_v52 }
 0x419   : > { %v17637_v11 = vpop.f32.mrf.mxu0  ;;  %v17743_v60 = vpop.f32.mrf.mxu1 }
 0x41a   : > { %v17638_v34 = vadd.f32 %v17637_v11, %v17636_v14  ;;  %v17744_v31 = vadd.f32 %v17743_v60, %v17742_v43 }
 0x41c   : > { %v21463_v47 = vadd.f32 %v17744_v31, %v17632_v57 }
 0x41d   : > { %9012 = vmatmul.mubr.bf16.gmra.mxu0 %v19281_v35 }
 0x41e   : > { %9165 = vmatmul.mubr.bf16.gmra.mxu1 %v19282_v25  ;;  %9019 = vmatprep.mubr.bf16.mxu0 %v19283_v45 }
 0x41f   : > { %9172 = vmatprep.mubr.bf16.mxu1 %v19285_v59 }
 0x423   : > { %v17639_v56 = vpop.f32.mrf.mxu0 }
 0x425   : > { %9020 = vmatmul.mubr.bf16.gmra.mxu0 %v19287_v17  ;;  %v17745_v7 = vpop.f32.mrf.mxu1  ;;  %v17640_v36 = vpop.f32.mrf.mxu0  ;;  %v19313_v17 = vld [vmem:[%s23934_s10 + $0x60] sm:$0xff]  }
 0x426   : > { %9173 = vmatmul.mubr.bf16.gmra.mxu1 %v19288_v3  ;;  %18625 = vmatprep.mubr.bf16.mxu0 %v19289_v26  ;;  %v17641_v49 = vadd.f32 %v17640_v36, %v17639_v56  ;;  %v19296_v26 = vld [vmem:[#allocation4 + $0x188] ss:$36 sps:$4 sm:$0xff]  }
 0x427   : > { %9180 = vmatprep.mubr.bf16.mxu1 %v21415_v51  ;;  %v17746_v6 = vpop.f32.mrf.mxu1  ;;  %v17642_v28 = vpop.f32.mrf.mxu0  ;;  %18059 = vmatprep.subr.bf16.mxu1 %v19313_v17 }
 0x428   : > { %v17747_v37 = vadd.f32 %v17746_v6, %v17745_v7  ;;  %v19297_v7 = vld [vmem:[#allocation4 + $0x1d0] ss:$36 sps:$4 sm:$0xff]  }
 0x429   : > { %v17748_v10 = vpop.f32.mrf.mxu1  ;;  %v17643_v21 = vpop.f32.mrf.mxu0 }
 0x42a   : > { %v21472_v41 = vadd.f32 %v17747_v37, %v17635_v30  ;;  %v17644_v42 = vadd.f32 %v17643_v21, %v17642_v28 }
 0x42b   : > { %v17749_v51 = vpop.f32.mrf.mxu1 }
 0x42c   : > { %v17750_v40 = vadd.f32 %v17749_v51, %v17748_v10 }
 0x42d   : > { %v17645_v61 = vpop.f32.mrf.mxu0  ;;  %18626 = vmatmul.mubr.bf16.vlgmr.msra.gmra.mxu0 %v19292_v0  ;;  %v19298_v0 = vld [vmem:[#allocation4 + $0x218] ss:$36 sps:$4 sm:$0xff]  }
 0x42e   : > { %v17751_v52 = vpop.f32.mrf.mxu1  ;;  %9181 = vmatmul.mubr.bf16.gmra.mxu1 %v15640_v16  ;;  %18629 = vmatprep.mubr.bf16.mxu0 %v19293_v58  ;;  %v21474_v27 = vadd.f32 %v17750_v40, %v17638_v34  ;;  %v19314_v34 = vld [vmem:[%s23934_s10 + $0x20] sm:$0xff]  }
 0x42f   : > { %v17646_v13 = vpop.f32.mrf.mxu0  ;;  %18060 = vmatpush3.bf16.msra.mxu1 %v19314_v34  ;;  %v19299_v58 = vld [vmem:[#allocation4 + $0x260] ss:$36 sps:$4 sm:$0xff]  }
 0x430   : > { %v17647_v46 = vadd.f32 %v17646_v13, %v17645_v61  ;;  %v17752_v18 = vpop.f32.mrf.mxu1 }
 0x431   : > { %v17753_v54 = vadd.f32 %v17752_v18, %v17751_v52  ;;  %v17648_v19 = vpop.f32.mrf.mxu0 }
 0x432   : > { %v17754_v63 = vpop.f32.mrf.mxu1 }
 0x433   : > { %v21476_v35 = vadd.f32 %v17753_v54, %v17641_v49  ;;  %v17649_v57 = vpop.f32.mrf.mxu0 }
 0x434   : > { %v17650_v25 = vadd.f32 %v17649_v57, %v17648_v19  ;;  %v17755_v45 = vpop.f32.mrf.mxu1 }
 0x435   : > { %v17756_v15 = vadd.f32 %v17755_v45, %v17754_v63  ;;  %v17651_v59 = vpop.f32.mrf.mxu0  ;;  %18630 = vmatmul.mubr.bf16.gmra.mxu0 %v19294_v55  ;;  %v19315_v55 = vld [vmem:[%s23934_s10 + $0x58] sm:$0xff]  }
 0x436   : > { %v17757_v22 = vpop.f32.mrf.mxu1  ;;  %18633 = vmatprep.mubr.bf16.mxu0 %v19295_v9  ;;  %18061 = vmatprep.subr.bf16.mxu1 %v19315_v55 }
 0x437   : > { %v21478_v5 = vadd.f32 %v17756_v15, %v17644_v42  ;;  %v17652_v30 = vpop.f32.mrf.mxu0  ;;  %v19300_v15 = vld [vmem:[#allocation4 + $0x2a8] ss:$36 sps:$4 sm:$0xff]  }
 0x438   : > { %v17653_v53 = vadd.f32 %v17652_v30, %v17651_v59  ;;  %v17758_v8 = vpop.f32.mrf.mxu1  ;;  %v19301_v30 = vld [vmem:[#allocation4 + $0x2f0] ss:$36 sps:$4 sm:$0xff]  }
 0x439   : > { %v17759_v14 = vadd.f32 %v17758_v8, %v17757_v22  ;;  %v17654_v43 = vpop.f32.mrf.mxu0 }
 0x43a   : > { %v17760_v11 = vpop.f32.mrf.mxu1 }
 0x43b   : > { %v21486_v60 = vadd.f32 %v17759_v14, %v17647_v46  ;;  %v17655_v3 = vpop.f32.mrf.mxu0 }
 0x43c   : > { %v17656_v31 = vadd.f32 %v17655_v3, %v17654_v43  ;;  %v17761_v56 = vpop.f32.mrf.mxu1 }
 0x43d   : > { %v17762_v36 = vadd.f32 %v17761_v56, %v17760_v11  ;;  %v17657_v32 = vpop.f32.mrf.mxu0  ;;  %18634 = vmatmul.mubr.bf16.gmra.mxu0 %v19296_v26 }
 0x43e   : > { %v17763_v1 = vpop.f32.mrf.mxu1  ;;  %18637 = vmatprep.mubr.bf16.mxu0 %v19297_v7 }
 0x43f   : > { %v21488_v49 = vadd.f32 %v17762_v36, %v17650_v25  ;;  %v17658_v6 = vpop.f32.mrf.mxu0  ;;  %v19316_v25 = vld [vmem:[%s23934_s10 + $0x18] sm:$0xff]  }
 0x440   : > { %v17659_v37 = vadd.f32 %v17658_v6, %v17657_v32  ;;  %v17764_v28 = vpop.f32.mrf.mxu1  ;;  %18062 = vmatpush3.bf16.msra.mxu1 %v19316_v25  ;;  %v19302_v36 = vld [vmem:[#allocation4 + $0x338] ss:$36 sps:$4 sm:$0xff]  }
 0x441   : > { %v17765_v10 = vadd.f32 %v17764_v28, %v17763_v1  ;;  %v17660_v16 = vpop.f32.mrf.mxu0  ;;  %v19303_v1 = vld [vmem:[#allocation4 + $0x380] ss:$36 sps:$4 sm:$0xff]  }
 0x442   : > { %v17766_v44 = vpop.f32.mrf.mxu1 }
 0x443   : > { %v21490_v20 = vadd.f32 %v17765_v10, %v17653_v53  ;;  %v17661_v21 = vpop.f32.mrf.mxu0 }
 0x444   : > { %v17662_v42 = vadd.f32 %v17661_v21, %v17660_v16  ;;  %v17767_v51 = vpop.f32.mrf.mxu1 }
 0x445   : > { %v17768_v40 = vadd.f32 %v17767_v51, %v17766_v44  ;;  %v17663_v61 = vpop.f32.mrf.mxu0  ;;  %18638 = vmatmul.mubr.bf16.gmra.mxu0 %v19298_v0 }
 0x446   : > { %v17769_v52 = vpop.f32.mrf.mxu1  ;;  %18641 = vmatprep.mubr.bf16.mxu0 %v19299_v58  ;;  %v19317_v58 = vld [vmem:[%s23934_s10 + $0x50] sm:$0xff]  }
 0x447   : > { %v21492_v13 = vadd.f32 %v17768_v40, %v17656_v31  ;;  %v17664_v46 = vpop.f32.mrf.mxu0  ;;  %v19318_v40 = vld [vmem:[%s23934_s10 + $0xf8] sm:$0xff]   ;;  %18063 = vmatprep.subr.bf16.mxu1 %v19317_v58 }
 0x448   : > { %v17665_v18 = vadd.f32 %v17664_v46, %v17663_v61  ;;  %v17770_v54 = vpop.f32.mrf.mxu1  ;;  %v19319_v61 = vld [vmem:[%s23934_s10 + $0x10] sm:$0xff]   ;;  %18165 = vmatprep.subr.bf16.mxu0 %v19318_v40  ;;  %v19326_v40 = vld [vmem:[%s23934_s10 + $0xa8] sm:$0xff]  }
 0x449   : > { %v17771_v19 = vadd.f32 %v17770_v54, %v17769_v52  ;;  %v17666_v63 = vpop.f32.mrf.mxu0  ;;  %v19320_v54 = vld [vmem:[%s23934_s10 + $0xb8] sm:$0xff]   ;;  %18064 = vmatpush3.bf16.msra.mxu1 %v19319_v61 }
 0x44a   : > { %v17772_v57 = vpop.f32.mrf.mxu1  ;;  %18166 = vmatpush3.bf16.msra.mxu0 %v19320_v54 }
 0x44b   : > { %v21500_v45 = vadd.f32 %v17771_v19, %v17659_v37  ;;  %v17667_v9 = vpop.f32.mrf.mxu0 }
 0x44c   : > { %v17668_v59 = vadd.f32 %v17667_v9, %v17666_v63  ;;  %v17773_v22 = vpop.f32.mrf.mxu1  ;;  %v19305_v63 = vld [vmem:[#allocation4 + $0x410] ss:$36 sps:$4 sm:$0xff]  }
 0x44d   : > { %v17774_v53 = vadd.f32 %v17773_v22, %v17772_v57  ;;  %v17669_v8 = vpop.f32.mrf.mxu0  ;;  %18642 = vmatmul.mubr.bf16.gmra.mxu0 %v19300_v15 }
 0x44e   : > { %v17775_v14 = vpop.f32.mrf.mxu1  ;;  %18645 = vmatprep.mubr.bf16.mxu0 %v19301_v30 }
 0x44f   : > { %v21502_v43 = vadd.f32 %v17774_v53, %v17662_v42  ;;  %v17670_v11 = vpop.f32.mrf.mxu0 }
 0x450   : > { %v17671_v17 = vadd.f32 %v17670_v11, %v17669_v8  ;;  %v17776_v34 = vpop.f32.mrf.mxu1  ;;  %v19321_v11 = vld [vmem:[%s23934_s10 + $0xf0] sm:$0xff]  }
 0x451   : > { %v17777_v3 = vadd.f32 %v17776_v34, %v17775_v14  ;;  %v17672_v26 = vpop.f32.mrf.mxu0  ;;  %18167 = vmatprep.subr.bf16.mxu0 %v19321_v11 }
 0x452   : > { %v17778_v31 = vpop.f32.mrf.mxu1 }
 0x453   : > { %v21504_v56 = vadd.f32 %v17777_v3, %v17665_v18  ;;  %v17673_v7 = vpop.f32.mrf.mxu0  ;;  %v19304_v18 = vld [vmem:[#allocation4 + $0x3c8] ss:$36 sps:$4 sm:$0xff]  }
 0x454   : > { %v17779_v32 = vpop.f32.mrf.mxu1  ;;  %v17674_v57 = vadd.f32 %v17673_v7, %v17672_v26 }
 0x455   : > { %v17780_v6 = vadd.f32 %v17779_v32, %v17778_v31  ;;  %v17675_v37 = vpop.f32.mrf.mxu0  ;;  %18646 = vmatmul.mubr.bf16.gmra.mxu0 %v19302_v36 }
 0x456   : > { %v17781_v28 = vpop.f32.mrf.mxu1  ;;  %18649 = vmatprep.mubr.bf16.mxu0 %v19303_v1 }
 0x457   : > { %v21506_v10 = vadd.f32 %v17780_v6, %v17668_v59  ;;  %v17676_v16 = vpop.f32.mrf.mxu0 }
 0x458   : > { %v17677_v44 = vadd.f32 %v17676_v16, %v17675_v37  ;;  %v17782_v21 = vpop.f32.mrf.mxu1 }
 0x459   : > { %v17783_v0 = vadd.f32 %v17782_v21, %v17781_v28  ;;  %v17678_v42 = vpop.f32.mrf.mxu0 }
 0x45a   : > { %v17784_v51 = vpop.f32.mrf.mxu1 }
 0x45b   : > { %v21517_v52 = vadd.f32 %v17783_v0, %v17671_v17  ;;  %v17679_v46 = vpop.f32.mrf.mxu0  ;;  %v19322_v17 = vld [vmem:[%s23934_s10 + $0xb0] sm:$0xff]  }
 0x45c   : > { %v17785_v19 = vpop.f32.mrf.mxu1  ;;  %v17680_v31 = vadd.f32 %v17679_v46, %v17678_v42  ;;  %18168 = vmatpush3.bf16.msra.mxu0 %v19322_v17  ;;  %v19324_v42 = vld [vmem:[%s23934_s10 + $0xe8] sm:$0xff]  }
 0x45d   : > { %v17786_v55 = vadd.f32 %v17785_v19, %v17784_v51  ;;  %v17681_v25 = vpop.f32.mrf.mxu0  ;;  %18650 = vmatmul.mubr.bf16.gmra.mxu0 %v19304_v18  ;;  %18169 = vmatprep.subr.bf16.mxu0 %v19324_v42 }
 0x45e   : > { %v17787_v9 = vpop.f32.mrf.mxu1  ;;  %18653 = vmatprep.mubr.bf16.mxu0 %v19305_v63 }
 0x45f   : > { %v21522_v15 = vadd.f32 %v17786_v55, %v17674_v57  ;;  %v17682_v59 = vpop.f32.mrf.mxu0 }
 0x460   : > { %v17683_v22 = vadd.f32 %v17682_v59, %v17681_v25  ;;  %v17788_v30 = vpop.f32.mrf.mxu1  ;;  %18170 = vmatpush3.bf16.msra.mxu0 %v19326_v40 }
 0x461   : > { %v17789_v53 = vadd.f32 %v17788_v30, %v17787_v9  ;;  %v17684_v8 = vpop.f32.mrf.mxu0 }
 0x462   : > { %v17790_v14 = vpop.f32.mrf.mxu1 }
 0x463   : > { %v21530_v34 = vadd.f32 %v17789_v53, %v17677_v44  ;;  %v17685_v3 = vpop.f32.mrf.mxu0  ;;  %v19323_v44 = vld [vmem:[%s23934_s10 + $0x48] sm:$0xff]  }
 0x464   : > { %v17791_v26 = vpop.f32.mrf.mxu1  ;;  %18065 = vmatprep.subr.bf16.mxu1 %v19323_v44  ;;  %v17686_v46 = vadd.f32 %v17685_v3, %v17684_v8 }
 0x465   : > { %v17792_v7 = vadd.f32 %v17791_v26, %v17790_v14  ;;  %v17687_v36 = vpop.f32.mrf.mxu0  ;;  %18654 = vmatmul.mubr.bf16.gmra.mxu0 %v21426_v29  ;;  %v19325_v29 = vld [vmem:[%s23934_s10 + $0x8] sm:$0xff]  }
 0x466   : > { %v17793_v32 = vpop.f32.mrf.mxu1  ;;  %18066 = vmatpush3.bf16.msra.mxu1 %v19325_v29 }
 0x467   : > { %v21533_v1 = vadd.f32 %v17792_v7, %v17680_v31  ;;  %v17688_v6 = vpop.f32.mrf.mxu0 }
 0x468   : > { %v17689_v37 = vadd.f32 %v17688_v6, %v17687_v36  ;;  %v17794_v28 = vpop.f32.mrf.mxu1 }
 0x469   : > { %v17795_v16 = vadd.f32 %v17794_v28, %v17793_v32  ;;  %v17690_v21 = vpop.f32.mrf.mxu0 }
 0x46a   : > { %v17796_v0 = vpop.f32.mrf.mxu1 }
 0x46b   : > { %v21544_v51 = vadd.f32 %v17795_v16, %v17683_v22  ;;  %v17691_v58 = vpop.f32.mrf.mxu0 }
 0x46c   : > { %v17797_v61 = vpop.f32.mrf.mxu1  ;;  %v17692_v17 = vadd.f32 %v17691_v58, %v17690_v21  ;;  %v19327_v21 = vld [vmem:[%s23934_s10 + $0xe0] sm:$0xff]  }
 0x46d   : > { %v17798_v18 = vadd.f32 %v17797_v61, %v17796_v0  ;;  %v17821_v54 = vpop.f32.mrf.mxu0  ;;  %18171 = vmatprep.subr.bf16.mxu0 %v19327_v21 }
 0x46e   : > { %v17799_v19 = vpop.f32.mrf.mxu1 }
 0x46f   : > { %v21549_v63 = vadd.f32 %v17798_v18, %v17686_v46  ;;  %v17822_v57 = vpop.f32.mrf.mxu0 }
 0x470   : > { %v17800_v55 = vpop.f32.mrf.mxu1  ;;  %v17823_v25 = vadd.f32 %v17822_v57, %v17821_v54 }
 0x471   : > { %v17801_v9 = vadd.f32 %v17800_v55, %v17799_v19  ;;  %v17824_v59 = vpop.f32.mrf.mxu0 }
 0x472   : > { %v8902_v22 = vadd.f32 %v17823_v25, %v21429_v33  ;;  %v17802_v30 = vpop.f32.mrf.mxu1 }
 0x473   : > { %v21552_v53 = vadd.f32 %v17801_v9, %v17689_v37  ;;  %v17825_v14 = vpop.f32.mrf.mxu0 }
 0x474   : > { %v17803_v11 = vpop.f32.mrf.mxu1  ;;  %v17826_v8 = vadd.f32 %v17825_v14, %v17824_v59 }
 0x475   : > { %24074 = vst [vmem:[#allocation8_spill] sm:$0xff] %v21552_v53  ;;  %v17804_v3 = vadd.f32 %v17803_v11, %v17802_v30  ;;  %v17827_v26 = vpop.f32.mrf.mxu0  ;;  %v19331_v30 = vld [vmem:[%s23934_s10] sm:$0xff]  }
 0x476   : > { %v8905_v31 = vadd.f32 %v17826_v8, %v21431_v23  ;;  %v17933_v7 = vpop.f32.mrf.mxu1  ;;  %v19328_v23 = vld [vmem:[%s23934_s10 + $0xa0] sm:$0xff]  }
 0x477   : > { %v21555_v36 = vadd.f32 %v17804_v3, %v17692_v17  ;;  %v17828_v32 = vpop.f32.mrf.mxu0  ;;  %18172 = vmatpush3.bf16.msra.mxu0 %v19328_v23  ;;  %v19335_v23 = vld [vmem:[#allocation4] ss:$36 sps:$4 sm:$0xff]  }
 0x478   : > { %v17829_v6 = vadd.f32 %v17828_v32, %v17827_v26  ;;  %v17934_v28 = vpop.f32.mrf.mxu1 }
 0x479   : > { %24075 = vst [vmem:[#allocation7_spill] sm:$0xff] %v21555_v36  ;;  %v17935_v16 = vadd.f32 %v17934_v28, %v17933_v7  ;;  %v17830_v0 = vpop.f32.mrf.mxu0 }
 0x47a   : > { %v21558_v33 = vadd.f32 %v17829_v6, %v21433_v48  ;;  %v17936_v37 = vpop.f32.mrf.mxu1 }
 0x47b   : > { %v17831_v44 = vpop.f32.mrf.mxu0  ;;  %v21560_v42 = vadd.f32 %v17935_v16, %v8902_v22  ;;  %v19330_v22 = vld [vmem:[%s23934_s10 + $0xd8] sm:$0xff]  }
 0x47c   : > { %v17832_v29 = vadd.f32 %v17831_v44, %v17830_v0  ;;  %v17937_v58 = vpop.f32.mrf.mxu1  ;;  %18173 = vmatprep.subr.bf16.mxu0 %v19330_v22  ;;  %v19334_v0 = vld [vmem:[%s23934_s10 + $0x90] sm:$0xff]  }
 0x47d   : > { %24076 = vst [vmem:[#allocation9_spill] sm:$0xff] %v21560_v42  ;;  %v17938_v40 = vadd.f32 %v17937_v58, %v17936_v37  ;;  %v17833_v61 = vpop.f32.mrf.mxu0 }
 0x47e   : > { %v21569_v48 = vadd.f32 %v17832_v29, %v21435_v50  ;;  %v21571_v46 = vpop.f32.mrf.mxu1  ;;  %v19329_v50 = vld [vmem:[%s23934_s10 + $0x40] sm:$0xff]  }
 0x47f   : > { %v17834_v18 = vpop.f32.mrf.mxu0  ;;  %v21573_v54 = vadd.f32 %v17938_v40, %v8905_v31  ;;  %18067 = vmatprep.subr.bf16.mxu1 %v19329_v50  ;;  %v19337_v29 = vld [vmem:[#allocation4 + $0x4] ss:$36 sps:$4 sm:$0xff]  }
 0x480   : > { %v17835_v19 = vadd.f32 %v17834_v18, %v17833_v61  ;;  %v21575_v57 = vpop.f32.mrf.mxu1  ;;  %18068 = vmatpush3.bf16.msra.mxu1 %v19331_v30  ;;  %12788 = vmatprep.mubr.bf16.mxu1 %v19337_v29 }
 0x481   : > { %24077 = vst [vmem:[#allocation5_spill] sm:$0xff] %v21573_v54  ;;  %v17836_v55 = vpop.f32.mrf.mxu0 }
 0x482   : > { %v21578_v25 = vadd.f32 %v17835_v19, %v21443_v24  ;;  %v21580_v9 = vpop.f32.mrf.mxu1  ;;  %v19332_v24 = vld [vmem:[%s23934_s10 + $0x98] sm:$0xff]  }
 0x483   : > { %v17837_v59 = vpop.f32.mrf.mxu0  ;;  %18174 = vmatpush3.bf16.msra.mxu0 %v19332_v24  ;;  %12789 = vmatmul.mubr.bf16.vlgmr.msra.gmra.mxu1 %v19335_v23  ;;  %v19340_v24 = vld [vmem:[%s23934_s10 + $0x88] sm:$0xff]  }
 0x484   : > { %v17838_v14 = vadd.f32 %v17837_v59, %v17836_v55  ;;  %v21591_v11 = vpop.f32.mrf.mxu1 }
 0x485   : > { %v17839_v8 = vpop.f32.mrf.mxu0 }
 0x486   : > { %v21597_v17 = vadd.f32 %v17838_v14, %v21445_v38  ;;  %v21599_v3 = vpop.f32.mrf.mxu1  ;;  %v19333_v38 = vld [vmem:[%s23934_s10 + $0xd0] sm:$0xff]   ;;  %v19339_v14 = vld [vmem:[%s23934_s10 + $0x178] sm:$0xff]  }
 0x487   : > { %v17840_v26 = vpop.f32.mrf.mxu0  ;;  %18175 = vmatprep.subr.bf16.mxu0 %v19333_v38  ;;  %18277 = vmatprep.subr.bf16.mxu1 %v19339_v14 }
 0x488   : > { %v17841_v31 = vadd.f32 %v17840_v26, %v17839_v8  ;;  %v21601_v7 = vpop.f32.mrf.mxu1  ;;  %18176 = vmatpush3.bf16.msra.mxu0 %v19334_v0  ;;  %v19341_v8 = vld [vmem:[%s23934_s10 + $0x138] sm:$0xff]  }
 0x489   : > { %v17842_v32 = vpop.f32.mrf.mxu0  ;;  %18278 = vmatpush3.bf16.msra.mxu1 %v19341_v8 }
 0x48a   : > { %v21604_v6 = vadd.f32 %v17841_v31, %v21447_v62  ;;  %v21606_v28 = vpop.f32.mrf.mxu1 }
 0x48b   : > { %v17843_v16 = vpop.f32.mrf.mxu0 }
 0x48c   : > { %v17844_v37 = vadd.f32 %v17843_v16, %v17842_v32  ;;  %v21614_v44 = vpop.f32.mrf.mxu1  ;;  %v19342_v16 = vld [vmem:[%s23934_s10 + $0xc0] sm:$0xff]  }
 0x48d   : > { %v17845_v21 = vpop.f32.mrf.mxu0 }
 0x48e   : > { %v21617_v62 = vadd.f32 %v17844_v37, %v21449_v39  ;;  %v21619_v58 = vpop.f32.mrf.mxu1  ;;  %v19338_v39 = vld [vmem:[%s23934_s10 + $0xc8] sm:$0xff]  }
 0x48f   : > { %v17846_v40 = vpop.f32.mrf.mxu0  ;;  %18177 = vmatprep.subr.bf16.mxu0 %v19338_v39 }
 0x490   : > { %v17847_v61 = vadd.f32 %v17846_v40, %v17845_v21  ;;  %v21621_v18 = vpop.f32.mrf.mxu1  ;;  %18178 = vmatpush3.bf16.msra.mxu0 %v19340_v24 }
 0x491   : > { %v17848_v19 = vpop.f32.mrf.mxu0  ;;  %18179 = vmatprep.subr.bf16.mxu0 %v19342_v16  ;;  %v19356_v16 = vld [vmem:[%s23934_s10 + $0x170] sm:$0xff]  }
 0x492   : > { %v21624_v55 = vadd.f32 %v17847_v61, %v21457_v4  ;;  %v21626_v59 = vpop.f32.mrf.mxu1  ;;  %18279 = vmatprep.subr.bf16.mxu1 %v19356_v16 }
 0x493   : > { %v17849_v50 = vpop.f32.mrf.mxu0 }
 0x494   : > { %24078 = vst [vmem:[#allocation11_spill] sm:$0xff] %v21624_v55  ;;  %v17850_v22 = vadd.f32 %v17849_v50, %v17848_v19  ;;  %v21628_v30 = vpop.f32.mrf.mxu1 }
 0x495   : > { %v17851_v4 = vpop.f32.mrf.mxu0 }
 0x496   : > { %v21643_v26 = vadd.f32 %v17850_v22, %v21459_v12  ;;  %v21645_v31 = vpop.f32.mrf.mxu1  ;;  %v19343_v12 = vld [vmem:[%s23934_s10 + $0x80] sm:$0xff]  }
 0x497   : > { %v17852_v32 = vpop.f32.mrf.mxu0  ;;  %18180 = vmatpush3.bf16.msra.mxu0 %v19343_v12 }
 0x498   : > { %24079 = vst [vmem:[#allocation10_spill] sm:$0xff] %v21643_v26  ;;  %v17853_v38 = vadd.f32 %v17852_v32, %v17851_v4  ;;  %v21650_v0 = vpop.f32.mrf.mxu1 }
 0x499   : > { %v17854_v37 = vpop.f32.mrf.mxu0 }
 0x49a   : > { %v21656_v21 = vadd.f32 %v17853_v38, %v21461_v2  ;;  %v21658_v23 = vpop.f32.mrf.mxu1  ;;  %v19358_v38 = vld [vmem:[%s23934_s10 + $0x130] sm:$0xff]  }
 0x49b   : > { %v17855_v29 = vpop.f32.mrf.mxu0  ;;  %18280 = vmatpush3.bf16.msra.mxu1 %v19358_v38 }
 0x49c   : > { %24080 = vst [vmem:[#allocation18_spill] sm:$0xff] %v21656_v21  ;;  %v17856_v40 = vadd.f32 %v17855_v29, %v17854_v37  ;;  %v21660_v61 = vpop.f32.mrf.mxu1 }
 0x49d   : > { %v17857_v19 = vpop.f32.mrf.mxu0 }
 0x49e   : > { %v21663_v50 = vadd.f32 %v17856_v40, %v21463_v47  ;;  %v21665_v22 = vpop.f32.mrf.mxu1  ;;  %v19357_v47 = vld [vmem:[%s23934_s10 + $0x1f8] sm:$0xff]  }
 0x49f   : > { %v17858_v39 = vpop.f32.mrf.mxu0  ;;  %18389 = vmatprep.subr.bf16.mxu0 %v19357_v47 }
 0x4a0   : > { %24081 = vst [vmem:[#allocation19_spill] sm:$0xff] %v21663_v50  ;;  %v17859_v14 = vadd.f32 %v17858_v39, %v17857_v19  ;;  %v21667_v24 = vpop.f32.mrf.mxu1 }
 0x4a1   : > { %v17860_v4 = vpop.f32.mrf.mxu0 }
 0x4a2   : > { %v21670_v2 = vadd.f32 %v17859_v14, %v21472_v41  ;;  %v21672_v8 = vpop.f32.mrf.mxu1 }
 0x4a3   : > { %v17861_v32 = vpop.f32.mrf.mxu0 }
 0x4a4   : > { %24082 = vst [vmem:[#allocation12_spill] sm:$0xff] %v21670_v2  ;;  %v17862_v37 = vadd.f32 %v17861_v32, %v17860_v4  ;;  %v21683_v12 = vpop.f32.mrf.mxu1 }
 0x4a5   : > { %v17863_v41 = vpop.f32.mrf.mxu0 }
 0x4a6   : > { %v21686_v29 = vadd.f32 %v17862_v37, %v21474_v27  ;;  %v21688_v40 = vpop.f32.mrf.mxu1 }
 0x4a7   : > { %v17864_v19 = vpop.f32.mrf.mxu0 }
 0x4a8   : > { %24083 = vst [vmem:[#allocation13_spill] sm:$0xff] %v21686_v29  ;;  %v17865_v39 = vadd.f32 %v17864_v19, %v17863_v41  ;;  %v21690_v14 = vpop.f32.mrf.mxu1 }
 0x4a9   : > { %v17866_v54 = vpop.f32.mrf.mxu0 }
 0x4aa   : > { %v21693_v36 = vadd.f32 %v17865_v39, %v21476_v35  ;;  %v21695_v4 = vpop.f32.mrf.mxu1 }
 0x4ab   : > { %v17867_v32 = vpop.f32.mrf.mxu0 }
 0x4ac   : > { %24084 = vst [vmem:[#allocation22_spill] sm:$0xff] %v21693_v36  ;;  %v17868_v53 = vadd.f32 %v17867_v32, %v17866_v54  ;;  %v21697_v16 = vpop.f32.mrf.mxu1  ;;  %v19372_v54 = vld [vmem:[%s23934_s10 + $0x168] sm:$0xff]  }
 0x4ad   : > { %v17869_v47 = vpop.f32.mrf.mxu0  ;;  %18281 = vmatprep.subr.bf16.mxu1 %v19372_v54 }
 0x4ae   : > { %v21700_v27 = vadd.f32 %v17868_v53, %v21478_v5  ;;  %v21702_v37 = vpop.f32.mrf.mxu1  ;;  %v19374_v5 = vld [vmem:[%s23934_s10 + $0x128] sm:$0xff]  }
 0x4af   : > { %v17870_v38 = vpop.f32.mrf.mxu0  ;;  %18282 = vmatpush3.bf16.msra.mxu1 %v19374_v5 }
 0x4b0   : > { %24085 = vst [vmem:[#allocation14_spill] sm:$0xff] %v21700_v27  ;;  %v17871_v41 = vadd.f32 %v17870_v38, %v17869_v47  ;;  %v21704_v19 = vpop.f32.mrf.mxu1 }
 0x4b1   : > { %v17872_v42 = vpop.f32.mrf.mxu0 }
 0x4b2   : > { %v21707_v35 = vadd.f32 %v17871_v41, %v21486_v60  ;;  %v21709_v39 = vpop.f32.mrf.mxu1  ;;  %v19388_v60 = vld [vmem:[%s23934_s10 + $0x160] sm:$0xff]  }
 0x4b3   : > { %v17873_v36 = vpop.f32.mrf.mxu0  ;;  %18283 = vmatprep.subr.bf16.mxu1 %v19388_v60 }
 0x4b4   : > { %24086 = vst [vmem:[#allocation24_spill] sm:$0xff] %v21707_v35  ;;  %v17874_v53 = vadd.f32 %v17873_v36, %v17872_v42  ;;  %v21717_v32 = vpop.f32.mrf.mxu1 }
 0x4b5   : > { %v17875_v47 = vpop.f32.mrf.mxu0 }
 0x4b6   : > { %v21723_v38 = vadd.f32 %v17874_v53, %v21488_v49  ;;  %v21725_v41 = vpop.f32.mrf.mxu1  ;;  %v19390_v49 = vld [vmem:[%s23934_s10 + $0x120] sm:$0xff]  }
 0x4b7   : > { %v17876_v35 = vpop.f32.mrf.mxu0  ;;  %18284 = vmatpush3.bf16.msra.mxu1 %v19390_v49 }
 0x4b8   : > { %24087 = vst [vmem:[#allocation28_spill] sm:$0xff] %v21723_v38  ;;  %v17877_v27 = vadd.f32 %v17876_v35, %v17875_v47  ;;  %v21727_v29 = vpop.f32.mrf.mxu1 }
 0x4b9   : > { %v17878_v36 = vpop.f32.mrf.mxu0 }
 0x4ba   : > { %v21730_v42 = vadd.f32 %v17877_v27, %v21490_v20  ;;  %v21732_v54 = vpop.f32.mrf.mxu1 }
 0x4bb   : > { %v17879_v2 = vpop.f32.mrf.mxu0 }
 0x4bc   : > { %24088 = vst [vmem:[#allocation29_spill] sm:$0xff] %v21730_v42  ;;  %v17880_v50 = vadd.f32 %v17879_v2, %v17878_v36  ;;  %v21734_v21 = vpop.f32.mrf.mxu1 }
 0x4bd   : > { %v17881_v5 = vpop.f32.mrf.mxu0 }
 0x4be   : > { %v21740_v53 = vadd.f32 %v17880_v50, %v21492_v13  ;;  %v21742_v35 = vpop.f32.mrf.mxu1  ;;  %v19404_v13 = vld [vmem:[%s23934_s10 + $0x158] sm:$0xff]  }
 0x4bf   : > { %v17882_v47 = vpop.f32.mrf.mxu0  ;;  %18285 = vmatprep.subr.bf16.mxu1 %v19404_v13 }
 0x4c0   : > { %24089 = vst [vmem:[#allocation6_spill] sm:$0xff] %v21740_v53  ;;  %v17883_v20 = vadd.f32 %v17882_v47, %v17881_v5  ;;  %v21744_v27 = vpop.f32.mrf.mxu1 }
 0x4c1   : > { %v17884_v60 = vpop.f32.mrf.mxu0 }
 0x4c2   : > { %v21747_v2 = vadd.f32 %v17883_v20, %v21500_v45  ;;  %v21749_v36 = vpop.f32.mrf.mxu1 }
 0x4c3   : > { %v17885_v42 = vpop.f32.mrf.mxu0 }
 0x4c4   : > { %24090 = vst [vmem:[#allocation15_spill] sm:$0xff] %v21747_v2  ;;  %v17886_v38 = vadd.f32 %v17885_v42, %v17884_v60  ;;  %v21751_v26 = vpop.f32.mrf.mxu1 }
 0x4c5   : > { %24091 = vst [vmem:[#allocation31_spill] sm:$0xff] %v21751_v26  ;;  %v17887_v55 = vpop.f32.mrf.mxu0 }
 0x4c6   : > { %v21757_v50 = vadd.f32 %v17886_v38, %v21502_v43  ;;  %v21759_v49 = vpop.f32.mrf.mxu1  ;;  %v19406_v43 = vld [vmem:[%s23934_s10 + $0x118] sm:$0xff]  }
 0x4c7   : > { %v17888_v5 = vpop.f32.mrf.mxu0  ;;  %18286 = vmatpush3.bf16.msra.mxu1 %v19406_v43 }
 0x4c8   : > { %24092 = vst [vmem:[#allocation33_spill] sm:$0xff] %v21757_v50  ;;  %v17889_v45 = vadd.f32 %v17888_v5, %v17887_v55  ;;  %v21761_v47 = vpop.f32.mrf.mxu1 }
 0x4c9   : > { %24093 = vst [vmem:[#allocation35_spill] sm:$0xff] %v21761_v47  ;;  %v17890_v20 = vpop.f32.mrf.mxu0 }
 0x4ca   : > { %v21764_v42 = vadd.f32 %v17889_v45, %v21504_v56  ;;  %v21766_v60 = vpop.f32.mrf.mxu1 }
 0x4cb   : > { %24095 = vst [vmem:[#allocation17_spill] sm:$0xff] %v21766_v60  ;;  %v17891_v2 = vpop.f32.mrf.mxu0 }
 0x4cc   : > { %24094 = vst [vmem:[#allocation16_spill] sm:$0xff] %v21764_v42  ;;  %v17892_v53 = vadd.f32 %v17891_v2, %v17890_v20  ;;  %v21768_v26 = vpop.f32.mrf.mxu1 }
 0x4cd   : > { %24096 = vst [vmem:[#allocation20_spill] sm:$0xff] %v21768_v26  ;;  %v17893_v38 = vpop.f32.mrf.mxu0 }
 0x4ce   : > { %v21774_v13 = vadd.f32 %v17892_v53, %v21506_v10  ;;  %v21776_v55 = vpop.f32.mrf.mxu1  ;;  %v19420_v10 = vld [vmem:[%s23934_s10 + $0x150] sm:$0xff]  }
 0x4cf   : > { %v17894_v5 = vpop.f32.mrf.mxu0  ;;  %18287 = vmatprep.subr.bf16.mxu1 %v19420_v10 }
 0x4d0   : > { %24097 = vst [vmem:[#allocation37_spill] sm:$0xff] %v21774_v13  ;;  %v17895_v56 = vadd.f32 %v17894_v5, %v17893_v38  ;;  %v21778_v45 = vpop.f32.mrf.mxu1 }
 0x4d1   : > { %v17896_v42 = vpop.f32.mrf.mxu0 }
 0x4d2   : > { %v21781_v2 = vadd.f32 %v17895_v56, %v21517_v52  ;;  %v21783_v20 = vpop.f32.mrf.mxu1 }
 0x4d3   : > { %v17897_v50 = vpop.f32.mrf.mxu0 }
 0x4d4   : > { %24098 = vst [vmem:[#allocation21_spill] sm:$0xff] %v21781_v2  ;;  %v17898_v26 = vadd.f32 %v17897_v50, %v17896_v42  ;;  %v21785_v60 = vpop.f32.mrf.mxu1 }
 0x4d5   : > { %24099 = vst [vmem:[#allocation23_spill] sm:$0xff] %v21785_v60  ;;  %v17899_v47 = vpop.f32.mrf.mxu0 }
 0x4d6   : > { %v21791_v53 = vadd.f32 %v17898_v26, %v21522_v15  ;;  %v21793_v43 = vpop.f32.mrf.mxu1  ;;  %v19422_v15 = vld [vmem:[%s23934_s10 + $0x110] sm:$0xff]  }
 0x4d7   : > { %v17900_v38 = vpop.f32.mrf.mxu0  ;;  %18288 = vmatpush3.bf16.msra.mxu1 %v19422_v15  ;;  %v17950_v15 = vadd.f32 %v21614_v44, %v21606_v28 }
 0x4d8   : > { %24100 = vst [vmem:[#allocation25_spill] sm:$0xff] %v21791_v53  ;;  %v17901_v52 = vadd.f32 %v17900_v38, %v17899_v47  ;;  %v21795_v5 = vpop.f32.mrf.mxu1  ;;  %v17944_v53 = vadd.f32 %v21591_v11, %v21580_v9  ;;  %v19436_v11 = vld [vmem:[%s23934_s10 + $0x148] sm:$0xff]  }
 0x4d9   : > { %v17902_v56 = vpop.f32.mrf.mxu0  ;;  %18289 = vmatprep.subr.bf16.mxu1 %v19436_v11  ;;  %v18001_v11 = vadd.f32 %v21778_v45, %v21776_v55  ;;  %v24118_v45 = vld [vmem:[#allocation29_spill] sm:$0xff] }
 0x4da   : > { %v21798_v50 = vadd.f32 %v17901_v52, %v21530_v34  ;;  %v21800_v42 = vpop.f32.mrf.mxu1 }
 0x4db   : > { %v17903_v2 = vpop.f32.mrf.mxu0 }
 0x4dc   : > { %24101 = vst [vmem:[#allocation26_spill] sm:$0xff] %v21798_v50  ;;  %v17904_v13 = vadd.f32 %v17903_v2, %v17902_v56  ;;  %v21802_v60 = vpop.f32.mrf.mxu1  ;;  %v17941_v2 = vadd.f32 %v21575_v57, %v21571_v46  ;;  %v17953_v46 = vadd.f32 %v21621_v18, %v21619_v58  ;;  %v17956_v57 = vadd.f32 %v21628_v30, %v21626_v59 }
 0x4dd   : > { %24102 = vst [vmem:[#allocation27_spill] sm:$0xff] %v21802_v60  ;;  %v17905_v26 = vpop.f32.mrf.mxu0  ;;  %v21841_v58 = vadd.f32 %v17944_v53, %v21569_v48  ;;  %v17968_v18 = vadd.f32 %v21683_v12, %v21672_v8  ;;  %v17971_v59 = vadd.f32 %v21690_v14, %v21688_v40  ;;  %v17974_v30 = vadd.f32 %v21697_v16, %v21695_v4  ;;  %v24103_v14 = vld [vmem:[#allocation31_spill] sm:$0xff] }
 0x4de   : > { %v21808_v10 = vadd.f32 %v17904_v13, %v21533_v1  ;;  %v21810_v47 = vpop.f32.mrf.mxu1  ;;  %v17947_v13 = vadd.f32 %v21601_v7, %v21599_v3  ;;  %v17959_v3 = vadd.f32 %v21650_v0, %v21645_v31  ;;  %v17962_v7 = vadd.f32 %v21660_v61, %v21658_v23  ;;  %v24104_v16 = vld [vmem:[#allocation11_spill] sm:$0xff] }
 0x4df   : > { %v17906_v38 = vpop.f32.mrf.mxu0  ;;  %v17980_v48 = vadd.f32 %v21717_v32, %v21709_v39  ;;  %v21859_v61 = vadd.f32 %v17950_v15, %v21597_v17  ;;  %v21866_v12 = vadd.f32 %v17953_v46, %v21604_v6  ;;  %v21869_v40 = vadd.f32 %v17956_v57, %v21617_v62  ;;  %v24106_v39 = vld [vmem:[#allocation18_spill] sm:$0xff]  ;;  %v24107_v32 = vld [vmem:[#allocation19_spill] sm:$0xff] }
 0x4e0   : > { %v17907_v34 = vadd.f32 %v17906_v38, %v17905_v26  ;;  %v21812_v52 = vpop.f32.mrf.mxu1  ;;  %v21856_v23 = vadd.f32 %v17947_v13, %v21578_v25  ;;  %v17989_v25 = vadd.f32 %v21744_v27, %v21742_v35  ;;  %v17992_v17 = vadd.f32 %v24103_v14, %v21749_v36  ;;  %v24109_v35 = vld [vmem:[#allocation13_spill] sm:$0xff]  ;;  %v24110_v36 = vld [vmem:[#allocation35_spill] sm:$0xff]  ;;  %v24113_v13 = vld [vmem:[#allocation22_spill] sm:$0xff] }
 0x4e1   : > { %v17908_v56 = vpop.f32.mrf.mxu0  ;;  %v21885_v62 = vadd.f32 %v17968_v18, %v24107_v32  ;;  %v21891_v27 = vadd.f32 %v17974_v30, %v24109_v35  ;;  %v17995_v53 = vadd.f32 %v24110_v36, %v21759_v49  ;;  %v19438_v57 = vld [vmem:[%s23934_s10 + $0x108] sm:$0xff]   ;;  %v24116_v18 = vld [vmem:[#allocation24_spill] sm:$0xff]  ;;  %v24122_v36 = vld [vmem:[#allocation15_spill] sm:$0xff] }
 0x4e2   : > { %v21819_v50 = vadd.f32 %v17907_v34, %v21544_v51  ;;  %v18014_v60 = vpop.f32.mrf.mxu1  ;;  %v9071_v51 = vadd.f32 %v17941_v2, %v21558_v33  ;;  %v17965_v33 = vadd.f32 %v21667_v24, %v21665_v22  ;;  %v17983_v22 = vadd.f32 %v21727_v29, %v21725_v41  ;;  %v24105_v29 = vld [vmem:[#allocation10_spill] sm:$0xff]  ;;  %v24108_v41 = vld [vmem:[#allocation12_spill] sm:$0xff]  ;;  %v24111_v34 = vld [vmem:[#allocation17_spill] sm:$0xff]  ;;  %18290 = vmatpush3.bf16.msra.mxu1 %v19438_v57 }
 0x4e3   : > { %v17909_v1 = vpop.f32.mrf.mxu0  ;;  %v17986_v24 = vadd.f32 %v21734_v21, %v21732_v54  ;;  %v21888_v54 = vadd.f32 %v17971_v59, %v24108_v41  ;;  %v24112_v2 = vld [vmem:[#allocation20_spill] sm:$0xff] }
 0x4e4   : > { %v17910_v26 = vadd.f32 %v17909_v1, %v17908_v56  ;;  %v18015_v38 = vpop.f32.mrf.mxu1  ;;  %v21882_v6 = vadd.f32 %v17965_v33, %v24106_v39  ;;  %v17998_v56 = vadd.f32 %v24112_v2, %v24111_v34  ;;  %v21913_v33 = vld [vmem:[%s23932_s8] ss:$0 sm:$0xff]  ;;  %v21916_v59 = vadd.f32 %v17983_v22, %v24116_v18  ;;  %v24117_v30 = vld [vmem:[#allocation28_spill] sm:$0xff]  ;;  %v24120_v39 = vld [vmem:[#allocation27_spill] sm:$0xff] }
 0x4e5   : > { %v17911_v9 = vpop.f32.mrf.mxu0  ;;  %v18010_v32 = vadd.f32 %v24120_v39, %v21800_v42  ;;  %v18013_v22 = vadd.f32 %v21812_v52, %v21810_v47  ;;  %v21941_v34 = vadd.f32 %v17995_v53, %v24122_v36  ;;  %v24123_v42 = vld [vmem:[#allocation33_spill] sm:$0xff] }
 0x4e6   : > { %v21838_v28 = vadd.f32 %v17910_v26, %v21549_v63  ;;  %v18017_v44 = vpop.f32.mrf.mxu1  ;;  %v17977_v63 = vadd.f32 %v21704_v19, %v21702_v37  ;;  %v21876_v37 = vadd.f32 %v17959_v3, %v24104_v16  ;;  %v21879_v19 = vadd.f32 %v17962_v7, %v24105_v29  ;;  %v24114_v26 = vld [vmem:[#allocation14_spill] sm:$0xff]  ;;  %v24115_v3 = vld [vmem:[#allocation23_spill] sm:$0xff] }
 0x4e7   : > { %v17912_v31 = vpop.f32.mrf.mxu0  ;;  %v21901_v46 = vadd.f32 %v17980_v48, %v24114_v26  ;;  %v18004_v49 = vadd.f32 %v24115_v3, %v21783_v20  ;;  %v18007_v48 = vadd.f32 %v21795_v5, %v21793_v43  ;;  %v21924_v16 = vadd.f32 %v17989_v25, %v24118_v45  ;;  %v24119_v20 = vld [vmem:[#allocation6_spill] sm:$0xff]  ;;  %v21936_v43 = vld [vmem:[%s23933_s9] ss:$0 sm:$0xff] }
 0x4e8   : > { %v18018_v0 = vpop.f32.mrf.mxu1  ;;  %v21898_v15 = vadd.f32 %v17977_v63, %v24113_v13  ;;  %v21919_v63 = vadd.f32 %v17986_v24, %v24117_v30  ;;  %v21927_v29 = vadd.f32 %v17992_v17, %v24119_v20  ;;  %v18016_v24 = vadd.f32 %v18015_v38, %v18014_v60  ;;  %v24121_v17 = vld [vmem:[#allocation9_spill] sm:$0xff]  ;;  %v24124_v38 = vld [vmem:[#allocation16_spill] sm:$0xff] }
 0x4e9   : > { %v17914_v8 = vpop.f32.mrf.mxu0  ;;  %v17913_v41 = vadd.f32 %v17912_v31, %v17911_v9  ;;  %v21944_v2 = vadd.f32 %v17998_v56, %v24123_v42  ;;  %v18019_v47 = vadd.f32 %v18018_v0, %v18017_v44  ;;  %v21947_v9 = vadd.f32 %v18001_v11, %v24124_v38  ;;  %v24125_v31 = vld [vmem:[#allocation37_spill] sm:$0xff]  ;;  %v24127_v56 = vld [vmem:[#allocation8_spill] sm:$0xff] }
 0x4ea   : > { %v18020_v4 = vpop.f32.mrf.mxu1  ;;  %v21950_v13 = vadd.f32 %v18004_v49, %v24125_v31  ;;  %v21963_v11 = vadd.f32 %v18016_v24, %v21808_v10  ;;  %v24129_v49 = vld [vmem:[#allocation25_spill] sm:$0xff] }
 0x4eb   : > { %v17915_v21 = vpop.f32.mrf.mxu0  ;;  %v9022_v44 = vadd.f32 %v17913_v41, %v24127_v56  ;;  %v21966_v30 = vadd.f32 %v18010_v32, %v24129_v49  ;;  %v24131_v41 = vld [vmem:[#allocation5_spill] sm:$0xff] }
 0x4ec   : > { %v18021_v1 = vpop.f32.mrf.mxu1  ;;  %v17916_v60 = vadd.f32 %v17915_v21, %v17914_v8  ;;  %v24128_v8 = vld [vmem:[#allocation26_spill] sm:$0xff]  ;;  %v19452_v10 = vld [vmem:[%s23934_s10 + $0x140] sm:$0xff]  }
 0x4ed   : > { %v18627_v7 = vpop.f32.mrf.mxu0  ;;  %v21960_v21 = vadd.f32 %v18013_v22, %v24128_v8  ;;  %v18022_v39 = vadd.f32 %v18021_v1, %v18020_v4  ;;  %v21973_v22 = vadd.f32 %v18019_v47, %v21819_v50  ;;  %18291 = vmatprep.subr.bf16.mxu1 %v19452_v10 }
 0x4ee   : > { %v18023_v14 = vpop.f32.mrf.mxu1  ;;  %v9232_v55 = vadd.f32 %v18627_v7, %v9071_v51  ;;  %v24126_v7 = vld [vmem:[#allocation21_spill] sm:$0xff] }
 0x4ef   : > { %v9223_v5 = vpop.f32.mrf.mxu0  ;;  %v21956_v18 = vadd.f32 %v18007_v48, %v24126_v7  ;;  %v24130_v48 = vld [vmem:[#allocation7_spill] sm:$0xff]  ;;  %v21987_v7 = vadd.f32 %v18022_v39, %v21838_v28  ;;  %v19454_v28 = vld [vmem:[%s23934_s10 + $0x100] sm:$0xff]  }
 0x4f0   : > { %v9359_v51 = vmul.f32 %v21913_v33, %v9232_v55  ;;  %v18024_v25 = vpop.f32.mrf.mxu1  ;;  %v9224_v35 = vadd.f32 %v9223_v5, %v24121_v17  ;;  %v9025_v20 = vadd.f32 %v17916_v60, %v24130_v48  ;;  %18292 = vmatpush3.bf16.msra.mxu1 %v19454_v28 }
 0x4f1   : > { %v18628_v52 = vpop.f32.mrf.mxu0  ;;  %v18025_v36 = vadd.f32 %v18024_v25, %v18023_v14 }
 0x4f2   : > { %v9398_v26 = vadd.f32 %v21936_v43, %v9359_v51  ;;  %v9357_v57 = vmul.f32 %v21913_v33, %v9224_v35  ;;  %v18026_v3 = vpop.f32.mrf.mxu1  ;;  %v9235_v53 = vadd.f32 %v18628_v52, %v21841_v58 }
 0x4f3   : > { %v9226_v0 = vpop.f32.mrf.mxu0 }
 0x4f4   : > { %vm9430_vm1 = vcmp.gt.f32.partialorder %v9398_v26, 0.0  ;;  %v9462_v55 = vmul.f32 0.01, %v9398_v26  ;;  %v9396_v45 = vadd.f32 %v21936_v43, %v9357_v57  ;;  %v9360_v58 = vmul.f32 %v21913_v33, %v9235_v53  ;;  %v18027_v35 = vpop.f32.mrf.mxu1 }
 0x4f5   : > { %v9227_v5 = vadd.f32 %v9226_v0, %v24131_v41  ;;  %v18631_v51 = vpop.f32.mrf.mxu0  ;;  %v18028_v38 = vadd.f32 %v18027_v35, %v18026_v3 }
 0x4f6   : > { %v9494_v32 = vsel %vm9430_vm1, %v9398_v26, %v9462_v55  ;;  %vm9428_vm2 = vcmp.gt.f32.partialorder %v9396_v45, 0.0  ;;  %v9460_v24 = vmul.f32 0.01, %v9396_v45  ;;  %v9399_v17 = vadd.f32 %v21936_v43, %v9360_v58 }
 0x4f7   : > { %9526 = vst [vmem:[#allocation2 + $0x48] sm:$0xff] %v9494_v32  ;;  %v9358_v4 = vmul.f32 %v21913_v33, %v9227_v5  ;;  %v9248_v1 = vadd.f32 %v18631_v51, %v21866_v12  ;;  %v9239_v42 = vpop.f32.mrf.mxu0  ;;  %v16839_v60 = vpack.c.bf16 %v9494_v32, %v9494_v32  ;;  %v21998_v39 = vadd.f32 %v18028_v38, %v9025_v20 }
 0x4f8   : > { %v9492_v50 = vsel %vm9428_vm2, %v9396_v45, %v9460_v24  ;;  %vm9431_vm3 = vcmp.gt.f32.partialorder %v9399_v17, 0.0  ;;  %v9463_v47 = vmul.f32 0.01, %v9399_v17  ;;  %v9240_v52 = vadd.f32 %v9239_v42, %v21856_v23 }
 0x4f9   : > { %9524 = vst [vmem:[#allocation2 + $0x28] sm:$0xff] %v9492_v50  ;;  %v9397_v31 = vadd.f32 %v21936_v43, %v9358_v4  ;;  %v9363_v26 = vmul.f32 %v21913_v33, %v9248_v1  ;;  %v18632_v57 = vpop.f32.mrf.mxu0  ;;  %v16837_v14 = vpack.c.bf16 %v9492_v50, %v9492_v50  ;;  %9912 = vst [vmem:[#allocation4 + $0x94] sm:$0xf] %v16839_v60 }
 0x4fa   : > { %v9495_v25 = vsel %vm9431_vm3, %v9399_v17, %v9463_v47  ;;  %v9361_v12 = vmul.f32 %v21913_v33, %v9240_v52  ;;  %v9251_v53 = vadd.f32 %v18632_v57, %v21869_v40  ;;  %v21993_v45 = vadd.f32 %v18025_v36, %v9022_v44 }
 0x4fb   : > { %9527 = vst [vmem:[#allocation2 + $0x50] sm:$0xff] %v9495_v25  ;;  %vm9429_vm4 = vcmp.gt.f32.partialorder %v9397_v31, 0.0  ;;  %v9461_v23 = vmul.f32 0.01, %v9397_v31  ;;  %v9402_v3 = vadd.f32 %v21936_v43, %v9363_v26  ;;  %v9242_v56 = vpop.f32.mrf.mxu0  ;;  %9910 = vst [vmem:[#allocation4 + $0x4c] sm:$0xf] %v16837_v14  ;;  %v16840_v0 = vpack.c.bf16 %v9495_v25, %v9495_v25 }
 0x4fc   : > { %v9400_v8 = vadd.f32 %v21936_v43, %v9361_v12  ;;  %v9364_v49 = vmul.f32 %v21913_v33, %v9251_v53  ;;  %v9243_v55 = vadd.f32 %v9242_v56, %v21859_v61 }
 0x4fd   : > { %v9493_v40 = vsel %vm9429_vm4, %v9397_v31, %v9461_v23  ;;  %vm9434_vm5 = vcmp.gt.f32.partialorder %v9402_v3, 0.0  ;;  %v9466_v58 = vmul.f32 0.01, %v9402_v3  ;;  %v18635_v48 = vpop.f32.mrf.mxu0  ;;  %9913 = vst [vmem:[#allocation4 + $0xb8] sm:$0xf] %v16840_v0 }
 0x4fe   : > { %9525 = vst [vmem:[#allocation2 + $0x30] sm:$0xff] %v9493_v40  ;;  %vm9432_vm6 = vcmp.gt.f32.partialorder %v9400_v8, 0.0  ;;  %v9464_v41 = vmul.f32 0.01, %v9400_v8  ;;  %v9403_v5 = vadd.f32 %v21936_v43, %v9364_v49  ;;  %v9362_v61 = vmul.f32 %v21913_v33, %v9243_v55  ;;  %v9560_v44 = vld [vmem:[#allocation2 + $0x47] sm:$0xff] }
 0x4ff   : > { %v22002_v51 = vsel %vm9434_vm5, %v9402_v3, %v9466_v58  ;;  %v9264_v10 = vadd.f32 %v18635_v48, %v21882_v6  ;;  %v9255_v32 = vpop.f32.mrf.mxu0  ;;  %v16838_v24 = vpack.c.bf16 %v9493_v40, %v9493_v40  ;;  %v16807_v17 = vpack.c.bf16 %v9560_v44, %v9560_v44 }
 0x500   : > { %9530 = vst [vmem:[#allocation2 + $0x88] sm:$0xff] %v22002_v51  ;;  %v9496_v20 = vsel %vm9432_vm6, %v9400_v8, %v9464_v41  ;;  %vm9435_vm7 = vcmp.gt.f32.partialorder %v9403_v5, 0.0  ;;  %v9467_v35 = vmul.f32 0.01, %v9403_v5  ;;  %v9401_v36 = vadd.f32 %v21936_v43, %v9362_v61  ;;  %v9558_v4 = vld [vmem:[#allocation2 + $0x27] sm:$0xff] }
 0x501   : > { %9528 = vst [vmem:[#allocation2 + $0x68] sm:$0xff] %v9496_v20  ;;  %v9367_v1 = vmul.f32 %v21913_v33, %v9264_v10  ;;  %v9256_v42 = vadd.f32 %v9255_v32, %v21876_v37  ;;  %v18636_v60 = vpop.f32.mrf.mxu0  ;;  %v16805_v50 = vpack.c.bf16 %v9558_v4, %v9558_v4  ;;  %9911 = vst [vmem:[#allocation4 + $0x70] sm:$0xf] %v16838_v24  ;;  %v22027_v24 = vld [vmem:[%s23934_s10 + $0x238] sm:$0xff]  }
 0x502   : > { %9720 = vst [vmem:[#allocation4 + $0x90] sm:$0xf] %v16807_v17  ;;  %10294 = vst [vmem:[#allocation4 + $0x54] sm:$0xf] %v16807_v17  ;;  %v16841_v6 = vpack.c.bf16 %v9496_v20, %v9496_v20  ;;  %v22009_v47 = vsel %vm9435_vm7, %v9403_v5, %v9467_v35  ;;  %vm9433_vm8 = vcmp.gt.f32.partialorder %v9401_v36, 0.0  ;;  %v9267_v38 = vadd.f32 %v18636_v60, %v21885_v62  ;;  %v9561_v31 = vld [vmem:[#allocation2 + $0x4f] sm:$0xff] }
 0x503   : > { %v9465_v52 = vmul.f32 0.01, %v9401_v36  ;;  %v9944_v26 = vld [vmem:[#allocation2 + $0x49] sm:$0xff]  ;;  %v9945_v57 = vld [vmem:[#allocation2 + $0x51] sm:$0xff]  ;;  %9531 = vst [vmem:[#allocation2 + $0x90] sm:$0xff] %v22009_v47  ;;  %v9406_v14 = vadd.f32 %v21936_v43, %v9367_v1  ;;  %v9365_v37 = vmul.f32 %v21913_v33, %v9256_v42  ;;  %v9258_v25 = vpop.f32.mrf.mxu0  ;;  %v16808_v12 = vpack.c.bf16 %v9561_v31, %v9561_v31  ;;  %18705 = vmatprep.subr.bf16.mxu1 %v22027_v24 }
 0x504   : > { %9718 = vst [vmem:[#allocation4 + $0x48] sm:$0xf] %v16805_v50  ;;  %10292 = vst [vmem:[#allocation4 + $0xc] sm:$0xf] %v16805_v50  ;;  %v16871_v53 = vpack.c.bf16 %v9944_v26, %v9944_v26  ;;  %v9368_v3 = vmul.f32 %v21913_v33, %v9267_v38  ;;  %v9259_v62 = vadd.f32 %v9258_v25, %v21879_v19 }
 0x505   : > { %9914 = vst [vmem:[#allocation4 + $0xdc] sm:$0xf] %v16841_v6  ;;  %v9497_v23 = vsel %vm9433_vm8, %v9401_v36, %v9465_v52  ;;  %v16872_v56 = vpack.c.bf16 %v9945_v57, %v9945_v57  ;;  %vm9438_vm9 = vcmp.gt.f32.partialorder %v9406_v14, 0.0  ;;  %v9470_v0 = vmul.f32 0.01, %v9406_v14  ;;  %v18639_v49 = vpop.f32.mrf.mxu0  ;;  %v9559_v55 = vld [vmem:[#allocation2 + $0x2f] sm:$0xff] }
 0x506   : > { %9529 = vst [vmem:[#allocation2 + $0x70] sm:$0xff] %v9497_v23  ;;  %v9404_v8 = vadd.f32 %v21936_v43, %v9365_v37  ;;  %9721 = vst [vmem:[#allocation4 + $0xb4] sm:$0xf] %v16808_v12  ;;  %v9942_v28 = vld [vmem:[#allocation2 + $0x29] sm:$0xff]  ;;  %v16842_v40 = vpack.c.bf16 %v9497_v23, %v9497_v23  ;;  %v9407_v58 = vadd.f32 %v21936_v43, %v9368_v3  ;;  %v9943_v5 = vld [vmem:[#allocation2 + $0x31] sm:$0xff] }
 0x507   : > { %10295 = vst [vmem:[#allocation4 + $0x78] sm:$0xf] %v16808_v12  ;;  %10104 = vst [vmem:[#allocation4 + $0x98] sm:$0xf] %v16871_v53  ;;  %v9366_v48 = vmul.f32 %v21913_v33, %v9259_v62  ;;  %v9280_v41 = vadd.f32 %v18639_v49, %v21898_v15  ;;  %v16806_v19 = vpack.c.bf16 %v9559_v55, %v9559_v55  ;;  %v9271_v10 = vpop.f32.mrf.mxu0  ;;  %v9564_v36 = vld [vmem:[#allocation2 + $0x87] sm:$0xff] }
 0x508   : > { %10105 = vst [vmem:[#allocation4 + $0xbc] sm:$0xf] %v16872_v56  ;;  %v22022_v61 = vsel %vm9438_vm9, %v9406_v14, %v9470_v0  ;;  %vm9436_vm10 = vcmp.gt.f32.partialorder %v9404_v8, 0.0  ;;  %v9468_v44 = vmul.f32 0.01, %v9404_v8  ;;  %v16869_v32 = vpack.c.bf16 %v9942_v28, %v9942_v28  ;;  %v9562_v35 = vld [vmem:[#allocation2 + $0x67] sm:$0xff] }
 0x509   : > { %9915 = vst [vmem:[#allocation4 + $0x100] sm:$0xf] %v16842_v40  ;;  %9534 = vst [vmem:[#allocation2 + $0xc8] sm:$0xff] %v22022_v61  ;;  %vm9439_vm11 = vcmp.gt.f32.partialorder %v9407_v58, 0.0  ;;  %v9471_v15 = vmul.f32 0.01, %v9407_v58  ;;  %v9405_v17 = vadd.f32 %v21936_v43, %v9366_v48  ;;  %v9371_v20 = vmul.f32 %v21913_v33, %v9280_v41  ;;  %v18640_v42 = vpop.f32.mrf.mxu0 }
 0x50a   : > { %9719 = vst [vmem:[#allocation4 + $0x6c] sm:$0xf] %v16806_v19  ;;  %10293 = vst [vmem:[#allocation4 + $0x30] sm:$0xf] %v16806_v19  ;;  %v22032_v4 = vsel %vm9436_vm10, %v9404_v8, %v9468_v44  ;;  %v9272_v1 = vadd.f32 %v9271_v10, %v21888_v54  ;;  %v16870_v60 = vpack.c.bf16 %v9943_v5, %v9943_v5  ;;  %v9565_v31 = vld [vmem:[#allocation2 + $0x8f] sm:$0xff] }
 0x50b   : > { %10102 = vst [vmem:[#allocation4 + $0x50] sm:$0xf] %v16869_v32  ;;  %v16809_v50 = vpack.c.bf16 %v9562_v35, %v9562_v35  ;;  %9532 = vst [vmem:[#allocation2 + $0xa8] sm:$0xff] %v22032_v4  ;;  %v22038_v6 = vsel %vm9439_vm11, %v9407_v58, %v9471_v15  ;;  %vm9437_vm12 = vcmp.gt.f32.partialorder %v9405_v17, 0.0  ;;  %v9469_v52 = vmul.f32 0.01, %v9405_v17  ;;  %v9274_v57 = vpop.f32.mrf.mxu0 }
 0x50c   : > { %v9410_v38 = vadd.f32 %v21936_v43, %v9371_v20  ;;  %9535 = vst [vmem:[#allocation2 + $0xd0] sm:$0xff] %v22038_v6  ;;  %v9369_v54 = vmul.f32 %v21913_v33, %v9272_v1  ;;  %v9283_v26 = vadd.f32 %v18640_v42, %v21901_v46  ;;  %10103 = vst [vmem:[#allocation4 + $0x74] sm:$0xf] %v16870_v60  ;;  %v19346_v10 = vld [vmem:[#allocation4 + $0x4c] ss:$36 sps:$4 sm:$0xff]  }
 0x50d   : > { %9722 = vst [vmem:[#allocation4 + $0xd8] sm:$0xf] %v16809_v50  ;;  %10296 = vst [vmem:[#allocation4 + $0x9c] sm:$0xf] %v16809_v50  ;;  %v16811_v14 = vpack.c.bf16 %v9564_v36, %v9564_v36  ;;  %v16812_v37 = vpack.c.bf16 %v9565_v31, %v9565_v31  ;;  %v22044_v25 = vsel %vm9437_vm12, %v9405_v17, %v9469_v52  ;;  %v18643_v62 = vpop.f32.mrf.mxu0  ;;  %v9563_v46 = vld [vmem:[#allocation2 + $0x6f] sm:$0xff]  ;;  %12796 = vmatprep.mubr.bf16.mxu1 %v19346_v10 }
 0x50e   : > { %vm9442_vm13 = vcmp.gt.f32.partialorder %v9410_v38, 0.0  ;;  %v9474_v12 = vmul.f32 0.01, %v9410_v38  ;;  %v9275_v53 = vadd.f32 %v9274_v57, %v21891_v27  ;;  %9533 = vst [vmem:[#allocation2 + $0xb0] sm:$0xff] %v22044_v25  ;;  %v9408_v23 = vadd.f32 %v21936_v43, %v9369_v54  ;;  %v9946_v8 = vld [vmem:[#allocation2 + $0x69] sm:$0xff]  ;;  %v9947_v40 = vld [vmem:[#allocation2 + $0x71] sm:$0xff] }
 0x50f   : > { %v9372_v3 = vmul.f32 %v21913_v33, %v9283_v26  ;;  %9724 = vst [vmem:[#allocation4 + $0x120] sm:$0xf] %v16811_v14  ;;  %9725 = vst [vmem:[#allocation4 + $0x144] sm:$0xf] %v16812_v37  ;;  %v16843_v56 = vpack.c.bf16 %v22002_v51, %v22002_v51  ;;  %v16844_v0 = vpack.c.bf16 %v22009_v47, %v22009_v47  ;;  %v9287_v48 = vpop.f32.mrf.mxu0  ;;  %v19359_v47 = vld [vmem:[%s23934_s10 + $0x1b8] sm:$0xff]   ;;  %v19373_v17 = vld [vmem:[%s23934_s10 + $0x1f0] sm:$0xff]  }
 0x510   : > { %10298 = vst [vmem:[#allocation4 + $0xe4] sm:$0xf] %v16811_v14  ;;  %10299 = vst [vmem:[#allocation4 + $0x108] sm:$0xf] %v16812_v37  ;;  %v22054_v27 = vsel %vm9442_vm13, %v9410_v38, %v9474_v12  ;;  %v9370_v49 = vmul.f32 %v21913_v33, %v9275_v53  ;;  %v9296_v55 = vadd.f32 %v18643_v62, %v21924_v16  ;;  %vm9440_vm14 = vcmp.gt.f32.partialorder %v9408_v23, 0.0  ;;  %v9948_v53 = vld [vmem:[#allocation2 + $0x89] sm:$0xff] }
 0x511   : > { %v16810_v28 = vpack.c.bf16 %v9563_v46, %v9563_v46  ;;  %9538 = vst [vmem:[#allocation2 + $0x108] sm:$0xff] %v22054_v27  ;;  %v9472_v58 = vmul.f32 0.01, %v9408_v23  ;;  %v9411_v51 = vadd.f32 %v21936_v43, %v9372_v3  ;;  %v19344_v41 = vld [vmem:[#allocation4 + $0x48] ss:$36 sps:$4 sm:$0xff]   ;;  %v16873_v19 = vpack.c.bf16 %v9946_v8, %v9946_v8  ;;  %v18644_v36 = vpop.f32.mrf.mxu0  ;;  %v19375_v62 = vld [vmem:[%s23934_s10 + $0x1b0] sm:$0xff]  }
 0x512   : > { %9916 = vst [vmem:[#allocation4 + $0x124] sm:$0xf] %v16843_v56  ;;  %9917 = vst [vmem:[#allocation4 + $0x148] sm:$0xf] %v16844_v0  ;;  %v9409_v5 = vadd.f32 %v21936_v43, %v9370_v49  ;;  %v9375_v16 = vmul.f32 %v21913_v33, %v9296_v55  ;;  %v9288_v44 = vadd.f32 %v9287_v48, %v21916_v59  ;;  %v19347_v32 = vld [vmem:[#allocation4 + $0x8] ss:$36 sps:$4 sm:$0xff]   ;;  %12797 = vmatmul.mubr.bf16.gmra.mxu1 %v19344_v41 }
 0x513   : > { %9723 = vst [vmem:[#allocation4 + $0xfc] sm:$0xf] %v16810_v28  ;;  %10297 = vst [vmem:[#allocation4 + $0xc0] sm:$0xf] %v16810_v28  ;;  %v16874_v15 = vpack.c.bf16 %v9947_v40, %v9947_v40  ;;  %v22070_v20 = vsel %vm9440_vm14, %v9408_v23, %v9472_v58  ;;  %vm9443_vm15 = vcmp.gt.f32.partialorder %v9411_v51, 0.0  ;;  %v16845_v59 = vpack.c.bf16 %v22032_v4, %v22032_v4  ;;  %v9290_v54 = vpop.f32.mrf.mxu0  ;;  %v9949_v56 = vld [vmem:[#allocation2 + $0x91] sm:$0xff] }
 0x514   : > { %v9475_v35 = vmul.f32 0.01, %v9411_v51  ;;  %v19349_v1 = vld [vmem:[#allocation4 + $0xc] ss:$36 sps:$4 sm:$0xff]   ;;  %10106 = vst [vmem:[#allocation4 + $0xe0] sm:$0xf] %v16873_v19  ;;  %v9414_v60 = vadd.f32 %v21936_v43, %v9375_v16  ;;  %v9373_v50 = vmul.f32 %v21913_v33, %v9288_v44  ;;  %v9299_v31 = vadd.f32 %v18644_v36, %v21927_v29 }
 0x515   : > { %9536 = vst [vmem:[#allocation2 + $0xe8] sm:$0xff] %v22070_v20  ;;  %vm9441_vm0 = vcmp.gt.f32.partialorder %v9409_v5, 0.0  ;;  %v9473_v42 = vmul.f32 0.01, %v9409_v5  ;;  %v19352_v52 = vld [vmem:[#allocation4 + $0x94] ss:$36 sps:$4 sm:$0xff]   ;;  %12949 = vmatprep.mubr.bf16.mxu0 %v19349_v1  ;;  %v16846_v4 = vpack.c.bf16 %v22044_v25, %v22044_v25  ;;  %v9291_v25 = vadd.f32 %v9290_v54, %v21919_v63  ;;  %v18647_v3 = vpop.f32.mrf.mxu0 }
 0x516   : > { %10107 = vst [vmem:[#allocation4 + $0x104] sm:$0xf] %v16874_v15  ;;  %v22077_v38 = vsel %vm9443_vm15, %v9411_v51, %v9475_v35  ;;  %v19355_v26 = vld [vmem:[#allocation4 + $0x54] ss:$36 sps:$4 sm:$0xff]   ;;  %9918 = vst [vmem:[#allocation4 + $0x16c] sm:$0xf] %v16845_v59  ;;  %v9412_v37 = vadd.f32 %v21936_v43, %v9373_v50  ;;  %12950 = vmatmul.mubr.bf16.vlgmr.msra.gmra.mxu0 %v19347_v32  ;;  %12804 = vmatprep.mubr.bf16.mxu1 %v19352_v52 }
 0x517   : > { %9539 = vst [vmem:[#allocation2 + $0x110] sm:$0xff] %v22077_v38  ;;  %v22084_v57 = vsel %vm9441_vm0, %v9409_v5, %v9473_v42  ;;  %vm9446_vm1 = vcmp.gt.f32.partialorder %v9414_v60, 0.0  ;;  %v9478_v14 = vmul.f32 0.01, %v9414_v60  ;;  %v9566_v29 = vld [vmem:[#allocation2 + $0xa7] sm:$0xff]  ;;  %v9567_v12 = vld [vmem:[#allocation2 + $0xaf] sm:$0xff]  ;;  %v9376_v23 = vmul.f32 %v21913_v33, %v9299_v31  ;;  %12957 = vmatprep.mubr.bf16.mxu0 %v19355_v26  ;;  %18390 = vmatpush3.bf16.msra.mxu0 %v19359_v47  ;;  %v9303_v58 = vpop.f32.mrf.mxu0 }
 0x518   : > { %9537 = vst [vmem:[#allocation2 + $0xf0] sm:$0xff] %v22084_v57  ;;  %v16813_v46 = vpack.c.bf16 %v9566_v29, %v9566_v29  ;;  %9919 = vst [vmem:[#allocation4 + $0x190] sm:$0xf] %v16846_v4  ;;  %v19389_v0 = vld [vmem:[%s23934_s10 + $0x1e8] sm:$0xff]   ;;  %vm9444_vm2 = vcmp.gt.f32.partialorder %v9412_v37, 0.0  ;;  %v9312_v63 = vadd.f32 %v18647_v3, %v21947_v9  ;;  %18391 = vmatprep.subr.bf16.mxu0 %v19373_v17  ;;  %v9951_v29 = vld [vmem:[#allocation2 + $0xb1] sm:$0xff] }
 0x519   : > { %v9510_v8 = vsel %vm9446_vm1, %v9414_v60, %v9478_v14  ;;  %v9476_v49 = vmul.f32 0.01, %v9412_v37  ;;  %v9568_v55 = vld [vmem:[#allocation2 + $0xc7] sm:$0xff]  ;;  %v9415_v28 = vadd.f32 %v21936_v43, %v9376_v23  ;;  %v9374_v40 = vmul.f32 %v21913_v33, %v9291_v25  ;;  %v9569_v41 = vld [vmem:[#allocation2 + $0xcf] sm:$0xff]  ;;  %v18648_v17 = vpop.f32.mrf.mxu0  ;;  %v19362_v59 = vld [vmem:[#allocation4 + $0xdc] ss:$36 sps:$4 sm:$0xff]  }
 0x51a   : > { %9542 = vst [vmem:[#allocation2 + $0x148] sm:$0xff] %v9510_v8  ;;  %v16814_v51 = vpack.c.bf16 %v9567_v12, %v9567_v12  ;;  %9726 = vst [vmem:[#allocation4 + $0x168] sm:$0xf] %v16813_v46  ;;  %v16875_v48 = vpack.c.bf16 %v9948_v53, %v9948_v53  ;;  %v19350_v19 = vld [vmem:[#allocation4 + $0x90] ss:$36 sps:$4 sm:$0xff]   ;;  %v9379_v5 = vmul.f32 %v21913_v33, %v9312_v63  ;;  %v19391_v44 = vld [vmem:[%s23934_s10 + $0x1a8] sm:$0xff]  }
 0x51b   : > { %10300 = vst [vmem:[#allocation4 + $0x12c] sm:$0xf] %v16813_v46  ;;  %v22100_v47 = vsel %vm9444_vm2, %v9412_v37, %v9476_v49  ;;  %v9304_v9 = vadd.f32 %v9303_v58, %v21941_v34  ;;  %v16876_v16 = vpack.c.bf16 %v9949_v56, %v9949_v56  ;;  %vm9447_vm3 = vcmp.gt.f32.partialorder %v9415_v28, 0.0  ;;  %v19353_v15 = vld [vmem:[#allocation4 + $0x50] ss:$36 sps:$4 sm:$0xff]   ;;  %18392 = vmatpush3.bf16.msra.mxu0 %v19375_v62  ;;  %v9306_v31 = vpop.f32.mrf.mxu0 }
 0x51c   : > { %9540 = vst [vmem:[#allocation2 + $0x128] sm:$0xff] %v22100_v47  ;;  %v9479_v10 = vmul.f32 0.01, %v9415_v28  ;;  %v9413_v32 = vadd.f32 %v21936_v43, %v9374_v40  ;;  %9727 = vst [vmem:[#allocation4 + $0x18c] sm:$0xf] %v16814_v51  ;;  %v16815_v35 = vpack.c.bf16 %v9568_v55, %v9568_v55  ;;  %v9418_v34 = vadd.f32 %v21936_v43, %v9379_v5  ;;  %v9950_v60 = vld [vmem:[#allocation2 + $0xa9] sm:$0xff] }
 0x51d   : > { %10108 = vst [vmem:[#allocation4 + $0x128] sm:$0xf] %v16875_v48  ;;  %10301 = vst [vmem:[#allocation4 + $0x150] sm:$0xf] %v16814_v51  ;;  %v9377_v36 = vmul.f32 %v21913_v33, %v9304_v9  ;;  %v9315_v1 = vadd.f32 %v18648_v17, %v21950_v13  ;;  %v16816_v42 = vpack.c.bf16 %v9569_v41, %v9569_v41  ;;  %18393 = vmatprep.subr.bf16.mxu0 %v19389_v0  ;;  %v19365_v54 = vld [vmem:[#allocation4 + $0x9c] ss:$36 sps:$4 sm:$0xff]   ;;  %v18651_v23 = vpop.f32.mrf.mxu0 }
 0x51e   : > { %10109 = vst [vmem:[#allocation4 + $0x14c] sm:$0xf] %v16876_v16  ;;  %v22113_v50 = vsel %vm9447_vm3, %v9415_v28, %v9479_v10  ;;  %vm9445_vm4 = vcmp.gt.f32.partialorder %v9413_v32, 0.0  ;;  %v9477_v52 = vmul.f32 0.01, %v9413_v32  ;;  %12805 = vmatmul.mubr.bf16.gmra.mxu1 %v19350_v19  ;;  %v16847_v26 = vpack.c.bf16 %v22022_v61, %v22022_v61  ;;  %v19405_v13 = vld [vmem:[%s23934_s10 + $0x1e0] sm:$0xff]   ;;  %12958 = vmatmul.mubr.bf16.gmra.mxu0 %v19353_v15 }
 0x51f   : > { %9728 = vst [vmem:[#allocation4 + $0x1b0] sm:$0xf] %v16815_v35  ;;  %10302 = vst [vmem:[#allocation4 + $0x174] sm:$0xf] %v16815_v35  ;;  %vm9450_vm5 = vcmp.gt.f32.partialorder %v9418_v34, 0.0  ;;  %v9416_v14 = vadd.f32 %v21936_v43, %v9377_v36  ;;  %v9380_v37 = vmul.f32 %v21913_v33, %v9315_v1  ;;  %12812 = vmatprep.mubr.bf16.mxu1 %v19362_v59  ;;  %v9570_v12 = vld [vmem:[#allocation2 + $0xe7] sm:$0xff]  ;;  %12965 = vmatprep.mubr.bf16.mxu0 %v19365_v54  ;;  %v9319_v49 = vpop.f32.mrf.mxu0 }
 0x520   : > { %9543 = vst [vmem:[#allocation2 + $0x150] sm:$0xff] %v22113_v50  ;;  %v9482_v4 = vmul.f32 0.01, %v9418_v34  ;;  %9729 = vst [vmem:[#allocation4 + $0x1d4] sm:$0xf] %v16816_v42  ;;  %v22124_v61 = vsel %vm9445_vm4, %v9413_v32, %v9477_v52  ;;  %v9307_v53 = vadd.f32 %v9306_v31, %v21944_v2  ;;  %v16848_v25 = vpack.c.bf16 %v22038_v6, %v22038_v6  ;;  %v9571_v0 = vld [vmem:[#allocation2 + $0xef] sm:$0xff] }
 0x521   : > { %10303 = vst [vmem:[#allocation4 + $0x198] sm:$0xf] %v16816_v42  ;;  %9920 = vst [vmem:[#allocation4 + $0x1b4] sm:$0xf] %v16847_v26  ;;  %v16877_v3 = vpack.c.bf16 %v9950_v60, %v9950_v60  ;;  %vm9448_vm6 = vcmp.gt.f32.partialorder %v9416_v14, 0.0  ;;  %v9419_v56 = vadd.f32 %v21936_v43, %v9380_v37  ;;  %18394 = vmatpush3.bf16.msra.mxu0 %v19391_v44  ;;  %v19407_v2 = vld [vmem:[%s23934_s10 + $0x1a0] sm:$0xff]   ;;  %v18652_v9 = vpop.f32.mrf.mxu0 }
 0x522   : > { %9541 = vst [vmem:[#allocation2 + $0x130] sm:$0xff] %v22124_v61  ;;  %v22131_v62 = vsel %vm9450_vm5, %v9418_v34, %v9482_v4  ;;  %v9480_v46 = vmul.f32 0.01, %v9416_v14  ;;  %v9378_v6 = vmul.f32 %v21913_v33, %v9307_v53  ;;  %v9328_v8 = vadd.f32 %v18651_v23, %v21960_v21  ;;  %9921 = vst [vmem:[#allocation4 + $0x1d8] sm:$0xf] %v16848_v25  ;;  %v19421_v28 = vld [vmem:[%s23934_s10 + $0x1d8] sm:$0xff]  }
 0x523   : > { %9546 = vst [vmem:[#allocation2 + $0x188] sm:$0xff] %v22131_v62  ;;  %v16878_v63 = vpack.c.bf16 %v9951_v29, %v9951_v29  ;;  %10110 = vst [vmem:[#allocation4 + $0x170] sm:$0xf] %v16877_v3  ;;  %v16817_v55 = vpack.c.bf16 %v9570_v12, %v9570_v12  ;;  %18395 = vmatprep.subr.bf16.mxu0 %v19405_v13  ;;  %vm9451_vm7 = vcmp.gt.f32.partialorder %v9419_v56, 0.0  ;;  %v9483_v58 = vmul.f32 0.01, %v9419_v56  ;;  %v9322_v1 = vpop.f32.mrf.mxu0 }
 0x524   : > { %v22144_v40 = vsel %vm9448_vm6, %v9416_v14, %v9480_v46  ;;  %v9320_v51 = vadd.f32 %v9319_v49, %v21956_v18  ;;  %v9952_v48 = vld [vmem:[#allocation2 + $0xc9] sm:$0xff]  ;;  %v19423_v21 = vld [vmem:[%s23934_s10 + $0x198] sm:$0xff]   ;;  %v9417_v41 = vadd.f32 %v21936_v43, %v9378_v6  ;;  %v9383_v5 = vmul.f32 %v21913_v33, %v9328_v8 }
 0x525   : > { %9544 = vst [vmem:[#allocation2 + $0x168] sm:$0xff] %v22144_v40  ;;  %v19360_v19 = vld [vmem:[#allocation4 + $0xd8] ss:$36 sps:$4 sm:$0xff]   ;;  %10111 = vst [vmem:[#allocation4 + $0x194] sm:$0xf] %v16878_v63  ;;  %v16818_v16 = vpack.c.bf16 %v9571_v0, %v9571_v0  ;;  %v16849_v44 = vpack.c.bf16 %v22070_v20, %v22070_v20  ;;  %v22155_v18 = vsel %vm9451_vm7, %v9419_v56, %v9483_v58  ;;  %18396 = vmatpush3.bf16.msra.mxu0 %v19407_v2  ;;  %v9572_v31 = vld [vmem:[#allocation2 + $0x107] sm:$0xff]  ;;  %v18655_v4 = vpop.f32.mrf.mxu0 }
 0x526   : > { %9730 = vst [vmem:[#allocation4 + $0x1f8] sm:$0xf] %v16817_v55  ;;  %10304 = vst [vmem:[#allocation4 + $0x1bc] sm:$0xf] %v16817_v55  ;;  %v19363_v10 = vld [vmem:[#allocation4 + $0x98] ss:$36 sps:$4 sm:$0xff]   ;;  %v9381_v32 = vmul.f32 %v21913_v33, %v9320_v51  ;;  %v9331_v15 = vadd.f32 %v18652_v9, %v21963_v11  ;;  %v16850_v35 = vpack.c.bf16 %v22084_v57, %v22084_v57  ;;  %12813 = vmatmul.mubr.bf16.gmra.mxu1 %v19360_v19 }
 0x527   : > { %v19368_v17 = vld [vmem:[#allocation4 + $0x124] ss:$36 sps:$4 sm:$0xff]   ;;  %v9953_v34 = vld [vmem:[#allocation2 + $0xd1] sm:$0xff]  ;;  %9547 = vst [vmem:[#allocation2 + $0x190] sm:$0xff] %v22155_v18  ;;  %vm9449_vm8 = vcmp.gt.f32.partialorder %v9417_v41, 0.0  ;;  %v9422_v20 = vadd.f32 %v21936_v43, %v9383_v5  ;;  %v16879_v42 = vpack.c.bf16 %v9952_v48, %v9952_v48  ;;  %18397 = vmatprep.subr.bf16.mxu0 %v19421_v28  ;;  %12966 = vmatmul.mubr.bf16.gmra.mxu0 %v19363_v10  ;;  %v9335_v25 = vpop.f32.mrf.mxu0 }
 0x528   : > { %v9481_v36 = vmul.f32 0.01, %v9417_v41  ;;  %v19371_v59 = vld [vmem:[#allocation4 + $0xe4] ss:$36 sps:$4 sm:$0xff]   ;;  %9731 = vst [vmem:[#allocation4 + $0x21c] sm:$0xf] %v16818_v16  ;;  %v9420_v57 = vadd.f32 %v21936_v43, %v9381_v32  ;;  %v9384_v60 = vmul.f32 %v21913_v33, %v9331_v15  ;;  %v9323_v52 = vadd.f32 %v9322_v1, %v21966_v30  ;;  %12820 = vmatprep.mubr.bf16.mxu1 %v19368_v17 }
 0x529   : > { %9922 = vst [vmem:[#allocation4 + $0x1fc] sm:$0xf] %v16849_v44  ;;  %10305 = vst [vmem:[#allocation4 + $0x1e0] sm:$0xf] %v16818_v16  ;;  %v19437_v11 = vld [vmem:[%s23934_s10 + $0x1d0] sm:$0xff]   ;;  %vm9454_vm9 = vcmp.gt.f32.partialorder %v9422_v20, 0.0  ;;  %12973 = vmatprep.mubr.bf16.mxu0 %v19371_v59  ;;  %v16880_v14 = vpack.c.bf16 %v9953_v34, %v9953_v34  ;;  %18398 = vmatpush3.bf16.msra.mxu0 %v19423_v21  ;;  %v9344_v23 = vadd.f32 %v18655_v4, %v21993_v45  ;;  %v18656_v51 = vpop.f32.mrf.mxu0 }
 0x52a   : > { %9923 = vst [vmem:[#allocation4 + $0x220] sm:$0xf] %v16850_v35  ;;  %v9573_v54 = vld [vmem:[#allocation2 + $0x10f] sm:$0xff]  ;;  %v22170_v26 = vsel %vm9449_vm8, %v9417_v41, %v9481_v36  ;;  %v9486_v13 = vmul.f32 0.01, %v9422_v20  ;;  %vm9452_vm10 = vcmp.gt.f32.partialorder %v9420_v57, 0.0  ;;  %v9423_v29 = vadd.f32 %v21936_v43, %v9384_v60  ;;  %18399 = vmatprep.subr.bf16.mxu0 %v19437_v11 }
 0x52b   : > { %10112 = vst [vmem:[#allocation4 + $0x1b8] sm:$0xf] %v16879_v42  ;;  %9545 = vst [vmem:[#allocation2 + $0x170] sm:$0xff] %v22170_v26  ;;  %v9484_v37 = vmul.f32 0.01, %v9420_v57  ;;  %v9382_v30 = vmul.f32 %v21913_v33, %v9323_v52  ;;  %v19439_v12 = vld [vmem:[%s23934_s10 + $0x190] sm:$0xff]   ;;  %v16819_v3 = vpack.c.bf16 %v9572_v31, %v9572_v31  ;;  %v16820_v46 = vpack.c.bf16 %v9573_v54, %v9573_v54  ;;  %v9338_v44 = vpop.f32.mrf.mxu0 }
 0x52c   : > { %v22178_v53 = vsel %vm9454_vm9, %v9422_v20, %v9486_v13  ;;  %10113 = vst [vmem:[#allocation4 + $0x1dc] sm:$0xf] %v16880_v14  ;;  %v19453_v56 = vld [vmem:[%s23934_s10 + $0x1c8] sm:$0xff]   ;;  %vm9455_vm11 = vcmp.gt.f32.partialorder %v9423_v29, 0.0  ;;  %v9487_v2 = vmul.f32 0.01, %v9423_v29  ;;  %v9387_v28 = vmul.f32 %v21913_v33, %v9344_v23 }
 0x52d   : > { %9550 = vst [vmem:[#allocation2 + $0x1c8] sm:$0xff] %v22178_v53  ;;  %v22185_v0 = vsel %vm9452_vm10, %v9420_v57, %v9484_v37  ;;  %v9421_v6 = vadd.f32 %v21936_v43, %v9382_v30  ;;  %v9954_v8 = vld [vmem:[#allocation2 + $0xe9] sm:$0xff]  ;;  %v9955_v49 = vld [vmem:[#allocation2 + $0xf1] sm:$0xff]  ;;  %v19366_v63 = vld [vmem:[#allocation4 + $0x120] ss:$36 sps:$4 sm:$0xff]   ;;  %v9336_v58 = vadd.f32 %v9335_v25, %v21973_v22  ;;  %v16851_v21 = vpack.c.bf16 %v22054_v27, %v22054_v27 }
 0x52e   : > { %v19455_v45 = vld [vmem:[%s23934_s10 + $0x188] sm:$0xff]   ;;  %9548 = vst [vmem:[#allocation2 + $0x1a8] sm:$0xff] %v22185_v0  ;;  %v19369_v55 = vld [vmem:[#allocation4 + $0xe0] ss:$36 sps:$4 sm:$0xff]   ;;  %9732 = vst [vmem:[#allocation4 + $0x240] sm:$0xf] %v16819_v3  ;;  %v16852_v41 = vpack.c.bf16 %v22077_v38, %v22077_v38  ;;  %v22199_v19 = vsel %vm9455_vm11, %v9423_v29, %v9487_v2  ;;  %v9347_v9 = vadd.f32 %v18656_v51, %v21998_v39  ;;  %18400 = vmatpush3.bf16.msra.mxu0 %v19439_v12 }
 0x52f   : > { %v19378_v48 = vld [vmem:[#allocation4 + $0x16c] ss:$36 sps:$4 sm:$0xff]   ;;  %9733 = vst [vmem:[#allocation4 + $0x264] sm:$0xf] %v16820_v46  ;;  %10306 = vst [vmem:[#allocation4 + $0x204] sm:$0xf] %v16819_v3  ;;  %v9426_v27 = vadd.f32 %v21936_v43, %v9387_v28  ;;  %v9385_v38 = vmul.f32 %v21913_v33, %v9336_v58  ;;  %12821 = vmatmul.mubr.bf16.gmra.mxu1 %v19366_v63  ;;  %v16881_v32 = vpack.c.bf16 %v9954_v8, %v9954_v8 }
 0x530   : > { %10307 = vst [vmem:[#allocation4 + $0x228] sm:$0xf] %v16820_v46  ;;  %vm9453_vm12 = vcmp.gt.f32.partialorder %v9421_v6, 0.0  ;;  %v9485_v5 = vmul.f32 0.01, %v9421_v6  ;;  %v9574_v22 = vld [vmem:[#allocation2 + $0x127] sm:$0xff]  ;;  %v16882_v15 = vpack.c.bf16 %v9955_v49, %v9955_v49  ;;  %v9388_v35 = vmul.f32 %v21913_v33, %v9347_v9  ;;  %12974 = vmatmul.mubr.bf16.gmra.mxu0 %v19369_v55  ;;  %12828 = vmatprep.mubr.bf16.mxu1 %v19378_v48 }
 0x531   : > { %v19468_v16 = vld [vmem:[%s23934_s10 + $0x1c0] sm:$0xff]   ;;  %9551 = vst [vmem:[#allocation2 + $0x1d0] sm:$0xff] %v22199_v19  ;;  %v19381_v10 = vld [vmem:[#allocation4 + $0x12c] ss:$36 sps:$4 sm:$0xff]   ;;  %9924 = vst [vmem:[#allocation4 + $0x244] sm:$0xf] %v16851_v21  ;;  %v9339_v34 = vadd.f32 %v9338_v44, %v21987_v7  ;;  %v9424_v20 = vadd.f32 %v21936_v43, %v9385_v38  ;;  %v16821_v1 = vpack.c.bf16 %v9574_v22, %v9574_v22  ;;  %18401 = vmatprep.subr.bf16.mxu0 %v19453_v56 }
 0x532   : > { %9925 = vst [vmem:[#allocation4 + $0x268] sm:$0xf] %v16852_v41  ;;  %v9575_v39 = vld [vmem:[#allocation2 + $0x12f] sm:$0xff]  ;;  %v22209_v17 = vsel %vm9453_vm12, %v9421_v6, %v9485_v5  ;;  %vm9458_vm13 = vcmp.gt.f32.partialorder %v9426_v27, 0.0  ;;  %v9490_v36 = vmul.f32 0.01, %v9426_v27  ;;  %12981 = vmatprep.mubr.bf16.mxu0 %v19381_v10  ;;  %v9427_v7 = vadd.f32 %v21936_v43, %v9388_v35  ;;  %18402 = vmatpush3.bf16.msra.mxu0 %v19455_v45 }
 0x533   : > { %9549 = vst [vmem:[#allocation2 + $0x1b0] sm:$0xff] %v22209_v17  ;;  %10114 = vst [vmem:[#allocation4 + $0x200] sm:$0xf] %v16881_v32  ;;  %v9956_v59 = vld [vmem:[#allocation2 + $0x109] sm:$0xff]  ;;  %v9957_v42 = vld [vmem:[#allocation2 + $0x111] sm:$0xff]  ;;  %v16822_v60 = vpack.c.bf16 %v9575_v39, %v9575_v39  ;;  %v16853_v52 = vpack.c.bf16 %v22100_v47, %v22100_v47  ;;  %vm9456_vm14 = vcmp.gt.f32.partialorder %v9424_v20, 0.0  ;;  %v16854_v43 = vpack.c.bf16 %v22124_v61, %v22124_v61 }
 0x534   : > { %10115 = vst [vmem:[#allocation4 + $0x224] sm:$0xf] %v16882_v15  ;;  %v19470_v33 = vld [vmem:[%s23934_s10 + $0x180] sm:$0xff]   ;;  %v9577_v54 = vld [vmem:[#allocation2 + $0x14f] sm:$0xff]  ;;  %v9522_v13 = vsel %vm9458_vm13, %v9426_v27, %v9490_v36  ;;  %v9488_v4 = vmul.f32 0.01, %v9424_v20  ;;  %18403 = vmatprep.subr.bf16.mxu0 %v19468_v16  ;;  %v16883_v46 = vpack.c.bf16 %v9956_v59, %v9956_v59  ;;  %v16884_v49 = vpack.c.bf16 %v9957_v42, %v9957_v42 }
 0x535   : > { %v19852_v11 = vld [vmem:[%s23932_s8] ss:$0 sm:$0xff]  ;;  %v9576_v31 = vld [vmem:[#allocation2 + $0x147] sm:$0xff]  ;;  %9734 = vst [vmem:[#allocation4 + $0x288] sm:$0xf] %v16821_v1  ;;  %v9959_v30 = vld [vmem:[#allocation2 + $0x131] sm:$0xff]  ;;  %v16824_v63 = vpack.c.bf16 %v9577_v54, %v9577_v54  ;;  %v16856_v41 = vpack.c.bf16 %v22113_v50, %v22113_v50  ;;  %v16857_v50 = vpack.c.bf16 %v22144_v40, %v22144_v40  ;;  %v16858_v15 = vpack.c.bf16 %v22170_v26, %v22170_v26 }
 0x536   : > { %v9386_v57 = vmul.f32 %v19852_v11, %v9339_v34  ;;  %v19376_v14 = vld [vmem:[#allocation4 + $0x168] ss:$36 sps:$4 sm:$0xff]   ;;  %10308 = vst [vmem:[#allocation4 + $0x24c] sm:$0xf] %v16821_v1  ;;  %9554 = vst [vmem:[#allocation2 + $0x208] sm:$0xff] %v9522_v13  ;;  %vm9459_vm15 = vcmp.gt.f32.partialorder %v9427_v7, 0.0  ;;  %v22235_v6 = vsel %vm9456_vm14, %v9424_v20, %v9488_v4  ;;  %v16823_v45 = vpack.c.bf16 %v9576_v31, %v9576_v31 }
 0x537   : > { %v9768_v37 = vld [vmem:[#allocation2 + $0x148] sm:$0xff]  ;;  %v9491_v47 = vmul.f32 0.01, %v9427_v7  ;;  %v19853_v12 = vld [vmem:[%s23933_s9] ss:$0 sm:$0xff]  ;;  %v22232_v2 = vld [vmem:[#allocation2 + $0x151] sm:$0xff]  ;;  %18404 = vmatpush3.bf16.msra.mxu0 %v19470_v33  ;;  %12829 = vmatmul.mubr.bf16.gmra.mxu1 %v19376_v14  ;;  %v16886_v9 = vpack.c.bf16 %v9959_v30, %v9959_v30  ;;  %v16859_v59 = vpack.c.bf16 %v22131_v62, %v22131_v62  ;;  %v16860_v26 = vpack.c.bf16 %v22155_v18, %v22155_v18 }
 0x538   : > { %v9958_v29 = vld [vmem:[#allocation2 + $0x129] sm:$0xff]  ;;  %v9425_v23 = vadd.f32 %v19853_v12, %v9386_v57  ;;  %v19384_v3 = vld [vmem:[#allocation4 + $0x1b4] ss:$36 sps:$4 sm:$0xff]   ;;  %9735 = vst [vmem:[#allocation4 + $0x2ac] sm:$0xf] %v16822_v60  ;;  %9552 = vst [vmem:[#allocation2 + $0x1e8] sm:$0xff] %v22235_v6  ;;  %v16855_v48 = vpack.c.bf16 %v9768_v37, %v9768_v37  ;;  %v16888_v35 = vpack.c.bf16 %v22232_v2, %v22232_v2  ;;  %18657 = vmatprep.subr.bf16.mxu0 %v22027_v24 }
 0x539   : > { %v19379_v25 = vld [vmem:[#allocation4 + $0x128] ss:$36 sps:$4 sm:$0xff]   ;;  %9926 = vst [vmem:[#allocation4 + $0x28c] sm:$0xf] %v16853_v52  ;;  %10309 = vst [vmem:[#allocation4 + $0x270] sm:$0xf] %v16822_v60  ;;  %v9523_v58 = vsel %vm9459_vm15, %v9427_v7, %v9491_v47  ;;  %v16885_v5 = vpack.c.bf16 %v9958_v29, %v9958_v29  ;;  %12836 = vmatprep.mubr.bf16.mxu1 %v19384_v3  ;;  %v16861_v18 = vpack.c.bf16 %v22185_v0, %v22185_v0 }
 0x53a   : > { %v9578_v61 = vld [vmem:[#allocation2 + $0x167] sm:$0xff]  ;;  %v19387_v8 = vld [vmem:[#allocation4 + $0x174] ss:$36 sps:$4 sm:$0xff]   ;;  %9927 = vst [vmem:[#allocation4 + $0x2b0] sm:$0xf] %v16854_v43  ;;  %vm9457_vm0 = vcmp.gt.f32.partialorder %v9425_v23, 0.0  ;;  %12982 = vmatmul.mubr.bf16.gmra.mxu0 %v19379_v25  ;;  %v16862_v13 = vpack.c.bf16 %v22209_v17, %v22209_v17  ;;  %v16863_v25 = vpack.c.bf16 %v22178_v53, %v22178_v53  ;;  %v16864_v3 = vpack.c.bf16 %v22199_v19, %v22199_v19 }
 0x53b   : > { %v22230_v56 = vld [vmem:[#allocation2 + $0x149] sm:$0xff]  ;;  %v9489_v51 = vmul.f32 0.01, %v9425_v23  ;;  %10116 = vst [vmem:[#allocation4 + $0x248] sm:$0xf] %v16883_v46  ;;  %9555 = vst [vmem:[#allocation2 + $0x210] sm:$0xff] %v9523_v58  ;;  %v16825_v22 = vpack.c.bf16 %v9578_v61, %v9578_v61  ;;  %12989 = vmatprep.mubr.bf16.mxu0 %v19387_v8 }
 0x53c   : > { %v9579_v55 = vld [vmem:[#allocation2 + $0x16f] sm:$0xff]  ;;  %v9580_v28 = vld [vmem:[#allocation2 + $0x187] sm:$0xff]  ;;  %10117 = vst [vmem:[#allocation4 + $0x26c] sm:$0xf] %v16884_v49  ;;  %9736 = vst [vmem:[#allocation4 + $0x2d0] sm:$0xf] %v16823_v45  ;;  %v16887_v39 = vpack.c.bf16 %v22230_v56, %v22230_v56 }
 0x53d   : > { %v9581_v21 = vld [vmem:[#allocation2 + $0x18f] sm:$0xff]  ;;  %9737 = vst [vmem:[#allocation4 + $0x2f4] sm:$0xf] %v16824_v63  ;;  %10310 = vst [vmem:[#allocation4 + $0x294] sm:$0xf] %v16823_v45  ;;  %v22246_v44 = vsel %vm9457_vm0, %v9425_v23, %v9489_v51  ;;  %v16826_v10 = vpack.c.bf16 %v9579_v55, %v9579_v55  ;;  %v9582_v32 = vld [vmem:[#allocation2 + $0x1a7] sm:$0xff]  ;;  %v16827_v34 = vpack.c.bf16 %v9580_v28, %v9580_v28 }
 0x53e   : > { %10311 = vst [vmem:[#allocation4 + $0x2b8] sm:$0xf] %v16824_v63  ;;  %v9962_v16 = vld [vmem:[#allocation2 + $0x169] sm:$0xff]  ;;  %v22241_v27 = vld [vmem:[#allocation2 + $0x171] sm:$0xff]  ;;  %9928 = vst [vmem:[#allocation4 + $0x2d4] sm:$0xf] %v16855_v48  ;;  %v16828_v1 = vpack.c.bf16 %v9581_v21, %v9581_v21  ;;  %v16829_v62 = vpack.c.bf16 %v9582_v32, %v9582_v32  ;;  %v16865_v55 = vpack.c.bf16 %v22235_v6, %v22235_v6 }
 0x53f   : > { %v22243_v38 = vld [vmem:[#allocation2 + $0x189] sm:$0xff]  ;;  %9553 = vst [vmem:[#allocation2 + $0x1f0] sm:$0xff] %v22246_v44  ;;  %9929 = vst [vmem:[#allocation4 + $0x2f8] sm:$0xf] %v16856_v41  ;;  %v9965_v36 = vld [vmem:[#allocation2 + $0x191] sm:$0xff]  ;;  %v16889_v42 = vpack.c.bf16 %v9962_v16, %v9962_v16  ;;  %v16890_v57 = vpack.c.bf16 %v22241_v27, %v22241_v27  ;;  %v16866_v28 = vpack.c.bf16 %v22246_v44, %v22246_v44 }
 0x540   : > { %10118 = vst [vmem:[#allocation4 + $0x290] sm:$0xf] %v16885_v5  ;;  %10119 = vst [vmem:[#allocation4 + $0x2b4] sm:$0xf] %v16886_v9  ;;  %v9583_v40 = vld [vmem:[#allocation2 + $0x1af] sm:$0xff]  ;;  %v9584_v20 = vld [vmem:[#allocation2 + $0x1c7] sm:$0xff]  ;;  %v16891_v4 = vpack.c.bf16 %v22243_v38, %v22243_v38  ;;  %v16892_v0 = vpack.c.bf16 %v9965_v36, %v9965_v36 }
 0x541   : > { %9738 = vst [vmem:[#allocation4 + $0x318] sm:$0xf] %v16825_v22  ;;  %10312 = vst [vmem:[#allocation4 + $0x2dc] sm:$0xf] %v16825_v22  ;;  %v9585_v33 = vld [vmem:[#allocation2 + $0x1cf] sm:$0xff]  ;;  %v16830_v60 = vpack.c.bf16 %v9583_v40, %v9583_v40  ;;  %v16831_v14 = vpack.c.bf16 %v9584_v20, %v9584_v20  ;;  %v22284_v37 = vld [vmem:[#allocation2 + $0x207] sm:$0xff] }
 0x542   : > { %9739 = vst [vmem:[#allocation4 + $0x33c] sm:$0xf] %v16826_v10  ;;  %9930 = vst [vmem:[#allocation4 + $0x31c] sm:$0xf] %v16857_v50  ;;  %v22261_v7 = vld [vmem:[#allocation2 + $0x1a9] sm:$0xff]  ;;  %v22270_v52 = vld [vmem:[#allocation2 + $0x1b1] sm:$0xff]  ;;  %v16832_v17 = vpack.c.bf16 %v9585_v33, %v9585_v33  ;;  %v16929_v22 = vpack.c.bf16 %v22284_v37, %v22284_v37 }
 0x543   : > { %10313 = vst [vmem:[#allocation4 + $0x300] sm:$0xf] %v16826_v10  ;;  %v22263_v11 = vld [vmem:[#allocation2 + $0x28] sm:$0xff]  ;;  %9931 = vst [vmem:[#allocation4 + $0x340] sm:$0xf] %v16858_v15  ;;  %v22274_v54 = vld [vmem:[#allocation2 + $0x30] sm:$0xff]  ;;  %v16893_v46 = vpack.c.bf16 %v22261_v7, %v22261_v7  ;;  %v16894_v53 = vpack.c.bf16 %v22270_v52, %v22270_v52 }
 0x544   : > { %10120 = vst [vmem:[#allocation4 + $0x2d8] sm:$0xf] %v16887_v39  ;;  %10121 = vst [vmem:[#allocation4 + $0x2fc] sm:$0xf] %v16888_v35  ;;  %v22272_v31 = vld [vmem:[#allocation2 + $0x1c9] sm:$0xff]  ;;  %v22282_v43 = vld [vmem:[#allocation2 + $0x1d1] sm:$0xff]  ;;  %v16931_v16 = vpack.c.bf16 %v22263_v11, %v22263_v11  ;;  %v16932_v32 = vpack.c.bf16 %v22274_v54, %v22274_v54 }
 0x545   : > { %9740 = vst [vmem:[#allocation4 + $0x360] sm:$0xf] %v16827_v34  ;;  %10314 = vst [vmem:[#allocation4 + $0x324] sm:$0xf] %v16827_v34  ;;  %v22276_v24 = vld [vmem:[#allocation2 + $0x29] sm:$0xff]  ;;  %v22286_v29 = vld [vmem:[#allocation2 + $0x31] sm:$0xff]  ;;  %v16895_v6 = vpack.c.bf16 %v22272_v31, %v22272_v31  ;;  %v16896_v5 = vpack.c.bf16 %v22282_v43, %v22282_v43 }
 0x546   : > { %9741 = vst [vmem:[#allocation4 + $0x384] sm:$0xf] %v16828_v1  ;;  %9932 = vst [vmem:[#allocation4 + $0x364] sm:$0xf] %v16859_v59  ;;  %v22288_v30 = vld [vmem:[#allocation2 + $0x48] sm:$0xff]  ;;  %v22290_v47 = vld [vmem:[#allocation2 + $0x50] sm:$0xff]  ;;  %v16963_v15 = vpack.c.bf16 %v22276_v24, %v22276_v24  ;;  %v16964_v36 = vpack.c.bf16 %v22286_v29, %v22286_v29 }
 0x547   : > { %9933 = vst [vmem:[#allocation4 + $0x388] sm:$0xf] %v16860_v26  ;;  %10122 = vst [vmem:[#allocation4 + $0x320] sm:$0xf] %v16889_v42  ;;  %v22292_v12 = vld [vmem:[#allocation2 + $0x49] sm:$0xff]  ;;  %v22300_v56 = vld [vmem:[#allocation2 + $0x51] sm:$0xff]  ;;  %v16933_v20 = vpack.c.bf16 %v22288_v30, %v22288_v30 }
 0x548   : > { %10315 = vst [vmem:[#allocation4 + $0x348] sm:$0xf] %v16828_v1  ;;  %v19382_v23 = vld [vmem:[#allocation4 + $0x1b0] ss:$36 sps:$4 sm:$0xff]   ;;  %10123 = vst [vmem:[#allocation4 + $0x344] sm:$0xf] %v16890_v57  ;;  %v16934_v1 = vpack.c.bf16 %v22290_v47, %v22290_v47  ;;  %v16965_v59 = vpack.c.bf16 %v22292_v12, %v22292_v12  ;;  %v16966_v33 = vpack.c.bf16 %v22300_v56, %v22300_v56 }
 0x549   : > { %9742 = vst [vmem:[#allocation4 + $0x3a8] sm:$0xf] %v16829_v62  ;;  %9743 = vst [vmem:[#allocation4 + $0x3cc] sm:$0xf] %v16830_v60  ;;  %v9586_v61 = vld [vmem:[#allocation2 + $0x1e7] sm:$0xff]  ;;  %v22304_v8 = vld [vmem:[#allocation2 + $0x4f] sm:$0xff]  ;;  %12837 = vmatmul.mubr.bf16.gmra.mxu1 %v19382_v23 }
 0x54a   : > { %9934 = vst [vmem:[#allocation4 + $0x3ac] sm:$0xf] %v16861_v18  ;;  %10316 = vst [vmem:[#allocation4 + $0x36c] sm:$0xf] %v16829_v62  ;;  %v22302_v2 = vld [vmem:[#allocation2 + $0x47] sm:$0xff]  ;;  %v16833_v19 = vpack.c.bf16 %v9586_v61, %v9586_v61  ;;  %v10329_v58 = vld [vmem:[#allocation2 + $0x70] sm:$0xff]  ;;  %v16996_v11 = vpack.c.bf16 %v22304_v8, %v22304_v8 }
 0x54b   : > { %10317 = vst [vmem:[#allocation4 + $0x390] sm:$0xf] %v16830_v60  ;;  %v22306_v49 = vld [vmem:[#allocation2 + $0x68] sm:$0xff]  ;;  %v19385_v45 = vld [vmem:[#allocation4 + $0x170] ss:$36 sps:$4 sm:$0xff]   ;;  %v16995_v7 = vpack.c.bf16 %v22302_v2, %v22302_v2  ;;  %v16936_v18 = vpack.c.bf16 %v10329_v58, %v10329_v58 }
 0x54c   : > { %v19394_v63 = vld [vmem:[#allocation4 + $0x1fc] ss:$36 sps:$4 sm:$0xff]   ;;  %9935 = vst [vmem:[#allocation4 + $0x3d0] sm:$0xf] %v16862_v13  ;;  %10124 = vst [vmem:[#allocation4 + $0x368] sm:$0xf] %v16891_v4  ;;  %12990 = vmatmul.mubr.bf16.gmra.mxu0 %v19385_v45  ;;  %v16935_v57 = vpack.c.bf16 %v22306_v49, %v22306_v49 }
 0x54d   : > { %10125 = vst [vmem:[#allocation4 + $0x38c] sm:$0xf] %v16892_v0  ;;  %9744 = vst [vmem:[#allocation4 + $0x3f0] sm:$0xf] %v16831_v14  ;;  %v22314_v51 = vld [vmem:[#allocation2 + $0x69] sm:$0xff]  ;;  %v22316_v48 = vld [vmem:[#allocation2 + $0x71] sm:$0xff]  ;;  %12844 = vmatprep.mubr.bf16.mxu1 %v19394_v63 }
 0x54e   : > { %10318 = vst [vmem:[#allocation4 + $0x3b4] sm:$0xf] %v16831_v14  ;;  %v22318_v21 = vld [vmem:[#allocation2 + $0x67] sm:$0xff]  ;;  %v19397_v41 = vld [vmem:[#allocation4 + $0x1bc] ss:$36 sps:$4 sm:$0xff]   ;;  %v10163_v9 = vld [vmem:[#allocation2 + $0x20f] sm:$0xff]  ;;  %v16967_v52 = vpack.c.bf16 %v22314_v51, %v22314_v51  ;;  %v16968_v31 = vpack.c.bf16 %v22316_v48, %v22316_v48 }
 0x54f   : > { %9745 = vst [vmem:[#allocation4 + $0x414] sm:$0xf] %v16832_v17  ;;  %9936 = vst [vmem:[#allocation4 + $0x3f4] sm:$0xf] %v16863_v25  ;;  %v22328_v27 = vld [vmem:[#allocation2 + $0x6f] sm:$0xff]  ;;  %v16930_v50 = vpack.c.bf16 %v10163_v9, %v10163_v9  ;;  %v22338_v35 = vld [vmem:[#allocation2 + $0x87] sm:$0xff]  ;;  %12997 = vmatprep.mubr.bf16.mxu0 %v19397_v41  ;;  %v16997_v54 = vpack.c.bf16 %v22318_v21, %v22318_v21 }
 0x550   : > { %9937 = vst [vmem:[#allocation4 + $0x418] sm:$0xf] %v16864_v3  ;;  %10126 = vst [vmem:[#allocation4 + $0x3b0] sm:$0xf] %v16893_v46  ;;  %v10330_v38 = vld [vmem:[#allocation2 + $0x88] sm:$0xff]  ;;  %v10331_v44 = vld [vmem:[#allocation2 + $0x90] sm:$0xff]  ;;  %v16998_v4 = vpack.c.bf16 %v22328_v27, %v22328_v27  ;;  %v16999_v12 = vpack.c.bf16 %v22338_v35, %v22338_v35 }
 0x551   : > { %10319 = vst [vmem:[#allocation4 + $0x3d8] sm:$0xf] %v16832_v17  ;;  %v22330_v10 = vld [vmem:[#allocation2 + $0x89] sm:$0xff]  ;;  %10127 = vst [vmem:[#allocation4 + $0x3d4] sm:$0xf] %v16894_v53  ;;  %v22336_v39 = vld [vmem:[#allocation2 + $0x91] sm:$0xff]  ;;  %v16937_v0 = vpack.c.bf16 %v10330_v38, %v10330_v38  ;;  %v16938_v14 = vpack.c.bf16 %v10331_v44, %v10331_v44 }
 0x552   : > { %9746 = vst [vmem:[#allocation4 + $0x438] sm:$0xf] %v16833_v19  ;;  %9938 = vst [vmem:[#allocation4 + $0x43c] sm:$0xf] %v16865_v55  ;;  %v22340_v34 = vld [vmem:[#allocation2 + $0x8f] sm:$0xff]  ;;  %v10714_v24 = vld [vmem:[#allocation2 + $0xa7] sm:$0xff]  ;;  %v16969_v43 = vpack.c.bf16 %v22330_v10, %v22330_v10  ;;  %v16970_v47 = vpack.c.bf16 %v22336_v39, %v22336_v39 }
 0x553   : > { %9939 = vst [vmem:[#allocation4 + $0x460] sm:$0xf] %v16866_v28  ;;  %10320 = vst [vmem:[#allocation4 + $0x3fc] sm:$0xf] %v16833_v19  ;;  %v10332_v40 = vld [vmem:[#allocation2 + $0xa8] sm:$0xff]  ;;  %v10333_v26 = vld [vmem:[#allocation2 + $0xb0] sm:$0xff]  ;;  %v17000_v23 = vpack.c.bf16 %v22340_v34, %v22340_v34  ;;  %v17001_v56 = vpack.c.bf16 %v10714_v24, %v10714_v24 }
 0x554   : > { %10128 = vst [vmem:[#allocation4 + $0x3f8] sm:$0xf] %v16895_v6  ;;  %10129 = vst [vmem:[#allocation4 + $0x41c] sm:$0xf] %v16896_v5  ;;  %v22350_v42 = vld [vmem:[#allocation2 + $0xa9] sm:$0xff]  ;;  %v10525_v62 = vld [vmem:[#allocation2 + $0xb1] sm:$0xff]  ;;  %v16939_v17 = vpack.c.bf16 %v10332_v40, %v10332_v40  ;;  %v16940_v3 = vpack.c.bf16 %v10333_v26, %v10333_v26  ;;  %v18069_v6 = vpop.f32.mrf.mxu1 }
 0x555   : > { %10322 = vst [vmem:[#allocation4 + $0x444] sm:$0xf] %v16929_v22  ;;  %10484 = vst [vmem:[#allocation4 + $0x10] sm:$0xf] %v16931_v16  ;;  %v19392_v60 = vld [vmem:[#allocation4 + $0x1f8] ss:$36 sps:$4 sm:$0xff]   ;;  %v16971_v46 = vpack.c.bf16 %v22350_v42, %v22350_v42  ;;  %v16972_v61 = vpack.c.bf16 %v10525_v62, %v10525_v62 }
 0x556   : > { %10323 = vst [vmem:[#allocation4 + $0x468] sm:$0xf] %v16930_v50  ;;  %10485 = vst [vmem:[#allocation4 + $0x34] sm:$0xf] %v16932_v32  ;;  %v10715_v13 = vld [vmem:[#allocation2 + $0xaf] sm:$0xff]  ;;  %12845 = vmatmul.mubr.bf16.gmra.mxu1 %v19392_v60  ;;  %v18070_v16 = vpop.f32.mrf.mxu1  ;;  %v10716_v35 = vld [vmem:[#allocation2 + $0xc7] sm:$0xff] }
 0x557   : > { %10676 = vst [vmem:[#allocation4 + $0x14] sm:$0xf] %v16963_v15  ;;  %10677 = vst [vmem:[#allocation4 + $0x38] sm:$0xf] %v16964_v36  ;;  %v10334_v37 = vld [vmem:[#allocation2 + $0xc8] sm:$0xff]  ;;  %v10335_v29 = vld [vmem:[#allocation2 + $0xd0] sm:$0xff]  ;;  %v17002_v8 = vpack.c.bf16 %v10715_v13, %v10715_v13  ;;  %v22378_v38 = vadd.f32 %v18070_v16, %v18069_v6 }
 0x558   : > { %10486 = vst [vmem:[#allocation4 + $0x58] sm:$0xf] %v16933_v20  ;;  %10487 = vst [vmem:[#allocation4 + $0x7c] sm:$0xf] %v16934_v1  ;;  %v19395_v30 = vld [vmem:[#allocation4 + $0x1b8] ss:$36 sps:$4 sm:$0xff]   ;;  %v16941_v49 = vpack.c.bf16 %v10334_v37, %v10334_v37  ;;  %v16942_v45 = vpack.c.bf16 %v10335_v29, %v10335_v29 }
 0x559   : > { %10678 = vst [vmem:[#allocation4 + $0x5c] sm:$0xf] %v16965_v59  ;;  %11060 = vst [vmem:[#allocation4 + $0x1c] sm:$0xf] %v16933_v20  ;;  %v19400_v25 = vld [vmem:[#allocation4 + $0x244] ss:$36 sps:$4 sm:$0xff]   ;;  %12998 = vmatmul.mubr.bf16.gmra.mxu0 %v19395_v30  ;;  %v17003_v20 = vpack.c.bf16 %v10716_v35, %v10716_v35 }
 0x55a   : > { %11061 = vst [vmem:[#allocation4 + $0x40] sm:$0xf] %v16934_v1  ;;  %10679 = vst [vmem:[#allocation4 + $0x80] sm:$0xf] %v16966_v33  ;;  %v19403_v2 = vld [vmem:[#allocation4 + $0x204] ss:$36 sps:$4 sm:$0xff]   ;;  %12852 = vmatprep.mubr.bf16.mxu1 %v19400_v25 }
 0x55b   : > { %10868 = vst [vmem:[#allocation4 + $0x18] sm:$0xf] %v16995_v7  ;;  %10869 = vst [vmem:[#allocation4 + $0x3c] sm:$0xf] %v16996_v11  ;;  %13005 = vmatprep.mubr.bf16.mxu0 %v19403_v2  ;;  %v19398_v63 = vld [vmem:[#allocation4 + $0x240] ss:$36 sps:$4 sm:$0xff]  }
 0x55c   : > { %10488 = vst [vmem:[#allocation4 + $0xa0] sm:$0xf] %v16935_v57  ;;  %11062 = vst [vmem:[#allocation4 + $0x64] sm:$0xf] %v16935_v57  ;;  %v19401_v53 = vld [vmem:[#allocation4 + $0x200] ss:$36 sps:$4 sm:$0xff]  }
 0x55d   : > { %10489 = vst [vmem:[#allocation4 + $0xc4] sm:$0xf] %v16936_v18  ;;  %10680 = vst [vmem:[#allocation4 + $0xa4] sm:$0xf] %v16967_v52  ;;  %v19410_v19 = vld [vmem:[#allocation4 + $0x28c] ss:$36 sps:$4 sm:$0xff]  }
 0x55e   : > { %10681 = vst [vmem:[#allocation4 + $0xc8] sm:$0xf] %v16968_v31  ;;  %10870 = vst [vmem:[#allocation4 + $0x60] sm:$0xf] %v16997_v54  ;;  %v9587_v55 = vld [vmem:[#allocation2 + $0x1ef] sm:$0xff]  ;;  %12853 = vmatmul.mubr.bf16.gmra.mxu1 %v19398_v63  ;;  %v10718_v57 = vld [vmem:[#allocation2 + $0xe7] sm:$0xff] }
 0x55f   : > { %11063 = vst [vmem:[#allocation4 + $0x88] sm:$0xf] %v16936_v18  ;;  %10871 = vst [vmem:[#allocation4 + $0x84] sm:$0xf] %v16998_v4  ;;  %v16834_v28 = vpack.c.bf16 %v9587_v55, %v9587_v55  ;;  %v9970_v58 = vld [vmem:[#allocation2 + $0x1e9] sm:$0xff]  ;;  %v9971_v51 = vld [vmem:[#allocation2 + $0x1f1] sm:$0xff]  ;;  %12860 = vmatprep.mubr.bf16.mxu1 %v19410_v19  ;;  %v17005_v52 = vpack.c.bf16 %v10718_v57, %v10718_v57 }
 0x560   : > { %10490 = vst [vmem:[#allocation4 + $0xe8] sm:$0xf] %v16937_v0  ;;  %10491 = vst [vmem:[#allocation4 + $0x10c] sm:$0xf] %v16938_v14  ;;  %v19413_v48 = vld [vmem:[#allocation4 + $0x24c] ss:$36 sps:$4 sm:$0xff]   ;;  %v16897_v21 = vpack.c.bf16 %v9970_v58, %v9970_v58  ;;  %v16898_v41 = vpack.c.bf16 %v9971_v51, %v9971_v51 }
 0x561   : > { %10682 = vst [vmem:[#allocation4 + $0xec] sm:$0xf] %v16969_v43  ;;  %11064 = vst [vmem:[#allocation4 + $0xac] sm:$0xf] %v16937_v0  ;;  %13006 = vmatmul.mubr.bf16.gmra.mxu0 %v19401_v53  ;;  %v19408_v5 = vld [vmem:[#allocation4 + $0x288] ss:$36 sps:$4 sm:$0xff]  }
 0x562   : > { %11065 = vst [vmem:[#allocation4 + $0xd0] sm:$0xf] %v16938_v14  ;;  %10683 = vst [vmem:[#allocation4 + $0x110] sm:$0xf] %v16970_v47  ;;  %13013 = vmatprep.mubr.bf16.mxu0 %v19413_v48  ;;  %v19411_v9 = vld [vmem:[#allocation4 + $0x248] ss:$36 sps:$4 sm:$0xff]  }
 0x563   : > { %10872 = vst [vmem:[#allocation4 + $0xa8] sm:$0xf] %v16999_v12  ;;  %10873 = vst [vmem:[#allocation4 + $0xcc] sm:$0xf] %v17000_v23  ;;  %v19416_v22 = vld [vmem:[#allocation4 + $0x2d4] ss:$36 sps:$4 sm:$0xff]  }
 0x564   : > { %10492 = vst [vmem:[#allocation4 + $0x130] sm:$0xf] %v16939_v17  ;;  %11066 = vst [vmem:[#allocation4 + $0xf4] sm:$0xf] %v16939_v17  ;;  %v19419_v27 = vld [vmem:[#allocation4 + $0x294] ss:$36 sps:$4 sm:$0xff]  }
 0x565   : > { %10493 = vst [vmem:[#allocation4 + $0x154] sm:$0xf] %v16940_v3  ;;  %10684 = vst [vmem:[#allocation4 + $0x134] sm:$0xf] %v16971_v46  ;;  %v19414_v44 = vld [vmem:[#allocation4 + $0x2d0] ss:$36 sps:$4 sm:$0xff]  }
 0x566   : > { %10685 = vst [vmem:[#allocation4 + $0x158] sm:$0xf] %v16972_v61  ;;  %10874 = vst [vmem:[#allocation4 + $0xf0] sm:$0xf] %v17001_v56  ;;  %12861 = vmatmul.mubr.bf16.gmra.mxu1 %v19408_v5  ;;  %v19417_v10 = vld [vmem:[#allocation4 + $0x290] ss:$36 sps:$4 sm:$0xff]  }
 0x567   : > { %11067 = vst [vmem:[#allocation4 + $0x118] sm:$0xf] %v16940_v3  ;;  %10875 = vst [vmem:[#allocation4 + $0x114] sm:$0xf] %v17002_v8  ;;  %12868 = vmatprep.mubr.bf16.mxu1 %v19416_v22  ;;  %v19426_v50 = vld [vmem:[#allocation4 + $0x31c] ss:$36 sps:$4 sm:$0xff]  }
 0x568   : > { %10494 = vst [vmem:[#allocation4 + $0x178] sm:$0xf] %v16941_v49  ;;  %10495 = vst [vmem:[#allocation4 + $0x19c] sm:$0xf] %v16942_v45  ;;  %v19429_v32 = vld [vmem:[#allocation4 + $0x2dc] ss:$36 sps:$4 sm:$0xff]  }
 0x569   : > { %11068 = vst [vmem:[#allocation4 + $0x13c] sm:$0xf] %v16941_v49  ;;  %11069 = vst [vmem:[#allocation4 + $0x160] sm:$0xf] %v16942_v45  ;;  %13014 = vmatmul.mubr.bf16.gmra.mxu0 %v19411_v9  ;;  %v10526_v15 = vld [vmem:[#allocation2 + $0xc9] sm:$0xff]  ;;  %v10527_v39 = vld [vmem:[#allocation2 + $0xd1] sm:$0xff] }
 0x56a   : > { %9747 = vst [vmem:[#allocation4 + $0x45c] sm:$0xf] %v16834_v28  ;;  %10321 = vst [vmem:[#allocation4 + $0x420] sm:$0xf] %v16834_v28  ;;  %13021 = vmatprep.mubr.bf16.mxu0 %v19419_v27  ;;  %v16973_v34 = vpack.c.bf16 %v10526_v15, %v10526_v15  ;;  %v16974_v40 = vpack.c.bf16 %v10527_v39, %v10527_v39  ;;  %v10717_v36 = vld [vmem:[#allocation2 + $0xcf] sm:$0xff]  ;;  %v10720_v30 = vld [vmem:[#allocation2 + $0x107] sm:$0xff] }
 0x56b   : > { %10130 = vst [vmem:[#allocation4 + $0x440] sm:$0xf] %v16897_v21  ;;  %10131 = vst [vmem:[#allocation4 + $0x464] sm:$0xf] %v16898_v41  ;;  %v10336_v1 = vld [vmem:[#allocation2 + $0xe8] sm:$0xff]  ;;  %v10337_v59 = vld [vmem:[#allocation2 + $0xf0] sm:$0xff]  ;;  %v17004_v26 = vpack.c.bf16 %v10717_v36, %v10717_v36  ;;  %v17007_v25 = vpack.c.bf16 %v10720_v30, %v10720_v30 }
 0x56c   : > { %v16943_v42 = vpack.c.bf16 %v10336_v1, %v10336_v1  ;;  %v16944_v33 = vpack.c.bf16 %v10337_v59, %v10337_v59  ;;  %v10528_v7 = vld [vmem:[#allocation2 + $0xe9] sm:$0xff]  ;;  %v10529_v11 = vld [vmem:[#allocation2 + $0xf1] sm:$0xff]  ;;  %10686 = vst [vmem:[#allocation4 + $0x17c] sm:$0xf] %v16973_v34  ;;  %10687 = vst [vmem:[#allocation4 + $0x1a0] sm:$0xf] %v16974_v40 }
 0x56d   : > { %10876 = vst [vmem:[#allocation4 + $0x138] sm:$0xf] %v17003_v20  ;;  %v16975_v62 = vpack.c.bf16 %v10528_v7, %v10528_v7  ;;  %v16976_v60 = vpack.c.bf16 %v10529_v11, %v10529_v11  ;;  %v10719_v18 = vld [vmem:[#allocation2 + $0xef] sm:$0xff]  ;;  %10877 = vst [vmem:[#allocation4 + $0x15c] sm:$0xf] %v17004_v26  ;;  %v10722_v53 = vld [vmem:[#allocation2 + $0x127] sm:$0xff] }
 0x56e   : > { %12869 = vmatmul.mubr.bf16.gmra.mxu1 %v19414_v44  ;;  %v10338_v31 = vld [vmem:[#allocation2 + $0x108] sm:$0xff]  ;;  %10496 = vst [vmem:[#allocation4 + $0x1c0] sm:$0xf] %v16943_v42  ;;  %10497 = vst [vmem:[#allocation4 + $0x1e4] sm:$0xf] %v16944_v33  ;;  %v17006_v54 = vpack.c.bf16 %v10719_v18, %v10719_v18  ;;  %v10339_v24 = vld [vmem:[#allocation2 + $0x110] sm:$0xff]  ;;  %v17009_v55 = vpack.c.bf16 %v10722_v53, %v10722_v53 }
 0x56f   : > { %12876 = vmatprep.mubr.bf16.mxu1 %v19426_v50  ;;  %11070 = vst [vmem:[#allocation4 + $0x184] sm:$0xf] %v16943_v42  ;;  %11071 = vst [vmem:[#allocation4 + $0x1a8] sm:$0xf] %v16944_v33  ;;  %v16945_v13 = vpack.c.bf16 %v10338_v31, %v10338_v31  ;;  %v10530_v4 = vld [vmem:[#allocation2 + $0x109] sm:$0xff]  ;;  %v10531_v0 = vld [vmem:[#allocation2 + $0x111] sm:$0xff]  ;;  %v16946_v43 = vpack.c.bf16 %v10339_v24, %v10339_v24 }
 0x570   : > { %v19424_v14 = vld [vmem:[#allocation4 + $0x318] ss:$36 sps:$4 sm:$0xff]   ;;  %10688 = vst [vmem:[#allocation4 + $0x1c4] sm:$0xf] %v16975_v62  ;;  %10689 = vst [vmem:[#allocation4 + $0x1e8] sm:$0xf] %v16976_v60  ;;  %v16977_v37 = vpack.c.bf16 %v10530_v4, %v10530_v4  ;;  %v16978_v29 = vpack.c.bf16 %v10531_v0, %v10531_v0 }
 0x571   : > { %13022 = vmatmul.mubr.bf16.gmra.mxu0 %v19417_v10  ;;  %10878 = vst [vmem:[#allocation4 + $0x180] sm:$0xf] %v17005_v52  ;;  %v10721_v47 = vld [vmem:[#allocation2 + $0x10f] sm:$0xff]  ;;  %v19427_v23 = vld [vmem:[#allocation4 + $0x2d8] ss:$36 sps:$4 sm:$0xff]   ;;  %v10724_v9 = vld [vmem:[#allocation2 + $0x147] sm:$0xff] }
 0x572   : > { %13029 = vmatprep.mubr.bf16.mxu0 %v19429_v32  ;;  %v10340_v12 = vld [vmem:[#allocation2 + $0x128] sm:$0xff]  ;;  %10879 = vst [vmem:[#allocation4 + $0x1a4] sm:$0xf] %v17006_v54  ;;  %10498 = vst [vmem:[#allocation4 + $0x208] sm:$0xf] %v16945_v13  ;;  %v17008_v3 = vpack.c.bf16 %v10721_v47, %v10721_v47  ;;  %v10341_v46 = vld [vmem:[#allocation2 + $0x130] sm:$0xff]  ;;  %v17011_v27 = vpack.c.bf16 %v10724_v9, %v10724_v9 }
 0x573   : > { %v19432_v17 = vld [vmem:[#allocation4 + $0x364] ss:$36 sps:$4 sm:$0xff]   ;;  %11072 = vst [vmem:[#allocation4 + $0x1cc] sm:$0xf] %v16945_v13  ;;  %v16947_v61 = vpack.c.bf16 %v10340_v12, %v10340_v12  ;;  %v10533_v2 = vld [vmem:[#allocation2 + $0x131] sm:$0xff]  ;;  %v16948_v49 = vpack.c.bf16 %v10341_v46, %v10341_v46 }
 0x574   : > { %v10532_v56 = vld [vmem:[#allocation2 + $0x129] sm:$0xff]  ;;  %10499 = vst [vmem:[#allocation4 + $0x22c] sm:$0xf] %v16946_v43  ;;  %10690 = vst [vmem:[#allocation4 + $0x20c] sm:$0xf] %v16977_v37  ;;  %v16980_v63 = vpack.c.bf16 %v10533_v2, %v10533_v2  ;;  %v10535_v6 = vld [vmem:[#allocation2 + $0x151] sm:$0xff] }
 0x575   : > { %v19435_v8 = vld [vmem:[#allocation4 + $0x324] ss:$36 sps:$4 sm:$0xff]   ;;  %10691 = vst [vmem:[#allocation4 + $0x230] sm:$0xf] %v16978_v29  ;;  %11073 = vst [vmem:[#allocation4 + $0x1f0] sm:$0xf] %v16946_v43  ;;  %v16979_v45 = vpack.c.bf16 %v10532_v56, %v10532_v56  ;;  %v16982_v16 = vpack.c.bf16 %v10535_v6, %v10535_v6 }
 0x576   : > { %v10723_v19 = vld [vmem:[#allocation2 + $0x12f] sm:$0xff]  ;;  %10880 = vst [vmem:[#allocation4 + $0x1c8] sm:$0xf] %v17007_v25  ;;  %10881 = vst [vmem:[#allocation4 + $0x1ec] sm:$0xf] %v17008_v3  ;;  %12877 = vmatmul.mubr.bf16.gmra.mxu1 %v19424_v14  ;;  %v10726_v42 = vld [vmem:[#allocation2 + $0x167] sm:$0xff] }
 0x577   : > { %10500 = vst [vmem:[#allocation4 + $0x250] sm:$0xf] %v16947_v61  ;;  %v17010_v28 = vpack.c.bf16 %v10723_v19, %v10723_v19  ;;  %11074 = vst [vmem:[#allocation4 + $0x214] sm:$0xf] %v16947_v61  ;;  %v10342_v58 = vld [vmem:[#allocation2 + $0x148] sm:$0xff]  ;;  %v10343_v51 = vld [vmem:[#allocation2 + $0x150] sm:$0xff]  ;;  %12884 = vmatprep.mubr.bf16.mxu1 %v19432_v17  ;;  %v17013_v62 = vpack.c.bf16 %v10726_v42, %v10726_v42 }
 0x578   : > { %v10534_v48 = vld [vmem:[#allocation2 + $0x149] sm:$0xff]  ;;  %10501 = vst [vmem:[#allocation4 + $0x274] sm:$0xf] %v16948_v49  ;;  %10692 = vst [vmem:[#allocation4 + $0x254] sm:$0xf] %v16979_v45  ;;  %v16949_v21 = vpack.c.bf16 %v10342_v58, %v10342_v58  ;;  %v16950_v41 = vpack.c.bf16 %v10343_v51, %v10343_v51  ;;  %v10537_v26 = vld [vmem:[#allocation2 + $0x171] sm:$0xff] }
 0x579   : > { %10693 = vst [vmem:[#allocation4 + $0x278] sm:$0xf] %v16980_v63  ;;  %11075 = vst [vmem:[#allocation4 + $0x238] sm:$0xf] %v16948_v49  ;;  %v16981_v5 = vpack.c.bf16 %v10534_v48, %v10534_v48  ;;  %v10725_v22 = vld [vmem:[#allocation2 + $0x14f] sm:$0xff]  ;;  %13030 = vmatmul.mubr.bf16.gmra.mxu0 %v19427_v23  ;;  %v16984_v11 = vpack.c.bf16 %v10537_v26, %v10537_v26  ;;  %v10728_v14 = vld [vmem:[#allocation2 + $0x187] sm:$0xff] }
 0x57a   : > { %10882 = vst [vmem:[#allocation4 + $0x210] sm:$0xf] %v17009_v55  ;;  %10883 = vst [vmem:[#allocation4 + $0x234] sm:$0xf] %v17010_v28  ;;  %v17012_v44 = vpack.c.bf16 %v10725_v22, %v10725_v22  ;;  %13037 = vmatprep.mubr.bf16.mxu0 %v19435_v8  ;;  %v19430_v10 = vld [vmem:[#allocation4 + $0x360] ss:$36 sps:$4 sm:$0xff]   ;;  %v17015_v29 = vpack.c.bf16 %v10728_v14, %v10728_v14 }
 0x57b   : > { %10502 = vst [vmem:[#allocation4 + $0x298] sm:$0xf] %v16949_v21  ;;  %10503 = vst [vmem:[#allocation4 + $0x2bc] sm:$0xf] %v16950_v41  ;;  %v19433_v50 = vld [vmem:[#allocation4 + $0x320] ss:$36 sps:$4 sm:$0xff]  }
 0x57c   : > { %10694 = vst [vmem:[#allocation4 + $0x29c] sm:$0xf] %v16981_v5  ;;  %11076 = vst [vmem:[#allocation4 + $0x25c] sm:$0xf] %v16949_v21  ;;  %v19442_v32 = vld [vmem:[#allocation4 + $0x3ac] ss:$36 sps:$4 sm:$0xff]  }
 0x57d   : > { %11077 = vst [vmem:[#allocation4 + $0x280] sm:$0xf] %v16950_v41  ;;  %11268 = vst [vmem:[#allocation4 + $0x260] sm:$0xf] %v16981_v5  ;;  %v19445_v15 = vld [vmem:[#allocation4 + $0x36c] ss:$36 sps:$4 sm:$0xff]  }
 0x57e   : > { %10695 = vst [vmem:[#allocation4 + $0x2c0] sm:$0xf] %v16982_v16  ;;  %10884 = vst [vmem:[#allocation4 + $0x258] sm:$0xf] %v17011_v27  ;;  %12885 = vmatmul.mubr.bf16.gmra.mxu1 %v19430_v10  ;;  %v19440_v39 = vld [vmem:[#allocation4 + $0x3a8] ss:$36 sps:$4 sm:$0xff]  }
 0x57f   : > { %10885 = vst [vmem:[#allocation4 + $0x27c] sm:$0xf] %v17012_v44  ;;  %11269 = vst [vmem:[#allocation4 + $0x284] sm:$0xf] %v16982_v16  ;;  %12892 = vmatprep.mubr.bf16.mxu1 %v19442_v32  ;;  %v19443_v35 = vld [vmem:[#allocation4 + $0x368] ss:$36 sps:$4 sm:$0xff]  }
 0x580   : > { %v19448_v34 = vld [vmem:[#allocation4 + $0x3f4] ss:$36 sps:$4 sm:$0xff]   ;;  %v10344_v40 = vld [vmem:[#allocation2 + $0x168] sm:$0xff]  ;;  %10697 = vst [vmem:[#allocation4 + $0x308] sm:$0xf] %v16984_v11 }
 0x581   : > { %13038 = vmatmul.mubr.bf16.gmra.mxu0 %v19433_v50  ;;  %v10345_v36 = vld [vmem:[#allocation2 + $0x170] sm:$0xff]  ;;  %v16951_v20 = vpack.c.bf16 %v10344_v40, %v10344_v40  ;;  %v10346_v60 = vld [vmem:[#allocation2 + $0x188] sm:$0xff]  ;;  %10886 = vst [vmem:[#allocation4 + $0x2a0] sm:$0xf] %v17013_v62  ;;  %11271 = vst [vmem:[#allocation4 + $0x2cc] sm:$0xf] %v16984_v11 }
 0x582   : > { %13045 = vmatprep.mubr.bf16.mxu0 %v19445_v15  ;;  %v16952_v1 = vpack.c.bf16 %v10345_v36, %v10345_v36  ;;  %v10536_v59 = vld [vmem:[#allocation2 + $0x169] sm:$0xff]  ;;  %v19451_v33 = vld [vmem:[#allocation4 + $0x3b4] ss:$36 sps:$4 sm:$0xff]   ;;  %v16953_v31 = vpack.c.bf16 %v10346_v60, %v10346_v60  ;;  %v19458_v49 = vld [vmem:[#allocation4 + $0x43c] ss:$36 sps:$4 sm:$0xff]  }
 0x583   : > { %v16983_v7 = vpack.c.bf16 %v10536_v59, %v10536_v59  ;;  %v10727_v57 = vld [vmem:[#allocation2 + $0x16f] sm:$0xff]  ;;  %10504 = vst [vmem:[#allocation4 + $0x2e0] sm:$0xf] %v16951_v20  ;;  %11078 = vst [vmem:[#allocation4 + $0x2a4] sm:$0xf] %v16951_v20  ;;  %v10730_v56 = vld [vmem:[#allocation2 + $0x1a7] sm:$0xff] }
 0x584   : > { %10505 = vst [vmem:[#allocation4 + $0x304] sm:$0xf] %v16952_v1  ;;  %v17014_v18 = vpack.c.bf16 %v10727_v57, %v10727_v57  ;;  %11079 = vst [vmem:[#allocation4 + $0x2c8] sm:$0xf] %v16952_v1  ;;  %v10347_v52 = vld [vmem:[#allocation2 + $0x190] sm:$0xff]  ;;  %v10348_v37 = vld [vmem:[#allocation2 + $0x1a8] sm:$0xff]  ;;  %v17017_v45 = vpack.c.bf16 %v10730_v56, %v10730_v56 }
 0x585   : > { %v10538_v54 = vld [vmem:[#allocation2 + $0x189] sm:$0xff]  ;;  %v10539_v24 = vld [vmem:[#allocation2 + $0x191] sm:$0xff]  ;;  %10696 = vst [vmem:[#allocation4 + $0x2e4] sm:$0xf] %v16983_v7  ;;  %v16954_v13 = vpack.c.bf16 %v10347_v52, %v10347_v52  ;;  %11270 = vst [vmem:[#allocation4 + $0x2a8] sm:$0xf] %v16983_v7  ;;  %v16955_v12 = vpack.c.bf16 %v10348_v37, %v10348_v37 }
 0x586   : > { %12893 = vmatmul.mubr.bf16.gmra.mxu1 %v19440_v39  ;;  %v16985_v4 = vpack.c.bf16 %v10538_v54, %v10538_v54  ;;  %v16986_v0 = vpack.c.bf16 %v10539_v24, %v10539_v24  ;;  %v10729_v43 = vld [vmem:[#allocation2 + $0x18f] sm:$0xff]  ;;  %10887 = vst [vmem:[#allocation4 + $0x2c4] sm:$0xf] %v17014_v18  ;;  %10506 = vst [vmem:[#allocation4 + $0x328] sm:$0xf] %v16953_v31  ;;  %v10732_v41 = vld [vmem:[#allocation2 + $0x1c7] sm:$0xff] }
 0x587   : > { %12900 = vmatprep.mubr.bf16.mxu1 %v19448_v34  ;;  %v17016_v30 = vpack.c.bf16 %v10729_v43, %v10729_v43  ;;  %11080 = vst [vmem:[#allocation4 + $0x2ec] sm:$0xf] %v16953_v31  ;;  %v10349_v47 = vld [vmem:[#allocation2 + $0x1b0] sm:$0xff]  ;;  %10507 = vst [vmem:[#allocation4 + $0x34c] sm:$0xf] %v16954_v13  ;;  %v10350_v53 = vld [vmem:[#allocation2 + $0x1c8] sm:$0xff]  ;;  %v17019_v9 = vpack.c.bf16 %v10732_v41, %v10732_v41 }
 0x588   : > { %v10540_v23 = vld [vmem:[#allocation2 + $0x1a9] sm:$0xff]  ;;  %v10541_v17 = vld [vmem:[#allocation2 + $0x1b1] sm:$0xff]  ;;  %10698 = vst [vmem:[#allocation4 + $0x32c] sm:$0xf] %v16985_v4  ;;  %10699 = vst [vmem:[#allocation4 + $0x350] sm:$0xf] %v16986_v0  ;;  %v16956_v3 = vpack.c.bf16 %v10349_v47, %v10349_v47  ;;  %v16957_v58 = vpack.c.bf16 %v10350_v53, %v10350_v53 }
 0x589   : > { %13046 = vmatmul.mubr.bf16.gmra.mxu0 %v19443_v35  ;;  %v19446_v25 = vld [vmem:[#allocation4 + $0x3f0] ss:$36 sps:$4 sm:$0xff]   ;;  %11081 = vst [vmem:[#allocation4 + $0x310] sm:$0xf] %v16954_v13  ;;  %v16987_v46 = vpack.c.bf16 %v10540_v23, %v10540_v23  ;;  %v16988_v61 = vpack.c.bf16 %v10541_v17, %v10541_v17  ;;  %11272 = vst [vmem:[#allocation4 + $0x2f0] sm:$0xf] %v16985_v4 }
 0x58a   : > { %13053 = vmatprep.mubr.bf16.mxu0 %v19451_v33  ;;  %v10731_v2 = vld [vmem:[#allocation2 + $0x1af] sm:$0xff]  ;;  %11273 = vst [vmem:[#allocation4 + $0x314] sm:$0xf] %v16986_v0  ;;  %10888 = vst [vmem:[#allocation4 + $0x2e8] sm:$0xf] %v17015_v29  ;;  %v10734_v39 = vld [vmem:[#allocation2 + $0x1e7] sm:$0xff] }
 0x58b   : > { %v19449_v8 = vld [vmem:[#allocation4 + $0x3b0] ss:$36 sps:$4 sm:$0xff]   ;;  %10889 = vst [vmem:[#allocation4 + $0x30c] sm:$0xf] %v17016_v30  ;;  %10508 = vst [vmem:[#allocation4 + $0x370] sm:$0xf] %v16955_v12  ;;  %v17018_v63 = vpack.c.bf16 %v10731_v2, %v10731_v2  ;;  %v17021_v40 = vpack.c.bf16 %v10734_v39, %v10734_v39 }
 0x58c   : > { %11082 = vst [vmem:[#allocation4 + $0x334] sm:$0xf] %v16955_v12  ;;  %v10351_v19 = vld [vmem:[#allocation2 + $0x1d0] sm:$0xff]  ;;  %v19461_v28 = vld [vmem:[#allocation4 + $0x3fc] ss:$36 sps:$4 sm:$0xff]   ;;  %v10352_v16 = vld [vmem:[#allocation2 + $0x1e8] sm:$0xff] }
 0x58d   : > { %v10542_v55 = vld [vmem:[#allocation2 + $0x1c9] sm:$0xff]  ;;  %10509 = vst [vmem:[#allocation4 + $0x394] sm:$0xf] %v16956_v3  ;;  %10700 = vst [vmem:[#allocation4 + $0x374] sm:$0xf] %v16987_v46  ;;  %v16958_v51 = vpack.c.bf16 %v10351_v19, %v10351_v19  ;;  %v10543_v48 = vld [vmem:[#allocation2 + $0x1d1] sm:$0xff]  ;;  %v16959_v10 = vpack.c.bf16 %v10352_v16, %v10352_v16 }
 0x58e   : > { %10701 = vst [vmem:[#allocation4 + $0x398] sm:$0xf] %v16988_v61  ;;  %11083 = vst [vmem:[#allocation4 + $0x358] sm:$0xf] %v16956_v3  ;;  %v16989_v21 = vpack.c.bf16 %v10542_v55, %v10542_v55  ;;  %v10733_v6 = vld [vmem:[#allocation2 + $0x1cf] sm:$0xff]  ;;  %v16990_v5 = vpack.c.bf16 %v10543_v48, %v10543_v48  ;;  %12901 = vmatmul.mubr.bf16.gmra.mxu1 %v19446_v25  ;;  %v10736_v4 = vld [vmem:[#allocation2 + $0x207] sm:$0xff] }
 0x58f   : > { %11274 = vst [vmem:[#allocation4 + $0x338] sm:$0xf] %v16987_v46  ;;  %11275 = vst [vmem:[#allocation4 + $0x35c] sm:$0xf] %v16988_v61  ;;  %v17020_v22 = vpack.c.bf16 %v10733_v6, %v10733_v6  ;;  %v10353_v27 = vld [vmem:[#allocation2 + $0x1f0] sm:$0xff]  ;;  %12908 = vmatprep.mubr.bf16.mxu1 %v19458_v49  ;;  %v10354_v62 = vld [vmem:[#allocation2 + $0x208] sm:$0xff]  ;;  %v17023_v37 = vpack.c.bf16 %v10736_v4, %v10736_v4 }
 0x590   : > { %10890 = vst [vmem:[#allocation4 + $0x330] sm:$0xf] %v17017_v45  ;;  %10891 = vst [vmem:[#allocation4 + $0x354] sm:$0xf] %v17018_v63  ;;  %v10544_v44 = vld [vmem:[#allocation2 + $0x1e9] sm:$0xff]  ;;  %v16960_v50 = vpack.c.bf16 %v10353_v27, %v10353_v27  ;;  %v10545_v32 = vld [vmem:[#allocation2 + $0x1f1] sm:$0xff]  ;;  %v16961_v18 = vpack.c.bf16 %v10354_v62, %v10354_v62 }
 0x591   : > { %10510 = vst [vmem:[#allocation4 + $0x3b8] sm:$0xf] %v16957_v58  ;;  %10511 = vst [vmem:[#allocation4 + $0x3dc] sm:$0xf] %v16958_v51  ;;  %v16991_v15 = vpack.c.bf16 %v10544_v44, %v10544_v44  ;;  %v10735_v35 = vld [vmem:[#allocation2 + $0x1ef] sm:$0xff]  ;;  %13054 = vmatmul.mubr.bf16.gmra.mxu0 %v19449_v8  ;;  %v16992_v34 = vpack.c.bf16 %v10545_v32, %v10545_v32  ;;  %v22388_v43 = vld [vmem:[%s23934_s10 + $0x238] sm:$0xff]  }
 0x592   : > { %10702 = vst [vmem:[#allocation4 + $0x3bc] sm:$0xf] %v16989_v21  ;;  %11084 = vst [vmem:[#allocation4 + $0x37c] sm:$0xf] %v16957_v58  ;;  %v17022_v36 = vpack.c.bf16 %v10735_v35, %v10735_v35  ;;  %13061 = vmatprep.mubr.bf16.mxu0 %v19461_v28  ;;  %v19456_v20 = vld [vmem:[#allocation4 + $0x438] ss:$36 sps:$4 sm:$0xff]  }
 0x593   : > { %11085 = vst [vmem:[#allocation4 + $0x3a0] sm:$0xf] %v16958_v51  ;;  %11276 = vst [vmem:[#allocation4 + $0x380] sm:$0xf] %v16989_v21  ;;  %v19459_v1 = vld [vmem:[#allocation4 + $0x3f8] ss:$36 sps:$4 sm:$0xff]  }
 0x594   : > { %10703 = vst [vmem:[#allocation4 + $0x3e0] sm:$0xf] %v16990_v5  ;;  %10892 = vst [vmem:[#allocation4 + $0x378] sm:$0xf] %v17019_v9  ;;  %v19467_v59 = vld [vmem:[#allocation4 + $0x14] ss:$36 sps:$4 sm:$0xff]  }
 0x595   : > { %10893 = vst [vmem:[#allocation4 + $0x39c] sm:$0xf] %v17020_v22  ;;  %11277 = vst [vmem:[#allocation4 + $0x3a4] sm:$0xf] %v16990_v5  ;;  %v19464_v26 = vld [vmem:[#allocation4 + $0x444] ss:$36 sps:$4 sm:$0xff]  }
 0x596   : > { %10512 = vst [vmem:[#allocation4 + $0x400] sm:$0xf] %v16959_v10  ;;  %10513 = vst [vmem:[#allocation4 + $0x424] sm:$0xf] %v16960_v50  ;;  %12909 = vmatmul.mubr.bf16.gmra.mxu1 %v19456_v20  ;;  %v19465_v42 = vld [vmem:[#allocation4 + $0x10] ss:$36 sps:$4 sm:$0xff]  }
 0x597   : > { %10704 = vst [vmem:[#allocation4 + $0x404] sm:$0xf] %v16991_v15  ;;  %11086 = vst [vmem:[#allocation4 + $0x3c4] sm:$0xf] %v16959_v10  ;;  %13110 = vmatprep.mubr.bf16.mxu1 %v19467_v59  ;;  %v22383_v33 = vld [vmem:[%s23934_s10 + $0x230] sm:$0xff]   ;;  %v22394_v17 = vld [vmem:[%s23934_s10 + $0x228] sm:$0xff]  }
 0x598   : > { %11087 = vst [vmem:[#allocation4 + $0x3e8] sm:$0xf] %v16960_v50  ;;  %11278 = vst [vmem:[#allocation4 + $0x3c8] sm:$0xf] %v16991_v15  ;;  %v19462_v7 = vld [vmem:[#allocation4 + $0x440] ss:$36 sps:$4 sm:$0xff]  }
 0x599   : > { %10705 = vst [vmem:[#allocation4 + $0x428] sm:$0xf] %v16992_v34  ;;  %10894 = vst [vmem:[#allocation4 + $0x3c0] sm:$0xf] %v17021_v40  ;;  %13062 = vmatmul.mubr.bf16.gmra.mxu0 %v19459_v1  ;;  %v19473_v11 = vld [vmem:[#allocation4 + $0x5c] ss:$36 sps:$4 sm:$0xff]  }
 0x59a   : > { %10895 = vst [vmem:[#allocation4 + $0x3e4] sm:$0xf] %v17022_v36  ;;  %11279 = vst [vmem:[#allocation4 + $0x3ec] sm:$0xf] %v16992_v34  ;;  %13069 = vmatprep.mubr.bf16.mxu0 %v19464_v26  ;;  %v19476_v57 = vld [vmem:[#allocation4 + $0x1c] ss:$36 sps:$4 sm:$0xff]  }
 0x59b   : > { %v10355_v60 = vld [vmem:[#allocation2 + $0x210] sm:$0xff]  ;;  %10514 = vst [vmem:[#allocation4 + $0x448] sm:$0xf] %v16961_v18  ;;  %11088 = vst [vmem:[#allocation4 + $0x40c] sm:$0xf] %v16961_v18  ;;  %v19509_v35 = vld [vmem:[%s23934_s10 + $0x220] sm:$0xff]  }
 0x59c   : > { %v10546_v52 = vld [vmem:[#allocation2 + $0x209] sm:$0xff]  ;;  %v10547_v31 = vld [vmem:[#allocation2 + $0x211] sm:$0xff]  ;;  %v16962_v54 = vpack.c.bf16 %v10355_v60, %v10355_v60  ;;  %10896 = vst [vmem:[#allocation4 + $0x408] sm:$0xf] %v17023_v37  ;;  %v19477_v34 = vld [vmem:[#allocation4 + $0xa0] ss:$36 sps:$4 sm:$0xff]  }
 0x59d   : > { %v16993_v24 = vpack.c.bf16 %v10546_v52, %v10546_v52  ;;  %v16994_v13 = vpack.c.bf16 %v10547_v31, %v10547_v31  ;;  %v10737_v0 = vld [vmem:[#allocation2 + $0x20f] sm:$0xff]  ;;  %v19471_v45 = vld [vmem:[#allocation4 + $0x58] ss:$36 sps:$4 sm:$0xff]   ;;  %v19479_v48 = vld [vmem:[#allocation4 + $0xa4] ss:$36 sps:$4 sm:$0xff]  }
 0x59e   : > { %13111 = vmatmul.mubr.bf16.vlgmr.msra.gmra.mxu1 %v19465_v42  ;;  %v11096_v14 = vld [vmem:[#allocation2 + $0x89] sm:$0xff]  ;;  %v17024_v29 = vpack.c.bf16 %v10737_v0, %v10737_v0  ;;  %v11097_v30 = vld [vmem:[#allocation2 + $0x91] sm:$0xff]  ;;  %10515 = vst [vmem:[#allocation4 + $0x46c] sm:$0xf] %v16962_v54  ;;  %11089 = vst [vmem:[#allocation4 + $0x430] sm:$0xf] %v16962_v54 }
 0x59f   : > { %18713 = vmatpush3.bf16.msra.mxu1 %v22388_v43  ;;  %v17063_v47 = vpack.c.bf16 %v11096_v14, %v11096_v14  ;;  %v11098_v12 = vld [vmem:[#allocation2 + $0xa9] sm:$0xff]  ;;  %v11099_v23 = vld [vmem:[#allocation2 + $0xb1] sm:$0xff]  ;;  %13118 = vmatprep.mubr.bf16.mxu1 %v19473_v11  ;;  %10706 = vst [vmem:[#allocation4 + $0x44c] sm:$0xf] %v16993_v24  ;;  %10707 = vst [vmem:[#allocation4 + $0x470] sm:$0xf] %v16994_v13  ;;  %v17064_v25 = vpack.c.bf16 %v11097_v30, %v11097_v30 }
 0x5a0   : > { %v17065_v3 = vpack.c.bf16 %v11098_v12, %v11098_v12  ;;  %v17066_v46 = vpack.c.bf16 %v11099_v23, %v11099_v23  ;;  %v11092_v61 = vld [vmem:[#allocation2 + $0x49] sm:$0xff]  ;;  %11280 = vst [vmem:[#allocation4 + $0x410] sm:$0xf] %v16993_v24  ;;  %11281 = vst [vmem:[#allocation4 + $0x434] sm:$0xf] %v16994_v13  ;;  %18706 = vmatprep.subr.bf16.mxu1 %v22383_v33  ;;  %v11093_v56 = vld [vmem:[#allocation2 + $0x51] sm:$0xff] }
 0x5a1   : > { %13070 = vmatmul.mubr.bf16.gmra.mxu0 %v19462_v7  ;;  %10897 = vst [vmem:[#allocation4 + $0x42c] sm:$0xf] %v17024_v29  ;;  %11256 = vst [vmem:[#allocation4 + $0xb0] sm:$0xf] %v17063_v47  ;;  %v17059_v2 = vpack.c.bf16 %v11092_v61, %v11092_v61  ;;  %v11100_v8 = vld [vmem:[#allocation2 + $0xc9] sm:$0xff]  ;;  %v11101_v49 = vld [vmem:[#allocation2 + $0xd1] sm:$0xff]  ;;  %v17060_v63 = vpack.c.bf16 %v11093_v56, %v11093_v56 }
 0x5a2   : > { %13271 = vmatprep.mubr.bf16.mxu0 %v19476_v57  ;;  %11257 = vst [vmem:[#allocation4 + $0xd4] sm:$0xf] %v17064_v25  ;;  %11258 = vst [vmem:[#allocation4 + $0xf8] sm:$0xf] %v17065_v3  ;;  %v17067_v53 = vpack.c.bf16 %v11100_v8, %v11100_v8  ;;  %v17068_v19 = vpack.c.bf16 %v11101_v49, %v11101_v49  ;;  %v11094_v55 = vld [vmem:[#allocation2 + $0x69] sm:$0xff]  ;;  %v11095_v28 = vld [vmem:[#allocation2 + $0x71] sm:$0xff]  ;;  %v18072_v3 = vpop.f32.mrf.mxu1 }
 0x5a3   : > { %11259 = vst [vmem:[#allocation4 + $0x11c] sm:$0xf] %v17066_v46  ;;  %v11102_v58 = vld [vmem:[#allocation2 + $0xe9] sm:$0xff]  ;;  %v19474_v51 = vld [vmem:[#allocation4 + $0x18] ss:$36 sps:$4 sm:$0xff]   ;;  %18714 = vmatpush3.bf16.msra.mxu1 %v22383_v33  ;;  %v17061_v21 = vpack.c.bf16 %v11094_v55, %v11094_v55  ;;  %v17062_v41 = vpack.c.bf16 %v11095_v28, %v11095_v28  ;;  %v19561_v57 = vld [vmem:[%s23934_s10 + $0x200] sm:$0xff]  }
 0x5a4   : > { %11252 = vst [vmem:[#allocation4 + $0x20] sm:$0xf] %v17059_v2  ;;  %v11103_v6 = vld [vmem:[#allocation2 + $0xf1] sm:$0xff]  ;;  %v17069_v5 = vpack.c.bf16 %v11102_v58, %v11102_v58  ;;  %v11104_v9 = vld [vmem:[#allocation2 + $0x109] sm:$0xff]  ;;  %18707 = vmatprep.subr.bf16.mxu1 %v22394_v17  ;;  %11253 = vst [vmem:[#allocation4 + $0x44] sm:$0xf] %v17060_v63  ;;  %v18073_v46 = vpop.f32.mrf.mxu1 }
 0x5a5   : > { %v11105_v22 = vld [vmem:[#allocation2 + $0x111] sm:$0xff]  ;;  %11260 = vst [vmem:[#allocation4 + $0x140] sm:$0xf] %v17067_v53  ;;  %11261 = vst [vmem:[#allocation4 + $0x164] sm:$0xf] %v17068_v19  ;;  %v17070_v16 = vpack.c.bf16 %v11103_v6, %v11103_v6  ;;  %v17071_v27 = vpack.c.bf16 %v11104_v9, %v11104_v9  ;;  %v11106_v10 = vld [vmem:[#allocation2 + $0x129] sm:$0xff] }
 0x5a6   : > { %v17072_v44 = vpack.c.bf16 %v11105_v22, %v11105_v22  ;;  %v11107_v50 = vld [vmem:[#allocation2 + $0x131] sm:$0xff]  ;;  %v19482_v32 = vld [vmem:[#allocation4 + $0x64] ss:$36 sps:$4 sm:$0xff]   ;;  %11254 = vst [vmem:[#allocation4 + $0x68] sm:$0xf] %v17061_v21  ;;  %v17073_v15 = vpack.c.bf16 %v11106_v10, %v11106_v10  ;;  %13119 = vmatmul.mubr.bf16.gmra.mxu1 %v19471_v45  ;;  %v18074_v22 = vadd.f32 %v18073_v46, %v18072_v3 }
 0x5a7   : > { %11255 = vst [vmem:[#allocation4 + $0x8c] sm:$0xf] %v17062_v41  ;;  %11262 = vst [vmem:[#allocation4 + $0x188] sm:$0xf] %v17069_v5  ;;  %v17074_v39 = vpack.c.bf16 %v11107_v50, %v11107_v50  ;;  %13126 = vmatprep.mubr.bf16.mxu1 %v19479_v48  ;;  %18715 = vmatpush3.bf16.msra.mxu1 %v22394_v17  ;;  %v19522_v40 = vld [vmem:[%s23934_s10 + $0x218] sm:$0xff]   ;;  %v19535_v59 = vld [vmem:[%s23934_s10 + $0x210] sm:$0xff]  }
 0x5a8   : > { %11263 = vst [vmem:[#allocation4 + $0x1ac] sm:$0xf] %v17070_v16  ;;  %11264 = vst [vmem:[#allocation4 + $0x1d0] sm:$0xf] %v17071_v27  ;;  %18708 = vmatprep.subr.bf16.mxu1 %v19509_v35  ;;  %v19480_v36 = vld [vmem:[#allocation4 + $0x60] ss:$36 sps:$4 sm:$0xff]  }
 0x5a9   : > { %11265 = vst [vmem:[#allocation4 + $0x1f4] sm:$0xf] %v17072_v44  ;;  %13272 = vmatmul.mubr.bf16.vlgmr.msra.gmra.mxu0 %v19474_v51  ;;  %11266 = vst [vmem:[#allocation4 + $0x218] sm:$0xf] %v17073_v15  ;;  %v19486_v20 = vld [vmem:[#allocation4 + $0xec] ss:$36 sps:$4 sm:$0xff]  }
 0x5aa   : > { %11267 = vst [vmem:[#allocation4 + $0x23c] sm:$0xf] %v17074_v39  ;;  %13279 = vmatprep.mubr.bf16.mxu0 %v19482_v32  ;;  %18658 = vmatpush3.bf16.msra.mxu0 %v22388_v43  ;;  %v19489_v1 = vld [vmem:[#allocation4 + $0xac] ss:$36 sps:$4 sm:$0xff]   ;;  %v19492_v7 = vld [vmem:[#allocation4 + $0x134] ss:$36 sps:$4 sm:$0xff]  }
 0x5ab   : > { %18659 = vmatprep.subr.bf16.mxu0 %v22383_v33  ;;  %18716 = vmatpush3.bf16.msra.mxu1 %v19509_v35  ;;  %v19548_v26 = vld [vmem:[%s23934_s10 + $0x208] sm:$0xff]   ;;  %v19495_v11 = vld [vmem:[#allocation4 + $0xf4] ss:$36 sps:$4 sm:$0xff]   ;;  %v19499_v18 = vld [vmem:[#allocation4 + $0x17c] ss:$36 sps:$4 sm:$0xff]  }
 0x5ac   : > { %18709 = vmatprep.subr.bf16.mxu1 %v19522_v40  ;;  %v19484_v42 = vld [vmem:[#allocation4 + $0xe8] ss:$36 sps:$4 sm:$0xff]   ;;  %v19490_v62 = vld [vmem:[#allocation4 + $0x130] ss:$36 sps:$4 sm:$0xff]   ;;  %v19502_v52 = vld [vmem:[#allocation4 + $0x13c] ss:$36 sps:$4 sm:$0xff]  }
 0x5ad   : > { %v19493_v60 = vld [vmem:[#allocation4 + $0xf0] ss:$36 sps:$4 sm:$0xff]   ;;  %v19497_v31 = vld [vmem:[#allocation4 + $0x178] ss:$36 sps:$4 sm:$0xff]   ;;  %v19505_v24 = vld [vmem:[#allocation4 + $0x1c4] ss:$36 sps:$4 sm:$0xff]  }
 0x5ae   : > { %18660 = vmatpush3.bf16.msra.mxu0 %v22383_v33  ;;  %13127 = vmatmul.mubr.bf16.gmra.mxu1 %v19477_v34  ;;  %v19487_v33 = vld [vmem:[#allocation4 + $0xa8] ss:$36 sps:$4 sm:$0xff]   ;;  %v19500_v54 = vld [vmem:[#allocation4 + $0x138] ss:$36 sps:$4 sm:$0xff]   ;;  %v19503_v4 = vld [vmem:[#allocation4 + $0x1c0] ss:$36 sps:$4 sm:$0xff]  }
 0x5af   : > { %18661 = vmatprep.subr.bf16.mxu0 %v22394_v17  ;;  %13134 = vmatprep.mubr.bf16.mxu1 %v19486_v20  ;;  %v19508_v13 = vld [vmem:[#allocation4 + $0x184] ss:$36 sps:$4 sm:$0xff]   ;;  %v19512_v14 = vld [vmem:[#allocation4 + $0x20c] ss:$36 sps:$4 sm:$0xff]   ;;  %v19518_v30 = vld [vmem:[#allocation4 + $0x254] ss:$36 sps:$4 sm:$0xff]  }
 0x5b0   : > { %18717 = vmatpush3.bf16.msra.mxu1 %v19522_v40  ;;  %v19506_v0 = vld [vmem:[#allocation4 + $0x180] ss:$36 sps:$4 sm:$0xff]   ;;  %v19515_v43 = vld [vmem:[#allocation4 + $0x1cc] ss:$36 sps:$4 sm:$0xff]   ;;  %v19521_v47 = vld [vmem:[#allocation4 + $0x214] ss:$36 sps:$4 sm:$0xff]  }
 0x5b1   : > { %13280 = vmatmul.mubr.bf16.gmra.mxu0 %v19480_v36  ;;  %18710 = vmatprep.subr.bf16.mxu1 %v19535_v59  ;;  %v19510_v37 = vld [vmem:[#allocation4 + $0x208] ss:$36 sps:$4 sm:$0xff]   ;;  %v19516_v12 = vld [vmem:[#allocation4 + $0x250] ss:$36 sps:$4 sm:$0xff]   ;;  %v19528_v25 = vld [vmem:[#allocation4 + $0x25c] ss:$36 sps:$4 sm:$0xff]  }
 0x5b2   : > { %13287 = vmatprep.mubr.bf16.mxu0 %v19489_v1  ;;  %18662 = vmatpush3.bf16.msra.mxu0 %v22394_v17  ;;  %v19513_v29 = vld [vmem:[#allocation4 + $0x1c8] ss:$36 sps:$4 sm:$0xff]   ;;  %v19519_v23 = vld [vmem:[#allocation4 + $0x210] ss:$36 sps:$4 sm:$0xff]   ;;  %v19525_v17 = vld [vmem:[#allocation4 + $0x29c] ss:$36 sps:$4 sm:$0xff]  }
 0x5b3   : > { %18663 = vmatprep.subr.bf16.mxu0 %v19509_v35  ;;  %v19523_v61 = vld [vmem:[#allocation4 + $0x298] ss:$36 sps:$4 sm:$0xff]   ;;  %v19531_v2 = vld [vmem:[#allocation4 + $0x2e4] ss:$36 sps:$4 sm:$0xff]   ;;  %v19538_v9 = vld [vmem:[#allocation4 + $0x32c] ss:$36 sps:$4 sm:$0xff]  }
 0x5b4   : > { %18718 = vmatpush3.bf16.msra.mxu1 %v19535_v59  ;;  %v19526_v56 = vld [vmem:[#allocation4 + $0x258] ss:$36 sps:$4 sm:$0xff]   ;;  %v19534_v49 = vld [vmem:[#allocation4 + $0x2a4] ss:$36 sps:$4 sm:$0xff]   ;;  %v19541_v44 = vld [vmem:[#allocation4 + $0x2ec] ss:$36 sps:$4 sm:$0xff]  }
 0x5b5   : > { %18711 = vmatprep.subr.bf16.mxu1 %v19548_v26  ;;  %v19529_v51 = vld [vmem:[#allocation4 + $0x2e0] ss:$36 sps:$4 sm:$0xff]   ;;  %v19539_v1 = vld [vmem:[#allocation4 + $0x2e8] ss:$36 sps:$4 sm:$0xff]  }
 0x5b6   : > { %18664 = vmatpush3.bf16.msra.mxu0 %v19509_v35  ;;  %13135 = vmatmul.mubr.bf16.gmra.mxu1 %v19484_v42  ;;  %v19532_v41 = vld [vmem:[#allocation4 + $0x2a0] ss:$36 sps:$4 sm:$0xff]   ;;  %v19544_v42 = vld [vmem:[#allocation4 + $0x374] ss:$36 sps:$4 sm:$0xff]  }
 0x5b7   : > { %18665 = vmatprep.subr.bf16.mxu0 %v19522_v40  ;;  %13142 = vmatprep.mubr.bf16.mxu1 %v19492_v7 }
 0x5b8   : > { %18719 = vmatpush3.bf16.msra.mxu1 %v19548_v26 }
 0x5b9   : > { %13288 = vmatmul.mubr.bf16.gmra.mxu0 %v19487_v33  ;;  %18712 = vmatprep.subr.bf16.mxu1 %v19561_v57 }
 0x5ba   : > { %13295 = vmatprep.mubr.bf16.mxu0 %v19495_v11  ;;  %18666 = vmatpush3.bf16.msra.mxu0 %v19522_v40  ;;  %v19536_v40 = vld [vmem:[#allocation4 + $0x328] ss:$36 sps:$4 sm:$0xff]   ;;  %v19547_v11 = vld [vmem:[#allocation4 + $0x334] ss:$36 sps:$4 sm:$0xff]  }
 0x5bb   : > { %18667 = vmatprep.subr.bf16.mxu0 %v19535_v59 }
 0x5bc   : > { %18720 = vmatpush3.bf16.msra.mxu1 %v19561_v57 }
 0x5be   : > { %18668 = vmatpush3.bf16.msra.mxu0 %v19535_v59  ;;  %13143 = vmatmul.mubr.bf16.gmra.mxu1 %v19490_v62 }
 0x5bf   : > { %18669 = vmatprep.subr.bf16.mxu0 %v19548_v26  ;;  %13150 = vmatprep.mubr.bf16.mxu1 %v19499_v18 }
 0x5c1   : > { %13296 = vmatmul.mubr.bf16.gmra.mxu0 %v19493_v60 }
 0x5c2   : > { %13303 = vmatprep.mubr.bf16.mxu0 %v19502_v52  ;;  %18670 = vmatpush3.bf16.msra.mxu0 %v19548_v26 }
 0x5c3   : > { %18671 = vmatprep.subr.bf16.mxu0 %v19561_v57 }
 0x5c6   : > { %18672 = vmatpush3.bf16.msra.mxu0 %v19561_v57  ;;  %13151 = vmatmul.mubr.bf16.gmra.mxu1 %v19497_v31 }
 0x5c7   : > { %13158 = vmatprep.mubr.bf16.mxu1 %v19505_v24 }
 0x5c9   : > { %13304 = vmatmul.mubr.bf16.gmra.mxu0 %v19500_v54 }
 0x5ca   : > { %13311 = vmatprep.mubr.bf16.mxu0 %v19508_v13  ;;  %v19542_v13 = vld [vmem:[#allocation4 + $0x370] ss:$36 sps:$4 sm:$0xff]  }
 0x5ce   : > { %13159 = vmatmul.mubr.bf16.gmra.mxu1 %v19503_v4 }
 0x5cf   : > { %13166 = vmatprep.mubr.bf16.mxu1 %v19512_v14  ;;  %v19545_v14 = vld [vmem:[#allocation4 + $0x330] ss:$36 sps:$4 sm:$0xff]  }
 0x5d1   : > { %13312 = vmatmul.mubr.bf16.gmra.mxu0 %v19506_v0 }
 0x5d2   : > { %13319 = vmatprep.mubr.bf16.mxu0 %v19515_v43  ;;  %v18075_v8 = vpop.f32.mrf.mxu1 }
 0x5d4   : > { %v18076_v63 = vpop.f32.mrf.mxu1 }
 0x5d5   : > { %v18077_v53 = vadd.f32 %v18076_v63, %v18075_v8  ;;  %v19549_v8 = vld [vmem:[#allocation4 + $0x3b8] ss:$36 sps:$4 sm:$0xff]  }
 0x5d6   : > { %13167 = vmatmul.mubr.bf16.gmra.mxu1 %v19510_v37  ;;  %v18181_v45 = vpop.f32.mrf.mxu0  ;;  %v18078_v28 = vpop.f32.mrf.mxu1  ;;  %v19552_v63 = vld [vmem:[#allocation4 + $0x378] ss:$36 sps:$4 sm:$0xff]  }
 0x5d7   : > { %13174 = vmatprep.mubr.bf16.mxu1 %v19518_v30 }
 0x5d8   : > { %v18182_v19 = vpop.f32.mrf.mxu0  ;;  %v18079_v21 = vpop.f32.mrf.mxu1 }
 0x5d9   : > { %13320 = vmatmul.mubr.bf16.gmra.mxu0 %v19513_v29  ;;  %v18183_v55 = vadd.f32 %v18182_v19, %v18181_v45  ;;  %v18080_v6 = vadd.f32 %v18079_v21, %v18078_v28  ;;  %v19551_v29 = vld [vmem:[#allocation4 + $0x3bc] ss:$36 sps:$4 sm:$0xff]  }
 0x5da   : > { %13327 = vmatprep.mubr.bf16.mxu0 %v19521_v47  ;;  %v18184_v58 = vpop.f32.mrf.mxu0 }
 0x5db   : > { %v22421_v48 = vadd.f32 %v18183_v55, %v22378_v38  ;;  %v19557_v55 = vld [vmem:[#allocation4 + $0x404] ss:$36 sps:$4 sm:$0xff]  }
 0x5dc   : > { %v18185_v5 = vpop.f32.mrf.mxu0 }
 0x5dd   : > { %v18186_v16 = vadd.f32 %v18185_v5, %v18184_v58 }
 0x5de   : > { %13175 = vmatmul.mubr.bf16.gmra.mxu1 %v19516_v12  ;;  %v18081_v27 = vpop.f32.mrf.mxu1  ;;  %v18187_v10 = vpop.f32.mrf.mxu0  ;;  %v19554_v12 = vld [vmem:[#allocation4 + $0x37c] ss:$36 sps:$4 sm:$0xff]  }
 0x5df   : > { %13182 = vmatprep.mubr.bf16.mxu1 %v19525_v17  ;;  %v22423_v50 = vadd.f32 %v18186_v16, %v18074_v22 }
 0x5e0   : > { %v18082_v32 = vpop.f32.mrf.mxu1  ;;  %v18188_v38 = vpop.f32.mrf.mxu0 }
 0x5e1   : > { %13328 = vmatmul.mubr.bf16.gmra.mxu0 %v19519_v23  ;;  %v18083_v15 = vadd.f32 %v18082_v32, %v18081_v27  ;;  %v18189_v39 = vadd.f32 %v18188_v38, %v18187_v10 }
 0x5e2   : > { %13335 = vmatprep.mubr.bf16.mxu0 %v19528_v25  ;;  %v18084_v35 = vpop.f32.mrf.mxu1  ;;  %v18190_v34 = vpop.f32.mrf.mxu0 }
 0x5e3   : > { %v22425_v36 = vadd.f32 %v18189_v39, %v18077_v53 }
 0x5e4   : > { %v18085_v20 = vpop.f32.mrf.mxu1  ;;  %v18191_v26 = vpop.f32.mrf.mxu0 }
 0x5e5   : > { %v18086_v59 = vadd.f32 %v18085_v20, %v18084_v35  ;;  %v18192_v33 = vadd.f32 %v18191_v26, %v18190_v34  ;;  %v19564_v35 = vld [vmem:[#allocation4 + $0x44c] ss:$36 sps:$4 sm:$0xff]  }
 0x5e6   : > { %13183 = vmatmul.mubr.bf16.gmra.mxu1 %v19523_v61  ;;  %v18087_v7 = vpop.f32.mrf.mxu1  ;;  %v19567_v20 = vld [vmem:[#allocation4 + $0x40c] ss:$36 sps:$4 sm:$0xff]  }
 0x5e7   : > { %13190 = vmatprep.mubr.bf16.mxu1 %v19531_v2  ;;  %v18193_v57 = vpop.f32.mrf.mxu0  ;;  %v22427_v62 = vadd.f32 %v18192_v33, %v18080_v6 }
 0x5e8   : > { %v18088_v60 = vpop.f32.mrf.mxu1 }
 0x5e9   : > { %13336 = vmatmul.mubr.bf16.gmra.mxu0 %v19526_v56  ;;  %v18089_v18 = vadd.f32 %v18088_v60, %v18087_v7  ;;  %v18194_v52 = vpop.f32.mrf.mxu0  ;;  %v19562_v60 = vld [vmem:[#allocation4 + $0x448] ss:$36 sps:$4 sm:$0xff]  }
 0x5ea   : > { %13343 = vmatprep.mubr.bf16.mxu0 %v19534_v49  ;;  %v18195_v31 = vadd.f32 %v18194_v52, %v18193_v57  ;;  %v18090_v54 = vpop.f32.mrf.mxu1 }
 0x5eb   : > { %v18196_v24 = vpop.f32.mrf.mxu0 }
 0x5ec   : > { %v22429_v4 = vadd.f32 %v18195_v31, %v18083_v15  ;;  %v18091_v0 = vpop.f32.mrf.mxu1  ;;  %v19558_v15 = vld [vmem:[#allocation4 + $0x3c0] ss:$36 sps:$4 sm:$0xff]   ;;  %v19571_v31 = vld [vmem:[#allocation4 + $0x454] ss:$36 sps:$4 sm:$0xff]  }
 0x5ed   : > { %v18092_v43 = vadd.f32 %v18091_v0, %v18090_v54  ;;  %v18197_v37 = vpop.f32.mrf.mxu0  ;;  %v19565_v54 = vld [vmem:[#allocation4 + $0x408] ss:$36 sps:$4 sm:$0xff]   ;;  %v19568_v0 = vld [vmem:[#allocation4 + $0xb0] ss:$36 sps:$4 sm:$0xff]  }
 0x5ee   : > { %13191 = vmatmul.mubr.bf16.gmra.mxu1 %v19529_v51  ;;  %v18198_v30 = vadd.f32 %v18197_v37, %v18196_v24  ;;  %v19560_v51 = vld [vmem:[#allocation4 + $0x3c4] ss:$36 sps:$4 sm:$0xff]  }
 0x5ef   : > { %13198 = vmatprep.mubr.bf16.mxu1 %v19538_v9  ;;  %v18093_v47 = vpop.f32.mrf.mxu1 }
 0x5f0   : > { %v18199_v23 = vpop.f32.mrf.mxu0  ;;  %v22431_v17 = vadd.f32 %v18198_v30, %v18086_v59 }
 0x5f1   : > { %13344 = vmatmul.mubr.bf16.gmra.mxu0 %v19532_v41  ;;  %v18094_v25 = vpop.f32.mrf.mxu1 }
 0x5f2   : > { %13351 = vmatprep.mubr.bf16.mxu0 %v19541_v44  ;;  %v18095_v3 = vadd.f32 %v18094_v25, %v18093_v47  ;;  %v18200_v46 = vpop.f32.mrf.mxu0  ;;  %v19555_v44 = vld [vmem:[#allocation4 + $0x400] ss:$36 sps:$4 sm:$0xff]  }
 0x5f3   : > { %v18201_v61 = vadd.f32 %v18200_v46, %v18199_v23  ;;  %v18096_v56 = vpop.f32.mrf.mxu1  ;;  %v19569_v46 = vld [vmem:[#allocation4 + $0x450] ss:$36 sps:$4 sm:$0xff]  }
 0x5f4   : > { %v18202_v2 = vpop.f32.mrf.mxu0 }
 0x5f5   : > { %v22433_v49 = vadd.f32 %v18201_v61, %v18089_v18  ;;  %v18097_v45 = vpop.f32.mrf.mxu1 }
 0x5f6   : > { %13199 = vmatmul.mubr.bf16.gmra.mxu1 %v19536_v40  ;;  %v18098_v53 = vadd.f32 %v18097_v45, %v18096_v56  ;;  %v18203_v19 = vpop.f32.mrf.mxu0 }
 0x5f7   : > { %13206 = vmatprep.mubr.bf16.mxu1 %v19544_v42  ;;  %v18204_v28 = vadd.f32 %v18203_v19, %v18202_v2  ;;  %v18099_v58 = vpop.f32.mrf.mxu1  ;;  %v19572_v2 = vld [vmem:[#allocation4 + $0xf8] ss:$36 sps:$4 sm:$0xff]  }
 0x5f9   : > { %13352 = vmatmul.mubr.bf16.gmra.mxu0 %v19539_v1  ;;  %v22435_v41 = vadd.f32 %v18204_v28, %v18092_v43  ;;  %v18100_v6 = vpop.f32.mrf.mxu1 }
 0x5fa   : > { %13359 = vmatprep.mubr.bf16.mxu0 %v19547_v11  ;;  %v18205_v21 = vpop.f32.mrf.mxu0  ;;  %v18101_v5 = vadd.f32 %v18100_v6, %v18099_v58 }
 0x5fb   : > { %v18102_v16 = vpop.f32.mrf.mxu1 }
 0x5fc   : > { %v18206_v9 = vpop.f32.mrf.mxu0 }
 0x5fd   : > { %v18207_v22 = vadd.f32 %v18206_v9, %v18205_v21  ;;  %v18103_v32 = vpop.f32.mrf.mxu1 }
 0x5fe   : > { %13207 = vmatmul.mubr.bf16.gmra.mxu1 %v19542_v13  ;;  %v18208_v27 = vpop.f32.mrf.mxu0  ;;  %v18104_v38 = vadd.f32 %v18103_v32, %v18102_v16 }
 0x5ff   : > { %13214 = vmatprep.mubr.bf16.mxu1 %v19551_v29  ;;  %v22437_v10 = vadd.f32 %v18207_v22, %v18095_v3 }
 0x600   : > { %v18209_v39 = vpop.f32.mrf.mxu0 }
 0x601   : > { %13360 = vmatmul.mubr.bf16.gmra.mxu0 %v19545_v14  ;;  %v18210_v34 = vadd.f32 %v18209_v39, %v18208_v27  ;;  %v19577_v39 = vld [vmem:[#allocation4 + $0x1d0] ss:$36 sps:$4 sm:$0xff]  }
 0x602   : > { %13367 = vmatprep.mubr.bf16.mxu0 %v19554_v12 }
 0x603   : > { %v22439_v59 = vadd.f32 %v18210_v34, %v18098_v53 }
 0x606   : > { %13215 = vmatmul.mubr.bf16.gmra.mxu1 %v19549_v8 }
 0x607   : > { %13222 = vmatprep.mubr.bf16.mxu1 %v19557_v55  ;;  %v19573_v55 = vld [vmem:[#allocation4 + $0x20] ss:$36 sps:$4 sm:$0xff]  }
 0x609   : > { %13368 = vmatmul.mubr.bf16.gmra.mxu0 %v19552_v63  ;;  %v18105_v40 = vpop.f32.mrf.mxu1  ;;  %v19574_v63 = vld [vmem:[#allocation4 + $0x140] ss:$36 sps:$4 sm:$0xff]  }
 0x60a   : > { %13375 = vmatprep.mubr.bf16.mxu0 %v19560_v51 }
 0x60b   : > { %v18106_v26 = vpop.f32.mrf.mxu1 }
 0x60c   : > { %v18211_v1 = vpop.f32.mrf.mxu0  ;;  %v18107_v42 = vadd.f32 %v18106_v26, %v18105_v40 }
 0x60d   : > { %v18108_v11 = vpop.f32.mrf.mxu1 }
 0x60e   : > { %13223 = vmatmul.mubr.bf16.gmra.mxu1 %v19555_v44  ;;  %v18212_v33 = vpop.f32.mrf.mxu0  ;;  %v19576_v44 = vld [vmem:[#allocation4 + $0x188] ss:$36 sps:$4 sm:$0xff]  }
 0x60f   : > { %13230 = vmatprep.mubr.bf16.mxu1 %v19564_v35  ;;  %v18213_v7 = vadd.f32 %v18212_v33, %v18211_v1  ;;  %v18109_v52 = vpop.f32.mrf.mxu1 }
 0x610   : > { %v18214_v57 = vpop.f32.mrf.mxu0  ;;  %v18110_v24 = vadd.f32 %v18109_v52, %v18108_v11  ;;  %v19578_v52 = vld [vmem:[#allocation4 + $0x218] ss:$36 sps:$4 sm:$0xff]  }
 0x611   : > { %13376 = vmatmul.mubr.bf16.gmra.mxu0 %v19558_v15  ;;  %v22441_v18 = vadd.f32 %v18213_v7, %v18101_v5 }
 0x612   : > { %13383 = vmatprep.mubr.bf16.mxu0 %v19567_v20  ;;  %v18215_v13 = vpop.f32.mrf.mxu0 }
 0x613   : > { %v18216_v14 = vadd.f32 %v18215_v13, %v18214_v57 }
 0x615   : > { %v22443_v29 = vadd.f32 %v18216_v14, %v18104_v38  ;;  %v19575_v38 = vld [vmem:[#allocation4 + $0x68] ss:$36 sps:$4 sm:$0xff]  }
 0x616   : > { %v18111_v43 = vpop.f32.mrf.mxu1  ;;  %13231 = vmatmul.mubr.bf16.gmra.mxu1 %v19562_v60 }
 0x617   : > { %18677 = vmatprep.mubr.bf16.mxu1 %v19568_v0 }
 0x618   : > { %v18112_v30 = vpop.f32.mrf.mxu1 }
 0x619   : > { %v18217_v37 = vpop.f32.mrf.mxu0  ;;  %13384 = vmatmul.mubr.bf16.gmra.mxu0 %v19565_v54  ;;  %v18113_v47 = vadd.f32 %v18112_v30, %v18111_v43 }
 0x61a   : > { %13391 = vmatprep.mubr.bf16.mxu0 %v19571_v31  ;;  %v18114_v25 = vpop.f32.mrf.mxu1 }
 0x61b   : > { %v18218_v12 = vpop.f32.mrf.mxu0 }
 0x61c   : > { %v18219_v23 = vadd.f32 %v18218_v12, %v18217_v37  ;;  %v18115_v56 = vpop.f32.mrf.mxu1 }
 0x61d   : > { %v18220_v3 = vpop.f32.mrf.mxu0  ;;  %v18116_v8 = vadd.f32 %v18115_v56, %v18114_v25  ;;  %v19580_v56 = vld [vmem:[#allocation4 + $0x2a8] ss:$36 sps:$4 sm:$0xff]  }
 0x61e   : > { %v22445_v61 = vadd.f32 %v18219_v23, %v18107_v42  ;;  %v18117_v19 = vpop.f32.mrf.mxu1  ;;  %18678 = vmatmul.mubr.bf16.vlgmr.msra.gmra.mxu1 %v19572_v2 }
 0x61f   : > { %v18221_v45 = vpop.f32.mrf.mxu0  ;;  %18681 = vmatprep.mubr.bf16.mxu1 %v19574_v63 }
 0x620   : > { %v18222_v53 = vadd.f32 %v18221_v45, %v18220_v3  ;;  %v18118_v51 = vpop.f32.mrf.mxu1  ;;  %v19581_v45 = vld [vmem:[#allocation4 + $0x2f0] ss:$36 sps:$4 sm:$0xff]  }
 0x621   : > { %v18223_v28 = vpop.f32.mrf.mxu0  ;;  %13392 = vmatmul.mubr.bf16.gmra.mxu0 %v19569_v46  ;;  %v18119_v21 = vadd.f32 %v18118_v51, %v18117_v19 }
 0x622   : > { %v22447_v58 = vadd.f32 %v18222_v53, %v18110_v24  ;;  %18673 = vmatprep.mubr.bf16.mxu0 %v19573_v55  ;;  %v18120_v9 = vpop.f32.mrf.mxu1  ;;  %v19579_v24 = vld [vmem:[#allocation4 + $0x260] ss:$36 sps:$4 sm:$0xff]  }
 0x623   : > { %v18224_v6 = vpop.f32.mrf.mxu0 }
 0x624   : > { %v18225_v5 = vadd.f32 %v18224_v6, %v18223_v28  ;;  %v18121_v27 = vpop.f32.mrf.mxu1 }
 0x625   : > { %v18226_v22 = vpop.f32.mrf.mxu0  ;;  %v18122_v32 = vadd.f32 %v18121_v27, %v18120_v9 }
 0x626   : > { %v22449_v16 = vadd.f32 %v18225_v5, %v18113_v47  ;;  %v18123_v34 = vpop.f32.mrf.mxu1  ;;  %18682 = vmatmul.mubr.bf16.gmra.mxu1 %v19576_v44  ;;  %v19582_v44 = vld [vmem:[#allocation4 + $0x338] ss:$36 sps:$4 sm:$0xff]  }
 0x627   : > { %v18227_v15 = vpop.f32.mrf.mxu0  ;;  %18685 = vmatprep.mubr.bf16.mxu1 %v19577_v39 }
 0x628   : > { %v18228_v35 = vadd.f32 %v18227_v15, %v18226_v22  ;;  %v18124_v1 = vpop.f32.mrf.mxu1 }
 0x629   : > { %v18229_v40 = vpop.f32.mrf.mxu0  ;;  %18674 = vmatmul.mubr.bf16.vlgmr.msra.gmra.mxu0 %v19575_v38  ;;  %v18125_v26 = vadd.f32 %v18124_v1, %v18123_v34  ;;  %v19583_v38 = vld [vmem:[#allocation4 + $0x380] ss:$36 sps:$4 sm:$0xff]  }
 0x62a   : > { %v22451_v20 = vadd.f32 %v18228_v35, %v18116_v8  ;;  %v18126_v7 = vpop.f32.mrf.mxu1 }
 0x62b   : > { %v18230_v42 = vpop.f32.mrf.mxu0 }
 0x62c   : > { %v18231_v33 = vadd.f32 %v18230_v42, %v18229_v40  ;;  %v18127_v60 = vpop.f32.mrf.mxu1 }
 0x62d   : > { %v18232_v11 = vpop.f32.mrf.mxu0  ;;  %v18128_v31 = vadd.f32 %v18127_v60, %v18126_v7 }
 0x62e   : > { %v22453_v57 = vadd.f32 %v18231_v33, %v18119_v21  ;;  %v18129_v0 = vpop.f32.mrf.mxu1  ;;  %18686 = vmatmul.mubr.bf16.gmra.mxu1 %v19578_v52 }
 0x62f   : > { %v18233_v54 = vpop.f32.mrf.mxu0  ;;  %18689 = vmatprep.mubr.bf16.mxu1 %v19579_v24 }
 0x630   : > { %v18234_v13 = vadd.f32 %v18233_v54, %v18232_v11  ;;  %v18130_v37 = vpop.f32.mrf.mxu1 }
 0x631   : > { %v18235_v14 = vpop.f32.mrf.mxu0  ;;  %v18131_v30 = vadd.f32 %v18130_v37, %v18129_v0 }
 0x632   : > { %v22455_v43 = vadd.f32 %v18234_v13, %v18122_v32  ;;  %v18132_v23 = vpop.f32.mrf.mxu1  ;;  %v19585_v13 = vld [vmem:[#allocation4 + $0x410] ss:$36 sps:$4 sm:$0xff]  }
 0x633   : > { %v18236_v47 = vpop.f32.mrf.mxu0 }
 0x634   : > { %v18237_v12 = vadd.f32 %v18236_v47, %v18235_v14  ;;  %v18133_v46 = vpop.f32.mrf.mxu1 }
 0x635   : > { %v18238_v25 = vpop.f32.mrf.mxu0  ;;  %v18134_v2 = vadd.f32 %v18133_v46, %v18132_v23 }
 0x636   : > { %v22457_v3 = vadd.f32 %v18237_v12, %v18125_v26  ;;  %v18135_v53 = vpop.f32.mrf.mxu1  ;;  %18690 = vmatmul.mubr.bf16.gmra.mxu1 %v19580_v56  ;;  %v19586_v56 = vld [vmem:[#allocation4 + $0x458] ss:$36 sps:$4 sm:$0xff]  }
 0x637   : > { %v18239_v8 = vpop.f32.mrf.mxu0  ;;  %18693 = vmatprep.mubr.bf16.mxu1 %v19581_v45 }
 0x638   : > { %v18240_v63 = vadd.f32 %v18239_v8, %v18238_v25  ;;  %v18136_v28 = vpop.f32.mrf.mxu1 }
 0x639   : > { %v18241_v19 = vpop.f32.mrf.mxu0  ;;  %v18137_v51 = vadd.f32 %v18136_v28, %v18135_v53 }
 0x63a   : > { %v22459_v55 = vadd.f32 %v18240_v63, %v18128_v31  ;;  %v18138_v5 = vpop.f32.mrf.mxu1  ;;  %v19584_v31 = vld [vmem:[#allocation4 + $0x3c8] ss:$36 sps:$4 sm:$0xff]  }
 0x63b   : > { %v18242_v21 = vpop.f32.mrf.mxu0 }
 0x63c   : > { %v18243_v6 = vadd.f32 %v18242_v21, %v18241_v19  ;;  %v18139_v27 = vpop.f32.mrf.mxu1 }
 0x63d   : > { %v18244_v9 = vpop.f32.mrf.mxu0  ;;  %v18140_v32 = vadd.f32 %v18139_v27, %v18138_v5 }
 0x63e   : > { %v22461_v22 = vadd.f32 %v18243_v6, %v18131_v30  ;;  %v18141_v35 = vpop.f32.mrf.mxu1  ;;  %18694 = vmatmul.mubr.bf16.gmra.mxu1 %v19582_v44 }
 0x63f   : > { %v18245_v15 = vpop.f32.mrf.mxu0  ;;  %18697 = vmatprep.mubr.bf16.mxu1 %v19583_v38 }
 0x640   : > { %v18246_v39 = vadd.f32 %v18245_v15, %v18244_v9  ;;  %v18142_v1 = vpop.f32.mrf.mxu1 }
 0x641   : > { %v18247_v34 = vpop.f32.mrf.mxu0  ;;  %v18143_v26 = vadd.f32 %v18142_v1, %v18141_v35 }
 0x642   : > { %v22463_v40 = vadd.f32 %v18246_v39, %v18134_v2  ;;  %v18144_v7 = vpop.f32.mrf.mxu1 }
 0x643   : > { %v18248_v42 = vpop.f32.mrf.mxu0 }
 0x644   : > { %v18249_v33 = vadd.f32 %v18248_v42, %v18247_v34  ;;  %v18145_v52 = vpop.f32.mrf.mxu1 }
 0x645   : > { %v18250_v11 = vpop.f32.mrf.mxu0  ;;  %v18146_v54 = vadd.f32 %v18145_v52, %v18144_v7 }
 0x646   : > { %v22465_v60 = vadd.f32 %v18249_v33, %v18137_v51  ;;  %v18147_v14 = vpop.f32.mrf.mxu1  ;;  %18698 = vmatmul.mubr.bf16.gmra.mxu1 %v19584_v31 }
 0x647   : > { %v18251_v24 = vpop.f32.mrf.mxu0  ;;  %18701 = vmatprep.mubr.bf16.mxu1 %v19585_v13 }
 0x648   : > { %v18252_v0 = vadd.f32 %v18251_v24, %v18250_v11  ;;  %v18148_v47 = vpop.f32.mrf.mxu1 }
 0x649   : > { %v18253_v37 = vpop.f32.mrf.mxu0  ;;  %v18149_v12 = vadd.f32 %v18148_v47, %v18147_v14 }
 0x64a   : > { %v22467_v30 = vadd.f32 %v18252_v0, %v18140_v32  ;;  %v18150_v46 = vpop.f32.mrf.mxu1 }
 0x64b   : > { %v18254_v23 = vpop.f32.mrf.mxu0 }
 0x64c   : > { %v18255_v25 = vadd.f32 %v18254_v23, %v18253_v37  ;;  %v18151_v45 = vpop.f32.mrf.mxu1 }
 0x64d   : > { %v18256_v2 = vpop.f32.mrf.mxu0  ;;  %v18152_v63 = vadd.f32 %v18151_v45, %v18150_v46 }
 0x64e   : > { %v22469_v8 = vadd.f32 %v18255_v25, %v18143_v26  ;;  %v18153_v28 = vpop.f32.mrf.mxu1  ;;  %18702 = vmatmul.mubr.bf16.gmra.mxu1 %v19586_v56 }
 0x64f   : > { %v18257_v53 = vpop.f32.mrf.mxu0 }
 0x650   : > { %v18258_v19 = vadd.f32 %v18257_v53, %v18256_v2  ;;  %v18154_v6 = vpop.f32.mrf.mxu1 }
 0x651   : > { %v18259_v51 = vpop.f32.mrf.mxu0  ;;  %v18155_v5 = vadd.f32 %v18154_v6, %v18153_v28 }
 0x652   : > { %v22471_v21 = vadd.f32 %v18258_v19, %v18146_v54  ;;  %v18156_v44 = vpop.f32.mrf.mxu1 }
 0x653   : > { %v18260_v9 = vpop.f32.mrf.mxu0 }
 0x654   : > { %v18261_v27 = vadd.f32 %v18260_v9, %v18259_v51  ;;  %v18157_v38 = vpop.f32.mrf.mxu1 }
 0x655   : > { %v18262_v32 = vpop.f32.mrf.mxu0  ;;  %v18158_v39 = vadd.f32 %v18157_v38, %v18156_v44 }
 0x656   : > { %v22473_v15 = vadd.f32 %v18261_v27, %v18149_v12  ;;  %v18159_v1 = vpop.f32.mrf.mxu1 }
 0x657   : > { %v18263_v35 = vpop.f32.mrf.mxu0 }
 0x658   : > { %v18264_v34 = vadd.f32 %v18263_v35, %v18262_v32  ;;  %v18160_v33 = vpop.f32.mrf.mxu1 }
 0x659   : > { %v18265_v26 = vpop.f32.mrf.mxu0  ;;  %v18161_v7 = vadd.f32 %v18160_v33, %v18159_v1 }
 0x65a   : > { %v22475_v42 = vadd.f32 %v18264_v34, %v18152_v63  ;;  %v18162_v31 = vpop.f32.mrf.mxu1 }
 0x65b   : > { %v18266_v11 = vpop.f32.mrf.mxu0 }
 0x65c   : > { %v18267_v52 = vadd.f32 %v18266_v11, %v18265_v26  ;;  %v18163_v13 = vpop.f32.mrf.mxu1 }
 0x65d   : > { %v18268_v54 = vpop.f32.mrf.mxu0  ;;  %v18164_v0 = vadd.f32 %v18163_v13, %v18162_v31 }
 0x65e   : > { %v22477_v24 = vadd.f32 %v18267_v52, %v18155_v5  ;;  %v18293_v47 = vpop.f32.mrf.mxu1 }
 0x65f   : > { %v18269_v14 = vpop.f32.mrf.mxu0 }
 0x660   : > { %v18270_v37 = vadd.f32 %v18269_v14, %v18268_v54  ;;  %v18294_v25 = vpop.f32.mrf.mxu1 }
 0x661   : > { %v18271_v12 = vpop.f32.mrf.mxu0  ;;  %v18295_v56 = vadd.f32 %v18294_v25, %v18293_v47 }
 0x662   : > { %v22479_v23 = vadd.f32 %v18270_v37, %v18158_v39  ;;  %v18296_v45 = vpop.f32.mrf.mxu1 }
 0x663   : > { %v18272_v46 = vpop.f32.mrf.mxu0  ;;  %v13113_v63 = vadd.f32 %v18295_v56, %v22421_v48 }
 0x664   : > { %v18273_v2 = vadd.f32 %v18272_v46, %v18271_v12  ;;  %v18297_v28 = vpop.f32.mrf.mxu1 }
 0x665   : > { %v18274_v53 = vpop.f32.mrf.mxu0  ;;  %v18298_v6 = vadd.f32 %v18297_v28, %v18296_v45 }
 0x666   : > { %v22482_v19 = vadd.f32 %v18273_v2, %v18161_v7  ;;  %v18299_v9 = vpop.f32.mrf.mxu1 }
 0x667   : > { %v18275_v51 = vpop.f32.mrf.mxu0  ;;  %v13116_v27 = vadd.f32 %v18298_v6, %v22423_v50 }
 0x668   : > { %v18276_v5 = vadd.f32 %v18275_v51, %v18274_v53  ;;  %v18300_v38 = vpop.f32.mrf.mxu1 }
 0x669   : > { %v18405_v44 = vpop.f32.mrf.mxu0  ;;  %v18301_v39 = vadd.f32 %v18300_v38, %v18299_v9 }
 0x66a   : > { %v22485_v32 = vadd.f32 %v18276_v5, %v18164_v0  ;;  %v18302_v1 = vpop.f32.mrf.mxu1 }
 0x66b   : > { %v18406_v35 = vpop.f32.mrf.mxu0  ;;  %v13121_v48 = vadd.f32 %v18301_v39, %v22425_v36 }
 0x66c   : > { %v18407_v34 = vadd.f32 %v18406_v35, %v18405_v44  ;;  %v18303_v33 = vpop.f32.mrf.mxu1 }
 0x66d   : > { %v18408_v26 = vpop.f32.mrf.mxu0  ;;  %v18304_v11 = vadd.f32 %v18303_v33, %v18302_v1 }
 0x66e   : > { %v22488_v7 = vadd.f32 %v18407_v34, %v13113_v63  ;;  %v18305_v54 = vpop.f32.mrf.mxu1 }
 0x66f   : > { %v18409_v52 = vpop.f32.mrf.mxu0  ;;  %v13124_v50 = vadd.f32 %v18304_v11, %v22427_v62 }
 0x670   : > { %v18410_v31 = vadd.f32 %v18409_v52, %v18408_v26  ;;  %v18306_v0 = vpop.f32.mrf.mxu1 }
 0x671   : > { %v18411_v13 = vpop.f32.mrf.mxu0  ;;  %v18307_v37 = vadd.f32 %v18306_v0, %v18305_v54 }
 0x672   : > { %v22491_v14 = vadd.f32 %v18410_v31, %v13116_v27  ;;  %v18308_v25 = vpop.f32.mrf.mxu1 }
 0x673   : > { %v18412_v47 = vpop.f32.mrf.mxu0  ;;  %v13129_v36 = vadd.f32 %v18307_v37, %v22429_v4 }
 0x674   : > { %v18413_v12 = vadd.f32 %v18412_v47, %v18411_v13  ;;  %v18309_v56 = vpop.f32.mrf.mxu1 }
 0x675   : > { %v18414_v46 = vpop.f32.mrf.mxu0  ;;  %v18310_v45 = vadd.f32 %v18309_v56, %v18308_v25 }
 0x676   : > { %v22494_v2 = vadd.f32 %v18413_v12, %v13121_v48  ;;  %v18311_v28 = vpop.f32.mrf.mxu1 }
 0x677   : > { %v18415_v63 = vpop.f32.mrf.mxu0  ;;  %v13132_v62 = vadd.f32 %v18310_v45, %v22431_v17 }
 0x678   : > { %v18416_v53 = vadd.f32 %v18415_v63, %v18414_v46  ;;  %v18312_v6 = vpop.f32.mrf.mxu1 }
 0x679   : > { %v18417_v51 = vpop.f32.mrf.mxu0  ;;  %v18313_v9 = vadd.f32 %v18312_v6, %v18311_v28 }
 0x67a   : > { %v22497_v5 = vadd.f32 %v18416_v53, %v13124_v50  ;;  %v18314_v38 = vpop.f32.mrf.mxu1 }
 0x67b   : > { %v18418_v27 = vpop.f32.mrf.mxu0  ;;  %v13137_v4 = vadd.f32 %v18313_v9, %v22433_v49 }
 0x67c   : > { %v18419_v44 = vadd.f32 %v18418_v27, %v18417_v51  ;;  %v18315_v35 = vpop.f32.mrf.mxu1 }
 0x67d   : > { %v18420_v39 = vpop.f32.mrf.mxu0  ;;  %v18316_v1 = vadd.f32 %v18315_v35, %v18314_v38 }
 0x67e   : > { %v22500_v34 = vadd.f32 %v18419_v44, %v13129_v36  ;;  %v18317_v33 = vpop.f32.mrf.mxu1 }
 0x67f   : > { %v18421_v48 = vpop.f32.mrf.mxu0  ;;  %v13140_v17 = vadd.f32 %v18316_v1, %v22435_v41 }
 0x680   : > { %v18422_v26 = vadd.f32 %v18421_v48, %v18420_v39  ;;  %v18318_v52 = vpop.f32.mrf.mxu1 }
 0x681   : > { %v18423_v11 = vpop.f32.mrf.mxu0  ;;  %v18319_v54 = vadd.f32 %v18318_v52, %v18317_v33 }
 0x682   : > { %v22503_v31 = vadd.f32 %v18422_v26, %v13132_v62  ;;  %v18320_v0 = vpop.f32.mrf.mxu1 }
 0x683   : > { %v18424_v50 = vpop.f32.mrf.mxu0  ;;  %v13145_v49 = vadd.f32 %v18319_v54, %v22437_v10 }
 0x684   : > { %v18425_v13 = vadd.f32 %v18424_v50, %v18423_v11  ;;  %v18321_v47 = vpop.f32.mrf.mxu1 }
 0x685   : > { %v18426_v37 = vpop.f32.mrf.mxu0  ;;  %v18322_v25 = vadd.f32 %v18321_v47, %v18320_v0 }
 0x686   : > { %v22506_v12 = vadd.f32 %v18425_v13, %v13137_v4  ;;  %v18323_v56 = vpop.f32.mrf.mxu1 }
 0x687   : > { %v18427_v36 = vpop.f32.mrf.mxu0  ;;  %v13148_v41 = vadd.f32 %v18322_v25, %v22439_v59 }
 0x688   : > { %v18428_v46 = vadd.f32 %v18427_v36, %v18426_v37  ;;  %v18324_v63 = vpop.f32.mrf.mxu1 }
 0x689   : > { %v18429_v45 = vpop.f32.mrf.mxu0  ;;  %v18325_v28 = vadd.f32 %v18324_v63, %v18323_v56 }
 0x68a   : > { %v22509_v53 = vadd.f32 %v18428_v46, %v13140_v17  ;;  %v18326_v6 = vpop.f32.mrf.mxu1 }
 0x68b   : > { %v18430_v62 = vpop.f32.mrf.mxu0  ;;  %v13153_v10 = vadd.f32 %v18325_v28, %v22441_v18 }
 0x68c   : > { %v18431_v51 = vadd.f32 %v18430_v62, %v18429_v45  ;;  %v18327_v27 = vpop.f32.mrf.mxu1 }
 0x68d   : > { %v18432_v9 = vpop.f32.mrf.mxu0  ;;  %v18328_v38 = vadd.f32 %v18327_v27, %v18326_v6 }
 0x68e   : > { %v22512_v44 = vadd.f32 %v18431_v51, %v13145_v49  ;;  %v18329_v35 = vpop.f32.mrf.mxu1 }
 0x68f   : > { %v18433_v4 = vpop.f32.mrf.mxu0  ;;  %v13156_v59 = vadd.f32 %v18328_v38, %v22443_v29 }
 0x690   : > { %v18434_v39 = vadd.f32 %v18433_v4, %v18432_v9  ;;  %v18330_v48 = vpop.f32.mrf.mxu1 }
 0x691   : > { %v18435_v1 = vpop.f32.mrf.mxu0  ;;  %v18331_v33 = vadd.f32 %v18330_v48, %v18329_v35 }
 0x692   : > { %v22515_v26 = vadd.f32 %v18434_v39, %v13148_v41  ;;  %v18332_v52 = vpop.f32.mrf.mxu1 }
 0x693   : > { %v18436_v17 = vpop.f32.mrf.mxu0  ;;  %v13161_v18 = vadd.f32 %v18331_v33, %v22445_v61 }
 0x694   : > { %v18437_v11 = vadd.f32 %v18436_v17, %v18435_v1  ;;  %v18333_v50 = vpop.f32.mrf.mxu1 }
 0x695   : > { %v18438_v54 = vpop.f32.mrf.mxu0  ;;  %v18334_v0 = vadd.f32 %v18333_v50, %v18332_v52 }
 0x696   : > { %v22518_v13 = vadd.f32 %v18437_v11, %v13153_v10  ;;  %v18335_v47 = vpop.f32.mrf.mxu1 }
 0x697   : > { %v18439_v49 = vpop.f32.mrf.mxu0  ;;  %v13164_v29 = vadd.f32 %v18334_v0, %v22447_v58 }
 0x698   : > { %v18440_v37 = vadd.f32 %v18439_v49, %v18438_v54  ;;  %v18336_v36 = vpop.f32.mrf.mxu1 }
 0x699   : > { %v18441_v25 = vpop.f32.mrf.mxu0  ;;  %v18337_v56 = vadd.f32 %v18336_v36, %v18335_v47 }
 0x69a   : > { %v22521_v46 = vadd.f32 %v18440_v37, %v13156_v59  ;;  %v18338_v63 = vpop.f32.mrf.mxu1 }
 0x69b   : > { %v18442_v41 = vpop.f32.mrf.mxu0  ;;  %v13169_v61 = vadd.f32 %v18337_v56, %v22449_v16 }
 0x69c   : > { %v18443_v45 = vadd.f32 %v18442_v41, %v18441_v25  ;;  %v18339_v62 = vpop.f32.mrf.mxu1 }
 0x69d   : > { %v18444_v28 = vpop.f32.mrf.mxu0  ;;  %v18340_v6 = vadd.f32 %v18339_v62, %v18338_v63 }
 0x69e   : > { %v22524_v51 = vadd.f32 %v18443_v45, %v13161_v18  ;;  %v18341_v27 = vpop.f32.mrf.mxu1 }
 0x69f   : > { %v18445_v10 = vpop.f32.mrf.mxu0  ;;  %v13172_v58 = vadd.f32 %v18340_v6, %v22451_v20 }
 0x6a0   : > { %v18446_v9 = vadd.f32 %v18445_v10, %v18444_v28  ;;  %v18342_v4 = vpop.f32.mrf.mxu1 }
 0x6a1   : > { %v18447_v38 = vpop.f32.mrf.mxu0  ;;  %v18343_v35 = vadd.f32 %v18342_v4, %v18341_v27 }
 0x6a2   : > { %v22527_v39 = vadd.f32 %v18446_v9, %v13164_v29  ;;  %v18344_v48 = vpop.f32.mrf.mxu1 }
 0x6a3   : > { %v18448_v59 = vpop.f32.mrf.mxu0  ;;  %v13177_v16 = vadd.f32 %v18343_v35, %v22453_v57 }
 0x6a4   : > { %v18449_v1 = vadd.f32 %v18448_v59, %v18447_v38  ;;  %v18345_v17 = vpop.f32.mrf.mxu1 }
 0x6a5   : > { %v18450_v33 = vpop.f32.mrf.mxu0  ;;  %v18346_v52 = vadd.f32 %v18345_v17, %v18344_v48 }
 0x6a6   : > { %v22530_v11 = vadd.f32 %v18449_v1, %v13169_v61  ;;  %v18347_v50 = vpop.f32.mrf.mxu1 }
 0x6a7   : > { %v18451_v18 = vpop.f32.mrf.mxu0  ;;  %v13180_v20 = vadd.f32 %v18346_v52, %v22455_v43 }
 0x6a8   : > { %v18452_v54 = vadd.f32 %v18451_v18, %v18450_v33  ;;  %v18348_v49 = vpop.f32.mrf.mxu1 }
 0x6a9   : > { %v18453_v0 = vpop.f32.mrf.mxu0  ;;  %v18349_v47 = vadd.f32 %v18348_v49, %v18347_v50 }
 0x6aa   : > { %v22533_v37 = vadd.f32 %v18452_v54, %v13172_v58  ;;  %v18350_v36 = vpop.f32.mrf.mxu1 }
 0x6ab   : > { %v18454_v29 = vpop.f32.mrf.mxu0  ;;  %v13185_v57 = vadd.f32 %v18349_v47, %v22457_v3 }
 0x6ac   : > { %v18455_v25 = vadd.f32 %v18454_v29, %v18453_v0  ;;  %v18351_v41 = vpop.f32.mrf.mxu1 }
 0x6ad   : > { %v18456_v56 = vpop.f32.mrf.mxu0  ;;  %v18352_v63 = vadd.f32 %v18351_v41, %v18350_v36 }
 0x6ae   : > { %v22536_v45 = vadd.f32 %v18455_v25, %v13177_v16  ;;  %v18353_v62 = vpop.f32.mrf.mxu1 }
 0x6af   : > { %v18457_v61 = vpop.f32.mrf.mxu0  ;;  %v13188_v43 = vadd.f32 %v18352_v63, %v22459_v55 }
 0x6b0   : > { %v18458_v28 = vadd.f32 %v18457_v61, %v18456_v56  ;;  %v18354_v10 = vpop.f32.mrf.mxu1 }
 0x6b1   : > { %v18459_v6 = vpop.f32.mrf.mxu0  ;;  %v18355_v27 = vadd.f32 %v18354_v10, %v18353_v62 }
 0x6b2   : > { %v22539_v9 = vadd.f32 %v18458_v28, %v13180_v20  ;;  %v18356_v4 = vpop.f32.mrf.mxu1 }
 0x6b3   : > { %v18460_v58 = vpop.f32.mrf.mxu0  ;;  %v13193_v3 = vadd.f32 %v18355_v27, %v22461_v22 }
 0x6b4   : > { %v18461_v38 = vadd.f32 %v18460_v58, %v18459_v6  ;;  %v18357_v59 = vpop.f32.mrf.mxu1 }
 0x6b5   : > { %v18462_v35 = vpop.f32.mrf.mxu0  ;;  %v18358_v48 = vadd.f32 %v18357_v59, %v18356_v4 }
 0x6b6   : > { %v22542_v1 = vadd.f32 %v18461_v38, %v13185_v57  ;;  %v18359_v17 = vpop.f32.mrf.mxu1 }
 0x6b7   : > { %v18463_v16 = vpop.f32.mrf.mxu0  ;;  %v13196_v55 = vadd.f32 %v18358_v48, %v22463_v40 }
 0x6b8   : > { %v18464_v33 = vadd.f32 %v18463_v16, %v18462_v35  ;;  %v18360_v18 = vpop.f32.mrf.mxu1 }
 0x6b9   : > { %v18465_v52 = vpop.f32.mrf.mxu0  ;;  %v18361_v50 = vadd.f32 %v18360_v18, %v18359_v17 }
 0x6ba   : > { %v22545_v54 = vadd.f32 %v18464_v33, %v13188_v43  ;;  %v18362_v49 = vpop.f32.mrf.mxu1 }
 0x6bb   : > { %v18466_v20 = vpop.f32.mrf.mxu0  ;;  %v13201_v22 = vadd.f32 %v18361_v50, %v22465_v60 }
 0x6bc   : > { %v18467_v0 = vadd.f32 %v18466_v20, %v18465_v52  ;;  %v18363_v29 = vpop.f32.mrf.mxu1 }
 0x6bd   : > { %v18468_v47 = vpop.f32.mrf.mxu0  ;;  %v18364_v36 = vadd.f32 %v18363_v29, %v18362_v49 }
 0x6be   : > { %v22548_v25 = vadd.f32 %v18467_v0, %v13193_v3  ;;  %v18365_v41 = vpop.f32.mrf.mxu1 }
 0x6bf   : > { %v18469_v57 = vpop.f32.mrf.mxu0  ;;  %v13204_v40 = vadd.f32 %v18364_v36, %v22467_v30 }
 0x6c0   : > { %v18470_v56 = vadd.f32 %v18469_v57, %v18468_v47  ;;  %v18366_v61 = vpop.f32.mrf.mxu1 }
 0x6c1   : > { %v18471_v63 = vpop.f32.mrf.mxu0  ;;  %v18367_v62 = vadd.f32 %v18366_v61, %v18365_v41 }
 0x6c2   : > { %v22551_v28 = vadd.f32 %v18470_v56, %v13196_v55  ;;  %v18368_v10 = vpop.f32.mrf.mxu1 }
 0x6c3   : > { %v18472_v43 = vpop.f32.mrf.mxu0  ;;  %v13209_v60 = vadd.f32 %v18367_v62, %v22469_v8 }
 0x6c4   : > { %v18473_v6 = vadd.f32 %v18472_v43, %v18471_v63  ;;  %v18369_v58 = vpop.f32.mrf.mxu1 }
 0x6c5   : > { %v18474_v27 = vpop.f32.mrf.mxu0  ;;  %v18370_v4 = vadd.f32 %v18369_v58, %v18368_v10 }
 0x6c6   : > { %v22554_v38 = vadd.f32 %v18473_v6, %v13201_v22  ;;  %v18371_v59 = vpop.f32.mrf.mxu1 }
 0x6c7   : > { %v18475_v3 = vpop.f32.mrf.mxu0  ;;  %v13212_v30 = vadd.f32 %v18370_v4, %v22471_v21 }
 0x6c8   : > { %v18476_v35 = vadd.f32 %v18475_v3, %v18474_v27  ;;  %v18372_v16 = vpop.f32.mrf.mxu1 }
 0x6c9   : > { %v18477_v48 = vpop.f32.mrf.mxu0  ;;  %v18373_v17 = vadd.f32 %v18372_v16, %v18371_v59 }
 0x6ca   : > { %v22557_v33 = vadd.f32 %v18476_v35, %v13204_v40  ;;  %v18374_v18 = vpop.f32.mrf.mxu1 }
 0x6cb   : > { %v18478_v55 = vpop.f32.mrf.mxu0  ;;  %v13217_v8 = vadd.f32 %v18373_v17, %v22473_v15 }
 0x6cc   : > { %v18479_v52 = vadd.f32 %v18478_v55, %v18477_v48  ;;  %v18375_v20 = vpop.f32.mrf.mxu1 }
 0x6cd   : > { %v18480_v50 = vpop.f32.mrf.mxu0  ;;  %v18376_v49 = vadd.f32 %v18375_v20, %v18374_v18 }
 0x6ce   : > { %v22560_v0 = vadd.f32 %v18479_v52, %v13209_v60  ;;  %v18377_v29 = vpop.f32.mrf.mxu1 }
 0x6cf   : > { %v18481_v22 = vpop.f32.mrf.mxu0  ;;  %v13220_v21 = vadd.f32 %v18376_v49, %v22475_v42  ;;  %v13735_v49 = vlaneseq }
 0x6d0   : > { %v18482_v47 = vadd.f32 %v18481_v22, %v18480_v50  ;;  %v18378_v57 = vpop.f32.mrf.mxu1 }
 0x6d1   : > { %v18483_v36 = vpop.f32.mrf.mxu0  ;;  %v18379_v41 = vadd.f32 %v18378_v57, %v18377_v29 }
 0x6d2   : > { %v22563_v56 = vadd.f32 %v18482_v47, %v13212_v30  ;;  %v18380_v61 = vpop.f32.mrf.mxu1 }
 0x6d3   : > { %v18484_v40 = vpop.f32.mrf.mxu0  ;;  %v13225_v15 = vadd.f32 %v18379_v41, %v22477_v24 }
 0x6d4   : > { %v18485_v63 = vadd.f32 %v18484_v40, %v18483_v36  ;;  %v18381_v43 = vpop.f32.mrf.mxu1 }
 0x6d5   : > { %v18486_v62 = vpop.f32.mrf.mxu0  ;;  %v18382_v10 = vadd.f32 %v18381_v43, %v18380_v61 }
 0x6d6   : > { %v22566_v6 = vadd.f32 %v18485_v63, %v13217_v8  ;;  %v18383_v58 = vpop.f32.mrf.mxu1 }
 0x6d7   : > { %v18487_v60 = vpop.f32.mrf.mxu0  ;;  %v13228_v42 = vadd.f32 %v18382_v10, %v22479_v23  ;;  %v22577_v23 = vld [vmem:[%s23935_s11] ss:$0 sm:$0xff] }
 0x6d8   : > { %v18488_v27 = vadd.f32 %v18487_v60, %v18486_v62  ;;  %v18384_v3 = vpop.f32.mrf.mxu1 }
 0x6d9   : > { %v18489_v4 = vpop.f32.mrf.mxu0  ;;  %v18385_v59 = vadd.f32 %v18384_v3, %v18383_v58 }
 0x6da   : > { %v22569_v35 = vadd.f32 %v18488_v27, %v13220_v21  ;;  %v18386_v16 = vpop.f32.mrf.mxu1 }
 0x6db   : > { %v18490_v30 = vpop.f32.mrf.mxu0  ;;  %v13233_v24 = vadd.f32 %v18385_v59, %v22482_v19  ;;  %v22584_v19 = vld [vmem:[%s23936_s12] ss:$0 sm:$0xff] }
 0x6dc   : > { %v18491_v48 = vadd.f32 %v18490_v30, %v18489_v4  ;;  %v18387_v55 = vpop.f32.mrf.mxu1 }
 0x6dd   : > { %v18492_v17 = vpop.f32.mrf.mxu0  ;;  %v18388_v18 = vadd.f32 %v18387_v55, %v18386_v16 }
 0x6de   : > { %v22572_v52 = vadd.f32 %v18491_v48, %v13225_v15  ;;  %v18679_v20 = vpop.f32.mrf.mxu1  ;;  %v22590_v15 = vand.u32 127, %v13735_v49 }
 0x6df   : > { %v18493_v8 = vpop.f32.mrf.mxu0  ;;  %v13236_v22 = vadd.f32 %v18388_v18, %v22485_v32  ;;  %v13459_v29 = vadd.f32 %v18679_v20, %v22506_v12 }
 0x6e0   : > { %v18494_v50 = vadd.f32 %v18493_v8, %v18492_v17  ;;  %v13450_v21 = vpop.f32.mrf.mxu1  ;;  %vm13737_vm2 = vcmp.lt.s32.totalorder %v22590_v15, 4  ;;  %vm13738_vm5 = vcmp.ge.s32.totalorder %v22590_v15, 8  ;;  %vm13739_vm6 = vcmp.lt.s32.totalorder %v22590_v15, 40 }
 0x6e1   : > { %v18495_v47 = vpop.f32.mrf.mxu0  ;;  %v13574_v57 = vmul.f32 %v22577_v23, %v13459_v29  ;;  %v13451_v40 = vadd.f32 %v13450_v21, %v22500_v34  ;;  %vm22641_vm8 = vmand %vm13738_vm5, %vm13739_vm6 }
 0x6e2   : > { %v22586_v36 = vadd.f32 %v18494_v50, %v13228_v42  ;;  %v18680_v61 = vpop.f32.mrf.mxu1 }
 0x6e3   : > { %v18496_v41 = vpop.f32.mrf.mxu0  ;;  %v13613_v32 = vadd.f32 %v22584_v19, %v13574_v57  ;;  %v13572_v12 = vmul.f32 %v22577_v23, %v13451_v40  ;;  %v13462_v43 = vadd.f32 %v18680_v61, %v22509_v53 }
 0x6e4   : > { %v18497_v63 = vadd.f32 %v18496_v41, %v18495_v47  ;;  %v13453_v10 = vpop.f32.mrf.mxu1 }
 0x6e5   : > { %v18498_v62 = vpop.f32.mrf.mxu0  ;;  %v13611_v27 = vadd.f32 %v22584_v19, %v13572_v12  ;;  %v13575_v58 = vmul.f32 %v22577_v23, %v13462_v43  ;;  %v13454_v34 = vadd.f32 %v13453_v10, %v22503_v31  ;;  %vm13645_vm1 = vcmp.gt.f32.partialorder %v13613_v32, 0.0 }
 0x6e6   : > { %v22595_v60 = vadd.f32 %v18497_v63, %v13233_v24  ;;  %v18683_v3 = vpop.f32.mrf.mxu1  ;;  %v13677_v59 = vmul.f32 0.01, %v13613_v32 }
 0x6e7   : > { %v18499_v42 = vpop.f32.mrf.mxu0  ;;  %v13614_v30 = vadd.f32 %v22584_v19, %v13575_v58  ;;  %v13573_v53 = vmul.f32 %v22577_v23, %v13454_v34  ;;  %v13475_v16 = vadd.f32 %v18683_v3, %v22518_v13  ;;  %vm13643_vm3 = vcmp.gt.f32.partialorder %v13611_v27, 0.0 }
 0x6e8   : > { %v18500_v4 = vadd.f32 %v18499_v42, %v18498_v62  ;;  %v13466_v24 = vpop.f32.mrf.mxu1  ;;  %v22604_v17 = vsel %vm13645_vm1, %v13613_v32, %v13677_v59  ;;  %v13675_v55 = vmul.f32 0.01, %v13611_v27 }
 0x6e9   : > { %v18675_v48 = vpop.f32.mrf.mxu0  ;;  %v22611_v8 = vsel %vm13737_vm2, %v22604_v17, -inf  ;;  %vm13646_vm4 = vcmp.gt.f32.partialorder %v13614_v30, 0.0  ;;  %v13678_v13 = vmul.f32 0.01, %v13614_v30  ;;  %v13612_v49 = vadd.f32 %v22584_v19, %v13573_v53 }
 0x6ea   : > { %v22606_v18 = vadd.f32 %v18500_v4, %v13236_v22  ;;  %v13443_v50 = vadd.f32 %v18675_v48, %v22494_v2  ;;  %13785 = vmax.xlane.f32.xlu0 %v22611_v8  ;;  %v18684_v20 = vpop.f32.mrf.mxu1  ;;  %v13578_v47 = vmul.f32 %v22577_v23, %v13475_v16  ;;  %v22617_v29 = vsel %vm13643_vm3, %v13611_v27, %v13675_v55 }
 0x6eb   : > { %v13434_v31 = vpop.f32.mrf.mxu0  ;;  %v22620_v57 = vsel %vm13646_vm4, %v13614_v30, %v13678_v13  ;;  %v13467_v2 = vadd.f32 %v13466_v24, %v22512_v44  ;;  %vm13644_vm7 = vcmp.gt.f32.partialorder %v13612_v49, 0.0  ;;  %v13676_v10 = vmul.f32 0.01, %v13612_v49 }
 0x6ec   : > { %v13435_v22 = vadd.f32 %v13434_v31, %v22488_v7  ;;  %v13469_v21 = vpop.f32.mrf.mxu1  ;;  %v22628_v40 = vsel %vm13737_vm2, %v22620_v57, -inf  ;;  %v13570_v63 = vmul.f32 %v22577_v23, %v13443_v50  ;;  %v22635_v7 = vsel %vm13737_vm2, %v22617_v29, -inf }
 0x6ed   : > { %v18676_v41 = vpop.f32.mrf.mxu0  ;;  %13787 = vmax.xlane.f32.xlu1 %v22628_v40  ;;  %v13617_v32 = vadd.f32 %v22584_v19, %v13578_v47  ;;  %v14067_v27 = vmul.f32 %v22604_v17, %v22604_v17  ;;  %v13576_v58 = vmul.f32 %v22577_v23, %v13467_v2  ;;  %v13478_v42 = vadd.f32 %v18684_v20, %v22521_v46 }
 0x6ee   : > { %v22637_v61 = vpop.f32.mrf.mxu1  ;;  %13781 = vmax.xlane.f32.xlu0 %v22635_v7  ;;  %v13568_v12 = vmul.f32 %v22577_v23, %v13435_v22  ;;  %v13446_v62 = vadd.f32 %v18676_v41, %v22497_v5  ;;  %v13609_v34 = vadd.f32 %v22584_v19, %v13570_v63  ;;  %v22654_v4 = vsel %vm13644_vm7, %v13612_v49, %v13676_v10 }
 0x6ef   : > { %v14099_v3 = vsel %vm22641_vm8, %v14067_v27, 0.0  ;;  %v14065_v5 = vmul.f32 %v22617_v29, %v22617_v29  ;;  %v22665_v30 = vsel %vm13737_vm2, %v22654_v4, -inf  ;;  %v14068_v46 = vmul.f32 %v22620_v57, %v22620_v57 }
 0x6f0   : > { %v22647_v43 = vpop.f32.mrf.mxu1  ;;  %v13607_v53 = vadd.f32 %v22584_v19, %v13568_v12  ;;  %v13571_v48 = vmul.f32 %v22577_v23, %v13446_v62  ;;  %vm13649_vm9 = vcmp.gt.f32.partialorder %v13617_v32, 0.0  ;;  %v13615_v24 = vadd.f32 %v22584_v19, %v13576_v58 }
 0x6f1   : > { %13783 = vmax.xlane.f32.xlu1 %v22665_v30  ;;  %v13681_v55 = vmul.f32 0.01, %v13617_v32  ;;  %v13579_v31 = vmul.f32 %v22577_v23, %v13478_v42  ;;  %v14097_v50 = vsel %vm22641_vm8, %v14065_v5, 0.0  ;;  %vm13641_vm10 = vcmp.gt.f32.partialorder %v13609_v34, 0.0  ;;  %v13437_v42 = vpop.f32.mrf.mxu0 }
 0x6f2   : > { %v22658_v59 = vpop.f32.mrf.mxu1  ;;  %14137 = vadd.xlane.f32.xlu0 %v14099_v3  ;;  %v13673_v13 = vmul.f32 0.01, %v13609_v34  ;;  %v13470_v49 = vadd.f32 %v13469_v21, %v22515_v26  ;;  %v14100_v47 = vsel %vm22641_vm8, %v14068_v46, 0.0  ;;  %v13610_v41 = vadd.f32 %v22584_v19, %v13571_v48 }
 0x6f3   : > { %v22682_v2 = vsel %vm13649_vm9, %v13617_v32, %v13681_v55  ;;  %vm13639_vm11 = vcmp.gt.f32.partialorder %v13607_v53, 0.0  ;;  %v13671_v62 = vmul.f32 0.01, %v13607_v53  ;;  %v13618_v21 = vadd.f32 %v22584_v19, %v13579_v31 }
 0x6f4   : > { %v22672_v16 = vpop.f32.mrf.mxu1  ;;  %v22685_v12 = vsel %vm13641_vm10, %v13609_v34, %v13673_v13  ;;  %v14066_v58 = vmul.f32 %v22654_v4, %v22654_v4  ;;  %v13577_v46 = vmul.f32 %v22577_v23, %v13470_v49  ;;  %v13674_v55 = vmul.f32 0.01, %v13610_v41 }
 0x6f5   : > { %14139 = vadd.xlane.f32.xlu1 %v14100_v47  ;;  %v22698_v32 = vsel %vm13737_vm2, %v22685_v12, -inf  ;;  %v22708_v5 = vsel %vm13639_vm11, %v13607_v53, %v13671_v62  ;;  %vm13647_vm12 = vcmp.gt.f32.partialorder %v13615_v24, 0.0  ;;  %v13679_v31 = vmul.f32 0.01, %v13615_v24 }
 0x6f6   : > { %v18691_v20 = vpop.f32.mrf.mxu1  ;;  %14133 = vadd.xlane.f32.xlu0 %v14097_v50  ;;  %vm13642_vm13 = vcmp.gt.f32.partialorder %v13610_v41, 0.0  ;;  %v14098_v53 = vsel %vm22641_vm8, %v14066_v58, 0.0  ;;  %v22723_v49 = vsel %vm13737_vm2, %v22708_v5, -inf  ;;  %vm13650_vm14 = vcmp.gt.f32.partialorder %v13618_v21, 0.0 }
 0x6f7   : > { %v13507_v22 = vadd.f32 %v18691_v20, %v22542_v1  ;;  %v22693_v1 = vsel %vm13737_vm2, %v22682_v2, -inf  ;;  %v22731_v62 = vsel %vm13647_vm12, %v13615_v24, %v13679_v31  ;;  %v13491_v31 = vadd.f32 %v22637_v61, %v22530_v11 }
 0x6f8   : > { %v13498_v63 = vpop.f32.mrf.mxu1  ;;  %24134 = vst [vmem:[#allocation30_spill] sm:$0xff] %v22731_v62  ;;  %v14071_v61 = vmul.f32 %v22682_v2, %v22682_v2 }
 0x6f9   : > { %v13586_v10 = vmul.f32 %v22577_v23, %v13507_v22  ;;  %v13499_v26 = vadd.f32 %v13498_v63, %v22536_v45  ;;  %13777 = vmax.xlane.f32.xlu1 %v22698_v32 }
 0x6fa   : > { %v18692_v27 = vpop.f32.mrf.mxu1  ;;  %13793 = vmax.xlane.f32.xlu0 %v22693_v1 }
 0x6fb   : > { %v22703_v34 = vadd.f32 %v22584_v19, %v13586_v10  ;;  %v13584_v45 = vmul.f32 %v22577_v23, %v13499_v26  ;;  %v13510_v3 = vadd.f32 %v18692_v27, %v22545_v54  ;;  %v13438_v54 = vadd.f32 %v13437_v42, %v22491_v14 }
 0x6fc   : > { %v13501_v48 = vpop.f32.mrf.mxu1  ;;  %v13616_v14 = vadd.f32 %v22584_v19, %v13577_v46  ;;  %v22734_v26 = vsel %vm13642_vm13, %v13610_v41, %v13674_v55  ;;  %v13682_v27 = vmul.f32 0.01, %v13618_v21  ;;  %v14063_v41 = vmul.f32 %v22685_v12, %v22685_v12 }
 0x6fd   : > { %v22713_v50 = vadd.f32 %v22584_v19, %v13584_v45  ;;  %v13587_v20 = vmul.f32 %v22577_v23, %v13510_v3  ;;  %v13502_v13 = vadd.f32 %v13501_v48, %v22539_v9  ;;  %14135 = vadd.xlane.f32.xlu1 %v14098_v53  ;;  %v13569_v3 = vmul.f32 %v22577_v23, %v13438_v54 }
 0x6fe   : > { %v18695_v47 = vpop.f32.mrf.mxu1  ;;  %13773 = vmax.xlane.f32.xlu0 %v22723_v49  ;;  %v13680_v54 = vmul.f32 0.01, %v13616_v14  ;;  %vm13648_vm15 = vcmp.gt.f32.partialorder %v13616_v14, 0.0  ;;  %vm13657_vm6 = vcmp.gt.f32.partialorder %v22703_v34, 0.0 }
 0x6ff   : > { %v22726_v22 = vadd.f32 %v22584_v19, %v13587_v20  ;;  %v13585_v63 = vmul.f32 %v22577_v23, %v13502_v13  ;;  %v13523_v9 = vadd.f32 %v18695_v47, %v22554_v38  ;;  %v22745_v38 = vsel %vm13737_vm2, %v22731_v62, -inf }
 0x700   : > { %v13514_v10 = vpop.f32.mrf.mxu1  ;;  %v22763_v13 = vsel %vm13650_vm14, %v13618_v21, %v13682_v27  ;;  %vm13655_vm7 = vcmp.gt.f32.partialorder %v22713_v50, 0.0 }
 0x701   : > { %v22737_v58 = vadd.f32 %v22584_v19, %v13585_v63  ;;  %v13590_v42 = vmul.f32 %v22577_v23, %v13523_v9  ;;  %v13515_v45 = vadd.f32 %v13514_v10, %v22548_v25  ;;  %v22756_v25 = vsel %vm13737_vm2, %v22734_v26, -inf  ;;  %24135 = vst [vmem:[#allocation32_spill] sm:$0xff] %v22763_v13 }
 0x702   : > { %v18696_v24 = vpop.f32.mrf.mxu1  ;;  %13789 = vmax.xlane.f32.xlu0 %v22745_v38  ;;  %13779 = vmax.xlane.f32.xlu1 %v22756_v25  ;;  %v13608_v9 = vadd.f32 %v22584_v19, %v13569_v3  ;;  %v22782_v27 = vsel %vm13737_vm2, %v22763_v13, -inf  ;;  %v22787_v3 = vsel %vm13648_vm15, %v13616_v14, %v13680_v54  ;;  %v14061_v14 = vmul.f32 %v22708_v5, %v22708_v5 }
 0x703   : > { %v22750_v46 = vadd.f32 %v22584_v19, %v13590_v42  ;;  %v13588_v48 = vmul.f32 %v22577_v23, %v13515_v45  ;;  %v13526_v55 = vadd.f32 %v18696_v24, %v22557_v33  ;;  %v14095_v33 = vsel %vm22641_vm8, %v14063_v41, 0.0  ;;  %24136 = vst [vmem:[#allocation34_spill] sm:$0xff] %v22787_v3 }
 0x704   : > { %v13517_v20 = vpop.f32.mrf.mxu1  ;;  %v13582_v42 = vmul.f32 %v22577_v23, %v13491_v31  ;;  %v13483_v24 = vadd.f32 %v22647_v43, %v22524_v51  ;;  %vm13640_vm0 = vcmp.gt.f32.partialorder %v13608_v9, 0.0  ;;  %vm13658_vm9 = vcmp.gt.f32.partialorder %v22726_v22, 0.0 }
 0x705   : > { %v22766_v53 = vadd.f32 %v22584_v19, %v13588_v48  ;;  %v13591_v47 = vmul.f32 %v22577_v23, %v13526_v55  ;;  %v13518_v63 = vadd.f32 %v13517_v20, %v22551_v28  ;;  %v13672_v20 = vmul.f32 0.01, %v13608_v9 }
 0x706   : > { %v18699_v11 = vpop.f32.mrf.mxu1  ;;  %14129 = vadd.xlane.f32.xlu0 %v14095_v33  ;;  %13795 = vmax.xlane.f32.xlu1 %v22782_v27  ;;  %v13494_v33 = vadd.f32 %v22658_v59, %v22533_v37  ;;  %v14072_v59 = vmul.f32 %v22763_v13, %v22763_v13  ;;  %vm13656_vm10 = vcmp.gt.f32.partialorder %v22737_v58, 0.0  ;;  %vm13661_vm11 = vcmp.gt.f32.partialorder %v22750_v46, 0.0 }
 0x707   : > { %v22776_v21 = vadd.f32 %v22584_v19, %v13591_v47  ;;  %v13589_v10 = vmul.f32 %v22577_v23, %v13518_v63  ;;  %v13539_v28 = vadd.f32 %v18699_v11, %v22566_v6  ;;  %v14103_v6 = vsel %vm22641_vm8, %v14071_v61, 0.0 }
 0x708   : > { %v13530_v45 = vpop.f32.mrf.mxu1  ;;  %v14064_v47 = vmul.f32 %v22734_v26, %v22734_v26  ;;  %v13621_v63 = vadd.f32 %v22584_v19, %v13582_v42  ;;  %v13580_v61 = vmul.f32 %v22577_v23, %v13483_v24  ;;  %v14093_v42 = vsel %vm22641_vm8, %v14061_v14, 0.0 }
 0x709   : > { %v22792_v41 = vadd.f32 %v22584_v19, %v13589_v10  ;;  %v13594_v48 = vmul.f32 %v22577_v23, %v13539_v28  ;;  %v13531_v55 = vadd.f32 %v13530_v45, %v22560_v0  ;;  %v22809_v0 = vsel %vm13737_vm2, %v22787_v3, -inf }
 0x70a   : > { %v18700_v31 = vpop.f32.mrf.mxu1  ;;  %14145 = vadd.xlane.f32.xlu0 %v14103_v6  ;;  %13791 = vmax.xlane.f32.xlu1 %v22809_v0  ;;  %v14069_v24 = vmul.f32 %v22731_v62, %v22731_v62  ;;  %v22835_v6 = vsel %vm13640_vm0, %v13608_v9, %v13672_v20  ;;  %vm13653_vm1 = vcmp.gt.f32.partialorder %v13621_v63, 0.0  ;;  %vm13659_vm12 = vcmp.gt.f32.partialorder %v22766_v53, 0.0 }
 0x70b   : > { %v22803_v51 = vadd.f32 %v22584_v19, %v13594_v48  ;;  %v13592_v43 = vmul.f32 %v22577_v23, %v13531_v55  ;;  %v13542_v54 = vadd.f32 %v18700_v31, %v22569_v35  ;;  %v14096_v35 = vsel %vm22641_vm8, %v14064_v47, 0.0  ;;  %24137 = vst [vmem:[#allocation36_spill] sm:$0xff] %v22835_v6 }
 0x70c   : > { %v13533_v11 = vpop.f32.mrf.mxu1  ;;  %v13583_v31 = vmul.f32 %v22577_v23, %v13494_v33  ;;  %v13486_v47 = vadd.f32 %v22672_v16, %v22527_v39  ;;  %v14101_v9 = vsel %vm22641_vm8, %v14069_v24, 0.0  ;;  %v14062_v39 = vmul.f32 %v22835_v6, %v22835_v6 }
 0x70d   : > { %v22818_v10 = vadd.f32 %v22584_v19, %v13592_v43  ;;  %v13595_v28 = vmul.f32 %v22577_v23, %v13542_v54  ;;  %v13534_v45 = vadd.f32 %v13533_v11, %v22563_v56  ;;  %vm13662_vm13 = vcmp.gt.f32.partialorder %v22776_v21, 0.0 }
 0x70e   : > { %v18703_v37 = vpop.f32.mrf.mxu1  ;;  %14125 = vadd.xlane.f32.xlu0 %v14093_v42  ;;  %14131 = vadd.xlane.f32.xlu1 %v14096_v35  ;;  %v13581_v35 = vmul.f32 %v22577_v23, %v13486_v47  ;;  %vm13665_vm14 = vcmp.gt.f32.partialorder %v22803_v51, 0.0  ;;  %vm13660_vm15 = vcmp.gt.f32.partialorder %v22792_v41, 0.0 }
 0x70f   : > { %v22831_v48 = vadd.f32 %v22584_v19, %v13595_v28  ;;  %v13593_v55 = vmul.f32 %v22577_v23, %v13534_v45  ;;  %v13555_v56 = vadd.f32 %v18703_v37, %v22595_v60  ;;  %v13619_v28 = vadd.f32 %v22584_v19, %v13580_v61 }
 0x710   : > { %v13546_v14 = vpop.f32.mrf.mxu1  ;;  %v14104_v60 = vsel %vm22641_vm8, %v14072_v59, 0.0  ;;  %v13685_v45 = vmul.f32 0.01, %v13621_v63  ;;  %v13622_v61 = vadd.f32 %v22584_v19, %v13583_v31  ;;  %vm13663_vm0 = vcmp.gt.f32.partialorder %v22818_v10, 0.0 }
 0x711   : > { %v22841_v43 = vadd.f32 %v22584_v19, %v13593_v55  ;;  %v13598_v54 = vmul.f32 %v22577_v23, %v13555_v56  ;;  %v13547_v11 = vadd.f32 %v13546_v14, %v22572_v52  ;;  %v14094_v55 = vsel %vm22641_vm8, %v14062_v39, 0.0 }
 0x712   : > { %v18704_v20 = vpop.f32.mrf.mxu1  ;;  %14141 = vadd.xlane.f32.xlu0 %v14101_v9  ;;  %14147 = vadd.xlane.f32.xlu1 %v14104_v60  ;;  %v14070_v56 = vmul.f32 %v22787_v3, %v22787_v3  ;;  %v22878_v14 = vsel %vm13653_vm1, %v13621_v63, %v13685_v45  ;;  %vm13651_vm3 = vcmp.gt.f32.partialorder %v13619_v28, 0.0  ;;  %vm13654_vm4 = vcmp.gt.f32.partialorder %v13622_v61, 0.0 }
 0x713   : > { %v22853_v16 = vadd.f32 %v22584_v19, %v13598_v54  ;;  %v13596_v33 = vmul.f32 %v22577_v23, %v13547_v11  ;;  %v13558_v52 = vadd.f32 %v18704_v20, %v22606_v18  ;;  %v22869_v18 = vsel %vm13737_vm2, %v22835_v6, -inf  ;;  %24138 = vst [vmem:[#allocation31_spill] sm:$0xff] %v22878_v14 }
 0x714   : > { %v13549_v42 = vpop.f32.mrf.mxu1  ;;  %v13620_v54 = vadd.f32 %v22584_v19, %v13581_v35  ;;  %v13686_v11 = vmul.f32 0.01, %v13622_v61  ;;  %v22887_v9 = vsel %vm13737_vm2, %v22878_v14, -inf  ;;  %vm13666_vm1 = vcmp.gt.f32.partialorder %v22831_v48, 0.0 }
 0x715   : > { %v22860_v37 = vadd.f32 %v22584_v19, %v13596_v33  ;;  %v13599_v59 = vmul.f32 %v22577_v23, %v13558_v52  ;;  %v13550_v24 = vadd.f32 %v13549_v42, %v22586_v36  ;;  %v13683_v36 = vmul.f32 0.01, %v13619_v28 }
 0x716   : > { %13775 = vmax.xlane.f32.xlu0 %v22869_v18  ;;  %14127 = vadd.xlane.f32.xlu1 %v14094_v55  ;;  %v22894_v20 = vsel %vm13654_vm4, %v13622_v61, %v13686_v11  ;;  %v13684_v39 = vmul.f32 0.01, %v13620_v54  ;;  %vm13652_vm5 = vcmp.gt.f32.partialorder %v13620_v54, 0.0  ;;  %v14075_v33 = vmul.f32 %v22878_v14, %v22878_v14 }
 0x717   : > { %v22874_v31 = vadd.f32 %v22584_v19, %v13599_v59  ;;  %v13597_v47 = vmul.f32 %v22577_v23, %v13550_v24  ;;  %v14102_v23 = vsel %vm22641_vm8, %v14070_v56, 0.0  ;;  %v22892_v63 = vsel %vm13651_vm3, %v13619_v28, %v13683_v36  ;;  %24140 = vst [vmem:[#allocation10_spill] sm:$0xff] %v22894_v20 }
 0x718   : > { %24139 = vst [vmem:[#allocation11_spill] sm:$0xff] %v22892_v63  ;;  %v22906_v52 = vsel %vm13737_vm2, %v22894_v20, -inf  ;;  %v22910_v28 = vsel %vm13652_vm5, %v13620_v54, %v13684_v39  ;;  %v14107_v45 = vsel %vm22641_vm8, %v14075_v33, 0.0  ;;  %v14073_v61 = vmul.f32 %v22892_v63, %v22892_v63 }
 0x719   : > { %v22882_v60 = vadd.f32 %v22584_v19, %v13597_v47  ;;  %v22899_v19 = vsel %vm13737_vm2, %v22892_v63, -inf  ;;  %24141 = vst [vmem:[#allocation18_spill] sm:$0xff] %v22910_v28  ;;  %v22919_v35 = vsel %vm13737_vm2, %v22910_v28, -inf  ;;  %v14076_v42 = vmul.f32 %v22894_v20, %v22894_v20 }
 0x71a   : > { %13801 = vmax.xlane.f32.xlu0 %v22887_v9  ;;  %14143 = vadd.xlane.f32.xlu1 %v14102_v23  ;;  %v13689_v59 = vmul.f32 0.01, %v22703_v34  ;;  %v14105_v24 = vsel %vm22641_vm8, %v14073_v61, 0.0  ;;  %v14074_v56 = vmul.f32 %v22910_v28, %v22910_v28  ;;  %v13687_v36 = vmul.f32 0.01, %v22713_v50 }
 0x71b   : > { %v14108_v55 = vsel %vm22641_vm8, %v14076_v42, 0.0  ;;  %v13690_v54 = vmul.f32 0.01, %v22726_v22  ;;  %v13688_v33 = vmul.f32 0.01, %v22737_v58  ;;  %vm13669_vm3 = vcmp.gt.f32.partialorder %v22853_v16, 0.0 }
 0x71c   : > { %v22933_v47 = vsel %vm13657_vm6, %v22703_v34, %v13689_v59  ;;  %v14106_v23 = vsel %vm22641_vm8, %v14074_v56, 0.0  ;;  %v22948_v34 = vsel %vm13655_vm7, %v22713_v50, %v13687_v36  ;;  %v13693_v56 = vmul.f32 0.01, %v22750_v46 }
 0x71d   : > { %24142 = vst [vmem:[#allocation19_spill] sm:$0xff] %v22933_v47  ;;  %v22942_v11 = vsel %vm13737_vm2, %v22933_v47, -inf  ;;  %24143 = vst [vmem:[#allocation12_spill] sm:$0xff] %v22948_v34  ;;  %v22951_v39 = vsel %vm13658_vm9, %v22726_v22, %v13690_v54  ;;  %v14079_v61 = vmul.f32 %v22933_v47, %v22933_v47  ;;  %v22970_v22 = vsel %vm13656_vm10, %v22737_v58, %v13688_v33 }
 0x71e   : > { %13797 = vmax.xlane.f32.xlu0 %v22899_v19  ;;  %13803 = vmax.xlane.f32.xlu1 %v22906_v52  ;;  %24144 = vst [vmem:[#allocation13_spill] sm:$0xff] %v22951_v39  ;;  %v22965_v50 = vsel %vm13737_vm2, %v22951_v39, -inf  ;;  %24145 = vst [vmem:[#allocation35_spill] sm:$0xff] %v22970_v22  ;;  %v14077_v59 = vmul.f32 %v22948_v34, %v22948_v34  ;;  %v14078_v54 = vmul.f32 %v22970_v22, %v22970_v22 }
 0x71f   : > { %v14111_v42 = vsel %vm22641_vm8, %v14079_v61, 0.0  ;;  %v13691_v33 = vmul.f32 0.01, %v22766_v53  ;;  %v13694_v61 = vmul.f32 0.01, %v22776_v21  ;;  %vm13664_vm4 = vcmp.gt.f32.partialorder %v22841_v43, 0.0 }
 0x720   : > { %v14109_v58 = vsel %vm22641_vm8, %v14077_v59, 0.0  ;;  %v14110_v59 = vsel %vm22641_vm8, %v14078_v54, 0.0  ;;  %v13695_v54 = vmul.f32 0.01, %v22818_v10  ;;  %vm13667_vm5 = vcmp.gt.f32.partialorder %v22860_v37, 0.0 }
 0x721   : > { %vm13670_vm6 = vcmp.gt.f32.partialorder %v22874_v31, 0.0  ;;  %vm13668_vm7 = vcmp.gt.f32.partialorder %v22882_v60, 0.0 }
 0x722   : > { %14153 = vadd.xlane.f32.xlu0 %v14107_v45  ;;  %13799 = vmax.xlane.f32.xlu1 %v22919_v35  ;;  %v22958_v45 = vsel %vm13737_vm2, %v22948_v34, -inf }
 0x726   : > { %14149 = vadd.xlane.f32.xlu0 %v14105_v24  ;;  %14155 = vadd.xlane.f32.xlu1 %v14108_v55  ;;  %v22979_v24 = vsel %vm13737_vm2, %v22970_v22, -inf  ;;  %v14080_v55 = vmul.f32 %v22951_v39, %v22951_v39  ;;  %v13696_v22 = vmul.f32 0.01, %v22841_v43  ;;  %v13702_v39 = vmul.f32 0.01, %v22874_v31 }
 0x728   : > { %v14112_v36 = vsel %vm22641_vm8, %v14080_v55, 0.0  ;;  %v13697_v55 = vmul.f32 0.01, %v22803_v51 }
 0x72a   : > { %13809 = vmax.xlane.f32.xlu0 %v22942_v11  ;;  %14151 = vadd.xlane.f32.xlu1 %v14106_v23  ;;  %v22993_v23 = vsel %vm13661_vm11, %v22750_v46, %v13693_v56  ;;  %v23008_v46 = vsel %vm13659_vm12, %v22766_v53, %v13691_v33  ;;  %v23012_v56 = vsel %vm13662_vm13, %v22776_v21, %v13694_v61  ;;  %v13698_v61 = vmul.f32 0.01, %v22831_v48 }
 0x72b   : > { %24146 = vst [vmem:[#allocation17_spill] sm:$0xff] %v22993_v23  ;;  %24147 = vst [vmem:[#allocation20_spill] sm:$0xff] %v23008_v46  ;;  %v23025_v53 = vsel %vm13737_vm2, %v23012_v56, -inf  ;;  %v23029_v21 = vsel %vm13665_vm14, %v22803_v51, %v13697_v55  ;;  %v13701_v55 = vmul.f32 0.01, %v22853_v16  ;;  %v14081_v63 = vmul.f32 %v23008_v46, %v23008_v46 }
 0x72c   : > { %24148 = vst [vmem:[#allocation22_spill] sm:$0xff] %v23012_v56  ;;  %24149 = vst [vmem:[#allocation14_spill] sm:$0xff] %v23029_v21 }
 0x72e   : > { %13805 = vmax.xlane.f32.xlu0 %v22958_v45  ;;  %13811 = vmax.xlane.f32.xlu1 %v22965_v50 }
 0x732   : > { %14161 = vadd.xlane.f32.xlu0 %v14111_v42  ;;  %13807 = vmax.xlane.f32.xlu1 %v22979_v24  ;;  %v23002_v42 = vsel %vm13737_vm2, %v22993_v23, -inf }
 0x736   : > { %14157 = vadd.xlane.f32.xlu0 %v14109_v58  ;;  %14163 = vadd.xlane.f32.xlu1 %v14112_v36  ;;  %v13692_v58 = vmul.f32 0.01, %v22792_v41  ;;  %v23020_v36 = vsel %vm13737_vm2, %v23008_v46, -inf }
 0x738   : > { %v23034_v33 = vsel %vm13660_vm15, %v22792_v41, %v13692_v58  ;;  %v23051_v41 = vsel %vm13663_vm0, %v22818_v10, %v13695_v54  ;;  %v23056_v58 = vsel %vm13666_vm1, %v22831_v48, %v13698_v61  ;;  %v23073_v48 = vsel %vm13669_vm3, %v22853_v16, %v13701_v55 }
 0x739   : > { %24150 = vst [vmem:[#allocation23_spill] sm:$0xff] %v23034_v33  ;;  %v23047_v51 = vsel %vm13737_vm2, %v23034_v33, -inf  ;;  %24151 = vst [vmem:[#allocation24_spill] sm:$0xff] %v23051_v41  ;;  %v23064_v34 = vsel %vm13737_vm2, %v23051_v41, -inf  ;;  %v23069_v10 = vsel %vm13737_vm2, %v23056_v58, -inf  ;;  %v23078_v61 = vsel %vm13664_vm4, %v22841_v43, %v13696_v22 }
 0x73a   : > { %13817 = vmax.xlane.f32.xlu0 %v23002_v42  ;;  %14159 = vadd.xlane.f32.xlu1 %v14110_v59  ;;  %v23042_v59 = vsel %vm13737_vm2, %v23029_v21, -inf  ;;  %24152 = vst [vmem:[#allocation28_spill] sm:$0xff] %v23056_v58  ;;  %24153 = vst [vmem:[#allocation29_spill] sm:$0xff] %v23073_v48  ;;  %v13699_v54 = vmul.f32 0.01, %v22860_v37  ;;  %v23086_v47 = vsel %vm13737_vm2, %v23073_v48, -inf  ;;  %v23099_v22 = vsel %vm13670_vm6, %v22874_v31, %v13702_v39 }
 0x73b   : > { %24154 = vst [vmem:[#allocation6_spill] sm:$0xff] %v23078_v61  ;;  %v23091_v16 = vsel %vm13737_vm2, %v23078_v61, -inf  ;;  %24156 = vst [vmem:[#allocation9_spill] sm:$0xff] %v23099_v22  ;;  %v13700_v55 = vmul.f32 0.01, %v22882_v60  ;;  %v14113_v39 = vsel %vm22641_vm8, %v14081_v63, 0.0  ;;  %v14082_v20 = vmul.f32 %v23034_v33, %v23034_v33 }
 0x73c   : > { %v23095_v43 = vsel %vm13667_vm5, %v22860_v37, %v13699_v54  ;;  %v23113_v37 = vsel %vm13737_vm2, %v23099_v22, -inf  ;;  %v14083_v54 = vmul.f32 %v22993_v23, %v22993_v23  ;;  %v14085_v63 = vmul.f32 %v23051_v41, %v23051_v41 }
 0x73d   : > { %24155 = vst [vmem:[#allocation27_spill] sm:$0xff] %v23095_v43  ;;  %v23106_v28 = vsel %vm13737_vm2, %v23095_v43, -inf  ;;  %v23118_v31 = vsel %vm13668_vm7, %v22882_v60, %v13700_v55  ;;  %v14114_v55 = vsel %vm22641_vm8, %v14082_v20, 0.0  ;;  %v14084_v23 = vmul.f32 %v23012_v56, %v23012_v56 }
 0x73e   : > { %13813 = vmax.xlane.f32.xlu0 %v23020_v36  ;;  %13819 = vmax.xlane.f32.xlu1 %v23025_v53  ;;  %24157 = vst [vmem:[#allocation15_spill] sm:$0xff] %v23118_v31  ;;  %v23127_v46 = vsel %vm13737_vm2, %v23118_v31, -inf  ;;  %v14115_v60 = vsel %vm22641_vm8, %v14083_v54, 0.0  ;;  %v14087_v33 = vmul.f32 %v23029_v21, %v23029_v21  ;;  %v14086_v41 = vmul.f32 %v23078_v61, %v23078_v61 }
 0x73f   : > { %v14116_v54 = vsel %vm22641_vm8, %v14084_v23, 0.0 }
 0x740   : > { %v14119_v20 = vsel %vm22641_vm8, %v14087_v33, 0.0 }
 0x742   : > { %13825 = vmax.xlane.f32.xlu0 %v23042_v59  ;;  %13815 = vmax.xlane.f32.xlu1 %v23047_v51 }
 0x746   : > { %13821 = vmax.xlane.f32.xlu0 %v23064_v34  ;;  %13827 = vmax.xlane.f32.xlu1 %v23069_v10 }
 0x74a   : > { %13833 = vmax.xlane.f32.xlu0 %v23086_v47  ;;  %13823 = vmax.xlane.f32.xlu1 %v23091_v16 }
 0x74e   : > { %13829 = vmax.xlane.f32.xlu0 %v23106_v28  ;;  %13835 = vmax.xlane.f32.xlu1 %v23113_v37 }
 0x752   : > { %14165 = vadd.xlane.f32.xlu0 %v14113_v39  ;;  %13831 = vmax.xlane.f32.xlu1 %v23127_v46  ;;  %v14117_v39 = vsel %vm22641_vm8, %v14085_v63, 0.0  ;;  %v14118_v63 = vsel %vm22641_vm8, %v14086_v41, 0.0 }
 0x756   : > { %14169 = vadd.xlane.f32.xlu0 %v14115_v60  ;;  %14167 = vadd.xlane.f32.xlu1 %v14114_v55  ;;  %v14089_v60 = vmul.f32 %v23095_v43, %v23095_v43  ;;  %v14088_v55 = vmul.f32 %v23056_v58, %v23056_v58 }
 0x758   : > { %v14121_v23 = vsel %vm22641_vm8, %v14089_v60, 0.0  ;;  %v14120_v33 = vsel %vm22641_vm8, %v14088_v55, 0.0  ;;  %v14090_v60 = vmul.f32 %v23118_v31, %v23118_v31 }
 0x75a   : > { %14173 = vadd.xlane.f32.xlu0 %v14117_v39  ;;  %14171 = vadd.xlane.f32.xlu1 %v14116_v54  ;;  %v14091_v39 = vmul.f32 %v23073_v48, %v23073_v48  ;;  %v14092_v54 = vmul.f32 %v23099_v22, %v23099_v22 }
 0x75c   : > { %v14123_v41 = vsel %vm22641_vm8, %v14091_v39, 0.0 }
 0x75e   : > { %14177 = vadd.xlane.f32.xlu0 %v14119_v20  ;;  %14175 = vadd.xlane.f32.xlu1 %v14118_v63  ;;  %v14124_v20 = vsel %vm22641_vm8, %v14092_v54, 0.0  ;;  %v14122_v63 = vsel %vm22641_vm8, %v14090_v60, 0.0 }
 0x762   : > { %14181 = vadd.xlane.f32.xlu0 %v14121_v23  ;;  %14179 = vadd.xlane.f32.xlu1 %v14120_v33 }
 0x766   : > { %14185 = vadd.xlane.f32.xlu0 %v14123_v41  ;;  %14187 = vadd.xlane.f32.xlu1 %v14124_v20 }
 0x76a   : > { %14183 = vadd.xlane.f32.xlu1 %v14122_v63 }
 0x773   : > { %v13786_v55 = vpop.xlane.xlu0 %13785 }
 0x774   : > { %v13843_v23 = vsub.f32 %v22611_v8, %v13786_v55 }
 0x776   : > { %v13881_v22 = vmul.f32 1.442695, %v13843_v23  ;;  %v13788_v33 = vpop.xlane.xlu1 %13787 }
 0x777   : > { %v13844_v39 = vsub.f32 %v22628_v40, %v13788_v33  ;;  %v13782_v48 = vpop.xlane.xlu0 %13781 }
 0x778   : > { %19587 = vpow2.f32 %v13881_v22  ;;  %v13841_v54 = vsub.f32 %v22635_v7, %v13782_v48 }
 0x779   : > { %v13883_v41 = vmul.f32 1.442695, %v13844_v39 }
 0x77a   : > { %v13877_v43 = vmul.f32 1.442695, %v13841_v54  ;;  %v13784_v20 = vpop.xlane.xlu1 %13783 }
 0x77b   : > { %19589 = vpow2.f32 %v13883_v41  ;;  %v23175_v31 = vpop.xlane.xlu0 %14137  ;;  %v13842_v60 = vsub.f32 %v22665_v30, %v13784_v20 }
 0x77c   : > { %19591 = vpow2.f32 %v13877_v43  ;;  %vm14233_vm9 = vcmp.eq.f32.partialorder %v23175_v31, inf  ;;  %vm14235_vm12 = vcmp.eq.f32.partialorder %v23175_v31, 0.0 }
 0x77d   : > { %v13879_v63 = vmul.f32 1.442695, %v13842_v60 }
 0x77e   : > { %v23180_v8 = vpop.xlane.xlu1 %14139 }
 0x77f   : > { %v23178_v61 = vpop.xlane.xlu0 %14133  ;;  %19593 = vpow2.f32 %v13879_v63  ;;  %vm14240_vm11 = vcmp.eq.f32.partialorder %v23180_v8, inf  ;;  %vm14242_vm14 = vcmp.eq.f32.partialorder %v23180_v8, 0.0 }
 0x780   : > { %vm14219_vm10 = vcmp.eq.f32.partialorder %v23178_v61, inf  ;;  %vm14221_vm13 = vcmp.eq.f32.partialorder %v23178_v61, 0.0 }
 0x782   : > { %v13778_v55 = vpop.xlane.xlu1 %13777 }
 0x783   : > { %v13794_v22 = vpop.xlane.xlu0 %13793  ;;  %v13839_v48 = vsub.f32 %v22698_v32, %v13778_v55 }
 0x784   : > { %v13847_v7 = vsub.f32 %v22693_v1, %v13794_v22 }
 0x785   : > { %v23182_v40 = vpop.eup %19587  ;;  %v13873_v43 = vmul.f32 1.442695, %v13839_v48 }
 0x786   : > { %13945 = vadd.xlane.f32.xlu0 %v23182_v40  ;;  %v23189_v30 = vpop.xlane.xlu1 %14135  ;;  %v13889_v54 = vmul.f32 1.442695, %v13847_v7 }
 0x787   : > { %v13774_v23 = vpop.xlane.xlu0 %13773  ;;  %19595 = vpow2.f32 %v13873_v43  ;;  %vm14226_vm15 = vcmp.eq.f32.partialorder %v23189_v30, inf  ;;  %vm14228_vm0 = vcmp.eq.f32.partialorder %v23189_v30, 0.0 }
 0x788   : > { %v23187_v33 = vpop.eup %19589  ;;  %v13837_v41 = vsub.f32 %v22723_v49, %v13774_v23  ;;  %19597 = vpow2.f32 %v13889_v54 }
 0x789   : > { %v23191_v39 = vpop.eup %19591  ;;  %13947 = vadd.xlane.f32.xlu1 %v23187_v33 }
 0x78a   : > { %13941 = vadd.xlane.f32.xlu0 %v23191_v39  ;;  %v13869_v60 = vmul.f32 1.442695, %v13837_v41 }
 0x78b   : > { %v13790_v1 = vpop.xlane.xlu0 %13789  ;;  %v13780_v32 = vpop.xlane.xlu1 %13779 }
 0x78c   : > { %v13845_v20 = vsub.f32 %v22745_v38, %v13790_v1  ;;  %v13840_v63 = vsub.f32 %v22756_v25, %v13780_v32  ;;  %v23198_v22 = vpop.eup %19593  ;;  %19599 = vpow2.f32 %v13869_v60 }
 0x78d   : > { %13943 = vadd.xlane.f32.xlu1 %v23198_v22 }
 0x78e   : > { %v13875_v55 = vmul.f32 1.442695, %v13840_v63  ;;  %v13885_v49 = vmul.f32 1.442695, %v13845_v20 }
 0x78f   : > { %v23201_v7 = vpop.xlane.xlu0 %14129  ;;  %v13796_v48 = vpop.xlane.xlu1 %13795 }
 0x790   : > { %v13848_v43 = vsub.f32 %v22782_v27, %v13796_v48  ;;  %19601 = vpow2.f32 %v13875_v55  ;;  %vm14205_vm1 = vcmp.eq.f32.partialorder %v23201_v7, inf  ;;  %vm14207_vm3 = vcmp.eq.f32.partialorder %v23201_v7, 0.0 }
 0x791   : > { %19603 = vpow2.f32 %v13885_v49 }
 0x792   : > { %v13891_v23 = vmul.f32 1.442695, %v13848_v43 }
 0x793   : > { %v23204_v58 = vpop.xlane.xlu0 %14145  ;;  %v13792_v38 = vpop.xlane.xlu1 %13791 }
 0x794   : > { %19605 = vpow2.f32 %v13891_v23  ;;  %v23206_v25 = vpop.eup %19595  ;;  %v13846_v63 = vsub.f32 %v22809_v0, %v13792_v38  ;;  %vm14261_vm4 = vcmp.eq.f32.partialorder %v23204_v58, inf  ;;  %vm14263_vm6 = vcmp.eq.f32.partialorder %v23204_v58, 0.0 }
 0x795   : > { %13937 = vadd.xlane.f32.xlu0 %v23206_v25  ;;  %v23213_v1 = vpop.eup %19597 }
 0x796   : > { %v13887_v56 = vmul.f32 1.442695, %v13846_v63 }
 0x797   : > { %v23209_v54 = vpop.xlane.xlu0 %14125  ;;  %v23211_v41 = vpop.xlane.xlu1 %14131 }
 0x798   : > { %vm14191_vm5 = vcmp.eq.f32.partialorder %v23209_v54, inf  ;;  %vm14193_vm7 = vcmp.eq.f32.partialorder %v23209_v54, 0.0 }
 0x799   : > { %13953 = vadd.xlane.f32.xlu0 %v23213_v1  ;;  %v23220_v20 = vpop.eup %19599 }
 0x79b   : > { %v23216_v27 = vpop.xlane.xlu0 %14141  ;;  %v23218_v32 = vpop.xlane.xlu1 %14147 }
 0x79d   : > { %v23222_v60 = vpop.eup %19601  ;;  %13933 = vadd.xlane.f32.xlu0 %v23220_v20 }
 0x79e   : > { %13939 = vadd.xlane.f32.xlu1 %v23222_v60  ;;  %v23230_v43 = vpop.eup %19603 }
 0x79f   : > { %v13776_v55 = vpop.xlane.xlu0 %13775  ;;  %v23227_v49 = vpop.xlane.xlu1 %14127  ;;  %24158 = vst [vmem:[#allocation33_spill] sm:$0xff] %v23230_v43 }
 0x7a0   : > { %v13838_v48 = vsub.f32 %v22869_v18, %v13776_v55 }
 0x7a1   : > { %v23232_v23 = vpop.eup %19605  ;;  %13949 = vadd.xlane.f32.xlu0 %v23230_v43 }
 0x7a2   : > { %24159 = vst [vmem:[#allocation16_spill] sm:$0xff] %v23232_v23  ;;  %v13871_v21 = vmul.f32 1.442695, %v13838_v48  ;;  %13955 = vadd.xlane.f32.xlu1 %v23232_v23 }
 0x7a3   : > { %v13802_v14 = vpop.xlane.xlu0 %13801  ;;  %v23236_v0 = vpop.xlane.xlu1 %14143 }
 0x7a4   : > { %19607 = vpow2.f32 %v13871_v21  ;;  %v13851_v38 = vsub.f32 %v22887_v9, %v13802_v14 }
 0x7a5   : > { %19609 = vpow2.f32 %v13887_v56 }
 0x7a6   : > { %v13897_v3 = vmul.f32 1.442695, %v13851_v38 }
 0x7a7   : > { %v13798_v6 = vpop.xlane.xlu0 %13797  ;;  %v13804_v18 = vpop.xlane.xlu1 %13803 }
 0x7a8   : > { %19611 = vpow2.f32 %v13897_v3  ;;  %v13852_v55 = vsub.f32 %v22906_v52, %v13804_v18  ;;  %v13849_v48 = vsub.f32 %v22899_v19, %v13798_v6 }
 0x7aa   : > { %v13899_v63 = vmul.f32 1.442695, %v13852_v55  ;;  %v13893_v43 = vmul.f32 1.442695, %v13849_v48 }
 0x7ab   : > { %v23241_v13 = vpop.xlane.xlu0 %14153  ;;  %v13800_v21 = vpop.xlane.xlu1 %13799 }
 0x7ac   : > { %19613 = vpow2.f32 %v13899_v63  ;;  %v13850_v23 = vsub.f32 %v22919_v35, %v13800_v21 }
 0x7ad   : > { %19615 = vpow2.f32 %v13893_v43 }
 0x7ae   : > { %v13895_v62 = vmul.f32 1.442695, %v13850_v23 }
 0x7af   : > { %v23244_v14 = vpop.xlane.xlu0 %14149  ;;  %v23246_v9 = vpop.xlane.xlu1 %14155 }
 0x7b0   : > { %19617 = vpow2.f32 %v13895_v62 }
 0x7b1   : > { %v23248_v3 = vpop.eup %19607 }
 0x7b2   : > { %13935 = vadd.xlane.f32.xlu1 %v23248_v3  ;;  %v23251_v19 = vpop.eup %19609 }
 0x7b3   : > { %v13810_v6 = vpop.xlane.xlu0 %13809  ;;  %24160 = vst [vmem:[#allocation37_spill] sm:$0xff] %v23251_v19  ;;  %v23253_v52 = vpop.xlane.xlu1 %14151 }
 0x7b4   : > { %v13855_v56 = vsub.f32 %v22942_v11, %v13810_v6 }
 0x7b5   : > { %v23256_v38 = vpop.eup %19611 }
 0x7b6   : > { %24161 = vst [vmem:[#allocation21_spill] sm:$0xff] %v23256_v38  ;;  %v13905_v35 = vmul.f32 1.442695, %v13855_v56  ;;  %13951 = vadd.xlane.f32.xlu1 %v23251_v19  ;;  %13961 = vadd.xlane.f32.xlu0 %v23256_v38 }
 0x7b7   : > { %v13806_v43 = vpop.xlane.xlu0 %13805  ;;  %v13812_v23 = vpop.xlane.xlu1 %13811 }
 0x7b8   : > { %19619 = vpow2.f32 %v13905_v35  ;;  %v13853_v62 = vsub.f32 %v22958_v45, %v13806_v43  ;;  %v13856_v18 = vsub.f32 %v22965_v50, %v13812_v23 }
 0x7b9   : > { %v23262_v55 = vpop.eup %19613 }
 0x7ba   : > { %24162 = vst [vmem:[#allocation8_spill] sm:$0xff] %v23262_v55  ;;  %v13901_v48 = vmul.f32 1.442695, %v13853_v62  ;;  %v13907_v63 = vmul.f32 1.442695, %v13856_v18  ;;  %13963 = vadd.xlane.f32.xlu1 %v23262_v55  ;;  %v23267_v21 = vpop.eup %19615 }
 0x7bb   : > { %v23265_v11 = vpop.xlane.xlu0 %14161  ;;  %24163 = vst [vmem:[#allocation26_spill] sm:$0xff] %v23267_v21  ;;  %v13808_v6 = vpop.xlane.xlu1 %13807  ;;  %13957 = vadd.xlane.f32.xlu0 %v23267_v21 }
 0x7bc   : > { %19621 = vpow2.f32 %v13901_v48  ;;  %v13854_v56 = vsub.f32 %v22979_v24, %v13808_v6 }
 0x7bd   : > { %19623 = vpow2.f32 %v13907_v63  ;;  %v23271_v45 = vpop.eup %19617 }
 0x7be   : > { %24164 = vst [vmem:[#allocation25_spill] sm:$0xff] %v23271_v45  ;;  %v13903_v50 = vmul.f32 1.442695, %v13854_v56  ;;  %13959 = vadd.xlane.f32.xlu1 %v23271_v45 }
 0x7bf   : > { %v23273_v35 = vpop.xlane.xlu0 %14157  ;;  %v23276_v43 = vpop.xlane.xlu1 %14163 }
 0x7c0   : > { %19625 = vpow2.f32 %v13903_v50 }
 0x7c3   : > { %v13818_v23 = vpop.xlane.xlu0 %13817  ;;  %v23278_v62 = vpop.xlane.xlu1 %14159 }
 0x7c4   : > { %v13859_v18 = vsub.f32 %v23002_v42, %v13818_v23 }
 0x7c5   : > { %v23281_v48 = vpop.eup %19619 }
 0x7c6   : > { %24165 = vst [vmem:[#allocation7_spill] sm:$0xff] %v23281_v48  ;;  %13969 = vadd.xlane.f32.xlu0 %v23281_v48  ;;  %v13913_v63 = vmul.f32 1.442695, %v13859_v18 }
 0x7c7   : > { %v13814_v24 = vpop.xlane.xlu0 %13813  ;;  %v13820_v6 = vpop.xlane.xlu1 %13819 }
 0x7c8   : > { %v13860_v21 = vsub.f32 %v23025_v53, %v13820_v6  ;;  %v13857_v45 = vsub.f32 %v23020_v36, %v13814_v24  ;;  %19627 = vpow2.f32 %v13913_v63 }
 0x7c9   : > { %v23284_v56 = vpop.eup %19621 }
 0x7ca   : > { %v23288_v55 = vpop.eup %19623  ;;  %13965 = vadd.xlane.f32.xlu0 %v23284_v56  ;;  %v13915_v50 = vmul.f32 1.442695, %v13860_v21  ;;  %v13909_v38 = vmul.f32 1.442695, %v13857_v45 }
 0x7cb   : > { %24166 = vst [vmem:[#allocation5_spill] sm:$0xff] %v23288_v55  ;;  %13971 = vadd.xlane.f32.xlu1 %v23288_v55  ;;  %v13826_v42 = vpop.xlane.xlu0 %13825  ;;  %v13816_v23 = vpop.xlane.xlu1 %13815 }
 0x7cc   : > { %v13863_v18 = vsub.f32 %v23042_v59, %v13826_v42  ;;  %19629 = vpow2.f32 %v13915_v50  ;;  %v13858_v48 = vsub.f32 %v23047_v51, %v13816_v23 }
 0x7cd   : > { %v23294_v19 = vpop.eup %19625  ;;  %19631 = vpow2.f32 %v13909_v38 }
 0x7ce   : > { %24167 = vst [vmem:[#allocation38_spill] sm:$0xff] %v23294_v19  ;;  %v13921_v36 = vmul.f32 1.442695, %v13863_v18  ;;  %v13911_v53 = vmul.f32 1.442695, %v13858_v48 }
 0x7cf   : > { %13967 = vadd.xlane.f32.xlu1 %v23294_v19  ;;  %v13822_v24 = vpop.xlane.xlu0 %13821  ;;  %v13828_v21 = vpop.xlane.xlu1 %13827 }
 0x7d0   : > { %19633 = vpow2.f32 %v13911_v53  ;;  %v13864_v45 = vsub.f32 %v23069_v10, %v13828_v21  ;;  %v13861_v63 = vsub.f32 %v23064_v34, %v13822_v24 }
 0x7d1   : > { %19635 = vpow2.f32 %v13921_v36 }
 0x7d2   : > { %v13923_v6 = vmul.f32 1.442695, %v13864_v45  ;;  %v13917_v59 = vmul.f32 1.442695, %v13861_v63 }
 0x7d3   : > { %v13834_v50 = vpop.xlane.xlu0 %13833  ;;  %v13824_v42 = vpop.xlane.xlu1 %13823 }
 0x7d4   : > { %19637 = vpow2.f32 %v13923_v6  ;;  %v13862_v51 = vsub.f32 %v23091_v16, %v13824_v42  ;;  %v13867_v23 = vsub.f32 %v23086_v47, %v13834_v50 }
 0x7d5   : > { %19639 = vpow2.f32 %v13917_v59  ;;  %v23302_v19 = vpop.eup %19627 }
 0x7d6   : > { %v13919_v38 = vmul.f32 1.442695, %v13862_v51  ;;  %24168 = vst [vmem:[#allocation39_spill] sm:$0xff] %v23302_v19  ;;  %13977 = vadd.xlane.f32.xlu0 %v23302_v19  ;;  %v13929_v16 = vmul.f32 1.442695, %v13867_v23 }
 0x7d7   : > { %v13830_v48 = vpop.xlane.xlu0 %13829  ;;  %v13836_v18 = vpop.xlane.xlu1 %13835 }
 0x7d8   : > { %v13865_v53 = vsub.f32 %v23106_v28, %v13830_v48  ;;  %19641 = vpow2.f32 %v13919_v38  ;;  %v13868_v47 = vsub.f32 %v23113_v37, %v13836_v18 }
 0x7d9   : > { %v23304_v10 = vpop.eup %19629 }
 0x7da   : > { %24169 = vst [vmem:[#allocation40_spill] sm:$0xff] %v23304_v10  ;;  %v13925_v34 = vmul.f32 1.442695, %v13865_v53  ;;  %v23307_v36 = vpop.eup %19631  ;;  %13979 = vadd.xlane.f32.xlu1 %v23304_v10  ;;  %v13931_v6 = vmul.f32 1.442695, %v13868_v47 }
 0x7db   : > { %24170 = vst [vmem:[#allocation41_spill] sm:$0xff] %v23307_v36  ;;  %v13832_v24 = vpop.xlane.xlu1 %13831  ;;  %13973 = vadd.xlane.f32.xlu0 %v23307_v36  ;;  %v23332_v42 = vpop.xlane.xlu0 %14165 }
 0x7dc   : > { %19643 = vpow2.f32 %v13925_v34  ;;  %v13866_v21 = vsub.f32 %v23127_v46, %v13832_v24 }
 0x7dd   : > { %v23312_v28 = vpop.eup %19633  ;;  %19645 = vpow2.f32 %v13929_v16 }
 0x7de   : > { %24171 = vst [vmem:[#allocation42_spill] sm:$0xff] %v23312_v28  ;;  %v23315_v45 = vpop.eup %19635  ;;  %v13927_v63 = vmul.f32 1.442695, %v13866_v21  ;;  %13975 = vadd.xlane.f32.xlu1 %v23312_v28 }
 0x7df   : > { %24172 = vst [vmem:[#allocation43_spill] sm:$0xff] %v23315_v45  ;;  %13985 = vadd.xlane.f32.xlu0 %v23315_v45  ;;  %v23342_v48 = vpop.xlane.xlu1 %14167  ;;  %v23346_v18 = vpop.xlane.xlu0 %14169 }
 0x7e0   : > { %19647 = vpow2.f32 %v13927_v63 }
 0x7e1   : > { %v23318_v59 = vpop.eup %19637  ;;  %19649 = vpow2.f32 %v13931_v6 }
 0x7e2   : > { %24173 = vst [vmem:[#allocation44_spill] sm:$0xff] %v23318_v59  ;;  %13987 = vadd.xlane.f32.xlu1 %v23318_v59  ;;  %v23322_v37 = vpop.eup %19639  ;;  %19651 = vrsqrt.f32 %v23175_v31  ;;  %v14243_v59 = vand.u32 2147483648, %v23180_v8 }
 0x7e3   : > { %24174 = vst [vmem:[#allocation45_spill] sm:$0xff] %v23322_v37  ;;  %13981 = vadd.xlane.f32.xlu0 %v23322_v37  ;;  %19653 = vrsqrt.f32 %v23178_v61  ;;  %v23350_v53 = vpop.xlane.xlu1 %14171  ;;  %v23354_v34 = vpop.xlane.xlu0 %14173 }
 0x7e4   : > { %19655 = vrsqrt.f32 %v23180_v8 }
 0x7e5   : > { %v23325_v46 = vpop.eup %19641  ;;  %19657 = vrsqrt.f32 %v23189_v30 }
 0x7e6   : > { %24175 = vst [vmem:[#allocation46_spill] sm:$0xff] %v23325_v46  ;;  %13983 = vadd.xlane.f32.xlu1 %v23325_v46  ;;  %19659 = vrsqrt.f32 %v23201_v7  ;;  %v14236_v46 = vand.u32 2147483648, %v23175_v31 }
 0x7e7   : > { %19661 = vrsqrt.f32 %v23204_v58  ;;  %v23358_v63 = vpop.xlane.xlu1 %14175 }
 0x7e8   : > { %19663 = vrsqrt.f32 %v23209_v54 }
 0x7e9   : > { %v23328_v50 = vpop.eup %19643  ;;  %19665 = vrsqrt.f32 %v23211_v41 }
 0x7ea   : > { %24176 = vst [vmem:[#allocation47_spill] sm:$0xff] %v23328_v50  ;;  %13989 = vadd.xlane.f32.xlu0 %v23328_v50  ;;  %v23334_v51 = vpop.eup %19645  ;;  %19667 = vrsqrt.f32 %v23216_v27 }
 0x7eb   : > { %24177 = vst [vmem:[#allocation48_spill] sm:$0xff] %v23334_v51  ;;  %v23374_v37 = vpop.xlane.xlu1 %14179  ;;  %19669 = vrsqrt.f32 %v23218_v32 }
 0x7ed   : > { %v23337_v38 = vpop.eup %19647 }
 0x7ee   : > { %24178 = vst [vmem:[#allocation49_spill] sm:$0xff] %v23337_v38  ;;  %13993 = vadd.xlane.f32.xlu0 %v23334_v51  ;;  %13991 = vadd.xlane.f32.xlu1 %v23337_v38  ;;  %v23344_v23 = vpop.eup %19649  ;;  %v23362_v38 = vpop.xlane.xlu0 %14177 }
 0x7ef   : > { %24179 = vst [vmem:[#allocation50_spill] sm:$0xff] %v23344_v23  ;;  %v19652_v16 = vpop.eup %19651 }
 0x7f0   : > { %v19654_v24 = vpop.eup %19653  ;;  %v14232_v21 = vmul.f32 %v19652_v16, %v23175_v31 }
 0x7f1   : > { %v19656_v47 = vpop.eup %19655  ;;  %v14218_v6 = vmul.f32 %v19654_v24, %v23178_v61 }
 0x7f2   : > { %13995 = vadd.xlane.f32.xlu1 %v23344_v23  ;;  %v14239_v23 = vmul.f32 %v19656_v47, %v23180_v8  ;;  %v14234_v51 = vsel %vm14233_vm9, %v23175_v31, %v14232_v21  ;;  %v19658_v50 = vpop.eup %19657  ;;  %v14222_v47 = vand.u32 2147483648, %v23178_v61  ;;  %vm14212_vm9 = vcmp.eq.f32.partialorder %v23211_v41, inf }
 0x7f3   : > { %v14220_v16 = vsel %vm14219_vm10, %v23178_v61, %v14218_v6  ;;  %v14237_v21 = vsel %vm14235_vm12, %v14236_v46, %v14234_v51  ;;  %v19660_v45 = vpop.eup %19659  ;;  %v14225_v36 = vmul.f32 %v19658_v50, %v23189_v30  ;;  %v23380_v6 = vpop.xlane.xlu0 %14181  ;;  %vm14214_vm10 = vcmp.eq.f32.partialorder %v23211_v41, 0.0 }
 0x7f4   : > { %v14241_v24 = vsel %vm14240_vm11, %v23180_v8, %v14239_v23  ;;  %v14223_v28 = vsel %vm14221_vm13, %v14222_v47, %v14220_v16  ;;  %v19662_v31 = vpop.eup %19661  ;;  %v14419_v19 = vmax.f32 %v14237_v21, 1e-12  ;;  %v14204_v46 = vmul.f32 %v19660_v45, %v23201_v7  ;;  %v23388_v50 = vpop.xlane.xlu1 %14187 }
 0x7f5   : > { %v14244_v10 = vsel %vm14242_vm14, %v14243_v59, %v14241_v24  ;;  %v19664_v23 = vpop.eup %19663  ;;  %v14417_v55 = vmax.f32 %v14223_v28, 1e-12  ;;  %v14227_v51 = vsel %vm14226_vm15, %v23189_v30, %v14225_v36  ;;  %v14260_v8 = vmul.f32 %v19662_v31, %v23204_v58 }
 0x7f6   : > { %v14420_v61 = vmax.f32 %v14244_v10, 1e-12  ;;  %v14229_v59 = vand.u32 2147483648, %v23189_v30  ;;  %v14190_v16 = vmul.f32 %v19664_v23, %v23209_v54  ;;  %19671 = vrcp.f32 %v14419_v19  ;;  %v19666_v30 = vpop.eup %19665 }
 0x7f7   : > { %v23395_v10 = vpop.xlane.xlu0 %14185  ;;  %19673 = vrcp.f32 %v14417_v55  ;;  %v14206_v28 = vsel %vm14205_vm1, %v23201_v7, %v14204_v46  ;;  %v14208_v45 = vand.u32 2147483648, %v23201_v7  ;;  %v14262_v24 = vsel %vm14261_vm4, %v23204_v58, %v14260_v8  ;;  %v19668_v7 = vpop.eup %19667 }
 0x7f8   : > { %v14230_v36 = vsel %vm14228_vm0, %v14229_v59, %v14227_v51  ;;  %19675 = vrcp.f32 %v14420_v61  ;;  %v14264_v19 = vand.u32 2147483648, %v23204_v58  ;;  %v14192_v47 = vsel %vm14191_vm5, %v23209_v54, %v14190_v16  ;;  %v23410_v23 = vpop.xlane.xlu1 %14183 }
 0x7f9   : > { %19677 = vrsqrt.f32 %v23227_v49  ;;  %v14418_v55 = vmax.f32 %v14230_v36, 1e-12  ;;  %v14209_v21 = vsel %vm14207_vm3, %v14208_v45, %v14206_v28  ;;  %v14194_v31 = vand.u32 2147483648, %v23209_v54 }
 0x7fa   : > { %19679 = vrsqrt.f32 %v23236_v0  ;;  %v14265_v61 = vsel %vm14263_vm6, %v14264_v19, %v14262_v24  ;;  %v14211_v58 = vmul.f32 %v19666_v30, %v23211_v41  ;;  %v14415_v8 = vmax.f32 %v14209_v21, 1e-12  ;;  %v19670_v24 = vpop.eup %19669 }
 0x7fb   : > { %v14195_v51 = vsel %vm14193_vm7, %v14194_v31, %v14192_v47  ;;  %v14423_v59 = vmax.f32 %v14265_v61, 1e-12  ;;  %v14215_v54 = vand.u32 2147483648, %v23211_v41  ;;  %v14246_v30 = vmul.f32 %v19668_v7, %v23216_v27 }
 0x7fc   : > { %v14413_v36 = vmax.f32 %v14195_v51, 1e-12  ;;  %v14213_v45 = vsel %vm14212_vm9, %v23211_v41, %v14211_v58  ;;  %v14267_v21 = vmul.f32 %v19670_v24, %v23218_v32  ;;  %vm14247_vm11 = vcmp.eq.f32.partialorder %v23216_v27, inf }
 0x7fd   : > { %v14216_v47 = vsel %vm14214_vm10, %v14215_v54, %v14213_v45  ;;  %vm14249_vm12 = vcmp.eq.f32.partialorder %v23216_v27, 0.0  ;;  %v14248_v58 = vsel %vm14247_vm11, %v23216_v27, %v14246_v30  ;;  %vm14268_vm13 = vcmp.eq.f32.partialorder %v23218_v32, inf }
 0x7fe   : > { %v14416_v41 = vmax.f32 %v14216_v47, 1e-12  ;;  %vm14270_vm14 = vcmp.eq.f32.partialorder %v23218_v32, 0.0  ;;  %v14269_v7 = vsel %vm14268_vm13, %v23218_v32, %v14267_v21  ;;  %vm14198_vm15 = vcmp.eq.f32.partialorder %v23227_v49, inf }
 0x7ff   : > { %vm14200_vm0 = vcmp.eq.f32.partialorder %v23227_v49, 0.0  ;;  %vm14254_vm1 = vcmp.eq.f32.partialorder %v23236_v0, inf  ;;  %vm14256_vm3 = vcmp.eq.f32.partialorder %v23236_v0, 0.0  ;;  %vm14289_vm4 = vcmp.eq.f32.partialorder %v23241_v13, inf }
 0x800   : > { %vm14275_vm5 = vcmp.eq.f32.partialorder %v23244_v14, inf  ;;  %vm14291_vm6 = vcmp.eq.f32.partialorder %v23241_v13, 0.0  ;;  %vm14296_vm7 = vcmp.eq.f32.partialorder %v23246_v9, inf  ;;  %vm14298_vm9 = vcmp.eq.f32.partialorder %v23246_v9, 0.0 }
 0x801   : > { %vm14277_vm10 = vcmp.eq.f32.partialorder %v23244_v14, 0.0  ;;  %vm14282_vm11 = vcmp.eq.f32.partialorder %v23253_v52, inf  ;;  %vm14317_vm13 = vcmp.eq.f32.partialorder %v23265_v11, inf }
 0x803   : > { %v19672_v19 = vpop.eup %19671 }
 0x804   : > { %v14458_v51 = vmul.f32 %v19672_v19, %v22604_v17 }
 0x806   : > { %v14515_v30 = vsel %vm22641_vm8, %v14458_v51, %v22604_v17 }
 0x80f   : > { %v13946_v46 = vpop.xlane.xlu0 %13945 }
 0x810   : > { %19681 = vrcp.f32 %v13946_v46 }
 0x811   : > { %19683 = vrcp.f32 %v14418_v55  ;;  %v19674_v55 = vpop.eup %19673 }
 0x812   : > { %v13948_v16 = vpop.xlane.xlu1 %13947  ;;  %v19676_v46 = vpop.eup %19675 }
 0x813   : > { %19685 = vrcp.f32 %v13948_v16  ;;  %v13942_v28 = vpop.xlane.xlu0 %13941  ;;  %v19678_v61 = vpop.eup %19677  ;;  %v14460_v19 = vmul.f32 %v19676_v46, %v22620_v57 }
 0x814   : > { %19687 = vrcp.f32 %v13942_v28  ;;  %v14197_v45 = vmul.f32 %v19678_v61, %v23227_v49 }
 0x815   : > { %19689 = vrcp.f32 %v14415_v8  ;;  %v19680_v8 = vpop.eup %19679 }
 0x816   : > { %19691 = vrcp.f32 %v14423_v59  ;;  %v13944_v31 = vpop.xlane.xlu1 %13943  ;;  %v14250_v59 = vand.u32 2147483648, %v23216_v27  ;;  %v14253_v54 = vmul.f32 %v19680_v8, %v23236_v0 }
 0x817   : > { %19693 = vrcp.f32 %v14413_v36  ;;  %v14271_v36 = vand.u32 2147483648, %v23218_v32  ;;  %v14199_v32 = vsel %vm14198_vm15, %v23227_v49, %v14197_v45  ;;  %vm14324_vm15 = vcmp.eq.f32.partialorder %v23276_v43, inf }
 0x818   : > { %19695 = vrsqrt.f32 %v23241_v13  ;;  %v14251_v28 = vsel %vm14249_vm12, %v14250_v59, %v14248_v58  ;;  %v14255_v8 = vsel %vm14254_vm1, %v23236_v0, %v14253_v54  ;;  %v14516_v59 = vsel %vm22641_vm8, %v14460_v19, %v22620_v57 }
 0x819   : > { %19697 = vrcp.f32 %v13944_v31  ;;  %v14272_v27 = vsel %vm14270_vm14, %v14271_v36, %v14269_v7  ;;  %v14421_v61 = vmax.f32 %v14251_v28, 1e-12  ;;  %v14257_v36 = vand.u32 2147483648, %v23236_v0 }
 0x81a   : > { %19699 = vrsqrt.f32 %v23246_v9  ;;  %v14424_v51 = vmax.f32 %v14272_v27, 1e-12  ;;  %vm14284_vm12 = vcmp.eq.f32.partialorder %v23253_v52, 0.0  ;;  %vm14319_vm14 = vcmp.eq.f32.partialorder %v23265_v11, 0.0 }
 0x81b   : > { %19701 = vrsqrt.f32 %v23244_v14  ;;  %vm14305_vm1 = vcmp.eq.f32.partialorder %v23273_v35, 0.0 }
 0x81c   : > { %19703 = vrsqrt.f32 %v23253_v52 }
 0x81d   : > { %v19682_v16 = vpop.eup %19681  ;;  %19705 = vrsqrt.f32 %v23265_v11 }
 0x81e   : > { %v14010_v24 = vmul.f32 %v19682_v16, %v23182_v40  ;;  %19707 = vrcp.f32 %v14416_v41  ;;  %v19684_v47 = vpop.eup %19683  ;;  %v14454_v40 = vmul.f32 %v19674_v55, %v22617_v29  ;;  %v14201_v41 = vand.u32 2147483648, %v23227_v49  ;;  %v13938_v17 = vpop.xlane.xlu0 %13937 }
 0x81f   : > { %19709 = vrsqrt.f32 %v23273_v35 }
 0x820   : > { %v14547_v21 = vsel %vm13737_vm2, %v14010_v24, %v14515_v30  ;;  %v19686_v31 = vpop.eup %19685  ;;  %19711 = vrsqrt.f32 %v23276_v43  ;;  %v14513_v28 = vsel %vm22641_vm8, %v14454_v40, %v22617_v29  ;;  %v14202_v57 = vsel %vm14200_vm0, %v14201_v41, %v14199_v32 }
 0x821   : > { %14579 = vst [vmem:[%s23438_s22 + $0x30] sm:$0xff] %v14547_v21  ;;  %v19688_v46 = vpop.eup %19687  ;;  %v14012_v55 = vmul.f32 %v19686_v31, %v23187_v33  ;;  %19713 = vrcp.f32 %v13938_v17  ;;  %v14456_v24 = vmul.f32 %v19684_v47, %v22654_v4  ;;  %v14258_v30 = vsel %vm14256_vm3, %v14257_v36, %v14255_v8 }
 0x822   : > { %v19690_v58 = vpop.eup %19689  ;;  %v14006_v16 = vmul.f32 %v19688_v46, %v23191_v39  ;;  %19715 = vrcp.f32 %v14421_v61  ;;  %v13954_v54 = vpop.xlane.xlu0 %13953  ;;  %v14292_v29 = vand.u32 2147483648, %v23241_v13  ;;  %v14414_v27 = vmax.f32 %v14202_v57, 1e-12 }
 0x823   : > { %v19692_v7 = vpop.eup %19691  ;;  %v14548_v33 = vsel %vm13737_vm2, %v14012_v55, %v14516_v59  ;;  %19717 = vrcp.f32 %v13954_v54  ;;  %v14299_v47 = vand.u32 2147483648, %v23246_v9  ;;  %v14422_v31 = vmax.f32 %v14258_v30, 1e-12 }
 0x824   : > { %v19694_v45 = vpop.eup %19693  ;;  %14580 = vst [vmem:[%s23438_s22 + $0x38] sm:$0xff] %v14548_v33  ;;  %v14545_v39 = vsel %vm13737_vm2, %v14006_v16, %v14513_v28  ;;  %19719 = vrcp.f32 %v14424_v51  ;;  %v14514_v61 = vsel %vm22641_vm8, %v14456_v24, %v22654_v4  ;;  %v14450_v41 = vmul.f32 %v19690_v58, %v22685_v12 }
 0x825   : > { %v19696_v0 = vpop.eup %19695  ;;  %14577 = vst [vmem:[%s23438_s22 + $0x20] sm:$0xff] %v14545_v39  ;;  %19721 = vrsqrt.f32 %v23278_v62  ;;  %v23501_v55 = vmul.f32 %v19692_v7, %v22682_v2  ;;  %v14278_v4 = vand.u32 2147483648, %v23244_v14  ;;  %v14285_v33 = vand.u32 2147483648, %v23253_v52 }
 0x826   : > { %v19698_v19 = vpop.eup %19697  ;;  %v13934_v17 = vpop.xlane.xlu0 %13933  ;;  %v14288_v32 = vmul.f32 %v19696_v0, %v23241_v13  ;;  %v14511_v28 = vsel %vm22641_vm8, %v14450_v41, %v22685_v12  ;;  %vm14303_vm0 = vcmp.eq.f32.partialorder %v23273_v35, inf  ;;  %vm14326_vm3 = vcmp.eq.f32.partialorder %v23276_v43, 0.0 }
 0x827   : > { %v19700_v49 = vpop.eup %19699  ;;  %v14008_v21 = vmul.f32 %v19698_v19, %v23198_v22  ;;  %v13940_v51 = vpop.xlane.xlu1 %13939  ;;  %19723 = vrcp.f32 %v13934_v17  ;;  %v14519_v0 = vsel %vm22641_vm8, %v23501_v55, %v22682_v2 }
 0x828   : > { %v19702_v40 = vpop.eup %19701  ;;  %v14295_v59 = vmul.f32 %v19700_v49, %v23246_v9  ;;  %19725 = vrcp.f32 %v13940_v51  ;;  %v14290_v24 = vsel %vm14289_vm4, %v23241_v13, %v14288_v32  ;;  %v14446_v49 = vmul.f32 %v19694_v45, %v22708_v5 }
 0x829   : > { %v19704_v46 = vpop.eup %19703  ;;  %v14546_v22 = vsel %vm13737_vm2, %v14008_v21, %v14514_v61  ;;  %19727 = vrcp.f32 %v14414_v27  ;;  %v14274_v16 = vmul.f32 %v19702_v40, %v23244_v14  ;;  %v14293_v40 = vsel %vm14291_vm6, %v14292_v29, %v14290_v24 }
 0x82a   : > { %v19706_v8 = vpop.eup %19705  ;;  %14578 = vst [vmem:[%s23438_s22 + $0x28] sm:$0xff] %v14546_v22  ;;  %19729 = vrcp.f32 %v14422_v31  ;;  %v14281_v36 = vmul.f32 %v19704_v46, %v23253_v52  ;;  %v13950_v57 = vpop.xlane.xlu0 %13949  ;;  %v14297_v12 = vsel %vm14296_vm7, %v23246_v9, %v14295_v59  ;;  %v14320_v45 = vand.u32 2147483648, %v23265_v11 }
 0x82b   : > { %v19708_v58 = vpop.eup %19707  ;;  %v14316_v54 = vmul.f32 %v19706_v8, %v23265_v11  ;;  %v13956_v30 = vpop.xlane.xlu1 %13955  ;;  %19731 = vrcp.f32 %v13950_v57  ;;  %v14276_v27 = vsel %vm14275_vm5, %v23244_v14, %v14274_v16  ;;  %v14300_v17 = vsel %vm14298_vm9, %v14299_v47, %v14297_v12 }
 0x82c   : > { %v19710_v7 = vpop.eup %19709  ;;  %19733 = vrcp.f32 %v13956_v30  ;;  %v14283_v31 = vsel %vm14282_vm11, %v23253_v52, %v14281_v36  ;;  %v14452_v13 = vmul.f32 %v19708_v58, %v22734_v26  ;;  %v14279_v32 = vsel %vm14277_vm10, %v14278_v4, %v14276_v27 }
 0x82d   : > { %v19712_v39 = vpop.eup %19711  ;;  %v14302_v2 = vmul.f32 %v19710_v7, %v23273_v35  ;;  %v14318_v46 = vsel %vm14317_vm13, %v23265_v11, %v14316_v54  ;;  %v14509_v9 = vsel %vm22641_vm8, %v14446_v49, %v22708_v5  ;;  %v14427_v22 = vmax.f32 %v14293_v40, 1e-12  ;;  %v24181_v49 = vld [vmem:[#allocation32_spill] sm:$0xff] }
 0x82e   : > { %v19714_v19 = vpop.eup %19713  ;;  %v14323_v61 = vmul.f32 %v19712_v39, %v23276_v43  ;;  %v14286_v55 = vsel %vm14284_vm12, %v14285_v33, %v14283_v31  ;;  %v14428_v8 = vmax.f32 %v14300_v17, 1e-12  ;;  %v14321_v59 = vsel %vm14319_vm14, %v14320_v45, %v14318_v46 }
 0x82f   : > { %v14002_v21 = vmul.f32 %v19714_v19, %v23206_v25  ;;  %v19716_v41 = vpop.eup %19715  ;;  %v14304_v51 = vsel %vm14303_vm0, %v23273_v35, %v14302_v2  ;;  %v14306_v58 = vand.u32 2147483648, %v23273_v35  ;;  %v14425_v5 = vmax.f32 %v14279_v32, 1e-12 }
 0x830   : > { %v19718_v29 = vpop.eup %19717  ;;  %v14325_v4 = vsel %vm14324_vm15, %v23276_v43, %v14323_v61  ;;  %v14327_v7 = vand.u32 2147483648, %v23276_v43  ;;  %v14426_v33 = vmax.f32 %v14286_v55, 1e-12  ;;  %v14512_v11 = vsel %vm22641_vm8, %v14452_v13, %v22734_v26 }
 0x831   : > { %v14543_v25 = vsel %vm13737_vm2, %v14002_v21, %v14511_v28  ;;  %v19720_v47 = vpop.eup %19719  ;;  %v14018_v14 = vmul.f32 %v19718_v29, %v23213_v1  ;;  %v14307_v1 = vsel %vm14305_vm1, %v14306_v58, %v14304_v51  ;;  %19735 = vrcp.f32 %v14427_v22  ;;  %v24184_v58 = vld [vmem:[#allocation36_spill] sm:$0xff] }
 0x832   : > { %14575 = vst [vmem:[%s23438_s22 + $0x10] sm:$0xff] %v14543_v25  ;;  %v19722_v16 = vpop.eup %19721  ;;  %v14431_v57 = vmax.f32 %v14321_v59, 1e-12  ;;  %v14328_v39 = vsel %vm14326_vm3, %v14327_v7, %v14325_v4  ;;  %19737 = vrcp.f32 %v14428_v8  ;;  %v14429_v12 = vmax.f32 %v14307_v1, 1e-12 }
 0x833   : > { %v14551_v52 = vsel %vm13737_vm2, %v14018_v14, %v14519_v0  ;;  %v14309_v54 = vmul.f32 %v19722_v16, %v23278_v62  ;;  %v24180_v0 = vld [vmem:[#allocation30_spill] sm:$0xff]  ;;  %19739 = vrcp.f32 %v14425_v5  ;;  %v14468_v27 = vmul.f32 %v19720_v47, %v24181_v49 }
 0x834   : > { %v19724_v36 = vpop.eup %19723  ;;  %14583 = vst [vmem:[%s23438_s22 + $0x50] sm:$0xff] %v14551_v52  ;;  %v14462_v30 = vmul.f32 %v19716_v41, %v24180_v0  ;;  %19741 = vrcp.f32 %v14426_v33  ;;  %vm14310_vm4 = vcmp.eq.f32.partialorder %v23278_v62, inf  ;;  %v24183_v41 = vld [vmem:[#allocation16_spill] sm:$0xff]  ;;  %v14313_v25 = vand.u32 2147483648, %v23278_v62  ;;  %v24185_v52 = vld [vmem:[#allocation34_spill] sm:$0xff]  ;;  %v24186_v33 = vld [vmem:[#allocation31_spill] sm:$0xff] }
 0x835   : > { %v19726_v28 = vpop.eup %19725  ;;  %v13998_v35 = vmul.f32 %v19724_v36, %v23220_v20  ;;  %v14432_v20 = vmax.f32 %v14328_v39, 1e-12  ;;  %19743 = vrcp.f32 %v14431_v57  ;;  %v14311_v61 = vsel %vm14310_vm4, %v23278_v62, %v14309_v54 }
 0x836   : > { %v19728_v24 = vpop.eup %19727  ;;  %v14004_v43 = vmul.f32 %v19726_v28, %v23222_v60  ;;  %v24182_v60 = vld [vmem:[#allocation33_spill] sm:$0xff]  ;;  %v14517_v46 = vsel %vm22641_vm8, %v14462_v30, %v24180_v0  ;;  %v14520_v13 = vsel %vm22641_vm8, %v14468_v27, %v24181_v49  ;;  %vm14312_vm5 = vcmp.eq.f32.partialorder %v23278_v62, 0.0 }
 0x837   : > { %v19730_v19 = vpop.eup %19729  ;;  %v14541_v26 = vsel %vm13737_vm2, %v13998_v35, %v14509_v9  ;;  %v14314_v9 = vsel %vm14312_vm5, %v14313_v25, %v14311_v61  ;;  %v14448_v16 = vmul.f32 %v19728_v24, %v24184_v58  ;;  %v24188_v24 = vld [vmem:[#allocation11_spill] sm:$0xff]  ;;  %vm14331_vm6 = vcmp.eq.f32.partialorder %v23332_v42, inf }
 0x838   : > { %v19732_v2 = vpop.eup %19731  ;;  %v14544_v21 = vsel %vm13737_vm2, %v14004_v43, %v14512_v11  ;;  %14573 = vst [vmem:[%s23438_s22] sm:$0xff] %v14541_v26  ;;  %v14430_v55 = vmax.f32 %v14314_v9, 1e-12  ;;  %v14464_v36 = vmul.f32 %v19730_v19, %v24185_v52  ;;  %v24187_v11 = vld [vmem:[#allocation10_spill] sm:$0xff]  ;;  %v14334_v61 = vand.u32 2147483648, %v23332_v42 }
 0x839   : > { %v19734_v40 = vpop.eup %19733  ;;  %14576 = vst [vmem:[%s23438_s22 + $0x18] sm:$0xff] %v14544_v21  ;;  %v14014_v31 = vmul.f32 %v19732_v2, %v24182_v60  ;;  %v24189_v43 = vld [vmem:[#allocation18_spill] sm:$0xff]  ;;  %v14510_v19 = vsel %vm22641_vm8, %v14448_v16, %v24184_v58  ;;  %v24190_v21 = vld [vmem:[#allocation37_spill] sm:$0xff]  ;;  %vm14345_vm7 = vcmp.eq.f32.partialorder %v23346_v18, inf  ;;  %vm14347_vm9 = vcmp.eq.f32.partialorder %v23346_v18, 0.0  ;;  %v24193_v58 = vld [vmem:[#allocation8_spill] sm:$0xff] }
 0x83a   : > { %v14020_v17 = vmul.f32 %v19734_v40, %v24183_v41  ;;  %v14518_v49 = vsel %vm22641_vm8, %v14464_v36, %v24185_v52  ;;  %v24191_v41 = vld [vmem:[#allocation21_spill] sm:$0xff]  ;;  %vm14338_vm10 = vcmp.eq.f32.partialorder %v23342_v48, inf  ;;  %v14341_v9 = vand.u32 2147483648, %v23342_v48 }
 0x83b   : > { %v13936_v45 = vpop.xlane.xlu1 %13935  ;;  %v14549_v29 = vsel %vm13737_vm2, %v14014_v31, %v14517_v46  ;;  %vm14333_vm11 = vcmp.eq.f32.partialorder %v23332_v42, 0.0  ;;  %vm14340_vm12 = vcmp.eq.f32.partialorder %v23342_v48, 0.0  ;;  %vm14352_vm13 = vcmp.eq.f32.partialorder %v23350_v53, inf }
 0x83c   : > { %19745 = vrcp.f32 %v13936_v45  ;;  %v14552_v32 = vsel %vm13737_vm2, %v14020_v17, %v14520_v13  ;;  %14581 = vst [vmem:[%s23438_s22 + $0x40] sm:$0xff] %v14549_v29  ;;  %v14348_v13 = vand.u32 2147483648, %v23346_v18  ;;  %vm14354_vm14 = vcmp.eq.f32.partialorder %v23350_v53, 0.0 }
 0x83d   : > { %19747 = vrcp.f32 %v14429_v12  ;;  %14584 = vst [vmem:[%s23438_s22 + $0x58] sm:$0xff] %v14552_v32  ;;  %vm14359_vm15 = vcmp.eq.f32.partialorder %v23354_v34, inf  ;;  %vm14373_vm0 = vcmp.eq.f32.partialorder %v23362_v38, inf  ;;  %vm14361_vm1 = vcmp.eq.f32.partialorder %v23354_v34, 0.0 }
 0x83e   : > { %19749 = vrcp.f32 %v14432_v20  ;;  %v19736_v51 = vpop.eup %19735  ;;  %vm14366_vm3 = vcmp.eq.f32.partialorder %v23358_v63, inf  ;;  %vm14375_vm4 = vcmp.eq.f32.partialorder %v23362_v38, 0.0  ;;  %vm14368_vm5 = vcmp.eq.f32.partialorder %v23358_v63, 0.0 }
 0x83f   : > { %19751 = vrsqrt.f32 %v23346_v18  ;;  %v13952_v47 = vpop.xlane.xlu1 %13951  ;;  %v13962_v22 = vpop.xlane.xlu0 %13961  ;;  %v14474_v1 = vmul.f32 %v19736_v51, %v24186_v33 }
 0x840   : > { %19753 = vrcp.f32 %v13952_v47  ;;  %v19738_v14 = vpop.eup %19737 }
 0x841   : > { %19755 = vrcp.f32 %v13962_v22  ;;  %v19740_v8 = vpop.eup %19739  ;;  %v23611_v28 = vmul.f32 %v19738_v14, %v24187_v11  ;;  %v14523_v27 = vsel %vm22641_vm8, %v14474_v1, %v24186_v33  ;;  %v24192_v14 = vld [vmem:[#allocation19_spill] sm:$0xff] }
 0x842   : > { %19757 = vrsqrt.f32 %v23350_v53  ;;  %v19742_v4 = vpop.eup %19741  ;;  %v23617_v54 = vmul.f32 %v19740_v8, %v24188_v24 }
 0x843   : > { %19759 = vrsqrt.f32 %v23332_v42  ;;  %v13964_v62 = vpop.xlane.xlu1 %13963  ;;  %v19744_v5 = vpop.eup %19743  ;;  %v23620_v0 = vmul.f32 %v19742_v4, %v24189_v43  ;;  %v14524_v2 = vsel %vm22641_vm8, %v23611_v28, %v24187_v11 }
 0x844   : > { %19761 = vrsqrt.f32 %v23342_v48  ;;  %v13958_v59 = vpop.xlane.xlu0 %13957  ;;  %v14521_v60 = vsel %vm22641_vm8, %v23617_v54, %v24188_v24  ;;  %v23672_v8 = vmul.f32 %v19744_v5, %v24192_v14  ;;  %v14355_v5 = vand.u32 2147483648, %v23350_v53 }
 0x845   : > { %19763 = vrcp.f32 %v13964_v62  ;;  %v14522_v31 = vsel %vm22641_vm8, %v23620_v0, %v24189_v43  ;;  %v14362_v62 = vand.u32 2147483648, %v23354_v34 }
 0x846   : > { %19765 = vrcp.f32 %v14430_v55 }
 0x847   : > { %19767 = vrcp.f32 %v13958_v59  ;;  %v13960_v57 = vpop.xlane.xlu1 %13959 }
 0x848   : > { %19769 = vrsqrt.f32 %v23362_v38 }
 0x849   : > { %v19746_v7 = vpop.eup %19745  ;;  %19771 = vrsqrt.f32 %v23374_v37 }
 0x84a   : > { %v23613_v39 = vpop.eup %19747  ;;  %v14000_v35 = vmul.f32 %v19746_v7, %v23248_v3  ;;  %19773 = vrcp.f32 %v13960_v57  ;;  %v24194_v57 = vld [vmem:[#allocation26_spill] sm:$0xff] }
 0x84b   : > { %v23622_v30 = vpop.eup %19749  ;;  %19775 = vrsqrt.f32 %v23354_v34 }
 0x84c   : > { %v19752_v12 = vpop.eup %19751  ;;  %v14542_v26 = vsel %vm13737_vm2, %v14000_v35, %v14510_v19  ;;  %19777 = vrsqrt.f32 %v23358_v63  ;;  %v14527_v19 = vsel %vm22641_vm8, %v23672_v8, %v24192_v14 }
 0x84d   : > { %v19754_v3 = vpop.eup %19753  ;;  %14574 = vst [vmem:[%s23438_s22 + $0x8] sm:$0xff] %v14542_v26  ;;  %v14344_v47 = vmul.f32 %v19752_v12, %v23346_v18  ;;  %v24195_v12 = vld [vmem:[#allocation13_spill] sm:$0xff] }
 0x84e   : > { %v19756_v20 = vpop.eup %19755  ;;  %v14016_v40 = vmul.f32 %v19754_v3, %v24190_v21  ;;  %v23699_v26 = vmul.f32 %v23622_v30, %v24195_v12  ;;  %v24196_v3 = vld [vmem:[#allocation12_spill] sm:$0xff]  ;;  %v24197_v21 = vld [vmem:[#allocation35_spill] sm:$0xff] }
 0x84f   : > { %v19758_v45 = vpop.eup %19757  ;;  %v14026_v17 = vmul.f32 %v19756_v20, %v24191_v41  ;;  %v13970_v46 = vpop.xlane.xlu0 %13969  ;;  %v14346_v11 = vsel %vm14345_vm7, %v23346_v18, %v14344_v47  ;;  %v24198_v41 = vld [vmem:[#allocation25_spill] sm:$0xff]  ;;  %vm14382_vm7 = vcmp.eq.f32.partialorder %v23374_v37, 0.0 }
 0x850   : > { %v19760_v25 = vpop.eup %19759  ;;  %v14550_v29 = vsel %vm13737_vm2, %v14016_v40, %v14518_v49  ;;  %19779 = vrcp.f32 %v13970_v46  ;;  %v14351_v51 = vmul.f32 %v19758_v45, %v23350_v53  ;;  %v23703_v49 = vmul.f32 %v23613_v39, %v24196_v3 }
 0x851   : > { %v19762_v32 = vpop.eup %19761  ;;  %19781 = vrsqrt.f32 %v23380_v6  ;;  %14582 = vst [vmem:[%s23438_s22 + $0x48] sm:$0xff] %v14550_v29  ;;  %v14555_v22 = vsel %vm13737_vm2, %v14026_v17, %v14523_v27  ;;  %v14330_v4 = vmul.f32 %v19760_v25, %v23332_v42  ;;  %v14349_v30 = vsel %vm14347_vm9, %v14348_v13, %v14346_v11 }
 0x852   : > { %v19764_v55 = vpop.eup %19763  ;;  %19783 = vrsqrt.f32 %v23395_v10  ;;  %14587 = vst [vmem:[%s23438_s22 + $0x70] sm:$0xff] %v14555_v22  ;;  %v14337_v36 = vmul.f32 %v19762_v32, %v23342_v48  ;;  %v14353_v54 = vsel %vm14352_vm13, %v23350_v53, %v14351_v51  ;;  %v14376_v29 = vand.u32 2147483648, %v23362_v38 }
 0x853   : > { %v19766_v59 = vpop.eup %19765  ;;  %19785 = vrsqrt.f32 %v23410_v23  ;;  %v14028_v16 = vmul.f32 %v19764_v55, %v24193_v58  ;;  %v13966_v7 = vpop.xlane.xlu0 %13965  ;;  %v14356_v25 = vsel %vm14354_vm14, %v14355_v5, %v14353_v54  ;;  %v14435_v47 = vmax.f32 %v14349_v30, 1e-12 }
 0x854   : > { %v19768_v52 = vpop.eup %19767  ;;  %v13972_v33 = vpop.xlane.xlu1 %13971  ;;  %19787 = vrcp.f32 %v13966_v7  ;;  %v23712_v40 = vmul.f32 %v19766_v59, %v24197_v21  ;;  %v14369_v55 = vand.u32 2147483648, %v23358_v63  ;;  %v14436_v0 = vmax.f32 %v14356_v25, 1e-12 }
 0x855   : > { %v19770_v1 = vpop.eup %19769  ;;  %v14556_v28 = vsel %vm13737_vm2, %v14028_v16, %v14524_v2  ;;  %v14022_v35 = vmul.f32 %v19768_v52, %v24194_v57  ;;  %19789 = vrcp.f32 %v13972_v33  ;;  %v14332_v2 = vsel %vm14331_vm6, %v23332_v42, %v14330_v4  ;;  %v24199_v4 = vld [vmem:[#allocation7_spill] sm:$0xff] }
 0x856   : > { %v19772_v24 = vpop.eup %19771  ;;  %14588 = vst [vmem:[%s23438_s22 + $0x78] sm:$0xff] %v14556_v28  ;;  %v14372_v39 = vmul.f32 %v19770_v1, %v23362_v38  ;;  %19791 = vrsqrt.f32 %v23388_v50  ;;  %v14335_v32 = vsel %vm14333_vm11, %v14334_v61, %v14332_v2  ;;  %vm14380_vm6 = vcmp.eq.f32.partialorder %v23374_v37, inf }
 0x857   : > { %v19774_v27 = vpop.eup %19773  ;;  %v14553_v20 = vsel %vm13737_vm2, %v14022_v35, %v14521_v60  ;;  %v14339_v60 = vsel %vm14338_vm10, %v23342_v48, %v14337_v36  ;;  %v14379_v18 = vmul.f32 %v19772_v24, %v23374_v37  ;;  %v14528_v14 = vsel %vm22641_vm8, %v23699_v26, %v24195_v12  ;;  %v24200_v26 = vld [vmem:[#allocation5_spill] sm:$0xff] }
 0x858   : > { %v19776_v45 = vpop.eup %19775  ;;  %14585 = vst [vmem:[%s23438_s22 + $0x60] sm:$0xff] %v14553_v20  ;;  %v14024_v17 = vmul.f32 %v19774_v27, %v24198_v41  ;;  %v13968_v46 = vpop.xlane.xlu1 %13967  ;;  %v14342_v43 = vsel %vm14340_vm12, %v14341_v9, %v14339_v60  ;;  %v14525_v48 = vsel %vm22641_vm8, %v23703_v49, %v24196_v3  ;;  %v14433_v8 = vmax.f32 %v14335_v32, 1e-12  ;;  %v24201_v41 = vld [vmem:[#allocation38_spill] sm:$0xff] }
 0x859   : > { %19793 = vrcp.f32 %v13968_v46  ;;  %v19778_v13 = vpop.eup %19777  ;;  %v14358_v22 = vmul.f32 %v19776_v45, %v23354_v34  ;;  %v14381_v51 = vsel %vm14380_vm6, %v23374_v37, %v14379_v18  ;;  %v14383_v59 = vand.u32 2147483648, %v23374_v37 }
 0x85a   : > { %v14554_v53 = vsel %vm13737_vm2, %v14024_v17, %v14522_v31  ;;  %v14374_v31 = vsel %vm14373_vm0, %v23362_v38, %v14372_v39  ;;  %v14365_v61 = vmul.f32 %v19778_v13, %v23358_v63  ;;  %v14434_v7 = vmax.f32 %v14342_v43, 1e-12 }
 0x85b   : > { %14586 = vst [vmem:[%s23438_s22 + $0x68] sm:$0xff] %v14554_v53  ;;  %19795 = vrcp.f32 %v14435_v47  ;;  %v14360_v52 = vsel %vm14359_vm15, %v23354_v34, %v14358_v22  ;;  %v14377_v36 = vsel %vm14375_vm4, %v14376_v29, %v14374_v31  ;;  %v14384_v33 = vsel %vm14382_vm7, %v14383_v59, %v14381_v51 }
 0x85c   : > { %19797 = vrcp.f32 %v14436_v0  ;;  %v14526_v37 = vsel %vm22641_vm8, %v23712_v40, %v24197_v21  ;;  %v14367_v28 = vsel %vm14366_vm3, %v23358_v63, %v14365_v61  ;;  %vm14387_vm9 = vcmp.eq.f32.partialorder %v23380_v6, inf }
 0x85d   : > { %v19780_v42 = vpop.eup %19779  ;;  %vm14389_vm10 = vcmp.eq.f32.partialorder %v23380_v6, 0.0  ;;  %19799 = vrcp.f32 %v14433_v8  ;;  %v14363_v35 = vsel %vm14361_vm1, %v14362_v62, %v14360_v52  ;;  %v14439_v24 = vmax.f32 %v14377_v36, 1e-12  ;;  %v24204_v36 = vld [vmem:[#allocation39_spill] sm:$0xff] }
 0x85e   : > { %v19782_v9 = vpop.eup %19781  ;;  %v14034_v58 = vmul.f32 %v19780_v42, %v24199_v4  ;;  %19801 = vrcp.f32 %v14434_v7  ;;  %v14370_v27 = vsel %vm14368_vm5, %v14369_v55, %v14367_v28  ;;  %v14390_v2 = vand.u32 2147483648, %v23380_v6  ;;  %v24203_v4 = vld [vmem:[#allocation22_spill] sm:$0xff]  ;;  %v24206_v28 = vld [vmem:[#allocation40_spill] sm:$0xff] }
 0x85f   : > { %v19784_v16 = vpop.eup %19783  ;;  %v14386_v57 = vmul.f32 %v19782_v9, %v23380_v6  ;;  %v13978_v49 = vpop.xlane.xlu0 %13977  ;;  %v14437_v45 = vmax.f32 %v14363_v35, 1e-12  ;;  %vm14401_vm11 = vcmp.eq.f32.partialorder %v23395_v10, inf  ;;  %vm14403_vm12 = vcmp.eq.f32.partialorder %v23395_v10, 0.0 }
 0x860   : > { %v19786_v5 = vpop.eup %19785  ;;  %v14559_v1 = vsel %vm13737_vm2, %v14034_v58, %v14527_v19  ;;  %v14440_v19 = vmax.f32 %v14384_v33, 1e-12  ;;  %v14400_v12 = vmul.f32 %v19784_v16, %v23395_v10  ;;  %19803 = vrcp.f32 %v13978_v49  ;;  %v24205_v33 = vld [vmem:[#allocation20_spill] sm:$0xff] }
 0x861   : > { %v19788_v11 = vpop.eup %19787  ;;  %14591 = vst [vmem:[%s23438_s22 + $0x90] sm:$0xff] %v14559_v1  ;;  %v14393_v21 = vmul.f32 %v19786_v5, %v23410_v23  ;;  %v14438_v30 = vmax.f32 %v14370_v27, 1e-12  ;;  %v14404_v25 = vand.u32 2147483648, %v23395_v10  ;;  %vm14394_vm13 = vcmp.eq.f32.partialorder %v23410_v23, inf  ;;  %v24208_v27 = vld [vmem:[#allocation41_spill] sm:$0xff] }
 0x862   : > { %v19790_v38 = vpop.eup %19789  ;;  %v14030_v54 = vmul.f32 %v19788_v11, %v23284_v56  ;;  %v14388_v56 = vsel %vm14387_vm9, %v23380_v6, %v14386_v57  ;;  %v14402_v39 = vsel %vm14401_vm11, %v23395_v10, %v14400_v12  ;;  %v14397_v6 = vand.u32 2147483648, %v23410_v23 }
 0x863   : > { %v14036_v3 = vmul.f32 %v19790_v38, %v24200_v26  ;;  %v13980_v62 = vpop.xlane.xlu1 %13979  ;;  %v19792_v20 = vpop.eup %19791  ;;  %v14391_v60 = vsel %vm14389_vm10, %v14390_v2, %v14388_v56  ;;  %v14395_v29 = vsel %vm14394_vm13, %v23410_v23, %v14393_v21  ;;  %v14405_v32 = vsel %vm14403_vm12, %v14404_v25, %v14402_v39  ;;  %v24210_v21 = vld [vmem:[#allocation14_spill] sm:$0xff] }
 0x864   : > { %v14557_v34 = vsel %vm13737_vm2, %v14030_v54, %v14525_v48  ;;  %19805 = vrcp.f32 %v13980_v62  ;;  %v13974_v46 = vpop.xlane.xlu0 %13973  ;;  %v14407_v13 = vmul.f32 %v19792_v20, %v23388_v50  ;;  %v14441_v47 = vmax.f32 %v14391_v60, 1e-12  ;;  %v24209_v20 = vld [vmem:[#allocation42_spill] sm:$0xff] }
 0x865   : > { %v14560_v40 = vsel %vm13737_vm2, %v14036_v3, %v14528_v14  ;;  %14589 = vst [vmem:[%s23438_s22 + $0x80] sm:$0xff] %v14557_v34  ;;  %19807 = vrcp.f32 %v14439_v24  ;;  %vm14396_vm14 = vcmp.eq.f32.partialorder %v23410_v23, 0.0  ;;  %vm14408_vm15 = vcmp.eq.f32.partialorder %v23388_v50, inf  ;;  %v24202_v23 = vld [vmem:[#allocation17_spill] sm:$0xff] }
 0x866   : > { %v19794_v63 = vpop.eup %19793  ;;  %14592 = vst [vmem:[%s23438_s22 + $0x98] sm:$0xff] %v14560_v40  ;;  %19809 = vrcp.f32 %v14440_v19  ;;  %v14398_v43 = vsel %vm14396_vm14, %v14397_v6, %v14395_v29  ;;  %v14409_v42 = vsel %vm14408_vm15, %v23388_v50, %v14407_v13  ;;  %v14443_v61 = vmax.f32 %v14405_v32, 1e-12  ;;  %v24207_v19 = vld [vmem:[#allocation23_spill] sm:$0xff]  ;;  %v24213_v32 = vld [vmem:[#allocation44_spill] sm:$0xff] }
 0x867   : > { %v14032_v17 = vmul.f32 %v19794_v63, %v24201_v41  ;;  %19811 = vrcp.f32 %v13974_v46  ;;  %v13976_v18 = vpop.xlane.xlu1 %13975  ;;  %v14411_v10 = vand.u32 2147483648, %v23388_v50  ;;  %vm14410_vm0 = vcmp.eq.f32.partialorder %v23388_v50, 0.0  ;;  %v24211_v41 = vld [vmem:[#allocation28_spill] sm:$0xff]  ;;  %v24212_v13 = vld [vmem:[#allocation43_spill] sm:$0xff] }
 0x868   : > { %19813 = vrcp.f32 %v13976_v18  ;;  %v13986_v22 = vpop.xlane.xlu0 %13985  ;;  %v19796_v55 = vpop.eup %19795  ;;  %v14442_v14 = vmax.f32 %v14398_v43, 1e-12 }
 0x869   : > { %v14558_v53 = vsel %vm13737_vm2, %v14032_v17, %v14526_v37  ;;  %19815 = vrcp.f32 %v14437_v45  ;;  %v19798_v31 = vpop.eup %19797  ;;  %v14490_v48 = vmul.f32 %v19796_v55, %v24202_v23  ;;  %v14412_v59 = vsel %vm14410_vm0, %v14411_v10, %v14409_v42  ;;  %v24215_v10 = vld [vmem:[#allocation6_spill] sm:$0xff] }
 0x86a   : > { %14590 = vst [vmem:[%s23438_s22 + $0x88] sm:$0xff] %v14558_v53  ;;  %19817 = vrcp.f32 %v14438_v30  ;;  %v19800_v51 = vpop.eup %19799  ;;  %v14492_v58 = vmul.f32 %v19798_v31, %v24203_v4  ;;  %v14444_v37 = vmax.f32 %v14412_v59, 1e-12  ;;  %v24217_v59 = vld [vmem:[#allocation27_spill] sm:$0xff] }
 0x86b   : > { %19819 = vrcp.f32 %v13986_v22  ;;  %v13988_v0 = vpop.xlane.xlu1 %13987  ;;  %v19802_v8 = vpop.eup %19801  ;;  %v14486_v1 = vmul.f32 %v19800_v51, %v24205_v33  ;;  %v14531_v11 = vsel %vm22641_vm8, %v14490_v48, %v24202_v23  ;;  %v24216_v23 = vld [vmem:[#allocation45_spill] sm:$0xff] }
 0x86c   : > { %19821 = vrcp.f32 %v13988_v0  ;;  %v13982_v9 = vpop.xlane.xlu0 %13981  ;;  %v14532_v54 = vsel %vm22641_vm8, %v14492_v58, %v24203_v4  ;;  %v14488_v12 = vmul.f32 %v19802_v8, %v24207_v19 }
 0x86d   : > { %19823 = vrcp.f32 %v14441_v47  ;;  %v19804_v16 = vpop.eup %19803  ;;  %v14529_v62 = vsel %vm22641_vm8, %v14486_v1, %v24205_v33  ;;  %v24214_v47 = vld [vmem:[#allocation24_spill] sm:$0xff]  ;;  %v24219_v1 = vld [vmem:[#allocation47_spill] sm:$0xff] }
 0x86e   : > { %19825 = vrcp.f32 %v13982_v9  ;;  %v14042_v5 = vmul.f32 %v19804_v16, %v24204_v36  ;;  %v14530_v39 = vsel %vm22641_vm8, %v14488_v12, %v24207_v19  ;;  %v24222_v12 = vld [vmem:[#allocation48_spill] sm:$0xff] }
 0x86f   : > { %19827 = vrcp.f32 %v14443_v61  ;;  %v13984_v7 = vpop.xlane.xlu1 %13983 }
 0x870   : > { %19829 = vrcp.f32 %v13984_v7  ;;  %v14563_v24 = vsel %vm13737_vm2, %v14042_v5, %v14531_v11  ;;  %v24218_v7 = vld [vmem:[#allocation46_spill] sm:$0xff]  ;;  %v24220_v11 = vld [vmem:[#allocation29_spill] sm:$0xff] }
 0x871   : > { %v19806_v52 = vpop.eup %19805  ;;  %19831 = vrcp.f32 %v14442_v14  ;;  %14595 = vst [vmem:[%s23438_s22 + $0xb0] sm:$0xff] %v14563_v24 }
 0x872   : > { %v19808_v50 = vpop.eup %19807  ;;  %v14044_v57 = vmul.f32 %v19806_v52, %v24206_v28 }
 0x873   : > { %v13990_v38 = vpop.xlane.xlu0 %13989  ;;  %v19810_v35 = vpop.eup %19809  ;;  %v14498_v40 = vmul.f32 %v19808_v50, %v24210_v21 }
 0x874   : > { %19833 = vrcp.f32 %v13990_v38  ;;  %v19812_v26 = vpop.eup %19811  ;;  %v14564_v3 = vsel %vm13737_vm2, %v14044_v57, %v14532_v54  ;;  %v14500_v17 = vmul.f32 %v19810_v35, %v24211_v41  ;;  %v24221_v35 = vld [vmem:[#allocation15_spill] sm:$0xff] }
 0x875   : > { %v19814_v49 = vpop.eup %19813  ;;  %14596 = vst [vmem:[%s23438_s22 + $0xb8] sm:$0xff] %v14564_v3  ;;  %v14038_v2 = vmul.f32 %v19812_v26, %v24208_v27  ;;  %19835 = vrcp.f32 %v14444_v37  ;;  %v14535_v53 = vsel %vm22641_vm8, %v14498_v40, %v24210_v21  ;;  %v24223_v3 = vld [vmem:[#allocation49_spill] sm:$0xff]  ;;  %v24225_v40 = vld [vmem:[#allocation50_spill] sm:$0xff] }
 0x876   : > { %v19816_v34 = vpop.eup %19815  ;;  %v14040_v56 = vmul.f32 %v19814_v49, %v24209_v20  ;;  %v14536_v0 = vsel %vm22641_vm8, %v14500_v17, %v24211_v41 }
 0x877   : > { %v13994_v63 = vpop.xlane.xlu0 %13993  ;;  %v19818_v45 = vpop.eup %19817  ;;  %v14561_v30 = vsel %vm13737_vm2, %v14038_v2, %v14529_v62  ;;  %v14494_v22 = vmul.f32 %v19816_v34, %v24214_v47  ;;  %v24224_v62 = vld [vmem:[#allocation9_spill] sm:$0xff] }
 0x878   : > { %v13992_v46 = vpop.xlane.xlu1 %13991  ;;  %19837 = vrcp.f32 %v13994_v63  ;;  %v19820_v60 = vpop.eup %19819  ;;  %14593 = vst [vmem:[%s23438_s22 + $0xa0] sm:$0xff] %v14561_v30  ;;  %v14562_v25 = vsel %vm13737_vm2, %v14040_v56, %v14530_v39  ;;  %v14496_v51 = vmul.f32 %v19818_v45, %v24215_v10 }
 0x879   : > { %19839 = vrcp.f32 %v13992_v46  ;;  %v19822_v18 = vpop.eup %19821  ;;  %14594 = vst [vmem:[%s23438_s22 + $0xa8] sm:$0xff] %v14562_v25  ;;  %v14050_v29 = vmul.f32 %v19820_v60, %v24212_v13  ;;  %v14533_v8 = vsel %vm22641_vm8, %v14494_v22, %v24214_v47 }
 0x87a   : > { %v14052_v6 = vmul.f32 %v19822_v18, %v24213_v32  ;;  %v19824_v55 = vpop.eup %19823  ;;  %v14534_v5 = vsel %vm22641_vm8, %v14496_v51, %v24215_v10 }
 0x87b   : > { %v14567_v43 = vsel %vm13737_vm2, %v14050_v29, %v14535_v53  ;;  %v19826_v42 = vpop.eup %19825  ;;  %v14502_v4 = vmul.f32 %v19824_v55, %v24217_v59 }
 0x87c   : > { %v13996_v31 = vpop.xlane.xlu1 %13995  ;;  %14599 = vst [vmem:[%s23438_s22 + $0xd0] sm:$0xff] %v14567_v43  ;;  %v14568_v61 = vsel %vm13737_vm2, %v14052_v6, %v14536_v0  ;;  %v19828_v14 = vpop.eup %19827  ;;  %v14046_v48 = vmul.f32 %v19826_v42, %v24216_v23 }
 0x87d   : > { %19841 = vrcp.f32 %v13996_v31  ;;  %14600 = vst [vmem:[%s23438_s22 + $0xd8] sm:$0xff] %v14568_v61  ;;  %v19830_v9 = vpop.eup %19829  ;;  %v14537_v37 = vsel %vm22641_vm8, %v14502_v4, %v24217_v59  ;;  %v14506_v28 = vmul.f32 %v19828_v14, %v24220_v11 }
 0x87e   : > { %v19832_v58 = vpop.eup %19831  ;;  %v14565_v16 = vsel %vm13737_vm2, %v14046_v48, %v14533_v8  ;;  %v14048_v52 = vmul.f32 %v19830_v9, %v24218_v7 }
 0x87f   : > { %14597 = vst [vmem:[%s23438_s22 + $0xc0] sm:$0xff] %v14565_v16  ;;  %v14504_v24 = vmul.f32 %v19832_v58, %v24221_v35  ;;  %v14539_v27 = vsel %vm22641_vm8, %v14506_v28, %v24220_v11 }
 0x880   : > { %v14566_v33 = vsel %vm13737_vm2, %v14048_v52, %v14534_v5 }
 0x881   : > { %v19834_v36 = vpop.eup %19833  ;;  %14598 = vst [vmem:[%s23438_s22 + $0xc8] sm:$0xff] %v14566_v33  ;;  %v14538_v2 = vsel %vm22641_vm8, %v14504_v24, %v24221_v35 }
 0x882   : > { %v14054_v50 = vmul.f32 %v19834_v36, %v24219_v1  ;;  %v19836_v57 = vpop.eup %19835 }
 0x883   : > { %v14508_v20 = vmul.f32 %v19836_v57, %v24224_v62 }
 0x884   : > { %v14569_v38 = vsel %vm13737_vm2, %v14054_v50, %v14537_v37 }
 0x885   : > { %v19838_v54 = vpop.eup %19837  ;;  %14601 = vst [vmem:[%s23438_s22 + $0xe0] sm:$0xff] %v14569_v38  ;;  %v14540_v45 = vsel %vm22641_vm8, %v14508_v20, %v24224_v62 }
 0x886   : > { %v19840_v19 = vpop.eup %19839  ;;  %v14058_v26 = vmul.f32 %v19838_v54, %v24222_v12 }
 0x887   : > { %v14056_v49 = vmul.f32 %v19840_v19, %v24223_v3 }
 0x888   : > { %v14571_v34 = vsel %vm13737_vm2, %v14058_v26, %v14539_v27 }
 0x889   : > { %v14570_v56 = vsel %vm13737_vm2, %v14056_v49, %v14538_v2  ;;  %14603 = vst [vmem:[%s23438_s22 + $0xf0] sm:$0xff] %v14571_v34 }
 0x88a   : > { %v19842_v21 = vpop.eup %19841  ;;  %14602 = vst [vmem:[%s23438_s22 + $0xe8] sm:$0xff] %v14570_v56 }
 0x88b   : > { %v14060_v63 = vmul.f32 %v19842_v21, %v24225_v40 }
 0x88d   : > { %v14572_v30 = vsel %vm13737_vm2, %v14060_v63, %v14540_v45 }
 0x88e   : > { %14604 = vst [vmem:[%s23438_s22 + $0xf8] sm:$0xff] %v14572_v30 }
 0x88f PF: > { %s23_s25 = sadd.s32 1, %s19861_s25  }
 0x890   : > { %p20_p4 = scmp.ge.s32.totalorder %s23_s25, 4  }
 0x892   :  { %22 = sbr.rel (!%p20_p4) target bundleno = 1 (0x1), region = 106 }

</bundles_post_ra>
